<compile_context>
chip_gen: v5e
topology: v5e:2x2
jax: 0.10.0
libtpu: 0.0.40
codegen_flags: <defaults>
</compile_context>

<pallas_src>
import functools

import jax
import jax.numpy as jnp
from jax import lax
from jax.experimental import pallas as pl
from jax.experimental.pallas import tpu as pltpu

BN_EPS = 1e-5


# ----------------------------------------------------------------------------
# Generation-aware VMEM budgeting (v5e/v6e: 128 MiB, v7x: 64 MiB per core)
# ----------------------------------------------------------------------------
@functools.lru_cache(maxsize=None)
def _vmem_capacity_bytes():
    try:
        info = pltpu.get_tpu_info()
        cap = int(getattr(info, "vmem_capacity_bytes", 0) or 0)
        if cap > 0:
            return cap
    except Exception:
        pass
    # Unknown generation -> assume the smallest (v7x-like) so we never over-ask.
    return 64 * 1024 * 1024


def _vmem_limit_bytes():
    cap = _vmem_capacity_bytes()
    # ~48 MiB on v7x, ~96 MiB on v5e/v6e, always leaving >=16 MiB headroom.
    return int(min(cap * 3 // 4, cap - 16 * 1024 * 1024))


def _tile_budget_bytes():
    # Fraction of the scoped limit usable by double-buffered tiles + scratch.
    return int(_vmem_limit_bytes() * 0.6)


def _largest_divisor(n, max_d, *, sublane_aligned=False):
    """Largest divisor of n that is <= max_d.

    With sublane_aligned=True prefer multiples of 8 (or the full extent), for
    block dims that land on the sublane axis.
    """
    max_d = max(1, min(n, max_d))
    if sublane_aligned:
        for d in range(max_d, 0, -1):
            if n % d == 0 and (d % 8 == 0 or d == n):
                return d
    for d in range(max_d, 0, -1):
        if n % d == 0:
            return d
    return n


# ----------------------------------------------------------------------------
# Pallas kernels
# ----------------------------------------------------------------------------
def _make_conv_kernel(*, ks, pad, tr, w, cin, cout, use_im2col, mxu_dtype,
                      bn_prologue, add_bias, relu_epilogue, emit_stats):
    """Fused conv kernel for one (batch element, row tile).

    Ref order (inputs, outputs, scratch):
      x_ref      : (1, TR, W, Cin)       interior rows of this tile
      xtop_ref   : (1, 1, W, Cin)        row above the tile (clamped at r==0)
      xbot_ref   : (1, 1, W, Cin)        row below the tile (clamped at last r)
      w_ref      : weights, whole array resident in VMEM
                   (ks*ks, Cin, Cout) per-tap mode / (ks*ks*Cin, Cout) im2col
      [sc_ref]   : (1, Cin)              folded BN scale of the previous layer
      [sh_ref]   : (1, Cin)              folded BN shift of the previous layer
      [b_ref]    : (1, Cout)             conv bias (no-BN path only)
      o_ref      : (1, TR, W, Cout)
      [ps_ref]   : (1, 1, 1, Cout)       per-tile channel sum
      [pq_ref]   : (1, 1, 1, Cout)       per-tile channel sum of squares
      xbuf_ref   : (TR+2p, W+2p, Cin)    VMEM scratch (padded slab)
    """

    def kernel(*refs):
        it = iter(refs)
        x_ref = next(it)
        xtop_ref = next(it)
        xbot_ref = next(it)
        w_ref = next(it)
        sc_ref = next(it) if bn_prologue else None
        sh_ref = next(it) if bn_prologue else None
        b_ref = next(it) if add_bias else None
        o_ref = next(it)
        ps_ref = next(it) if emit_stats else None
        pq_ref = next(it) if emit_stats else None
        xbuf_ref = next(it)

        r = pl.program_id(1)
        nrt = pl.num_programs(1)

        def prologue(v):
            v = v.astype(jnp.float32)
            if bn_prologue:
                # previous layer's BatchNorm affine + ReLU, fused into this conv
                v = jnp.maximum(v * sc_ref[0] + sh_ref[0], 0.0)
            return v

        # ---- assemble the padded slab in VMEM -------------------------------
        # Only the halo is zeroed: the two halo columns every step (cheap and
        # megacore-safe; scratch contents are per-core garbage initially) and
        # the top/bottom halo row only at the image boundary.
        zcol = jnp.zeros((tr + 2 * pad, pad, cin), jnp.float32)
        xbuf_ref[:, 0:pad, :] = zcol
        xbuf_ref[:, pad + w:, :] = zcol

        # TODO(synk): interior sits at a +1 sublane/lane offset (masked/shifted
        # stores); an offset-0 interior with masked edge taps would avoid it.
        xbuf_ref[pad:pad + tr, pad:pad + w, :] = prologue(x_ref[0])

        @pl.when(r > 0)
        def _():
            xbuf_ref[0:pad, pad:pad + w, :] = prologue(xtop_ref[0])

        @pl.when(r == 0)
        def _():
            xbuf_ref[0:pad, :, :] = jnp.zeros((pad, w + 2 * pad, cin), jnp.float32)

        @pl.when(r < nrt - 1)
        def _():
            xbuf_ref[pad + tr:, pad:pad + w, :] = prologue(xbot_ref[0])

        @pl.when(r == nrt - 1)
        def _():
            xbuf_ref[pad + tr:, :, :] = jnp.zeros((pad, w + 2 * pad, cin),
                                                  jnp.float32)

        xp = xbuf_ref[...]                                   # (TR+2p, W+2p, Cin)

        # ---- convolution on the MXU ------------------------------------------
        if use_im2col:
            # deep layers (Cin % 128 == 0): single dot with K = ks*ks*Cin
            taps = [xp[kh:kh + tr, kw:kw + w, :]
                    for kh in range(ks) for kw in range(ks)]
            patch = jnp.concatenate(taps, axis=-1).reshape(tr * w, ks * ks * cin)
            acc = jnp.dot(patch.astype(mxu_dtype), w_ref[...],
                          preferred_element_type=jnp.float32)
        else:
            # shallow layers: accumulate 9 per-tap dots, no (M, 9*Cin) patch
            acc = jnp.zeros((tr * w, cout), jnp.float32)
            t = 0
            for kh in range(ks):
                for kw in range(ks):
                    tap = xp[kh:kh + tr, kw:kw + w, :].reshape(tr * w, cin)
                    acc = acc + jnp.dot(tap.astype(mxu_dtype), w_ref[t],
                                        preferred_element_type=jnp.float32)
                    t += 1

        if add_bias:
            acc = acc + b_ref[0]
        if relu_epilogue:
            acc = jnp.maximum(acc, 0.0)

        o_ref[0] = acc.reshape(tr, w, cout).astype(o_ref.dtype)

        if emit_stats:
            # per-(batch, row-tile) partials; the folded BatchNorm is finished
            # on tiny (Cout,) vectors in the wrapper -> no extra HBM pass of y.
            ps_ref[0, 0, 0] = jnp.sum(acc, axis=0)
            pq_ref[0, 0, 0] = jnp.sum(acc * acc, axis=0)

    return kernel


def _bn_relu_kernel(x_ref, scale_ref, shift_ref, o_ref):
    """Folded BatchNorm affine + ReLU on a lane-dense (1, TR, W*C) block."""
    o_ref[...] = jnp.maximum(
        x_ref[...].astype(jnp.float32) * scale_ref[0] + shift_ref[0], 0.0
    ).astype(o_ref.dtype)


# ----------------------------------------------------------------------------
# Wrappers around pallas_call
# ----------------------------------------------------------------------------
def conv_layer_pallas(x_nhwc, w_oihw, *, bias=None, in_scale=None, in_shift=None,
                      relu_epilogue=False, emit_stats=False, padding=1,
                      mxu_dtype=jnp.float32, out_dtype=jnp.float32,
                      rows_per_tile=None):
    """One Conv2d(ks=3, stride=1, padding=1) layer over NHWC input, row-tiled.

    Optionally fuses (a) the previous layer's BN affine+ReLU into the prologue,
    (b) bias + ReLU into the epilogue (no-BN path), and (c) emits per-tile
    channel sum / sum-of-squares partials for BatchNorm statistics.
    """
    n, h, w, cin = x_nhwc.shape
    cout, cin_w, ks, ks2 = w_oihw.shape
    assert cin_w == cin and ks == ks2
    assert ks == 3 and padding == 1, "supports the unetConv2 default ks=3/s=1/p=1"
    pad = padding

    bn_prologue = in_scale is not None
    add_bias = bias is not None
    use_im2col = (cin % 128 == 0)

    # (Cout, Cin, kh, kw) -> (kh, kw, Cin, Cout); tap order = kh outer, kw inner.
    w_khwc = jnp.transpose(w_oihw, (2, 3, 1, 0))
    if use_im2col:
        w_mat = w_khwc.reshape(ks * ks * cin, cout).astype(mxu_dtype)
    else:
        w_mat = w_khwc.reshape(ks * ks, cin, cout).astype(mxu_dtype)

    # ---- row-tile selection against the per-generation VMEM budget ----------
    mxu_itemsize = jnp.dtype(mxu_dtype).itemsize
    budget = _tile_budget_bytes()
    per_row = 4 * (2 * w * cin            # input block, double-buffered
                   + 2 * w * cout         # output block, double-buffered
                   + (w + 2 * pad) * cin  # padded slab scratch
                   + w * cout)            # f32 accumulator value
    per_row += mxu_itemsize * w * (ks * ks * cin if use_im2col else cin)
    fixed = (mxu_itemsize * ks * ks * cin * cout          # resident weights
             + 4 * 2 * pad * (w + 2 * pad) * cin          # slab halo rows
             + 4 * 4 * pad * w * cin)                     # halo blocks (x2 buf)
    max_rows = max(1, (budget - fixed) // max(1, per_row))
    if rows_per_tile is not None:
        max_rows = min(max_rows, rows_per_tile)
    tr = _largest_divisor(h, max_rows)
    nrt = h // tr

    kernel = _make_conv_kernel(ks=ks, pad=pad, tr=tr, w=w, cin=cin, cout=cout,
                               use_im2col=use_im2col, mxu_dtype=mxu_dtype,
                               bn_prologue=bn_prologue, add_bias=add_bias,
                               relu_epilogue=relu_epilogue,
                               emit_stats=emit_stats)

    # Whole-array VMEM residency for grid-invariant operands (weights, folded
    # BN scale/shift, bias): a single copy, no per-step double-buffering.
    vmem_resident = pl.BlockSpec(memory_space=pltpu.MemorySpace.VMEM)

    in_specs = [
        pl.BlockSpec((1, tr, w, cin), lambda i, r: (i, r, 0, 0)),
        # Halo rows as 1-row blocks addressed by element row (block size 1 on
        # the H axis => block index == row index).  Clamped at the boundary;
        # boundary tiles overwrite them with zeros inside the kernel.
        pl.BlockSpec((1, pad, w, cin),
                     lambda i, r: (i, jnp.maximum(r * tr - pad, 0), 0, 0)),
        pl.BlockSpec((1, pad, w, cin),
                     lambda i, r: (i, jnp.minimum(r * tr + tr, h - pad), 0, 0)),
        vmem_resident,                     # weights
    ]
    inputs = [x_nhwc, x_nhwc, x_nhwc, w_mat]
    if bn_prologue:
        in_specs += [vmem_resident, vmem_resident]
        inputs += [in_scale.reshape(1, cin).astype(jnp.float32),
                   in_shift.reshape(1, cin).astype(jnp.float32)]
    if add_bias:
        in_specs += [vmem_resident]
        inputs += [bias.reshape(1, cout).astype(jnp.float32)]

    out_shape = [jax.ShapeDtypeStruct((n, h, w, cout), out_dtype)]
    out_specs = [pl.BlockSpec((1, tr, w, cout), lambda i, r: (i, r, 0, 0))]
    if emit_stats:
        out_shape += [jax.ShapeDtypeStruct((n, nrt, 1, cout), jnp.float32)] * 2
        out_specs += [pl.BlockSpec((1, 1, 1, cout), lambda i, r: (i, r, 0, 0))] * 2

    res = pl.pallas_call(
        kernel,
        out_shape=tuple(out_shape),
        grid=(n, nrt),
        in_specs=in_specs,
        out_specs=tuple(out_specs),
        scratch_shapes=[pltpu.VMEM((tr + 2 * pad, w + 2 * pad, cin), jnp.float32)],
        compiler_params=pltpu.CompilerParams(
            # both axes parallel: stats are per-tile partials, no carried state,
            # so v7x's 2 TensorCores can split work within a batch element too.
            dimension_semantics=("parallel", "parallel"),
            vmem_limit_bytes=_vmem_limit_bytes(),
        ),
    )(*inputs)

    if emit_stats:
        return res
    return res[0]


def bn_relu_pallas(y_nhwc, scale, shift):
    """Folded-BatchNorm affine + ReLU on a lane-dense (N, H, W*C) view.

    Row-tiled to several MiB per block (HBM-bandwidth bound pass) and written
    in place via input_output_aliases.
    """
    n, h, w, c = y_nhwc.shape
    wc = w * c
    y2 = y_nhwc.reshape(n, h, wc)                       # free reshape in HBM
    scale_wc = jnp.tile(scale.astype(jnp.float32), w).reshape(1, wc)
    shift_wc = jnp.tile(shift.astype(jnp.float32), w).reshape(1, wc)

    blk_bytes = min(8 * 1024 * 1024, max(1, _tile_budget_bytes() // 6))
    tr = _largest_divisor(h, max(1, blk_bytes // (wc * 4)), sublane_aligned=True)

    vmem_resident = pl.BlockSpec(memory_space=pltpu.MemorySpace.VMEM)
    out = pl.pallas_call(
        _bn_relu_kernel,
        out_shape=jax.ShapeDtypeStruct((n, h, wc), y_nhwc.dtype),
        grid=(n, h // tr),
        in_specs=[pl.BlockSpec((1, tr, wc), lambda i, r: (i, r, 0)),
                  vmem_resident, vmem_resident],
        out_specs=pl.BlockSpec((1, tr, wc), lambda i, r: (i, r, 0)),
        input_output_aliases={0: 0},                    # in place: halves HBM traffic
        compiler_params=pltpu.CompilerParams(
            dimension_semantics=("parallel", "parallel"),
            vmem_limit_bytes=_vmem_limit_bytes()),
    )(y2, scale_wc, shift_wc)
    return out.reshape(n, h, w, c)


# ----------------------------------------------------------------------------
# Forward pass
# ----------------------------------------------------------------------------
def unet_conv2_forward(x_nchw, params, *, is_batchnorm=True, padding=1,
                       mxu_dtype=jnp.float32, act_dtype=jnp.float32,
                       rows_per_tile=None):
    """Pallas forward of unetConv2.  x_nchw: (N, Cin, H, W) float32.

    mxu_dtype / act_dtype can be set to jnp.bfloat16 for v6e/v7x production
    (3x MXU throughput / half the activation bytes); defaults stay f32 to meet
    the 1e-4 parity tolerance with the PyTorch reference.
    """
    x = jnp.transpose(x_nchw, (0, 2, 3, 1)).astype(jnp.float32)   # NCHW -> NHWC
    n_layers = len(params)

    if not is_batchnorm:
        for li, p in enumerate(params):
            out_dt = jnp.float32 if li == n_layers - 1 else act_dtype
            x = conv_layer_pallas(x, p["w"], bias=p["b"], relu_epilogue=True,
                                  padding=padding, mxu_dtype=mxu_dtype,
                                  out_dtype=out_dt, rows_per_tile=rows_per_tile)
        return jnp.transpose(x, (0, 3, 1, 2))

    # BatchNorm path:
    #  * conv bias dropped (exactly cancelled by the mean subtraction)
    #  * layer i's BN affine + ReLU is applied inside layer i+1's conv kernel
    #  * only the last layer needs the standalone (in-place) affine+ReLU pass
    scale = shift = None
    for li, p in enumerate(params):
        out_dt = jnp.float32 if li == n_layers - 1 else act_dtype
        y, psum, psumsq = conv_layer_pallas(
            x, p["w"], bias=None, in_scale=scale, in_shift=shift,
            relu_epilogue=False, emit_stats=True, padding=padding,
            mxu_dtype=mxu_dtype, out_dtype=out_dt, rows_per_tile=rows_per_tile)
        cnt = y.shape[0] * y.shape[1] * y.shape[2]
        # TODO(synk): switch to a shifted/compensated variance for very large
        #             N*H*W (E[y^2]-E[y]^2 is cancellation-prone at scale).
        mean = jnp.sum(psum, axis=(0, 1, 2)) / cnt
        var = jnp.sum(psumsq, axis=(0, 1, 2)) / cnt - mean * mean
        var = jnp.maximum(var, 0.0)
        scale = p["gamma"] / jnp.sqrt(var + BN_EPS)
        shift = p["beta"] - mean * scale
        x = y
    x = bn_relu_pallas(x, scale, shift)
    return jnp.transpose(x, (0, 3, 1, 2))


# ----------------------------------------------------------------------------
# Parameter init (deterministic, matches torch shapes / kaiming fan_in stats)
# ----------------------------------------------------------------------------
def init_params(key, in_size, out_size, n=2, ks=3):
    params = []
    cin = in_size
    for _ in range(n):
        key, kw_, kb_, kg_ = jax.random.split(key, 4)
        fan_in = cin * ks * ks
        std = (2.0 / fan_in) ** 0.5                       # kaiming_normal_, fan_in
        w = std * jax.random.normal(kw_, (out_size, cin, ks, ks), jnp.float32)
        bound = 1.0 / (fan_in ** 0.5)                     # torch conv bias init
        b = jax.random.uniform(kb_, (out_size,), jnp.float32, -bound, bound)
        gamma = 1.0 + 0.02 * jax.random.normal(kg_, (out_size,), jnp.float32)
        beta = jnp.zeros((out_size,), jnp.float32)
        params.append({"w": w, "b": b, "gamma": gamma, "beta": beta})
        cin = out_size
    return params


# ----------------------------------------------------------------------------
# Pure-JAX reference (for correctness check)
# ----------------------------------------------------------------------------
def reference_forward(x_nchw, params, *, is_batchnorm=True, padding=1):
    x = x_nchw
    for p in params:
        y = lax.conv_general_dilated(
            x, p["w"], window_strides=(1, 1),
            padding=((padding, padding), (padding, padding)),
            dimension_numbers=("NCHW", "OIHW", "NCHW"))
        y = y + p["b"][None, :, None, None]
        if is_batchnorm:
            mean = jnp.mean(y, axis=(0, 2, 3), keepdims=True)
            var = jnp.var(y, axis=(0, 2, 3), keepdims=True)
            y = (y - mean) / jnp.sqrt(var + BN_EPS)
            y = y * p["gamma"][None, :, None, None] + p["beta"][None, :, None, None]
        x = jnp.maximum(y, 0.0)
    return x


# ----------------------------------------------------------------------------
if __name__ == "__main__":
    key = jax.random.PRNGKey(0)
    k_x, k_p = jax.random.split(key)

    N, Cin, H, W = 2, 4, 16, 16
    Cout = 8
    x = jax.random.normal(k_x, (N, Cin, H, W), jnp.float32)
    params = init_params(k_p, Cin, Cout, n=2, ks=3)

    ref_bn = jax.block_until_ready(reference_forward(x, params, is_batchnorm=True))
    ref_nobn = jax.block_until_ready(reference_forward(x, params, is_batchnorm=False))

    # 1) BatchNorm path, auto row tiling (whole image per tile at this toy size)
    fwd_bn = jax.jit(functools.partial(unet_conv2_forward, is_batchnorm=True))
    out = jax.block_until_ready(fwd_bn(x, params))
    assert out.shape == (N, Cout, H, W), out.shape
    err = float(jnp.max(jnp.abs(out - ref_bn)))
    assert err < 1e-4, err

    # 2) BatchNorm path with forced small row tiles: exercises the halo rows,
    #    boundary zeroing, and the per-tile partial-statistics reduction.
    fwd_bn_t = jax.jit(functools.partial(unet_conv2_forward, is_batchnorm=True,
                                         rows_per_tile=4))
    out_t = jax.block_until_ready(fwd_bn_t(x, params))
    err_t = float(jnp.max(jnp.abs(out_t - ref_bn)))
    assert err_t < 1e-4, err_t

    # 3) no-BatchNorm path (conv + bias + ReLU fused), row-tiled as well
    fwd_nobn = jax.jit(functools.partial(unet_conv2_forward, is_batchnorm=False,
                                         rows_per_tile=8))
    out2 = jax.block_until_ready(fwd_nobn(x, params))
    err2 = float(jnp.max(jnp.abs(out2 - ref_nobn)))
    assert err2 < 1e-4, err2

    print("KERNEL_OK")
</pallas_src>

<mosaic_0001>
module attributes {stable_mosaic.version = 11 : i64} {
  func.func @kernel(%arg0: i32, %arg1: i32, %arg2: memref<1x16x16x4xf32, #tpu.memory_space<vmem>>, %arg3: memref<1x1x16x4xf32, #tpu.memory_space<vmem>>, %arg4: memref<1x1x16x4xf32, #tpu.memory_space<vmem>>, %arg5: memref<9x4x8xf32, #tpu.memory_space<vmem>>, %arg6: memref<1x16x16x8xf32, #tpu.memory_space<vmem>>, %arg7: memref<1x1x1x8xf32, #tpu.memory_space<vmem>>, %arg8: memref<1x1x1x8xf32, #tpu.memory_space<vmem>>, %arg9: memref<18x18x4xf32, #tpu.memory_space<vmem>>) attributes {dimension_semantics = [#tpu.dimension_semantics<parallel>, #tpu.dimension_semantics<parallel>], iteration_bounds = array<i64: 2, 1>, scalar_prefetch = 0 : i64, scratch_operands = 1 : i64, tpu.core_type = #tpu.core_type<tc>, window_params = [{transform_indices = @transform_0, window_bounds = array<i64: 1, 16, 16, 4>}, {transform_indices = @transform_1, window_bounds = array<i64: 1, 1, 16, 4>}, {transform_indices = @transform_2, window_bounds = array<i64: 1, 1, 16, 4>}, {pipeline_mode = #tpu.pipeline_mode<synchronous>, transform_indices = @transform_3, window_bounds = array<i64: 9, 4, 8>}, {transform_indices = @transform_4, window_bounds = array<i64: 1, 16, 16, 8>}, {transform_indices = @transform_5, window_bounds = array<i64: 1, 1, 1, 8>}, {transform_indices = @transform_6, window_bounds = array<i64: 1, 1, 1, 8>}]} {
    %cst = arith.constant 0.000000e+00 : f32
    %0 = vector.broadcast %cst : f32 to vector<18x1x4xf32>
    %c0 = arith.constant 0 : index
    %c0_0 = arith.constant 0 : index
    %c0_1 = arith.constant 0 : index
    %1 = vector.load %arg9[%c0, %c0_0, %c0_1] : memref<18x18x4xf32, #tpu.memory_space<vmem>>, vector<18x1x4xf32>
    tpu.vector_store %arg9[%c0, %c0_0, %c0_1], %0 {strides = array<i32>} : memref<18x18x4xf32, #tpu.memory_space<vmem>>, vector<18x1x4xf32>,
    %c0_2 = arith.constant 0 : index
    %c17 = arith.constant 17 : index
    %c0_3 = arith.constant 0 : index
    %2 = vector.load %arg9[%c0_2, %c17, %c0_3] : memref<18x18x4xf32, #tpu.memory_space<vmem>>, vector<18x1x4xf32>
    tpu.vector_store %arg9[%c0_2, %c17, %c0_3], %0 {strides = array<i32>} : memref<18x18x4xf32, #tpu.memory_space<vmem>>, vector<18x1x4xf32>,
    %c0_4 = arith.constant 0 : index
    %c0_5 = arith.constant 0 : index
    %c0_6 = arith.constant 0 : index
    %c0_7 = arith.constant 0 : index
    %3 = vector.load %arg2[%c0_4, %c0_5, %c0_6, %c0_7] : memref<1x16x16x4xf32, #tpu.memory_space<vmem>>, vector<1x16x16x4xf32>
    %4 = vector.shape_cast %3 : vector<1x16x16x4xf32> to vector<16x16x4xf32>
    %c1 = arith.constant 1 : index
    %c1_8 = arith.constant 1 : index
    %c0_9 = arith.constant 0 : index
    %5 = vector.load %arg9[%c1, %c1_8, %c0_9] : memref<18x18x4xf32, #tpu.memory_space<vmem>>, vector<16x16x4xf32>
    tpu.vector_store %arg9[%c1, %c1_8, %c0_9], %4 {strides = array<i32>} : memref<18x18x4xf32, #tpu.memory_space<vmem>>, vector<16x16x4xf32>,
    %c0_i32 = arith.constant 0 : i32
    %6 = arith.cmpi sgt, %arg1, %c0_i32 : i32
    %7 = arith.extui %6 : i1 to i32
    %c0_i32_10 = arith.constant 0 : i32
    %8 = arith.cmpi ne, %7, %c0_i32_10 : i32
    scf.if %8 {
      %c0_64 = arith.constant 0 : index
      %c0_65 = arith.constant 0 : index
      %c0_66 = arith.constant 0 : index
      %c0_67 = arith.constant 0 : index
      %87 = vector.load %arg3[%c0_64, %c0_65, %c0_66, %c0_67] : memref<1x1x16x4xf32, #tpu.memory_space<vmem>>, vector<1x1x16x4xf32>
      %88 = vector.shape_cast %87 : vector<1x1x16x4xf32> to vector<1x16x4xf32>
      %c0_68 = arith.constant 0 : index
      %c1_69 = arith.constant 1 : index
      %c0_70 = arith.constant 0 : index
      %89 = vector.load %arg9[%c0_68, %c1_69, %c0_70] : memref<18x18x4xf32, #tpu.memory_space<vmem>>, vector<1x16x4xf32>
      tpu.vector_store %arg9[%c0_68, %c1_69, %c0_70], %88 {strides = array<i32>} : memref<18x18x4xf32, #tpu.memory_space<vmem>>, vector<1x16x4xf32>,
    } else {
    }
    %c0_i32_11 = arith.constant 0 : i32
    %9 = arith.cmpi eq, %arg1, %c0_i32_11 : i32
    %10 = arith.extui %9 : i1 to i32
    %c0_i32_12 = arith.constant 0 : i32
    %11 = arith.cmpi ne, %10, %c0_i32_12 : i32
    scf.if %11 {
      %cst_64 = arith.constant 0.000000e+00 : f32
      %87 = vector.broadcast %cst_64 : f32 to vector<1x18x4xf32>
      %c0_65 = arith.constant 0 : index
      %c0_66 = arith.constant 0 : index
      %c0_67 = arith.constant 0 : index
      %88 = vector.load %arg9[%c0_65, %c0_66, %c0_67] : memref<18x18x4xf32, #tpu.memory_space<vmem>>, vector<1x18x4xf32>
      tpu.vector_store %arg9[%c0_65, %c0_66, %c0_67], %87 {strides = array<i32>} : memref<18x18x4xf32, #tpu.memory_space<vmem>>, vector<1x18x4xf32>,
    } else {
    }
    %c0_i32_13 = arith.constant 0 : i32
    %12 = arith.cmpi slt, %arg1, %c0_i32_13 : i32
    %13 = arith.extui %12 : i1 to i32
    %c0_i32_14 = arith.constant 0 : i32
    %14 = arith.cmpi ne, %13, %c0_i32_14 : i32
    scf.if %14 {
      %c0_64 = arith.constant 0 : index
      %c0_65 = arith.constant 0 : index
      %c0_66 = arith.constant 0 : index
      %c0_67 = arith.constant 0 : index
      %87 = vector.load %arg4[%c0_64, %c0_65, %c0_66, %c0_67] : memref<1x1x16x4xf32, #tpu.memory_space<vmem>>, vector<1x1x16x4xf32>
      %88 = vector.shape_cast %87 : vector<1x1x16x4xf32> to vector<1x16x4xf32>
      %c17_68 = arith.constant 17 : index
      %c1_69 = arith.constant 1 : index
      %c0_70 = arith.constant 0 : index
      %89 = vector.load %arg9[%c17_68, %c1_69, %c0_70] : memref<18x18x4xf32, #tpu.memory_space<vmem>>, vector<1x16x4xf32>
      tpu.vector_store %arg9[%c17_68, %c1_69, %c0_70], %88 {strides = array<i32>} : memref<18x18x4xf32, #tpu.memory_space<vmem>>, vector<1x16x4xf32>,
    } else {
    }
    %c0_i32_15 = arith.constant 0 : i32
    %15 = arith.cmpi eq, %arg1, %c0_i32_15 : i32
    %16 = arith.extui %15 : i1 to i32
    %c0_i32_16 = arith.constant 0 : i32
    %17 = arith.cmpi ne, %16, %c0_i32_16 : i32
    scf.if %17 {
      %cst_64 = arith.constant 0.000000e+00 : f32
      %87 = vector.broadcast %cst_64 : f32 to vector<1x18x4xf32>
      %c17_65 = arith.constant 17 : index
      %c0_66 = arith.constant 0 : index
      %c0_67 = arith.constant 0 : index
      %88 = vector.load %arg9[%c17_65, %c0_66, %c0_67] : memref<18x18x4xf32, #tpu.memory_space<vmem>>, vector<1x18x4xf32>
      tpu.vector_store %arg9[%c17_65, %c0_66, %c0_67], %87 {strides = array<i32>} : memref<18x18x4xf32, #tpu.memory_space<vmem>>, vector<1x18x4xf32>,
    } else {
    }
    %c0_17 = arith.constant 0 : index
    %c0_18 = arith.constant 0 : index
    %c0_19 = arith.constant 0 : index
    %18 = vector.load %arg9[%c0_17, %c0_18, %c0_19] : memref<18x18x4xf32, #tpu.memory_space<vmem>>, vector<18x18x4xf32>
    %cst_20 = arith.constant 0.000000e+00 : f32
    %19 = vector.broadcast %cst_20 : f32 to vector<256x8xf32>
    %20 = vector.extract_strided_slice %18 {offsets = [0, 0, 0], sizes = [16, 16, 4], strides = [1, 1, 1]} : vector<18x18x4xf32> to vector<16x16x4xf32>
    %21 = vector.shape_cast %20 : vector<16x16x4xf32> to vector<256x4xf32>
    %c0_21 = arith.constant 0 : index
    %c0_22 = arith.constant 0 : index
    %c0_23 = arith.constant 0 : index
    %22 = vector.load %arg5[%c0_21, %c0_22, %c0_23] : memref<9x4x8xf32, #tpu.memory_space<vmem>>, vector<1x4x8xf32>
    %23 = vector.shape_cast %22 : vector<1x4x8xf32> to vector<4x8xf32>
    %cst_24 = arith.constant dense<0.000000e+00> : vector<256x8xf32>
    %24 = tpu.matmul %21, %23, %cst_24 {dimension_numbers = #tpu.dot_dimension_numbers<[1], [0], [0], [1], [0, 0, 1, 1], [], []>} : vector<256x4xf32>, vector<4x8xf32>, vector<256x8xf32> -> vector<256x8xf32>
    %25 = arith.addf %19, %24 : vector<256x8xf32>
    %26 = vector.extract_strided_slice %18 {offsets = [0, 1, 0], sizes = [16, 16, 4], strides = [1, 1, 1]} : vector<18x18x4xf32> to vector<16x16x4xf32>
    %27 = vector.shape_cast %26 : vector<16x16x4xf32> to vector<256x4xf32>
    %c1_25 = arith.constant 1 : index
    %c0_26 = arith.constant 0 : index
    %c0_27 = arith.constant 0 : index
    %28 = vector.load %arg5[%c1_25, %c0_26, %c0_27] : memref<9x4x8xf32, #tpu.memory_space<vmem>>, vector<1x4x8xf32>
    %29 = vector.shape_cast %28 : vector<1x4x8xf32> to vector<4x8xf32>
    %cst_28 = arith.constant dense<0.000000e+00> : vector<256x8xf32>
    %30 = tpu.matmul %27, %29, %cst_28 {dimension_numbers = #tpu.dot_dimension_numbers<[1], [0], [0], [1], [0, 0, 1, 1], [], []>} : vector<256x4xf32>, vector<4x8xf32>, vector<256x8xf32> -> vector<256x8xf32>
    %31 = arith.addf %25, %30 : vector<256x8xf32>
    %32 = vector.extract_strided_slice %18 {offsets = [0, 2, 0], sizes = [16, 16, 4], strides = [1, 1, 1]} : vector<18x18x4xf32> to vector<16x16x4xf32>
    %33 = vector.shape_cast %32 : vector<16x16x4xf32> to vector<256x4xf32>
    %c2 = arith.constant 2 : index
    %c0_29 = arith.constant 0 : index
    %c0_30 = arith.constant 0 : index
    %34 = vector.load %arg5[%c2, %c0_29, %c0_30] : memref<9x4x8xf32, #tpu.memory_space<vmem>>, vector<1x4x8xf32>
    %35 = vector.shape_cast %34 : vector<1x4x8xf32> to vector<4x8xf32>
    %cst_31 = arith.constant dense<0.000000e+00> : vector<256x8xf32>
    %36 = tpu.matmul %33, %35, %cst_31 {dimension_numbers = #tpu.dot_dimension_numbers<[1], [0], [0], [1], [0, 0, 1, 1], [], []>} : vector<256x4xf32>, vector<4x8xf32>, vector<256x8xf32> -> vector<256x8xf32>
    %37 = arith.addf %31, %36 : vector<256x8xf32>
    %38 = vector.extract_strided_slice %18 {offsets = [1, 0, 0], sizes = [16, 16, 4], strides = [1, 1, 1]} : vector<18x18x4xf32> to vector<16x16x4xf32>
    %39 = vector.shape_cast %38 : vector<16x16x4xf32> to vector<256x4xf32>
    %c3 = arith.constant 3 : index
    %c0_32 = arith.constant 0 : index
    %c0_33 = arith.constant 0 : index
    %40 = vector.load %arg5[%c3, %c0_32, %c0_33] : memref<9x4x8xf32, #tpu.memory_space<vmem>>, vector<1x4x8xf32>
    %41 = vector.shape_cast %40 : vector<1x4x8xf32> to vector<4x8xf32>
    %cst_34 = arith.constant dense<0.000000e+00> : vector<256x8xf32>
    %42 = tpu.matmul %39, %41, %cst_34 {dimension_numbers = #tpu.dot_dimension_numbers<[1], [0], [0], [1], [0, 0, 1, 1], [], []>} : vector<256x4xf32>, vector<4x8xf32>, vector<256x8xf32> -> vector<256x8xf32>
    %43 = arith.addf %37, %42 : vector<256x8xf32>
    %44 = vector.extract_strided_slice %18 {offsets = [1, 1, 0], sizes = [16, 16, 4], strides = [1, 1, 1]} : vector<18x18x4xf32> to vector<16x16x4xf32>
    %45 = vector.shape_cast %44 : vector<16x16x4xf32> to vector<256x4xf32>
    %c4 = arith.constant 4 : index
    %c0_35 = arith.constant 0 : index
    %c0_36 = arith.constant 0 : index
    %46 = vector.load %arg5[%c4, %c0_35, %c0_36] : memref<9x4x8xf32, #tpu.memory_space<vmem>>, vector<1x4x8xf32>
    %47 = vector.shape_cast %46 : vector<1x4x8xf32> to vector<4x8xf32>
    %cst_37 = arith.constant dense<0.000000e+00> : vector<256x8xf32>
    %48 = tpu.matmul %45, %47, %cst_37 {dimension_numbers = #tpu.dot_dimension_numbers<[1], [0], [0], [1], [0, 0, 1, 1], [], []>} : vector<256x4xf32>, vector<4x8xf32>, vector<256x8xf32> -> vector<256x8xf32>
    %49 = arith.addf %43, %48 : vector<256x8xf32>
    %50 = vector.extract_strided_slice %18 {offsets = [1, 2, 0], sizes = [16, 16, 4], strides = [1, 1, 1]} : vector<18x18x4xf32> to vector<16x16x4xf32>
    %51 = vector.shape_cast %50 : vector<16x16x4xf32> to vector<256x4xf32>
    %c5 = arith.constant 5 : index
    %c0_38 = arith.constant 0 : index
    %c0_39 = arith.constant 0 : index
    %52 = vector.load %arg5[%c5, %c0_38, %c0_39] : memref<9x4x8xf32, #tpu.memory_space<vmem>>, vector<1x4x8xf32>
    %53 = vector.shape_cast %52 : vector<1x4x8xf32> to vector<4x8xf32>
    %cst_40 = arith.constant dense<0.000000e+00> : vector<256x8xf32>
    %54 = tpu.matmul %51, %53, %cst_40 {dimension_numbers = #tpu.dot_dimension_numbers<[1], [0], [0], [1], [0, 0, 1, 1], [], []>} : vector<256x4xf32>, vector<4x8xf32>, vector<256x8xf32> -> vector<256x8xf32>
    %55 = arith.addf %49, %54 : vector<256x8xf32>
    %56 = vector.extract_strided_slice %18 {offsets = [2, 0, 0], sizes = [16, 16, 4], strides = [1, 1, 1]} : vector<18x18x4xf32> to vector<16x16x4xf32>
    %57 = vector.shape_cast %56 : vector<16x16x4xf32> to vector<256x4xf32>
    %c6 = arith.constant 6 : index
    %c0_41 = arith.constant 0 : index
    %c0_42 = arith.constant 0 : index
    %58 = vector.load %arg5[%c6, %c0_41, %c0_42] : memref<9x4x8xf32, #tpu.memory_space<vmem>>, vector<1x4x8xf32>
    %59 = vector.shape_cast %58 : vector<1x4x8xf32> to vector<4x8xf32>
    %cst_43 = arith.constant dense<0.000000e+00> : vector<256x8xf32>
    %60 = tpu.matmul %57, %59, %cst_43 {dimension_numbers = #tpu.dot_dimension_numbers<[1], [0], [0], [1], [0, 0, 1, 1], [], []>} : vector<256x4xf32>, vector<4x8xf32>, vector<256x8xf32> -> vector<256x8xf32>
    %61 = arith.addf %55, %60 : vector<256x8xf32>
    %62 = vector.extract_strided_slice %18 {offsets = [2, 1, 0], sizes = [16, 16, 4], strides = [1, 1, 1]} : vector<18x18x4xf32> to vector<16x16x4xf32>
    %63 = vector.shape_cast %62 : vector<16x16x4xf32> to vector<256x4xf32>
    %c7 = arith.constant 7 : index
    %c0_44 = arith.constant 0 : index
    %c0_45 = arith.constant 0 : index
    %64 = vector.load %arg5[%c7, %c0_44, %c0_45] : memref<9x4x8xf32, #tpu.memory_space<vmem>>, vector<1x4x8xf32>
    %65 = vector.shape_cast %64 : vector<1x4x8xf32> to vector<4x8xf32>
    %cst_46 = arith.constant dense<0.000000e+00> : vector<256x8xf32>
    %66 = tpu.matmul %63, %65, %cst_46 {dimension_numbers = #tpu.dot_dimension_numbers<[1], [0], [0], [1], [0, 0, 1, 1], [], []>} : vector<256x4xf32>, vector<4x8xf32>, vector<256x8xf32> -> vector<256x8xf32>
    %67 = arith.addf %61, %66 : vector<256x8xf32>
    %68 = vector.extract_strided_slice %18 {offsets = [2, 2, 0], sizes = [16, 16, 4], strides = [1, 1, 1]} : vector<18x18x4xf32> to vector<16x16x4xf32>
    %69 = vector.shape_cast %68 : vector<16x16x4xf32> to vector<256x4xf32>
    %c8 = arith.constant 8 : index
    %c0_47 = arith.constant 0 : index
    %c0_48 = arith.constant 0 : index
    %70 = vector.load %arg5[%c8, %c0_47, %c0_48] : memref<9x4x8xf32, #tpu.memory_space<vmem>>, vector<1x4x8xf32>
    %71 = vector.shape_cast %70 : vector<1x4x8xf32> to vector<4x8xf32>
    %cst_49 = arith.constant dense<0.000000e+00> : vector<256x8xf32>
    %72 = tpu.matmul %69, %71, %cst_49 {dimension_numbers = #tpu.dot_dimension_numbers<[1], [0], [0], [1], [0, 0, 1, 1], [], []>} : vector<256x4xf32>, vector<4x8xf32>, vector<256x8xf32> -> vector<256x8xf32>
    %73 = arith.addf %67, %72 : vector<256x8xf32>
    %74 = vector.shape_cast %73 : vector<256x8xf32> to vector<16x16x8xf32>
    %c0_50 = arith.constant 0 : index
    %c0_51 = arith.constant 0 : index
    %c0_52 = arith.constant 0 : index
    %c0_53 = arith.constant 0 : index
    %75 = vector.load %arg6[%c0_50, %c0_51, %c0_52, %c0_53] : memref<1x16x16x8xf32, #tpu.memory_space<vmem>>, vector<1x16x16x8xf32>
    %76 = vector.shape_cast %75 : vector<1x16x16x8xf32> to vector<16x16x8xf32>
    %77 = vector.shape_cast %74 : vector<16x16x8xf32> to vector<1x16x16x8xf32>
    tpu.vector_store %arg6[%c0_50, %c0_51, %c0_52, %c0_53], %77 {strides = array<i32>} : memref<1x16x16x8xf32, #tpu.memory_space<vmem>>, vector<1x16x16x8xf32>,
    %cst_54 = arith.constant dense<0.000000e+00> : vector<8xf32>
    %78 = vector.multi_reduction <add>, %73, %cst_54 [0] : vector<256x8xf32> to vector<8xf32>
    %c0_55 = arith.constant 0 : index
    %c0_56 = arith.constant 0 : index
    %c0_57 = arith.constant 0 : index
    %c0_58 = arith.constant 0 : index
    %79 = vector.load %arg7[%c0_55, %c0_56, %c0_57, %c0_58] : memref<1x1x1x8xf32, #tpu.memory_space<vmem>>, vector<1x1x1x8xf32>
    %80 = vector.shape_cast %79 : vector<1x1x1x8xf32> to vector<8xf32>
    %81 = vector.shape_cast %78 : vector<8xf32> to vector<1x1x1x8xf32>
    tpu.vector_store %arg7[%c0_55, %c0_56, %c0_57, %c0_58], %81 {strides = array<i32>} : memref<1x1x1x8xf32, #tpu.memory_space<vmem>>, vector<1x1x1x8xf32>,
    %82 = arith.mulf %73, %73 : vector<256x8xf32>
    %cst_59 = arith.constant dense<0.000000e+00> : vector<8xf32>
    %83 = vector.multi_reduction <add>, %82, %cst_59 [0] : vector<256x8xf32> to vector<8xf32>
    %c0_60 = arith.constant 0 : index
    %c0_61 = arith.constant 0 : index
    %c0_62 = arith.constant 0 : index
    %c0_63 = arith.constant 0 : index
    %84 = vector.load %arg8[%c0_60, %c0_61, %c0_62, %c0_63] : memref<1x1x1x8xf32, #tpu.memory_space<vmem>>, vector<1x1x1x8xf32>
    %85 = vector.shape_cast %84 : vector<1x1x1x8xf32> to vector<8xf32>
    %86 = vector.shape_cast %83 : vector<8xf32> to vector<1x1x1x8xf32>
    tpu.vector_store %arg8[%c0_60, %c0_61, %c0_62, %c0_63], %86 {strides = array<i32>} : memref<1x1x1x8xf32, #tpu.memory_space<vmem>>, vector<1x1x1x8xf32>,
    return
  }
  func.func @transform_0(%arg0: i32, %arg1: i32) -> (i32, i32, i32, i32) {
    %c0_i32 = arith.constant 0 : i32
    %c0_i32_0 = arith.constant 0 : i32
    %c0_i32_1 = arith.constant 0 : i32
    return %arg0, %arg1, %c0_i32, %c0_i32_0 : i32, i32, i32, i32
  }
  func.func @transform_1(%arg0: i32, %arg1: i32) -> (i32, i32, i32, i32) {
    %c16_i32 = arith.constant 16 : i32
    %0 = arith.muli %arg1, %c16_i32 : i32
    %c1_i32 = arith.constant 1 : i32
    %1 = arith.subi %0, %c1_i32 : i32
    %c0_i32 = arith.constant 0 : i32
    %2 = arith.maxsi %1, %c0_i32 : i32
    %c0_i32_0 = arith.constant 0 : i32
    %c0_i32_1 = arith.constant 0 : i32
    %c0_i32_2 = arith.constant 0 : i32
    return %arg0, %2, %c0_i32_0, %c0_i32_1 : i32, i32, i32, i32
  }
  func.func @transform_2(%arg0: i32, %arg1: i32) -> (i32, i32, i32, i32) {
    %c16_i32 = arith.constant 16 : i32
    %0 = arith.muli %arg1, %c16_i32 : i32
    %c16_i32_0 = arith.constant 16 : i32
    %1 = arith.addi %0, %c16_i32_0 : i32
    %c15_i32 = arith.constant 15 : i32
    %2 = arith.minsi %1, %c15_i32 : i32
    %c0_i32 = arith.constant 0 : i32
    %c0_i32_1 = arith.constant 0 : i32
    %c0_i32_2 = arith.constant 0 : i32
    return %arg0, %2, %c0_i32, %c0_i32_1 : i32, i32, i32, i32
  }
  func.func @transform_3(%arg0: i32, %arg1: i32) -> (i32, i32, i32) {
    %c0_i32 = arith.constant 0 : i32
    %c0_i32_0 = arith.constant 0 : i32
    %c0_i32_1 = arith.constant 0 : i32
    %c0_i32_2 = arith.constant 0 : i32
    return %c0_i32, %c0_i32_0, %c0_i32_1 : i32, i32, i32
  }
  func.func @transform_4(%arg0: i32, %arg1: i32) -> (i32, i32, i32, i32) {
    %c0_i32 = arith.constant 0 : i32
    %c0_i32_0 = arith.constant 0 : i32
    %c0_i32_1 = arith.constant 0 : i32
    return %arg0, %arg1, %c0_i32, %c0_i32_0 : i32, i32, i32, i32
  }
  func.func @transform_5(%arg0: i32, %arg1: i32) -> (i32, i32, i32, i32) {
    %c0_i32 = arith.constant 0 : i32
    %c0_i32_0 = arith.constant 0 : i32
    %c0_i32_1 = arith.constant 0 : i32
    return %arg0, %arg1, %c0_i32, %c0_i32_0 : i32, i32, i32, i32
  }
  func.func @transform_6(%arg0: i32, %arg1: i32) -> (i32, i32, i32, i32) {
    %c0_i32 = arith.constant 0 : i32
    %c0_i32_0 = arith.constant 0 : i32
    %c0_i32_1 = arith.constant 0 : i32
    return %arg0, %arg1, %c0_i32, %c0_i32_0 : i32, i32, i32, i32
  }
}

module attributes {stable_mosaic.version = 11 : i64} {
  func.func @kernel(%arg0: i32, %arg1: i32, %arg2: memref<1x16x16x8xf32, #tpu.memory_space<vmem>>, %arg3: memref<1x1x16x8xf32, #tpu.memory_space<vmem>>, %arg4: memref<1x1x16x8xf32, #tpu.memory_space<vmem>>, %arg5: memref<9x8x8xf32, #tpu.memory_space<vmem>>, %arg6: memref<1x8xf32, #tpu.memory_space<vmem>>, %arg7: memref<1x8xf32, #tpu.memory_space<vmem>>, %arg8: memref<1x16x16x8xf32, #tpu.memory_space<vmem>>, %arg9: memref<1x1x1x8xf32, #tpu.memory_space<vmem>>, %arg10: memref<1x1x1x8xf32, #tpu.memory_space<vmem>>, %arg11: memref<18x18x8xf32, #tpu.memory_space<vmem>>) attributes {dimension_semantics = [#tpu.dimension_semantics<parallel>, #tpu.dimension_semantics<parallel>], iteration_bounds = array<i64: 2, 1>, scalar_prefetch = 0 : i64, scratch_operands = 1 : i64, tpu.core_type = #tpu.core_type<tc>, window_params = [{transform_indices = @transform_0, window_bounds = array<i64: 1, 16, 16, 8>}, {transform_indices = @transform_1, window_bounds = array<i64: 1, 1, 16, 8>}, {transform_indices = @transform_2, window_bounds = array<i64: 1, 1, 16, 8>}, {pipeline_mode = #tpu.pipeline_mode<synchronous>, transform_indices = @transform_3, window_bounds = array<i64: 9, 8, 8>}, {pipeline_mode = #tpu.pipeline_mode<synchronous>, transform_indices = @transform_4, window_bounds = array<i64: 1, 8>}, {pipeline_mode = #tpu.pipeline_mode<synchronous>, transform_indices = @transform_5, window_bounds = array<i64: 1, 8>}, {transform_indices = @transform_6, window_bounds = array<i64: 1, 16, 16, 8>}, {transform_indices = @transform_7, window_bounds = array<i64: 1, 1, 1, 8>}, {transform_indices = @transform_8, window_bounds = array<i64: 1, 1, 1, 8>}]} {
    %cst = arith.constant 0.000000e+00 : f32
    %0 = vector.broadcast %cst : f32 to vector<18x1x8xf32>
    %c0 = arith.constant 0 : index
    %c0_0 = arith.constant 0 : index
    %c0_1 = arith.constant 0 : index
    %1 = vector.load %arg11[%c0, %c0_0, %c0_1] : memref<18x18x8xf32, #tpu.memory_space<vmem>>, vector<18x1x8xf32>
    tpu.vector_store %arg11[%c0, %c0_0, %c0_1], %0 {strides = array<i32>} : memref<18x18x8xf32, #tpu.memory_space<vmem>>, vector<18x1x8xf32>,
    %c0_2 = arith.constant 0 : index
    %c17 = arith.constant 17 : index
    %c0_3 = arith.constant 0 : index
    %2 = vector.load %arg11[%c0_2, %c17, %c0_3] : memref<18x18x8xf32, #tpu.memory_space<vmem>>, vector<18x1x8xf32>
    tpu.vector_store %arg11[%c0_2, %c17, %c0_3], %0 {strides = array<i32>} : memref<18x18x8xf32, #tpu.memory_space<vmem>>, vector<18x1x8xf32>,
    %c0_4 = arith.constant 0 : index
    %c0_5 = arith.constant 0 : index
    %c0_6 = arith.constant 0 : index
    %c0_7 = arith.constant 0 : index
    %3 = vector.load %arg2[%c0_4, %c0_5, %c0_6, %c0_7] : memref<1x16x16x8xf32, #tpu.memory_space<vmem>>, vector<1x16x16x8xf32>
    %4 = vector.shape_cast %3 : vector<1x16x16x8xf32> to vector<16x16x8xf32>
    %c0_8 = arith.constant 0 : index
    %c0_9 = arith.constant 0 : index
    %5 = vector.load %arg6[%c0_8, %c0_9] : memref<1x8xf32, #tpu.memory_space<vmem>>, vector<1x8xf32>
    %6 = vector.shape_cast %5 : vector<1x8xf32> to vector<8xf32>
    %7 = vector.shape_cast %6 : vector<8xf32> to vector<1x1x8xf32>
    %8 = vector.broadcast %7 : vector<1x1x8xf32> to vector<16x16x8xf32>
    %9 = arith.mulf %4, %8 : vector<16x16x8xf32>
    %c0_10 = arith.constant 0 : index
    %c0_11 = arith.constant 0 : index
    %10 = vector.load %arg7[%c0_10, %c0_11] : memref<1x8xf32, #tpu.memory_space<vmem>>, vector<1x8xf32>
    %11 = vector.shape_cast %10 : vector<1x8xf32> to vector<8xf32>
    %12 = vector.shape_cast %11 : vector<8xf32> to vector<1x1x8xf32>
    %13 = vector.broadcast %12 : vector<1x1x8xf32> to vector<16x16x8xf32>
    %14 = arith.addf %9, %13 : vector<16x16x8xf32>
    %cst_12 = arith.constant 0.000000e+00 : f32
    %15 = vector.broadcast %cst_12 : f32 to vector<16x16x8xf32>
    %16 = arith.maximumf %14, %15 : vector<16x16x8xf32>
    %c1 = arith.constant 1 : index
    %c1_13 = arith.constant 1 : index
    %c0_14 = arith.constant 0 : index
    %17 = vector.load %arg11[%c1, %c1_13, %c0_14] : memref<18x18x8xf32, #tpu.memory_space<vmem>>, vector<16x16x8xf32>
    tpu.vector_store %arg11[%c1, %c1_13, %c0_14], %16 {strides = array<i32>} : memref<18x18x8xf32, #tpu.memory_space<vmem>>, vector<16x16x8xf32>,
    %c0_i32 = arith.constant 0 : i32
    %18 = arith.cmpi sgt, %arg1, %c0_i32 : i32
    %19 = arith.extui %18 : i1 to i32
    %c0_i32_15 = arith.constant 0 : i32
    %20 = arith.cmpi ne, %19, %c0_i32_15 : i32
    scf.if %20 {
      %c0_69 = arith.constant 0 : index
      %c0_70 = arith.constant 0 : index
      %c0_71 = arith.constant 0 : index
      %c0_72 = arith.constant 0 : index
      %99 = vector.load %arg3[%c0_69, %c0_70, %c0_71, %c0_72] : memref<1x1x16x8xf32, #tpu.memory_space<vmem>>, vector<1x1x16x8xf32>
      %100 = vector.shape_cast %99 : vector<1x1x16x8xf32> to vector<1x16x8xf32>
      %c0_73 = arith.constant 0 : index
      %c0_74 = arith.constant 0 : index
      %101 = vector.load %arg6[%c0_73, %c0_74] : memref<1x8xf32, #tpu.memory_space<vmem>>, vector<1x8xf32>
      %102 = vector.shape_cast %101 : vector<1x8xf32> to vector<8xf32>
      %103 = vector.shape_cast %102 : vector<8xf32> to vector<1x1x8xf32>
      %104 = vector.broadcast %103 : vector<1x1x8xf32> to vector<1x16x8xf32>
      %105 = arith.mulf %100, %104 : vector<1x16x8xf32>
      %c0_75 = arith.constant 0 : index
      %c0_76 = arith.constant 0 : index
      %106 = vector.load %arg7[%c0_75, %c0_76] : memref<1x8xf32, #tpu.memory_space<vmem>>, vector<1x8xf32>
      %107 = vector.shape_cast %106 : vector<1x8xf32> to vector<8xf32>
      %108 = vector.shape_cast %107 : vector<8xf32> to vector<1x1x8xf32>
      %109 = vector.broadcast %108 : vector<1x1x8xf32> to vector<1x16x8xf32>
      %110 = arith.addf %105, %109 : vector<1x16x8xf32>
      %cst_77 = arith.constant 0.000000e+00 : f32
      %111 = vector.broadcast %cst_77 : f32 to vector<1x16x8xf32>
      %112 = arith.maximumf %110, %111 : vector<1x16x8xf32>
      %c0_78 = arith.constant 0 : index
      %c1_79 = arith.constant 1 : index
      %c0_80 = arith.constant 0 : index
      %113 = vector.load %arg11[%c0_78, %c1_79, %c0_80] : memref<18x18x8xf32, #tpu.memory_space<vmem>>, vector<1x16x8xf32>
      tpu.vector_store %arg11[%c0_78, %c1_79, %c0_80], %112 {strides = array<i32>} : memref<18x18x8xf32, #tpu.memory_space<vmem>>, vector<1x16x8xf32>,
    } else {
    }
    %c0_i32_16 = arith.constant 0 : i32
    %21 = arith.cmpi eq, %arg1, %c0_i32_16 : i32
    %22 = arith.extui %21 : i1 to i32
    %c0_i32_17 = arith.constant 0 : i32
    %23 = arith.cmpi ne, %22, %c0_i32_17 : i32
    scf.if %23 {
      %cst_69 = arith.constant 0.000000e+00 : f32
      %99 = vector.broadcast %cst_69 : f32 to vector<1x18x8xf32>
      %c0_70 = arith.constant 0 : index
      %c0_71 = arith.constant 0 : index
      %c0_72 = arith.constant 0 : index
      %100 = vector.load %arg11[%c0_70, %c0_71, %c0_72] : memref<18x18x8xf32, #tpu.memory_space<vmem>>, vector<1x18x8xf32>
      tpu.vector_store %arg11[%c0_70, %c0_71, %c0_72], %99 {strides = array<i32>} : memref<18x18x8xf32, #tpu.memory_space<vmem>>, vector<1x18x8xf32>,
    } else {
    }
    %c0_i32_18 = arith.constant 0 : i32
    %24 = arith.cmpi slt, %arg1, %c0_i32_18 : i32
    %25 = arith.extui %24 : i1 to i32
    %c0_i32_19 = arith.constant 0 : i32
    %26 = arith.cmpi ne, %25, %c0_i32_19 : i32
    scf.if %26 {
      %c0_69 = arith.constant 0 : index
      %c0_70 = arith.constant 0 : index
      %c0_71 = arith.constant 0 : index
      %c0_72 = arith.constant 0 : index
      %99 = vector.load %arg4[%c0_69, %c0_70, %c0_71, %c0_72] : memref<1x1x16x8xf32, #tpu.memory_space<vmem>>, vector<1x1x16x8xf32>
      %100 = vector.shape_cast %99 : vector<1x1x16x8xf32> to vector<1x16x8xf32>
      %c0_73 = arith.constant 0 : index
      %c0_74 = arith.constant 0 : index
      %101 = vector.load %arg6[%c0_73, %c0_74] : memref<1x8xf32, #tpu.memory_space<vmem>>, vector<1x8xf32>
      %102 = vector.shape_cast %101 : vector<1x8xf32> to vector<8xf32>
      %103 = vector.shape_cast %102 : vector<8xf32> to vector<1x1x8xf32>
      %104 = vector.broadcast %103 : vector<1x1x8xf32> to vector<1x16x8xf32>
      %105 = arith.mulf %100, %104 : vector<1x16x8xf32>
      %c0_75 = arith.constant 0 : index
      %c0_76 = arith.constant 0 : index
      %106 = vector.load %arg7[%c0_75, %c0_76] : memref<1x8xf32, #tpu.memory_space<vmem>>, vector<1x8xf32>
      %107 = vector.shape_cast %106 : vector<1x8xf32> to vector<8xf32>
      %108 = vector.shape_cast %107 : vector<8xf32> to vector<1x1x8xf32>
      %109 = vector.broadcast %108 : vector<1x1x8xf32> to vector<1x16x8xf32>
      %110 = arith.addf %105, %109 : vector<1x16x8xf32>
      %cst_77 = arith.constant 0.000000e+00 : f32
      %111 = vector.broadcast %cst_77 : f32 to vector<1x16x8xf32>
      %112 = arith.maximumf %110, %111 : vector<1x16x8xf32>
      %c17_78 = arith.constant 17 : index
      %c1_79 = arith.constant 1 : index
      %c0_80 = arith.constant 0 : index
      %113 = vector.load %arg11[%c17_78, %c1_79, %c0_80] : memref<18x18x8xf32, #tpu.memory_space<vmem>>, vector<1x16x8xf32>
      tpu.vector_store %arg11[%c17_78, %c1_79, %c0_80], %112 {strides = array<i32>} : memref<18x18x8xf32, #tpu.memory_space<vmem>>, vector<1x16x8xf32>,
    } else {
    }
    %c0_i32_20 = arith.constant 0 : i32
    %27 = arith.cmpi eq, %arg1, %c0_i32_20 : i32
    %28 = arith.extui %27 : i1 to i32
    %c0_i32_21 = arith.constant 0 : i32
    %29 = arith.cmpi ne, %28, %c0_i32_21 : i32
    scf.if %29 {
      %cst_69 = arith.constant 0.000000e+00 : f32
      %99 = vector.broadcast %cst_69 : f32 to vector<1x18x8xf32>
      %c17_70 = arith.constant 17 : index
      %c0_71 = arith.constant 0 : index
      %c0_72 = arith.constant 0 : index
      %100 = vector.load %arg11[%c17_70, %c0_71, %c0_72] : memref<18x18x8xf32, #tpu.memory_space<vmem>>, vector<1x18x8xf32>
      tpu.vector_store %arg11[%c17_70, %c0_71, %c0_72], %99 {strides = array<i32>} : memref<18x18x8xf32, #tpu.memory_space<vmem>>, vector<1x18x8xf32>,
    } else {
    }
    %c0_22 = arith.constant 0 : index
    %c0_23 = arith.constant 0 : index
    %c0_24 = arith.constant 0 : index
    %30 = vector.load %arg11[%c0_22, %c0_23, %c0_24] : memref<18x18x8xf32, #tpu.memory_space<vmem>>, vector<18x18x8xf32>
    %cst_25 = arith.constant 0.000000e+00 : f32
    %31 = vector.broadcast %cst_25 : f32 to vector<256x8xf32>
    %32 = vector.extract_strided_slice %30 {offsets = [0, 0, 0], sizes = [16, 16, 8], strides = [1, 1, 1]} : vector<18x18x8xf32> to vector<16x16x8xf32>
    %33 = vector.shape_cast %32 : vector<16x16x8xf32> to vector<256x8xf32>
    %c0_26 = arith.constant 0 : index
    %c0_27 = arith.constant 0 : index
    %c0_28 = arith.constant 0 : index
    %34 = vector.load %arg5[%c0_26, %c0_27, %c0_28] : memref<9x8x8xf32, #tpu.memory_space<vmem>>, vector<1x8x8xf32>
    %35 = vector.shape_cast %34 : vector<1x8x8xf32> to vector<8x8xf32>
    %cst_29 = arith.constant dense<0.000000e+00> : vector<256x8xf32>
    %36 = tpu.matmul %33, %35, %cst_29 {dimension_numbers = #tpu.dot_dimension_numbers<[1], [0], [0], [1], [0, 0, 1, 1], [], []>} : vector<256x8xf32>, vector<8x8xf32>, vector<256x8xf32> -> vector<256x8xf32>
    %37 = arith.addf %31, %36 : vector<256x8xf32>
    %38 = vector.extract_strided_slice %30 {offsets = [0, 1, 0], sizes = [16, 16, 8], strides = [1, 1, 1]} : vector<18x18x8xf32> to vector<16x16x8xf32>
    %39 = vector.shape_cast %38 : vector<16x16x8xf32> to vector<256x8xf32>
    %c1_30 = arith.constant 1 : index
    %c0_31 = arith.constant 0 : index
    %c0_32 = arith.constant 0 : index
    %40 = vector.load %arg5[%c1_30, %c0_31, %c0_32] : memref<9x8x8xf32, #tpu.memory_space<vmem>>, vector<1x8x8xf32>
    %41 = vector.shape_cast %40 : vector<1x8x8xf32> to vector<8x8xf32>
    %cst_33 = arith.constant dense<0.000000e+00> : vector<256x8xf32>
    %42 = tpu.matmul %39, %41, %cst_33 {dimension_numbers = #tpu.dot_dimension_numbers<[1], [0], [0], [1], [0, 0, 1, 1], [], []>} : vector<256x8xf32>, vector<8x8xf32>, vector<256x8xf32> -> vector<256x8xf32>
    %43 = arith.addf %37, %42 : vector<256x8xf32>
    %44 = vector.extract_strided_slice %30 {offsets = [0, 2, 0], sizes = [16, 16, 8], strides = [1, 1, 1]} : vector<18x18x8xf32> to vector<16x16x8xf32>
    %45 = vector.shape_cast %44 : vector<16x16x8xf32> to vector<256x8xf32>
    %c2 = arith.constant 2 : index
    %c0_34 = arith.constant 0 : index
    %c0_35 = arith.constant 0 : index
    %46 = vector.load %arg5[%c2, %c0_34, %c0_35] : memref<9x8x8xf32, #tpu.memory_space<vmem>>, vector<1x8x8xf32>
    %47 = vector.shape_cast %46 : vector<1x8x8xf32> to vector<8x8xf32>
    %cst_36 = arith.constant dense<0.000000e+00> : vector<256x8xf32>
    %48 = tpu.matmul %45, %47, %cst_36 {dimension_numbers = #tpu.dot_dimension_numbers<[1], [0], [0], [1], [0, 0, 1, 1], [], []>} : vector<256x8xf32>, vector<8x8xf32>, vector<256x8xf32> -> vector<256x8xf32>
    %49 = arith.addf %43, %48 : vector<256x8xf32>
    %50 = vector.extract_strided_slice %30 {offsets = [1, 0, 0], sizes = [16, 16, 8], strides = [1, 1, 1]} : vector<18x18x8xf32> to vector<16x16x8xf32>
    %51 = vector.shape_cast %50 : vector<16x16x8xf32> to vector<256x8xf32>
    %c3 = arith.constant 3 : index
    %c0_37 = arith.constant 0 : index
    %c0_38 = arith.constant 0 : index
    %52 = vector.load %arg5[%c3, %c0_37, %c0_38] : memref<9x8x8xf32, #tpu.memory_space<vmem>>, vector<1x8x8xf32>
    %53 = vector.shape_cast %52 : vector<1x8x8xf32> to vector<8x8xf32>
    %cst_39 = arith.constant dense<0.000000e+00> : vector<256x8xf32>
    %54 = tpu.matmul %51, %53, %cst_39 {dimension_numbers = #tpu.dot_dimension_numbers<[1], [0], [0], [1], [0, 0, 1, 1], [], []>} : vector<256x8xf32>, vector<8x8xf32>, vector<256x8xf32> -> vector<256x8xf32>
    %55 = arith.addf %49, %54 : vector<256x8xf32>
    %56 = vector.extract_strided_slice %30 {offsets = [1, 1, 0], sizes = [16, 16, 8], strides = [1, 1, 1]} : vector<18x18x8xf32> to vector<16x16x8xf32>
    %57 = vector.shape_cast %56 : vector<16x16x8xf32> to vector<256x8xf32>
    %c4 = arith.constant 4 : index
    %c0_40 = arith.constant 0 : index
    %c0_41 = arith.constant 0 : index
    %58 = vector.load %arg5[%c4, %c0_40, %c0_41] : memref<9x8x8xf32, #tpu.memory_space<vmem>>, vector<1x8x8xf32>
    %59 = vector.shape_cast %58 : vector<1x8x8xf32> to vector<8x8xf32>
    %cst_42 = arith.constant dense<0.000000e+00> : vector<256x8xf32>
    %60 = tpu.matmul %57, %59, %cst_42 {dimension_numbers = #tpu.dot_dimension_numbers<[1], [0], [0], [1], [0, 0, 1, 1], [], []>} : vector<256x8xf32>, vector<8x8xf32>, vector<256x8xf32> -> vector<256x8xf32>
    %61 = arith.addf %55, %60 : vector<256x8xf32>
    %62 = vector.extract_strided_slice %30 {offsets = [1, 2, 0], sizes = [16, 16, 8], strides = [1, 1, 1]} : vector<18x18x8xf32> to vector<16x16x8xf32>
    %63 = vector.shape_cast %62 : vector<16x16x8xf32> to vector<256x8xf32>
    %c5 = arith.constant 5 : index
    %c0_43 = arith.constant 0 : index
    %c0_44 = arith.constant 0 : index
    %64 = vector.load %arg5[%c5, %c0_43, %c0_44] : memref<9x8x8xf32, #tpu.memory_space<vmem>>, vector<1x8x8xf32>
    %65 = vector.shape_cast %64 : vector<1x8x8xf32> to vector<8x8xf32>
    %cst_45 = arith.constant dense<0.000000e+00> : vector<256x8xf32>
    %66 = tpu.matmul %63, %65, %cst_45 {dimension_numbers = #tpu.dot_dimension_numbers<[1], [0], [0], [1], [0, 0, 1, 1], [], []>} : vector<256x8xf32>, vector<8x8xf32>, vector<256x8xf32> -> vector<256x8xf32>
    %67 = arith.addf %61, %66 : vector<256x8xf32>
    %68 = vector.extract_strided_slice %30 {offsets = [2, 0, 0], sizes = [16, 16, 8], strides = [1, 1, 1]} : vector<18x18x8xf32> to vector<16x16x8xf32>
    %69 = vector.shape_cast %68 : vector<16x16x8xf32> to vector<256x8xf32>
    %c6 = arith.constant 6 : index
    %c0_46 = arith.constant 0 : index
    %c0_47 = arith.constant 0 : index
    %70 = vector.load %arg5[%c6, %c0_46, %c0_47] : memref<9x8x8xf32, #tpu.memory_space<vmem>>, vector<1x8x8xf32>
    %71 = vector.shape_cast %70 : vector<1x8x8xf32> to vector<8x8xf32>
    %cst_48 = arith.constant dense<0.000000e+00> : vector<256x8xf32>
    %72 = tpu.matmul %69, %71, %cst_48 {dimension_numbers = #tpu.dot_dimension_numbers<[1], [0], [0], [1], [0, 0, 1, 1], [], []>} : vector<256x8xf32>, vector<8x8xf32>, vector<256x8xf32> -> vector<256x8xf32>
    %73 = arith.addf %67, %72 : vector<256x8xf32>
    %74 = vector.extract_strided_slice %30 {offsets = [2, 1, 0], sizes = [16, 16, 8], strides = [1, 1, 1]} : vector<18x18x8xf32> to vector<16x16x8xf32>
    %75 = vector.shape_cast %74 : vector<16x16x8xf32> to vector<256x8xf32>
    %c7 = arith.constant 7 : index
    %c0_49 = arith.constant 0 : index
    %c0_50 = arith.constant 0 : index
    %76 = vector.load %arg5[%c7, %c0_49, %c0_50] : memref<9x8x8xf32, #tpu.memory_space<vmem>>, vector<1x8x8xf32>
    %77 = vector.shape_cast %76 : vector<1x8x8xf32> to vector<8x8xf32>
    %cst_51 = arith.constant dense<0.000000e+00> : vector<256x8xf32>
    %78 = tpu.matmul %75, %77, %cst_51 {dimension_numbers = #tpu.dot_dimension_numbers<[1], [0], [0], [1], [0, 0, 1, 1], [], []>} : vector<256x8xf32>, vector<8x8xf32>, vector<256x8xf32> -> vector<256x8xf32>
    %79 = arith.addf %73, %78 : vector<256x8xf32>
    %80 = vector.extract_strided_slice %30 {offsets = [2, 2, 0], sizes = [16, 16, 8], strides = [1, 1, 1]} : vector<18x18x8xf32> to vector<16x16x8xf32>
    %81 = vector.shape_cast %80 : vector<16x16x8xf32> to vector<256x8xf32>
    %c8 = arith.constant 8 : index
    %c0_52 = arith.constant 0 : index
    %c0_53 = arith.constant 0 : index
    %82 = vector.load %arg5[%c8, %c0_52, %c0_53] : memref<9x8x8xf32, #tpu.memory_space<vmem>>, vector<1x8x8xf32>
    %83 = vector.shape_cast %82 : vector<1x8x8xf32> to vector<8x8xf32>
    %cst_54 = arith.constant dense<0.000000e+00> : vector<256x8xf32>
    %84 = tpu.matmul %81, %83, %cst_54 {dimension_numbers = #tpu.dot_dimension_numbers<[1], [0], [0], [1], [0, 0, 1, 1], [], []>} : vector<256x8xf32>, vector<8x8xf32>, vector<256x8xf32> -> vector<256x8xf32>
    %85 = arith.addf %79, %84 : vector<256x8xf32>
    %86 = vector.shape_cast %85 : vector<256x8xf32> to vector<16x16x8xf32>
    %c0_55 = arith.constant 0 : index
    %c0_56 = arith.constant 0 : index
    %c0_57 = arith.constant 0 : index
    %c0_58 = arith.constant 0 : index
    %87 = vector.load %arg8[%c0_55, %c0_56, %c0_57, %c0_58] : memref<1x16x16x8xf32, #tpu.memory_space<vmem>>, vector<1x16x16x8xf32>
    %88 = vector.shape_cast %87 : vector<1x16x16x8xf32> to vector<16x16x8xf32>
    %89 = vector.shape_cast %86 : vector<16x16x8xf32> to vector<1x16x16x8xf32>
    tpu.vector_store %arg8[%c0_55, %c0_56, %c0_57, %c0_58], %89 {strides = array<i32>} : memref<1x16x16x8xf32, #tpu.memory_space<vmem>>, vector<1x16x16x8xf32>,
    %cst_59 = arith.constant dense<0.000000e+00> : vector<8xf32>
    %90 = vector.multi_reduction <add>, %85, %cst_59 [0] : vector<256x8xf32> to vector<8xf32>
    %c0_60 = arith.constant 0 : index
    %c0_61 = arith.constant 0 : index
    %c0_62 = arith.constant 0 : index
    %c0_63 = arith.constant 0 : index
    %91 = vector.load %arg9[%c0_60, %c0_61, %c0_62, %c0_63] : memref<1x1x1x8xf32, #tpu.memory_space<vmem>>, vector<1x1x1x8xf32>
    %92 = vector.shape_cast %91 : vector<1x1x1x8xf32> to vector<8xf32>
    %93 = vector.shape_cast %90 : vector<8xf32> to vector<1x1x1x8xf32>
    tpu.vector_store %arg9[%c0_60, %c0_61, %c0_62, %c0_63], %93 {strides = array<i32>} : memref<1x1x1x8xf32, #tpu.memory_space<vmem>>, vector<1x1x1x8xf32>,
    %94 = arith.mulf %85, %85 : vector<256x8xf32>
    %cst_64 = arith.constant dense<0.000000e+00> : vector<8xf32>
    %95 = vector.multi_reduction <add>, %94, %cst_64 [0] : vector<256x8xf32> to vector<8xf32>
    %c0_65 = arith.constant 0 : index
    %c0_66 = arith.constant 0 : index
    %c0_67 = arith.constant 0 : index
    %c0_68 = arith.constant 0 : index
    %96 = vector.load %arg10[%c0_65, %c0_66, %c0_67, %c0_68] : memref<1x1x1x8xf32, #tpu.memory_space<vmem>>, vector<1x1x1x8xf32>
    %97 = vector.shape_cast %96 : vector<1x1x1x8xf32> to vector<8xf32>
    %98 = vector.shape_cast %95 : vector<8xf32> to vector<1x1x1x8xf32>
    tpu.vector_store %arg10[%c0_65, %c0_66, %c0_67, %c0_68], %98 {strides = array<i32>} : memref<1x1x1x8xf32, #tpu.memory_space<vmem>>, vector<1x1x1x8xf32>,
    return
  }
  func.func @transform_0(%arg0: i32, %arg1: i32) -> (i32, i32, i32, i32) {
    %c0_i32 = arith.constant 0 : i32
    %c0_i32_0 = arith.constant 0 : i32
    %c0_i32_1 = arith.constant 0 : i32
    return %arg0, %arg1, %c0_i32, %c0_i32_0 : i32, i32, i32, i32
  }
  func.func @transform_1(%arg0: i32, %arg1: i32) -> (i32, i32, i32, i32) {
    %c16_i32 = arith.constant 16 : i32
    %0 = arith.muli %arg1, %c16_i32 : i32
    %c1_i32 = arith.constant 1 : i32
    %1 = arith.subi %0, %c1_i32 : i32
    %c0_i32 = arith.constant 0 : i32
    %2 = arith.maxsi %1, %c0_i32 : i32
    %c0_i32_0 = arith.constant 0 : i32
    %c0_i32_1 = arith.constant 0 : i32
    %c0_i32_2 = arith.constant 0 : i32
    return %arg0, %2, %c0_i32_0, %c0_i32_1 : i32, i32, i32, i32
  }
  func.func @transform_2(%arg0: i32, %arg1: i32) -> (i32, i32, i32, i32) {
    %c16_i32 = arith.constant 16 : i32
    %0 = arith.muli %arg1, %c16_i32 : i32
    %c16_i32_0 = arith.constant 16 : i32
    %1 = arith.addi %0, %c16_i32_0 : i32
    %c15_i32 = arith.constant 15 : i32
    %2 = arith.minsi %1, %c15_i32 : i32
    %c0_i32 = arith.constant 0 : i32
    %c0_i32_1 = arith.constant 0 : i32
    %c0_i32_2 = arith.constant 0 : i32
    return %arg0, %2, %c0_i32, %c0_i32_1 : i32, i32, i32, i32
  }
  func.func @transform_3(%arg0: i32, %arg1: i32) -> (i32, i32, i32) {
    %c0_i32 = arith.constant 0 : i32
    %c0_i32_0 = arith.constant 0 : i32
    %c0_i32_1 = arith.constant 0 : i32
    %c0_i32_2 = arith.constant 0 : i32
    return %c0_i32, %c0_i32_0, %c0_i32_1 : i32, i32, i32
  }
  func.func @transform_4(%arg0: i32, %arg1: i32) -> (i32, i32) {
    %c0_i32 = arith.constant 0 : i32
    %c0_i32_0 = arith.constant 0 : i32
    %c0_i32_1 = arith.constant 0 : i32
    return %c0_i32, %c0_i32_0 : i32, i32
  }
  func.func @transform_5(%arg0: i32, %arg1: i32) -> (i32, i32) {
    %c0_i32 = arith.constant 0 : i32
    %c0_i32_0 = arith.constant 0 : i32
    %c0_i32_1 = arith.constant 0 : i32
    return %c0_i32, %c0_i32_0 : i32, i32
  }
  func.func @transform_6(%arg0: i32, %arg1: i32) -> (i32, i32, i32, i32) {
    %c0_i32 = arith.constant 0 : i32
    %c0_i32_0 = arith.constant 0 : i32
    %c0_i32_1 = arith.constant 0 : i32
    return %arg0, %arg1, %c0_i32, %c0_i32_0 : i32, i32, i32, i32
  }
  func.func @transform_7(%arg0: i32, %arg1: i32) -> (i32, i32, i32, i32) {
    %c0_i32 = arith.constant 0 : i32
    %c0_i32_0 = arith.constant 0 : i32
    %c0_i32_1 = arith.constant 0 : i32
    return %arg0, %arg1, %c0_i32, %c0_i32_0 : i32, i32, i32, i32
  }
  func.func @transform_8(%arg0: i32, %arg1: i32) -> (i32, i32, i32, i32) {
    %c0_i32 = arith.constant 0 : i32
    %c0_i32_0 = arith.constant 0 : i32
    %c0_i32_1 = arith.constant 0 : i32
    return %arg0, %arg1, %c0_i32, %c0_i32_0 : i32, i32, i32, i32
  }
}

module attributes {stable_mosaic.version = 11 : i64} {
  func.func @_bn_relu_kernel(%arg0: i32, %arg1: i32, %arg2: memref<1x16x128xf32, #tpu.memory_space<vmem>>, %arg3: memref<1x128xf32, #tpu.memory_space<vmem>>, %arg4: memref<1x128xf32, #tpu.memory_space<vmem>>, %arg5: memref<1x16x128xf32, #tpu.memory_space<vmem>>) attributes {dimension_semantics = [#tpu.dimension_semantics<parallel>, #tpu.dimension_semantics<parallel>], iteration_bounds = array<i64: 2, 1>, scalar_prefetch = 0 : i64, scratch_operands = 0 : i64, tpu.core_type = #tpu.core_type<tc>, window_params = [{transform_indices = @transform_0, window_bounds = array<i64: 1, 16, 128>}, {pipeline_mode = #tpu.pipeline_mode<synchronous>, transform_indices = @transform_1, window_bounds = array<i64: 1, 128>}, {pipeline_mode = #tpu.pipeline_mode<synchronous>, transform_indices = @transform_2, window_bounds = array<i64: 1, 128>}, {transform_indices = @transform_3, window_bounds = array<i64: 1, 16, 128>}]} {
    %c0 = arith.constant 0 : index
    %c0_0 = arith.constant 0 : index
    %c0_1 = arith.constant 0 : index
    %0 = vector.load %arg2[%c0, %c0_0, %c0_1] : memref<1x16x128xf32, #tpu.memory_space<vmem>>, vector<1x16x128xf32>
    %c0_2 = arith.constant 0 : index
    %c0_3 = arith.constant 0 : index
    %1 = vector.load %arg3[%c0_2, %c0_3] : memref<1x128xf32, #tpu.memory_space<vmem>>, vector<1x128xf32>
    %2 = vector.shape_cast %1 : vector<1x128xf32> to vector<128xf32>
    %3 = vector.shape_cast %2 : vector<128xf32> to vector<1x1x128xf32>
    %4 = vector.broadcast %3 : vector<1x1x128xf32> to vector<1x16x128xf32>
    %5 = arith.mulf %0, %4 : vector<1x16x128xf32>
    %c0_4 = arith.constant 0 : index
    %c0_5 = arith.constant 0 : index
    %6 = vector.load %arg4[%c0_4, %c0_5] : memref<1x128xf32, #tpu.memory_space<vmem>>, vector<1x128xf32>
    %7 = vector.shape_cast %6 : vector<1x128xf32> to vector<128xf32>
    %8 = vector.shape_cast %7 : vector<128xf32> to vector<1x1x128xf32>
    %9 = vector.broadcast %8 : vector<1x1x128xf32> to vector<1x16x128xf32>
    %10 = arith.addf %5, %9 : vector<1x16x128xf32>
    %cst = arith.constant 0.000000e+00 : f32
    %11 = vector.broadcast %cst : f32 to vector<1x16x128xf32>
    %12 = arith.maximumf %10, %11 : vector<1x16x128xf32>
    %c0_6 = arith.constant 0 : index
    %c0_7 = arith.constant 0 : index
    %c0_8 = arith.constant 0 : index
    %13 = vector.load %arg5[%c0_6, %c0_7, %c0_8] : memref<1x16x128xf32, #tpu.memory_space<vmem>>, vector<1x16x128xf32>
    tpu.vector_store %arg5[%c0_6, %c0_7, %c0_8], %12 {strides = array<i32>} : memref<1x16x128xf32, #tpu.memory_space<vmem>>, vector<1x16x128xf32>,
    return
  }
  func.func @transform_0(%arg0: i32, %arg1: i32) -> (i32, i32, i32) {
    %c0_i32 = arith.constant 0 : i32
    %c0_i32_0 = arith.constant 0 : i32
    return %arg0, %arg1, %c0_i32 : i32, i32, i32
  }
  func.func @transform_1(%arg0: i32, %arg1: i32) -> (i32, i32) {
    %c0_i32 = arith.constant 0 : i32
    %c0_i32_0 = arith.constant 0 : i32
    %c0_i32_1 = arith.constant 0 : i32
    return %c0_i32, %c0_i32_0 : i32, i32
  }
  func.func @transform_2(%arg0: i32, %arg1: i32) -> (i32, i32) {
    %c0_i32 = arith.constant 0 : i32
    %c0_i32_0 = arith.constant 0 : i32
    %c0_i32_1 = arith.constant 0 : i32
    return %c0_i32, %c0_i32_0 : i32, i32
  }
  func.func @transform_3(%arg0: i32, %arg1: i32) -> (i32, i32, i32) {
    %c0_i32 = arith.constant 0 : i32
    %c0_i32_0 = arith.constant 0 : i32
    return %arg0, %arg1, %c0_i32 : i32, i32, i32
  }
}

</mosaic_0001>

<bundles_post_ra>
// kernel: tile.18
= control target key start
LH: loop header
LB: loop body
LE: loop exit
PB: predicated region body
PF: predicated region fallthrough
CT: control target
= control target key end

     0   :  { %s28_s0 = inlined_call_operand.vmem [shape: f32[8], index: 0, kind: input, shape index: {}]   ;;  %s29_s1 = inlined_call_operand.vmem [shape: f32[16,8], index: 1, kind: output, shape index: {}]  }
   0x1   :  { %v4_v0 = vld [vmem:[%s28_s0] ss:$0 sm:$0xff] }
   0x2   :  { %5 = vst [vmem:[%s29_s1] sm:$0xff] %v4_v0 }
   0x3   :  { %8 = vst [vmem:[%s29_s1 + $0x8] sm:$0xff] %v4_v0 }

// kernel: tile.19
= control target key start
LH: loop header
LB: loop body
LE: loop exit
PB: predicated region body
PF: predicated region fallthrough
CT: control target
= control target key end

     0   :  { %s131_s10 = smov 120   ;;  %s132_s11 = smov 104   ;;  %vm3_vm0 = vcmask 64512   ;;  %vm9_vm1 = vcmask 1048512   ;;  %vm15_vm2 = vcmask 982912   ;;  %vm21_vm3 = vcmask 917312   ;;  %s207_s0 = inlined_call_operand.vmem [shape: f32[16,8], index: 0, kind: input, shape index: {}]   ;;  %s208_s1 = inlined_call_operand.vmem [shape: f32[1,128], index: 1, kind: output, shape index: {}]  }
   0x1   :  { %v101_v0 = vld [vmem:[%s207_s0 + $0xf] sm:$0x1]   ;;  %v103_v1 = vld [vmem:[%s207_s0 + $0xd] sm:$0x1]   ;;  %v105_v2 = vld [vmem:[%s207_s0 + $0xb] sm:$0x1]  }
   0x2   :  { %7 = vrot.lane.b32.xlu0 %v101_v0, %s131_s10  ;;  %19 = vrot.lane.b32.xlu1 %v103_v1, %s132_s11  ;;  %s133_s14 = smov 88   ;;  %v102_v3 = vld [vmem:[%s207_s0 + $0xe] sm:$0x1]   ;;  %v104_v4 = vld [vmem:[%s207_s0 + $0xc] sm:$0x1]   ;;  %s134_s19 = smov 112  }
   0x3   :  { %31 = vrot.lane.b32.xlu2 %v105_v2, %s133_s14  ;;  %s135_s20 = smov 96   ;;  %v106_v5 = vld [vmem:[%s207_s0 + $0xa] sm:$0x1]   ;;  %s136_s23 = smov 80   ;;  %v107_v6 = vld [vmem:[%s207_s0 + $0x9] sm:$0x1]  }
   0x4   :  { %v108_v7 = vld [vmem:[%s207_s0 + $0x8] sm:$0x1]   ;;  %s137_s28 = smov 72   ;;  %s138_s29 = smov 64   ;;  %v109_v8 = vld [vmem:[%s207_s0 + $0x7] sm:$0x1]  }
   0x5   :  { %s139_s3 = smov 56   ;;  %v110_v9 = vld [vmem:[%s207_s0 + $0x6] sm:$0x1]   ;;  %v111_v10 = vld [vmem:[%s207_s0 + $0x5] sm:$0x1]   ;;  %s140_s8 = smov 48  }
   0x6   :  { %s141_s9 = smov 40   ;;  %v112_v11 = vld [vmem:[%s207_s0 + $0x4] sm:$0x1]   ;;  %s142_s12 = smov 32   ;;  %v113_v12 = vld [vmem:[%s207_s0 + $0x3] sm:$0x1]  }
   0x7   :  { %v114_v13 = vld [vmem:[%s207_s0 + $0x2] sm:$0x1]   ;;  %s143_s17 = smov 24   ;;  %s144_s18 = smov 16   ;;  %v115_v14 = vld [vmem:[%s207_s0 + $0x1] sm:$0x1]  }
   0x8   :  { %s145_s21 = smov 8   ;;  %v2_v15 = vld [vmem:[%s207_s0] sm:$0x1]   ;;  %vm27_vm4 = vcmask 851712   ;;  %vm33_vm5 = vcmask 786112   ;;  %vm39_vm6 = vcmask 720512  }
   0x9   :  { %4 = vst.msk [vmem:[#allocation0] sm:$0x1] %vm3_vm0, %v2_v15   ;;  %vm45_vm7 = vcmask 654912   ;;  %vm51_vm8 = vcmask 589312   ;;  %vm57_vm9 = vcmask 523712   ;;  %vm63_vm10 = vcmask 458112  }
   0xa   :  { %13 = vrot.lane.b32.xlu0 %v102_v3, %s134_s19  ;;  %25 = vrot.lane.b32.xlu1 %v104_v4, %s135_s20  ;;  %vm69_vm11 = vcmask 392512   ;;  %vm75_vm12 = vcmask 326912   ;;  %vm81_vm13 = vcmask 261312   ;;  %vm87_vm14 = vcmask 195712  }
   0xb   :  { %37 = vrot.lane.b32.xlu2 %v106_v5, %s136_s23  ;;  %vm93_vm15 = vcmask 130112  }
  0x12   :  { %43 = vrot.lane.b32.xlu0 %v107_v6, %s137_s28  ;;  %49 = vrot.lane.b32.xlu1 %v108_v7, %s138_s29 }
  0x13   :  { %55 = vrot.lane.b32.xlu2 %v109_v8, %s139_s3 }
  0x1a   :  { %61 = vrot.lane.b32.xlu0 %v110_v9, %s140_s8  ;;  %67 = vrot.lane.b32.xlu1 %v111_v10, %s141_s9 }
  0x1b   :  { %73 = vrot.lane.b32.xlu2 %v112_v11, %s142_s12 }
  0x22   :  { %79 = vrot.lane.b32.xlu0 %v113_v12, %s143_s17  ;;  %85 = vrot.lane.b32.xlu1 %v114_v13, %s144_s18 }
  0x23   :  { %91 = vrot.lane.b32.xlu2 %v115_v14, %s145_s21 }
  0x5d   :  { %v32_v16 = vpop.permute.xlu2 %31  }
  0x65   :  { %v38_v17 = vpop.permute.xlu2 %37  }
  0x6d   :  { %v56_v18 = vpop.permute.xlu2 %55  }
  0x74   :  { %v8_v19 = vpop.permute.xlu0 %7   ;;  %v20_v20 = vpop.permute.xlu1 %19  }
  0x75   :  { %10 = vst.msk [vmem:[#allocation0] sm:$0x1] %vm9_vm1, %v8_v19   ;;  %v74_v21 = vpop.permute.xlu2 %73  }
  0x7c   :  { %v14_v22 = vpop.permute.xlu0 %13   ;;  %v26_v23 = vpop.permute.xlu1 %25  }
  0x7d   :  { %16 = vst.msk [vmem:[#allocation0] sm:$0x1] %vm15_vm2, %v14_v22   ;;  %v92_v24 = vpop.permute.xlu2 %91  }
  0x7e   :  { %22 = vst.msk [vmem:[#allocation0] sm:$0x1] %vm21_vm3, %v20_v20  }
  0x7f   :  { %28 = vst.msk [vmem:[#allocation0] sm:$0x1] %vm27_vm4, %v26_v23  }
  0x80   :  { %34 = vst.msk [vmem:[#allocation0] sm:$0x1] %vm33_vm5, %v32_v16  }
  0x81   :  { %40 = vst.msk [vmem:[#allocation0] sm:$0x1] %vm39_vm6, %v38_v17  }
  0x84   :  { %v44_v25 = vpop.permute.xlu0 %43   ;;  %v50_v26 = vpop.permute.xlu1 %49  }
  0x85   :  { %46 = vst.msk [vmem:[#allocation0] sm:$0x1] %vm45_vm7, %v44_v25  }
  0x86   :  { %52 = vst.msk [vmem:[#allocation0] sm:$0x1] %vm51_vm8, %v50_v26  }
  0x87   :  { %58 = vst.msk [vmem:[#allocation0] sm:$0x1] %vm57_vm9, %v56_v18  }
  0x8c   :  { %v62_v27 = vpop.permute.xlu0 %61   ;;  %v68_v28 = vpop.permute.xlu1 %67  }
  0x8d   :  { %64 = vst.msk [vmem:[#allocation0] sm:$0x1] %vm63_vm10, %v62_v27  }
  0x8e   :  { %70 = vst.msk [vmem:[#allocation0] sm:$0x1] %vm69_vm11, %v68_v28  }
  0x8f   :  { %76 = vst.msk [vmem:[#allocation0] sm:$0x1] %vm75_vm12, %v74_v21  }
  0x94   :  { %v80_v29 = vpop.permute.xlu0 %79   ;;  %v86_v30 = vpop.permute.xlu1 %85  }
  0x95   :  { %82 = vst.msk [vmem:[#allocation0] sm:$0x1] %vm81_vm13, %v80_v29  }
  0x96   :  { %88 = vst.msk [vmem:[#allocation0] sm:$0x1] %vm87_vm14, %v86_v30  }
  0x97   :  { %94 = vst.msk [vmem:[#allocation0] sm:$0x1] %vm93_vm15, %v92_v24  }
  0x9e   :  { %v97_v31 = vld [vmem:[#allocation0] sm:$0x1] }
  0x9f   :  { %100 = vst [vmem:[%s208_s1] sm:$0x1] %v97_v31 }

// kernel: unet_conv2_forward.5
= control target key start
LH: loop header
LB: loop body
LE: loop exit
PB: predicated region body
PF: predicated region fallthrough
CT: control target
= control target key end

     0   :  { %s398_s12 = smov 0   ;;  %s400_s13 = smov 0   ;;  %s430_s0 = inlined_call_operand.vmem [shape: f32[2,16,128], index: 0, kind: input, shape index: {}, may-alias: {0,3}]   ;;  %s431_s1 = inlined_call_operand.vmem [shape: f32[1,128], index: 1, kind: input, shape index: {}]   ;;  %s432_s2 = inlined_call_operand.vmem [shape: f32[1,128], index: 2, kind: input, shape index: {}]   ;;  %s433_s3 = inlined_call_operand.vmem [shape: f32[2,16,128], index: 3, kind: output, shape index: {}, may-alias: {0,3}]  }
   0x1   :  { %s402_s14 = smov 0  }
   0x2 LB: > { %s25_s15 = sadd.s32 1, %s372_s13  ;;  %p319_p0 = scmp.ge.s32.totalorder %s376_s14, 1  ;;  %s376_s14 = sphi %s402_s14, %s13_s14   ;;  %s372_s13 = sphi %s400_s13, %s435_s13   ;;  %s368_s12 = sphi %s398_s12, %s434_s12  }
   0x3   : > { %p27_p1 = scmp.ge.s32.totalorder %s25_s15, 2  ;;  %p158_p2 = scmp.lt.s32.totalorder %s376_s14, 3 }
   0x5   : > { %s437_s15 = smov (%p27_p1, %s25_s15), 0  ;;  %p159_p3 = pnand %p319_p0, %p158_p2 }
   0x6   : > { %p191_p4 = scmp.lt.s32.totalorder (!%p159_p3), %s368_s12, 1 }
   0x7   : > { %162 = sbr.rel (%p159_p3) target bundleno = 24 (0x18), region = 32 }
   0xc   : > { %s439_s12 = smov (!%p191_p4, %s368_s12), 1  ;;  %v352_v0 = vld [vmem:[%s431_s1] ss:$0 sm:$0xff] }
   0xd   : > { %s326_s18 = sshll.u32 %s439_s12, 4  ;;  %v353_v1 = vld [vmem:[%s432_s2] ss:$0 sm:$0xff] }
   0xe   : > { %s198_s21 = scalar_lea.vmem %s430_s0, %s326_s18  ;;  %s208_s26 = scalar_lea.vmem %s433_s3, %s326_s18 }
   0xf   : > { %v210_v2 = vld [vmem:[%s198_s21] sm:$0xff]  ;;  %v211_v3 = vld [vmem:[%s198_s21 + $0x8] sm:$0xff] }
  0x10   : > { %v216_v4 = vmul.f32 %v352_v0, %v210_v2  ;;  %v217_v5 = vmul.f32 %v352_v0, %v211_v3 }
  0x12   : > { %v222_v6 = vadd.f32 %v353_v1, %v216_v4  ;;  %v223_v7 = vadd.f32 %v353_v1, %v217_v5 }
  0x14   : > { %v224_v8 = vmax.f32 %v222_v6, 0.0  ;;  %v225_v9 = vmax.f32 %v223_v7, 0.0 }
  0x16   : > { %226 = vst [vmem:[%s208_s26] sm:$0xff] %v224_v8 }
  0x17   : > { %227 = vst [vmem:[%s208_s26 + $0x8] sm:$0xff] %v225_v9 }
  0x18 PF: > { %s13_s14 = sadd.s32 1, %s376_s14   ;;  %s434_s12 = smov %s372_s13 }
  0x19   : > { %p10_p5 = scmp.ge.s32.totalorder %s13_s14, 4   ;;  %s435_s13 = smov %s437_s15 }
  0x1b   :  { %12 = sbr.rel (!%p10_p5) target bundleno = 2 (0x2), region = 62 }

// kernel: unet_conv2_forward.3
= control target key start
LH: loop header
LB: loop body
LE: loop exit
PB: predicated region body
PF: predicated region fallthrough
CT: control target
= control target key end

     0   :  { %s3232_s21 = smov 0   ;;  %s3234_s22 = smov 0   ;;  %s4727_s0 = inlined_call_operand.vmem [shape: f32[2,16,16,4], index: 0, kind: input, shape index: {}, may-alias: {0,1,2}]   ;;  %s4728_s1 = inlined_call_operand.vmem [shape: f32[2,16,16,4], index: 1, kind: input, shape index: {}, may-alias: {0,1,2}]   ;;  %s4729_s2 = inlined_call_operand.vmem [shape: f32[2,16,16,4], index: 2, kind: input, shape index: {}, may-alias: {0,1,2}]   ;;  %s4730_s3 = inlined_call_operand.vmem [shape: f32[9,4,8], index: 3, kind: input, shape index: {}]   ;;  %s4731_s4 = inlined_call_operand.vmem [shape: f32[2,16,16,8], index: 4, kind: output, shape index: {0}]   ;;  %s4732_s5 = inlined_call_operand.vmem [shape: f32[2,1,1,8], index: 5, kind: output, shape index: {1}]   ;;  %s4733_s6 = inlined_call_operand.vmem [shape: f32[2,1,1,8], index: 6, kind: output, shape index: {2}]  }
   0x1   :  { %s3236_s1 = smov 0  }
   0x2 LB: > { %s29_s2 = sadd.s32 1, %s3190_s22  ;;  %p2799_p0 = scmp.ge.s32.totalorder %s3194_s1, 1  ;;  %s3194_s1 = sphi %s3236_s1, %s17_s1   ;;  %s3190_s22 = sphi %s3234_s22, %s4943_s22   ;;  %s3186_s21 = sphi %s3232_s21, %s4942_s21  }
   0x3   : > { %p31_p1 = scmp.ge.s32.totalorder %s29_s2, 2  ;;  %p307_p2 = scmp.lt.s32.totalorder %s3194_s1, 3 }
   0x5   : > { %s4945_s2 = smov (%p31_p1, %s29_s2), 0  ;;  %p308_p3 = pnand %p2799_p0, %p307_p2 }
   0x7   : > { %311 = sbr.rel (%p308_p3) target bundleno = 792 (0x318), region = 36 }
   0xc   : > { %v2808_v0 = vld [vmem:[%s4730_s3 + $0x4] sm:$0xf]  ;;  %vm839_vm0 = vcmask 1043456   ;;  %p386_p4 = scmp.lt.s32.totalorder %s3186_s21, 1  ;;  %vm453_vm1 = vcmask 24576   ;;  %v3196_v1 = vmov 0.0  }
   0xd   : > { %3120 = vmatpush.msk.msra.mxu1 %vm839_vm0, %v2808_v0  ;;  %3121 = vmatpush.msk.msra.mxu2 %vm839_vm0, %v2808_v0  ;;  %458 = vst.msk [vmem:[#allocation2 + $0x60] sm:$0x1] %vm453_vm1, %v3196_v1  ;;  %vm523_vm2 = vcmask 31744   ;;  %vm692_vm3 = vcmask 1046528   ;;  %v2875_v9 = vld [vmem:[%s4730_s3 + $0x8] sm:$0xf] }
   0xe   : > { %s4947_s21 = smov (!%p386_p4, %s3186_s21), 1  ;;  %454 = vst.msk [vmem:[#allocation2] sm:$0x1] %vm453_vm1, %v3196_v1  ;;  %3122 = vmatpush.msk.msra.mxu3 %vm839_vm0, %v2808_v0  ;;  %2809 = vmatpush.msk.msra.mxu0 %vm839_vm0, %v2808_v0  ;;  %v2909_v10 = vld [vmem:[%s4730_s3 + $0xc] sm:$0xf]  ;;  %vm570_vm4 = vcmask 25600  }
   0xf   : > { %455 = vst.msk [vmem:[#allocation2 + $0x18] sm:$0x1] %vm453_vm1, %v3196_v1  ;;  %s3115_s25 = sshll.u32 %s4947_s21, 8  ;;  %2876 = vmatpush.msk.msrb.mxu2 %vm839_vm0, %v2875_v9  ;;  %v643_v11 = vld [vmem:[%s4730_s3] sm:$0xf]  ;;  %vm1136_vm5 = vcmask 1045504   ;;  %s452_s7 = scalar_lea.vmem %s4733_s6, %s4947_s21 }
  0x10   : > { %456 = vst.msk [vmem:[#allocation2 + $0x30] sm:$0x1] %vm453_vm1, %v3196_v1  ;;  %s3273_s28 = scalar_lea.vmem %s4727_s0, %s3115_s25  ;;  %2910 = vmatpush.msk.msrb.mxu3 %vm839_vm0, %v2909_v10  ;;  %2842 = vmatpush.msk.msrb.mxu1 %vm839_vm0, %v643_v11  ;;  %v2943_v14 = vld [vmem:[%s4730_s3 + $0x10] sm:$0xf]  ;;  %s4446_s26 = scalar_lea.vmem %s4731_s4, %s3115_s25  ;;  %vm2381_vm6 = vcmask 64512   ;;  %vm2483_vm7 = vcmask 57344  }
  0x11   : > { %457 = vst.msk [vmem:[#allocation2 + $0x48] sm:$0x1] %vm453_vm1, %v3196_v1  ;;  %v496_v2 = vld [vmem:[%s3273_s28 + $0x30] sm:$0xff]  ;;  %v497_v3 = vld [vmem:[%s3273_s28 + $0x38] sm:$0xff]  ;;  %2944 = vmatpush.msk.msrb.mxu0 %vm839_vm0, %v2943_v14  ;;  %v498_v20 = vld [vmem:[%s3273_s28 + $0x40] sm:$0xff] }
  0x12   : > { %459 = vst.msk [vmem:[#allocation2 + $0x78] sm:$0x1] %vm453_vm1, %v3196_v1  ;;  %v504_v16 = vld [vmem:[%s3273_s28 + $0x70] sm:$0xff]  ;;  %v505_v17 = vld [vmem:[%s3273_s28 + $0x78] sm:$0xff]  ;;  %v499_v21 = vld [vmem:[%s3273_s28 + $0x48] sm:$0xff] }
  0x13   : > { %530 = vst.msk [vmem:[#allocation2 + $0x61] sm:$0xff] %vm523_vm2, %v496_v2  ;;  %v512_v18 = vld [vmem:[%s3273_s28 + $0xb0] sm:$0xff]  ;;  %v513_v19 = vld [vmem:[%s3273_s28 + $0xb8] sm:$0xff]  ;;  %v506_v23 = vld [vmem:[%s3273_s28 + $0x80] sm:$0xff] }
  0x14   : > { %531 = vst.msk [vmem:[#allocation2 + $0x69] sm:$0xff] %vm523_vm2, %v497_v3  ;;  %v507_v24 = vld [vmem:[%s3273_s28 + $0x88] sm:$0xff]  ;;  %v514_v31 = vld [vmem:[%s3273_s28 + $0xc0] sm:$0xff]  ;;  %v500_v45 = vld [vmem:[%s3273_s28 + $0x50] sm:$0xff] }
  0x15   : > { %460 = vst.msk [vmem:[#allocation2 + $0x90] sm:$0x1] %vm453_vm1, %v3196_v1  ;;  %v515_v34 = vld [vmem:[%s3273_s28 + $0xc8] sm:$0xff]  ;;  %v490_v37 = vld [vmem:[%s3273_s28] sm:$0xff]  ;;  %v501_v49 = vld [vmem:[%s3273_s28 + $0x58] sm:$0xff] }
  0x16   : > { %461 = vst.msk [vmem:[#allocation2 + $0xa8] sm:$0x1] %vm453_vm1, %v3196_v1  ;;  %v491_v41 = vld [vmem:[%s3273_s28 + $0x8] sm:$0xff]  ;;  %v508_v52 = vld [vmem:[%s3273_s28 + $0x90] sm:$0xff]  ;;  %v509_v54 = vld [vmem:[%s3273_s28 + $0x98] sm:$0xff] }
  0x17   : > { %462 = vst.msk [vmem:[#allocation2 + $0xc0] sm:$0x1] %vm453_vm1, %v3196_v1  ;;  %v516_v59 = vld [vmem:[%s3273_s28 + $0xd0] sm:$0xff]  ;;  %v517_v63 = vld [vmem:[%s3273_s28 + $0xd8] sm:$0xff]  ;;  %v502_v11 = vld [vmem:[%s3273_s28 + $0x60] sm:$0xff] }
  0x18   : > { %463 = vst.msk [vmem:[#allocation2 + $0xd8] sm:$0x1] %vm453_vm1, %v3196_v1  ;;  %v493_v3 = vld [vmem:[%s3273_s28 + $0x18] sm:$0xff] }
  0x19   : > { %464 = vst.msk [vmem:[#allocation2 + $0xf0] sm:$0x1] %vm453_vm1, %v3196_v1 }
  0x1a   : > { %v3293_v4 = vld [vmem:[#allocation2 + $0x60] sm:$0xff]  ;;  %465 = vst.msk [vmem:[#allocation2 + $0x108] sm:$0x1] %vm453_vm1, %v3196_v1 }
  0x1b   : > { %v3297_v5 = vld [vmem:[#allocation2 + $0x68] sm:$0xff]  ;;  %v713_v6 = vrot.slane %v3293_v4, 1  ;;  %466 = vst.msk [vmem:[#allocation2 + $0x120] sm:$0x1] %vm453_vm1, %v3196_v1 }
  0x1c   : > { %v714_v7 = vrot.slane %v3297_v5, 1  ;;  %467 = vst.msk [vmem:[#allocation2 + $0x138] sm:$0x1] %vm453_vm1, %v3196_v1 }
  0x1d   : > { %468 = vst.msk [vmem:[#allocation2 + $0x150] sm:$0x1] %vm453_vm1, %v3196_v1 }
  0x1e   : > { %v3308_v8 = vsel %vm692_vm3, %v713_v6, %v714_v7  ;;  %469 = vst.msk [vmem:[#allocation2 + $0x168] sm:$0x1] %vm453_vm1, %v3196_v1 }
  0x1f   : > { %2818 = vmatmul.msk.f32.vlgmr.msra.gmra.mxu1 %vm523_vm2, %v3308_v8  ;;  %470 = vst.msk [vmem:[#allocation2 + $0x180] sm:$0x1] %vm453_vm1, %v3196_v1 }
  0x20   : > { %471 = vst.msk [vmem:[#allocation2 + $0x198] sm:$0x1] %vm453_vm1, %v3196_v1 }
  0x21   : > { %472 = vst.msk [vmem:[#allocation2 + $0x11] sm:$0x1] %vm453_vm1, %v3196_v1 }
  0x22   : > { %473 = vst.msk [vmem:[#allocation2 + $0x29] sm:$0x1] %vm453_vm1, %v3196_v1 }
  0x23   : > { %474 = vst.msk [vmem:[#allocation2 + $0x41] sm:$0x1] %vm453_vm1, %v3196_v1 }
  0x24   : > { %475 = vst.msk [vmem:[#allocation2 + $0x59] sm:$0x1] %vm453_vm1, %v3196_v1 }
  0x25   : > { %476 = vst.msk [vmem:[#allocation2 + $0x71] sm:$0x1] %vm453_vm1, %v3196_v1 }
  0x26   : > { %477 = vst.msk [vmem:[#allocation2 + $0x89] sm:$0x1] %vm453_vm1, %v3196_v1 }
  0x27   : > { %478 = vst.msk [vmem:[#allocation2 + $0xa1] sm:$0x1] %vm453_vm1, %v3196_v1 }
  0x28   : > { %479 = vst.msk [vmem:[#allocation2 + $0xb9] sm:$0x1] %vm453_vm1, %v3196_v1 }
  0x29   : > { %480 = vst.msk [vmem:[#allocation2 + $0xd1] sm:$0x1] %vm453_vm1, %v3196_v1 }
  0x2a   : > { %481 = vst.msk [vmem:[#allocation2 + $0xe9] sm:$0x1] %vm453_vm1, %v3196_v1 }
  0x2b   : > { %482 = vst.msk [vmem:[#allocation2 + $0x101] sm:$0x1] %vm453_vm1, %v3196_v1 }
  0x2c   : > { %483 = vst.msk [vmem:[#allocation2 + $0x119] sm:$0x1] %vm453_vm1, %v3196_v1  ;;  %v3354_v12 = vld [vmem:[#allocation2 + $0x70] sm:$0x3] }
  0x2d   : > { %484 = vst.msk [vmem:[#allocation2 + $0x131] sm:$0x1] %vm453_vm1, %v3196_v1  ;;  %v716_v13 = vrot.slane %v3354_v12, 1 }
  0x2e   : > { %485 = vst.msk [vmem:[#allocation2 + $0x149] sm:$0x1] %vm453_vm1, %v3196_v1 }
  0x2f   : > { %486 = vst.msk [vmem:[#allocation2 + $0x161] sm:$0x1] %vm453_vm1, %v3196_v1  ;;  %v3368_v15 = vsel %vm692_vm3, %v714_v7, %v716_v13  ;;  %v503_v13 = vld [vmem:[%s3273_s28 + $0x68] sm:$0xff] }
  0x30   : > { %4806 = vst [vmem:[#allocation3_spill] sm:$0xff] %v3368_v15  ;;  %2819 = vmatmul.msk.f32.gmra.mxu1 %vm523_vm2, %v3368_v15 }
  0x31   : > { %487 = vst.msk [vmem:[#allocation2 + $0x179] sm:$0x1] %vm453_vm1, %v3196_v1 }
  0x32   : > { %488 = vst.msk [vmem:[#allocation2 + $0x191] sm:$0x1] %vm453_vm1, %v3196_v1 }
  0x33   : > { %489 = vst.msk [vmem:[#allocation2 + $0x1a9] sm:$0x1] %vm453_vm1, %v3196_v1 }
  0x34   : > { %569 = vst.msk [vmem:[#allocation2 + $0x8] sm:$0xff] %vm523_vm2, %v3196_v1 }
  0x35   : > { %586 = vst.msk [vmem:[#allocation2 + $0x1a0] sm:$0xff] %vm523_vm2, %v3196_v1 }
  0x36   : > { %538 = vst.msk [vmem:[#allocation2 + $0xc1] sm:$0xff] %vm523_vm2, %v504_v16 }
  0x37   : > { %539 = vst.msk [vmem:[#allocation2 + $0xc9] sm:$0xff] %vm523_vm2, %v505_v17 }
  0x38   : > { %568 = vst.msk [vmem:[#allocation2] sm:$0xff] %vm523_vm2, %v3196_v1 }
  0x39   : > { %585 = vst.msk [vmem:[#allocation2 + $0x198] sm:$0xff] %vm523_vm2, %v3196_v1 }
  0x3a   : > { %546 = vst.msk [vmem:[#allocation2 + $0x121] sm:$0xff] %vm523_vm2, %v512_v18 }
  0x3b   : > { %547 = vst.msk [vmem:[#allocation2 + $0x129] sm:$0xff] %vm523_vm2, %v513_v19  ;;  %v3396_v22 = vld [vmem:[#allocation2 + $0x8] sm:$0xff] }
  0x3c   : > { %532 = vst.msk [vmem:[#allocation2 + $0x79] sm:$0xff] %vm523_vm2, %v498_v20  ;;  %v694_v28 = vrot.slane %v3396_v22, 1 }
  0x3d   : > { %v3401_v25 = vld [vmem:[#allocation2 + $0xc0] sm:$0xff]  ;;  %533 = vst.msk [vmem:[#allocation2 + $0x81] sm:$0xff] %vm523_vm2, %v499_v21 }
  0x3e   : > { %v3404_v26 = vld [vmem:[#allocation2 + $0xc8] sm:$0xff]  ;;  %v733_v27 = vrot.slane %v3401_v25, 1  ;;  %540 = vst.msk [vmem:[#allocation2 + $0xd9] sm:$0xff] %vm523_vm2, %v506_v23  ;;  %v3414_v32 = vld [vmem:[#allocation2 + $0xd0] sm:$0x3]  ;;  %v510_v21 = vld [vmem:[%s3273_s28 + $0xa0] sm:$0xff] }
  0x3f   : > { %v734_v29 = vrot.slane %v3404_v26, 1  ;;  %v3410_v30 = vld [vmem:[#allocation2] sm:$0xff]  ;;  %541 = vst.msk [vmem:[#allocation2 + $0xe1] sm:$0xff] %vm523_vm2, %v507_v24  ;;  %v736_v43 = vrot.slane %v3414_v32, 1 }
  0x40   : > { %v693_v33 = vrot.slane %v3410_v30, 1  ;;  %571 = vst.msk [vmem:[#allocation2 + $0x10] sm:$0x3] %vm570_vm4, %v3196_v1 }
  0x41   : > { %v3420_v35 = vsel %vm692_vm3, %v733_v27, %v734_v29  ;;  %v3422_v36 = vld [vmem:[#allocation2 + $0x120] sm:$0xff]  ;;  %588 = vst.msk [vmem:[#allocation2 + $0x1a8] sm:$0x3] %vm570_vm4, %v3196_v1  ;;  %v3461_v55 = vsel %vm692_vm3, %v734_v29, %v736_v43  ;;  %v492_v1 = vld [vmem:[%s3273_s28 + $0x10] sm:$0xff]  ;;  %v511_v27 = vld [vmem:[%s3273_s28 + $0xa8] sm:$0xff] }
  0x42   : > { %4807 = vst [vmem:[#allocation4_spill] sm:$0xff] %v3420_v35  ;;  %2826 = vmatmul.msk.f32.vlgmr.msra.gmra.mxu2 %vm523_vm2, %v3420_v35  ;;  %v3428_v38 = vld [vmem:[#allocation2 + $0x128] sm:$0xff]  ;;  %v753_v39 = vrot.slane %v3422_v36, 1  ;;  %v695_v40 = vsel %vm692_vm3, %v693_v33, %v694_v28  ;;  %v3441_v46 = vld [vmem:[#allocation2 + $0x130] sm:$0x3]  ;;  %v518_v33 = vld [vmem:[%s3273_s28 + $0xe0] sm:$0xff] }
  0x43   : > { %4808 = vst [vmem:[#allocation5_spill] sm:$0xff] %v3422_v36  ;;  %v754_v42 = vrot.slane %v3428_v38, 1  ;;  %2810 = vmatmul.msk.f32.vlgmr.msra.gmra.mxu0 %vm523_vm2, %v695_v40  ;;  %v3437_v44 = vld [vmem:[#allocation2 + $0x78] sm:$0xff]  ;;  %v756_v56 = vrot.slane %v3441_v46, 1  ;;  %v494_v43 = vld [vmem:[%s3273_s28 + $0x20] sm:$0xff] }
  0x44   : > { %4809 = vst [vmem:[#allocation6_spill] sm:$0xff] %v3428_v38  ;;  %v3443_v47 = vld [vmem:[#allocation2 + $0x80] sm:$0xff]  ;;  %v718_v48 = vrot.slane %v3437_v44, 1  ;;  %v3456_v53 = vld [vmem:[#allocation2 + $0x88] sm:$0x3] }
  0x45   : > { %548 = vst.msk [vmem:[#allocation2 + $0x139] sm:$0xff] %vm523_vm2, %v514_v31  ;;  %v3449_v50 = vsel %vm692_vm3, %v753_v39, %v754_v42  ;;  %v719_v51 = vrot.slane %v3443_v47, 1  ;;  %v3473_v60 = vld [vmem:[#allocation2 + $0xd8] sm:$0xff]  ;;  %v721_v0 = vrot.slane %v3456_v53, 1  ;;  %v3489_v6 = vsel %vm692_vm3, %v754_v42, %v756_v56  ;;  %v519_v39 = vld [vmem:[%s3273_s28 + $0xe8] sm:$0xff] }
  0x46   : > { %549 = vst.msk [vmem:[#allocation2 + $0x141] sm:$0xff] %vm523_vm2, %v515_v34  ;;  %2834 = vmatmul.msk.f32.vlgmr.msra.gmra.mxu3 %vm523_vm2, %v3449_v50  ;;  %v3475_v61 = vld [vmem:[#allocation2 + $0xe0] sm:$0xff]  ;;  %v738_v7 = vrot.slane %v3473_v60, 1  ;;  %v3530_v34 = vld [vmem:[#allocation2 + $0xe8] sm:$0x3] }
  0x47   : > { %4810 = vst [vmem:[#allocation7_spill] sm:$0xff] %v3441_v46  ;;  %v3465_v57 = vsel %vm692_vm3, %v718_v48, %v719_v51  ;;  %v3467_v58 = vld [vmem:[#allocation2 + $0x10] sm:$0x3]  ;;  %v739_v9 = vrot.slane %v3475_v61, 1  ;;  %v3508_v19 = vsel %vm692_vm3, %v719_v51, %v721_v0  ;;  %v741_v48 = vrot.slane %v3530_v34, 1 }
  0x48   : > { %524 = vst.msk [vmem:[#allocation2 + $0x19] sm:$0xff] %vm523_vm2, %v490_v37  ;;  %2820 = vmatmul.msk.f32.gmra.mxu1 %vm523_vm2, %v3465_v57  ;;  %v696_v62 = vrot.slane %v3467_v58, 1 }
  0x49   : > { %4811 = vst [vmem:[#allocation8_spill] sm:$0xff] %v3449_v50 }
  0x4a   : > { %525 = vst.msk [vmem:[#allocation2 + $0x21] sm:$0xff] %vm523_vm2, %v491_v41  ;;  %2827 = vmatmul.msk.f32.gmra.mxu2 %vm523_vm2, %v3461_v55  ;;  %v697_v2 = vsel %vm692_vm3, %v694_v28, %v696_v62  ;;  %v3522_v28 = vsel %vm692_vm3, %v738_v7, %v739_v9 }
  0x4b   : > { %534 = vst.msk [vmem:[#allocation2 + $0x91] sm:$0xff] %vm523_vm2, %v500_v45  ;;  %2811 = vmatmul.msk.f32.gmra.mxu0 %vm523_vm2, %v697_v2 }
  0x4c   : > { %4812 = vst [vmem:[#allocation9_spill] sm:$0xff] %v3461_v55  ;;  %v3499_v14 = vld [vmem:[#allocation2 + $0x138] sm:$0xff] }
  0x4d   : > { %4813 = vst [vmem:[#allocation10_spill] sm:$0xff] %v3465_v57  ;;  %v3501_v16 = vld [vmem:[#allocation2 + $0x140] sm:$0xff]  ;;  %v758_v29 = vrot.slane %v3499_v14, 1  ;;  %v3554_v51 = vld [vmem:[#allocation2 + $0x148] sm:$0x3] }
  0x4e   : > { %535 = vst.msk [vmem:[#allocation2 + $0x99] sm:$0xff] %vm523_vm2, %v501_v49  ;;  %2835 = vmatmul.msk.f32.gmra.mxu3 %vm523_vm2, %v3489_v6  ;;  %v759_v31 = vrot.slane %v3501_v16, 1  ;;  %v495_v49 = vld [vmem:[%s3273_s28 + $0x28] sm:$0xff]  ;;  %v761_v62 = vrot.slane %v3554_v51, 1 }
  0x4f   : > { %542 = vst.msk [vmem:[#allocation2 + $0xf1] sm:$0xff] %vm523_vm2, %v508_v52  ;;  %v3494_v10 = vld [vmem:[#allocation2 + $0x18] sm:$0xff] }
  0x50   : > { %543 = vst.msk [vmem:[#allocation2 + $0xf9] sm:$0xff] %vm523_vm2, %v509_v54  ;;  %v698_v18 = vrot.slane %v3494_v10, 1  ;;  %2821 = vmatmul.msk.f32.gmra.mxu1 %vm523_vm2, %v3508_v19  ;;  %v3547_v45 = vsel %vm692_vm3, %v758_v29, %v759_v31 }
  0x51   : > { %550 = vst.msk [vmem:[#allocation2 + $0x151] sm:$0xff] %vm523_vm2, %v516_v59  ;;  %v3503_v17 = vld [vmem:[#allocation2 + $0x20] sm:$0xff]  ;;  %v3539_v42 = vld [vmem:[#allocation2 + $0x28] sm:$0x3]  ;;  %v3567_v59 = vsel %vm692_vm3, %v739_v9, %v741_v48  ;;  %v3587_v9 = vsel %vm692_vm3, %v759_v31, %v761_v62 }
  0x52   : > { %4814 = vst [vmem:[#allocation11_spill] sm:$0xff] %v3489_v6  ;;  %v699_v20 = vrot.slane %v3503_v17, 1  ;;  %v3515_v23 = vld [vmem:[#allocation2 + $0x90] sm:$0xff]  ;;  %2828 = vmatmul.msk.f32.gmra.mxu2 %vm523_vm2, %v3522_v28  ;;  %v701_v52 = vrot.slane %v3539_v42, 1 }
  0x53   : > { %551 = vst.msk [vmem:[#allocation2 + $0x159] sm:$0xff] %vm523_vm2, %v517_v63  ;;  %v723_v40 = vrot.slane %v3515_v23, 1 }
  0x54   : > { %4815 = vst [vmem:[#allocation12_spill] sm:$0xff] %v3499_v14  ;;  %v3533_v37 = vsel %vm692_vm3, %v698_v18, %v699_v20 }
  0x55   : > { %4816 = vst [vmem:[#allocation13_spill] sm:$0xff] %v3501_v16  ;;  %v3517_v24 = vld [vmem:[#allocation2 + $0x98] sm:$0xff]  ;;  %2812 = vmatmul.msk.f32.gmra.mxu0 %vm523_vm2, %v3533_v37  ;;  %v3564_v56 = vld [vmem:[#allocation2 + $0xa0] sm:$0x3] }
  0x56   : > { %526 = vst.msk [vmem:[#allocation2 + $0x31] sm:$0xff] %vm523_vm2, %v492_v1  ;;  %v724_v41 = vrot.slane %v3517_v24, 1  ;;  %2836 = vmatmul.msk.f32.gmra.mxu3 %vm523_vm2, %v3547_v45  ;;  %v3572_v63 = vld [vmem:[#allocation2 + $0xf0] sm:$0xff]  ;;  %v3577_v1 = vsel %vm692_vm3, %v699_v20, %v701_v52  ;;  %v726_v2 = vrot.slane %v3564_v56, 1 }
  0x57   : > { %4817 = vst [vmem:[#allocation14_spill] sm:$0xff] %v3508_v19  ;;  %v3574_v0 = vld [vmem:[#allocation2 + $0xf8] sm:$0xff]  ;;  %v3615_v48 = vld [vmem:[#allocation2 + $0x100] sm:$0x3] }
  0x58   : > { %527 = vst.msk [vmem:[#allocation2 + $0x39] sm:$0xff] %vm523_vm2, %v493_v3  ;;  %v3559_v54 = vsel %vm692_vm3, %v723_v40, %v724_v41  ;;  %v3593_v18 = vld [vmem:[#allocation2 + $0x150] sm:$0xff]  ;;  %v3600_v29 = vsel %vm692_vm3, %v724_v41, %v726_v2  ;;  %v3011_v2 = vld [vmem:[%s4730_s3 + $0x18] sm:$0xf] }
  0x59   : > { %536 = vst.msk [vmem:[#allocation2 + $0xa9] sm:$0xff] %vm523_vm2, %v502_v11  ;;  %2822 = vmatmul.msk.f32.gmra.mxu1 %vm523_vm2, %v3559_v54  ;;  %v743_v11 = vrot.slane %v3572_v63, 1  ;;  %v763_v40 = vrot.slane %v3593_v18, 1  ;;  %3012 = vmatpush.msk.msra.mxu2 %vm839_vm0, %v3011_v2  ;;  %v2977_v2 = vld [vmem:[%s4730_s3 + $0x14] sm:$0xf] }
  0x5a   : > { %4818 = vst [vmem:[#allocation15_spill] sm:$0xff] %v3522_v28  ;;  %2829 = vmatmul.msk.f32.gmra.mxu2 %vm523_vm2, %v3567_v59  ;;  %v3595_v20 = vld [vmem:[#allocation2 + $0x158] sm:$0xff]  ;;  %2978 = vmatpush.msk.msra.mxu1 %vm839_vm0, %v2977_v2 }
  0x5b   : > { %537 = vst.msk [vmem:[#allocation2 + $0xb1] sm:$0xff] %vm523_vm2, %v503_v13  ;;  %v744_v13 = vrot.slane %v3574_v0, 1 }
  0x5c   : > { %544 = vst.msk [vmem:[#allocation2 + $0x109] sm:$0xff] %vm523_vm2, %v510_v21 }
  0x5d   : > { %545 = vst.msk [vmem:[#allocation2 + $0x111] sm:$0xff] %vm523_vm2, %v511_v27  ;;  %v3580_v3 = vld [vmem:[#allocation2 + $0x30] sm:$0xff]  ;;  %2813 = vmatmul.msk.f32.gmra.mxu0 %vm523_vm2, %v3577_v1 }
  0x5e   : > { %552 = vst.msk [vmem:[#allocation2 + $0x169] sm:$0xff] %vm523_vm2, %v518_v33  ;;  %v703_v21 = vrot.slane %v3580_v3, 1  ;;  %2837 = vmatmul.msk.f32.gmra.mxu3 %vm523_vm2, %v3587_v9 }
  0x5f   : > { %4819 = vst [vmem:[#allocation16_spill] sm:$0xff] %v3547_v45  ;;  %v3582_v7 = vld [vmem:[#allocation2 + $0x38] sm:$0xff]  ;;  %v3622_v62 = vld [vmem:[#allocation2 + $0x40] sm:$0x3] }
  0x60   : > { %553 = vst.msk [vmem:[#allocation2 + $0x171] sm:$0xff] %vm523_vm2, %v519_v39  ;;  %v704_v27 = vrot.slane %v3582_v7, 1  ;;  %v3604_v31 = vld [vmem:[#allocation2 + $0xa8] sm:$0xff]  ;;  %v3609_v39 = vsel %vm692_vm3, %v743_v11, %v744_v13 }
  0x61   : > { %4820 = vst [vmem:[#allocation17_spill] sm:$0xff] %v3554_v51  ;;  %2823 = vmatmul.msk.f32.gmra.mxu1 %vm523_vm2, %v3600_v29 }
  0x62   : > { %528 = vst.msk [vmem:[#allocation2 + $0x49] sm:$0xff] %vm523_vm2, %v494_v43  ;;  %v3606_v33 = vld [vmem:[#allocation2 + $0xb0] sm:$0xff]  ;;  %v764_v43 = vrot.slane %v3595_v20, 1  ;;  %v3618_v41 = vsel %vm692_vm3, %v703_v21, %v704_v27  ;;  %2830 = vmatmul.msk.f32.gmra.mxu2 %vm523_vm2, %v3609_v39  ;;  %v3636_v21 = vld [vmem:[#allocation2 + $0x160] sm:$0x3] }
  0x63   : > { %4821 = vst [vmem:[#allocation18_spill] sm:$0xff] %v3559_v54  ;;  %v729_v52 = vrot.slane %v3606_v33, 1  ;;  %v766_v14 = vrot.slane %v3636_v21, 1 }
  0x64   : > { %529 = vst.msk [vmem:[#allocation2 + $0x51] sm:$0xff] %vm523_vm2, %v495_v49  ;;  %v728_v49 = vrot.slane %v3604_v31, 1  ;;  %v3630_v11 = vsel %vm692_vm3, %v763_v40, %v764_v43  ;;  %v3045_v40 = vld [vmem:[%s4730_s3 + $0x1c] sm:$0xf] }
  0x65   : > { %4822 = vst [vmem:[#allocation19_spill] sm:$0xff] %v3587_v9  ;;  %2814 = vmatmul.msk.f32.gmra.mxu0 %vm523_vm2, %v3618_v41  ;;  %v3644_v9 = vld [vmem:[#allocation2 + $0xb8] sm:$0x3]  ;;  %3046 = vmatpush.msk.msra.mxu3 %vm839_vm0, %v3045_v40  ;;  %v3675_v40 = vsel %vm692_vm3, %v764_v43, %v766_v14  ;;  %v3079_v14 = vld [vmem:[%s4730_s3 + $0x20] sm:$0xf] }
  0x66   : > { %4823 = vst [vmem:[#allocation20_spill] sm:$0xff] %v3593_v18  ;;  %v706_v18 = vrot.slane %v3622_v62, 1  ;;  %v3640_v51 = vsel %vm692_vm3, %v728_v49, %v729_v52  ;;  %2838 = vmatmul.msk.f32.gmra.mxu3 %vm523_vm2, %v3630_v11  ;;  %v3660_v49 = vld [vmem:[#allocation2 + $0x108] sm:$0xff]  ;;  %v731_v46 = vrot.slane %v3644_v9, 1  ;;  %3080 = vmatpush.msk.msra.mxu0 %vm839_vm0, %v3079_v14 }
  0x67   : > { %4824 = vst [vmem:[#allocation21_spill] sm:$0xff] %v3595_v20  ;;  %v746_v20 = vrot.slane %v3615_v48, 1  ;;  %v748_v2 = vrot.slane %v3660_v49, 1  ;;  %v3718_v14 = vld [vmem:[#allocation2 + $0x178] sm:$0x3] }
  0x68   : > { %4825 = vst [vmem:[#allocation22_spill] sm:$0xff] %v3600_v29  ;;  %v3665_v45 = vsel %vm692_vm3, %v704_v27, %v706_v18  ;;  %v3681_v18 = vld [vmem:[#allocation2 + $0x168] sm:$0xff]  ;;  %v3683_v27 = vld [vmem:[#allocation2 + $0x170] sm:$0xff]  ;;  %v3688_v36 = vsel %vm692_vm3, %v729_v52, %v731_v46  ;;  %v3703_v46 = vld [vmem:[#allocation2 + $0x118] sm:$0x3] }
  0x69   : > { %4826 = vst [vmem:[#allocation23_spill] sm:$0xff] %v3630_v11  ;;  %v3653_v16 = vsel %vm692_vm3, %v744_v13, %v746_v20  ;;  %2824 = vmatmul.msk.f32.gmra.mxu1 %vm523_vm2, %v3640_v51  ;;  %v3662_v11 = vld [vmem:[#allocation2 + $0x110] sm:$0xff]  ;;  %v3668_v13 = vld [vmem:[#allocation2 + $0x48] sm:$0xff]  ;;  %v768_v50 = vrot.slane %v3681_v18, 1 }
  0x6a   : > { %4827 = vst [vmem:[#allocation24_spill] sm:$0xff] %v3636_v21  ;;  %2831 = vmatmul.msk.f32.gmra.mxu2 %vm523_vm2, %v3653_v16  ;;  %v749_v21 = vrot.slane %v3662_v11, 1  ;;  %v708_v6 = vrot.slane %v3668_v13, 1 }
  0x6b   : > { %4828 = vst [vmem:[#allocation25_spill] sm:$0xff] %v3640_v51  ;;  %v3670_v20 = vld [vmem:[#allocation2 + $0x50] sm:$0xff] }
  0x6c   : > { %4829 = vst [vmem:[#allocation26_spill] sm:$0xff] %v3660_v49  ;;  %v709_v38 = vrot.slane %v3670_v20, 1  ;;  %v3696_v43 = vsel %vm692_vm3, %v748_v2, %v749_v21  ;;  %v771_v49 = vrot.slane %v3718_v14, 1 }
  0x6d   : > { %4830 = vst [vmem:[#allocation27_spill] sm:$0xff] %v3662_v11  ;;  %2815 = vmatmul.msk.f32.gmra.mxu0 %vm523_vm2, %v3665_v45  ;;  %v769_v11 = vrot.slane %v3683_v27, 1 }
  0x6e   : > { %4831 = vst [vmem:[#allocation28_spill] sm:$0xff] %v3675_v40  ;;  %2839 = vmatmul.msk.f32.gmra.mxu3 %vm523_vm2, %v3675_v40  ;;  %v3706_v52 = vsel %vm692_vm3, %v708_v6, %v709_v38  ;;  %v3708_v40 = vld [vmem:[#allocation2 + $0x58] sm:$0x3] }
  0x6f   : > { %4832 = vst [vmem:[#allocation29_spill] sm:$0xff] %v3681_v18  ;;  %v3713_v2 = vsel %vm692_vm3, %v768_v50, %v769_v11  ;;  %v711_v18 = vrot.slane %v3708_v40, 1 }
  0x70   : > { %4833 = vst [vmem:[#allocation30_spill] sm:$0xff] %v3683_v27  ;;  %v751_v27 = vrot.slane %v3703_v46, 1 }
  0x71   : > { %4834 = vst [vmem:[#allocation31_spill] sm:$0xff] %v3688_v36  ;;  %2825 = vmatmul.msk.f32.gmra.mxu1 %vm523_vm2, %v3688_v36  ;;  %v3730_v50 = vsel %vm692_vm3, %v709_v38, %v711_v18 }
  0x72   : > { %4835 = vst [vmem:[#allocation32_spill] sm:$0xff] %v3696_v43  ;;  %2832 = vmatmul.msk.f32.gmra.mxu2 %vm523_vm2, %v3696_v43  ;;  %v3724_v6 = vsel %vm692_vm3, %v749_v21, %v751_v27  ;;  %v1137_v43 = vrot.slane %v3410_v30, 2  ;;  %v1142_v21 = vrot.slane %v3494_v10, 2  ;;  %v1152_v27 = vrot.slane %v3668_v13, 2 }
  0x73   : > { %4836 = vst [vmem:[#allocation33_spill] sm:$0xff] %v3703_v46  ;;  %v3735_v46 = vsel %vm692_vm3, %v769_v11, %v771_v49  ;;  %v1140_v11 = vrot.slane %v3467_v58, 2  ;;  %v1150_v49 = vrot.slane %v3622_v62, 2 }
  0x74   : > { %4837 = vst [vmem:[#allocation34_spill] sm:$0xff] %v3713_v2 }
  0x75   : > { %2816 = vmatmul.msk.f32.gmra.mxu0 %vm523_vm2, %v3706_v52  ;;  %4838 = vst [vmem:[#allocation35_spill] sm:$0xff] %v3724_v6 }
  0x76   : > { %2840 = vmatmul.msk.f32.gmra.mxu3 %vm523_vm2, %v3713_v2  ;;  %4839 = vst [vmem:[#allocation36_spill] sm:$0xff] %v3735_v46  ;;  %v1138_v2 = vrot.slane %v3396_v22, 2 }
  0x78   : > { %v1139_v38 = vsel %vm1136_vm5, %v1137_v43, %v1138_v2  ;;  %v1153_v43 = vrot.slane %v3670_v20, 2 }
  0x79   : > { %2843 = vmatmul.msk.f32.vlgmr.msrb.gmra.mxu1 %vm523_vm2, %v3410_v30  ;;  %v1141_v30 = vsel %vm1136_vm5, %v1138_v2, %v1140_v11 }
  0x7a   : > { %2833 = vmatmul.msk.f32.gmra.mxu2 %vm523_vm2, %v3724_v6  ;;  %v3813_v62 = vsel %vm1136_vm5, %v1152_v27, %v1153_v43 }
  0x7d   : > { %2817 = vmatmul.msk.f32.gmra.mxu0 %vm523_vm2, %v3730_v50 }
  0x7e   : > { %2841 = vmatmul.msk.f32.gmra.mxu3 %vm523_vm2, %v3735_v46 }
  0x81   : > { %2844 = vmatmul.msk.f32.gmra.mxu1 %vm523_vm2, %v3396_v22  ;;  %v1143_v22 = vrot.slane %v3503_v17, 2 }
  0x82   : > { %2877 = vmatmul.msk.f32.vlgmr.msrb.gmra.mxu2 %vm523_vm2, %v1139_v38  ;;  %v1155_v38 = vrot.slane %v3708_v40, 2 }
  0x83   : > { %v3763_v58 = vsel %vm1136_vm5, %v1142_v21, %v1143_v22  ;;  %v1158_v21 = vrot.slane %v3297_v5, 2 }
  0x84   : > { %v3827_v11 = vsel %vm1136_vm5, %v1153_v43, %v1155_v38  ;;  %v1163_v43 = vrot.slane %v3443_v47, 2 }
  0x85   : > { %2945 = vmatmul.msk.f32.vlgmr.msrb.gmra.mxu0 %vm523_vm2, %v3533_v37  ;;  %v1145_v37 = vrot.slane %v3539_v42, 2 }
  0x86   : > { %2911 = vmatmul.msk.f32.vlgmr.msrb.gmra.mxu3 %vm523_vm2, %v3494_v10 }
  0x89   : > { %2845 = vmatmul.msk.f32.gmra.mxu1 %vm523_vm2, %v3494_v10  ;;  %v3775_v10 = vsel %vm1136_vm5, %v1143_v22, %v1145_v37 }
  0x8a   : > { %2878 = vmatmul.msk.f32.gmra.mxu2 %vm523_vm2, %v1141_v30  ;;  %v1157_v30 = vrot.slane %v3293_v4, 2 }
  0x8c   : > { %v3842_v22 = vsel %vm1136_vm5, %v1157_v30, %v1158_v21 }
  0x8d   : > { %2946 = vmatmul.msk.f32.gmra.mxu0 %vm523_vm2, %v3577_v1  ;;  %v1148_v1 = vrot.slane %v3582_v7, 2 }
  0x8e   : > { %2912 = vmatmul.msk.f32.gmra.mxu3 %vm523_vm2, %v3503_v17 }
  0x8f   : > { %v3800_v18 = vsel %vm1136_vm5, %v1148_v1, %v1150_v49 }
  0x91   : > { %2846 = vmatmul.msk.f32.gmra.mxu1 %vm523_vm2, %v3503_v17  ;;  %v1147_v17 = vrot.slane %v3580_v3, 2 }
  0x92   : > { %2879 = vmatmul.msk.f32.gmra.mxu2 %vm523_vm2, %v3763_v58 }
  0x93   : > { %v3788_v42 = vsel %vm1136_vm5, %v1147_v17, %v1148_v1 }
  0x95   : > { %2947 = vmatmul.msk.f32.gmra.mxu0 %vm523_vm2, %v3618_v41 }
  0x96   : > { %2913 = vmatmul.msk.f32.gmra.mxu3 %vm523_vm2, %v3580_v3 }
  0x99   : > { %2847 = vmatmul.msk.f32.gmra.mxu1 %vm523_vm2, %v3580_v3 }
  0x9a   : > { %2880 = vmatmul.msk.f32.gmra.mxu2 %vm523_vm2, %v3775_v10 }
  0x9c   : > { %v3817_v2 = vpop.f32.mrf.mxu1 }
  0x9d   : > { %2948 = vmatmul.msk.f32.gmra.mxu0 %vm523_vm2, %v3665_v45 }
  0x9e   : > { %2914 = vmatmul.msk.f32.gmra.mxu3 %vm523_vm2, %v3582_v7 }
  0xa1   : > { %2848 = vmatmul.msk.f32.gmra.mxu1 %vm523_vm2, %v3582_v7 }
  0xa2   : > { %2881 = vmatmul.msk.f32.gmra.mxu2 %vm523_vm2, %v3788_v42 }
  0xa5   : > { %2949 = vmatmul.msk.f32.gmra.mxu0 %vm523_vm2, %v3706_v52 }
  0xa6   : > { %2915 = vmatmul.msk.f32.gmra.mxu3 %vm523_vm2, %v3668_v13 }
  0xa9   : > { %2849 = vmatmul.msk.f32.gmra.mxu1 %vm523_vm2, %v3668_v13 }
  0xaa   : > { %2882 = vmatmul.msk.f32.gmra.mxu2 %vm523_vm2, %v3800_v18 }
  0xad   : > { %2950 = vmatmul.msk.f32.gmra.mxu0 %vm523_vm2, %v3730_v50  ;;  %v3837_v40 = vpop.f32.mrf.mxu1 }
  0xae   : > { %2916 = vmatmul.msk.f32.gmra.mxu3 %vm523_vm2, %v3670_v20 }
  0xb1   : > { %2850 = vmatmul.msk.f32.gmra.mxu1 %vm523_vm2, %v3670_v20 }
  0xb2   : > { %2883 = vmatmul.msk.f32.gmra.mxu2 %vm523_vm2, %v3813_v62 }
  0xb5   : > { %2951 = vmatmul.msk.f32.gmra.mxu0 %vm523_vm2, %v3308_v8 }
  0xb6   : > { %2917 = vmatmul.msk.f32.gmra.mxu3 %vm523_vm2, %v3293_v4 }
  0xb9   : > { %2851 = vmatmul.msk.f32.gmra.mxu1 %vm523_vm2, %v3293_v4  ;;  %v1160_v4 = vrot.slane %v3354_v12, 2  ;;  %v1162_v12 = vrot.slane %v3437_v44, 2 }
  0xba   : > { %2884 = vmatmul.msk.f32.gmra.mxu2 %vm523_vm2, %v3827_v11 }
  0xbb   : > { %v3860_v49 = vsel %vm1136_vm5, %v1158_v21, %v1160_v4  ;;  %v3881_v21 = vsel %vm1136_vm5, %v1162_v12, %v1163_v43 }
  0xbc   : > { %4841 = vst [vmem:[#allocation38_spill] sm:$0xff] %v3881_v21 }
  0xbd   : > { %2952 = vmatmul.msk.f32.gmra.mxu0 %vm523_vm2, %v3368_v15 }
  0xbe   : > { %2918 = vmatmul.msk.f32.gmra.mxu3 %vm523_vm2, %v3297_v5 }
  0xc0   : > { %v3844_v37 = vpop.f32.mrf.mxu0 }
  0xc1   : > { %2852 = vmatmul.msk.f32.gmra.mxu1 %vm523_vm2, %v3297_v5 }
  0xc2   : > { %2885 = vmatmul.msk.f32.gmra.mxu2 %vm523_vm2, %v3842_v22 }
  0xc5   : > { %2953 = vmatmul.msk.f32.gmra.mxu0 %vm523_vm2, %v3465_v57  ;;  %v3853_v17 = vpop.f32.mrf.mxu2  ;;  %v3855_v1 = vpop.f32.mrf.mxu1 }
  0xc6   : > { %2919 = vmatmul.msk.f32.gmra.mxu3 %vm523_vm2, %v3437_v44 }
  0xc8   : > { %v3862_v27 = vpop.f32.mrf.mxu0 }
  0xc9   : > { %2853 = vmatmul.msk.f32.gmra.mxu1 %vm523_vm2, %v3437_v44  ;;  %v3866_v5 = vpop.f32.mrf.mxu3 }
  0xca   : > { %4840 = vst [vmem:[#allocation37_spill] sm:$0xff] %v3866_v5  ;;  %2886 = vmatmul.msk.f32.gmra.mxu2 %vm523_vm2, %v3860_v49  ;;  %v1165_v5 = vrot.slane %v3456_v53, 2  ;;  %v1167_v53 = vrot.slane %v3515_v23, 2 }
  0xcc   : > { %v3901_v12 = vsel %vm1136_vm5, %v1163_v43, %v1165_v5 }
  0xcd   : > { %2954 = vmatmul.msk.f32.gmra.mxu0 %vm523_vm2, %v3508_v19  ;;  %v3874_v38 = vpop.f32.mrf.mxu2  ;;  %v3876_v30 = vpop.f32.mrf.mxu1  ;;  %4843 = vst [vmem:[#allocation40_spill] sm:$0xff] %v3901_v12 }
  0xce   : > { %2920 = vmatmul.msk.f32.gmra.mxu3 %vm523_vm2, %v3443_v47 }
  0xd1   : > { %2854 = vmatmul.msk.f32.gmra.mxu1 %vm523_vm2, %v3443_v47  ;;  %v3887_v44 = vpop.f32.mrf.mxu3 }
  0xd2   : > { %v3883_v4 = vpop.f32.mrf.mxu0  ;;  %4842 = vst [vmem:[#allocation39_spill] sm:$0xff] %v3887_v44  ;;  %2887 = vmatmul.msk.f32.gmra.mxu2 %vm523_vm2, %v3881_v21 }
  0xd5   : > { %2955 = vmatmul.msk.f32.gmra.mxu0 %vm523_vm2, %v3559_v54  ;;  %v3894_v19 = vpop.f32.mrf.mxu2  ;;  %v1168_v54 = vrot.slane %v3517_v24, 2 }
  0xd6   : > { %v3896_v57 = vpop.f32.mrf.mxu1  ;;  %2921 = vmatmul.msk.f32.gmra.mxu3 %vm523_vm2, %v3515_v23 }
  0xd7   : > { %v3922_v43 = vsel %vm1136_vm5, %v1167_v53, %v1168_v54 }
  0xd8   : > { %4845 = vst [vmem:[#allocation42_spill] sm:$0xff] %v3922_v43 }
  0xd9   : > { %2855 = vmatmul.msk.f32.gmra.mxu1 %vm523_vm2, %v3515_v23  ;;  %v3907_v44 = vpop.f32.mrf.mxu3 }
  0xda   : > { %v3903_v47 = vpop.f32.mrf.mxu0  ;;  %4844 = vst [vmem:[#allocation41_spill] sm:$0xff] %v3907_v44  ;;  %2888 = vmatmul.msk.f32.gmra.mxu2 %vm523_vm2, %v3901_v12 }
  0xdd   : > { %2956 = vmatmul.msk.f32.gmra.mxu0 %vm523_vm2, %v3600_v29  ;;  %v3915_v21 = vpop.f32.mrf.mxu2  ;;  %v1170_v29 = vrot.slane %v3564_v56, 2  ;;  %v1172_v56 = vrot.slane %v3604_v31, 2 }
  0xde   : > { %v3917_v5 = vpop.f32.mrf.mxu1  ;;  %2922 = vmatmul.msk.f32.gmra.mxu3 %vm523_vm2, %v3517_v24 }
  0xdf   : > { %v3942_v53 = vsel %vm1136_vm5, %v1168_v54, %v1170_v29 }
  0xe0   : > { %4847 = vst [vmem:[#allocation44_spill] sm:$0xff] %v3942_v53 }
  0xe1   : > { %2856 = vmatmul.msk.f32.gmra.mxu1 %vm523_vm2, %v3517_v24  ;;  %v3928_v23 = vpop.f32.mrf.mxu3 }
  0xe2   : > { %v3924_v44 = vpop.f32.mrf.mxu0  ;;  %4846 = vst [vmem:[#allocation43_spill] sm:$0xff] %v3928_v23  ;;  %2889 = vmatmul.msk.f32.gmra.mxu2 %vm523_vm2, %v3922_v43 }
  0xe5   : > { %2957 = vmatmul.msk.f32.gmra.mxu0 %vm523_vm2, %v3640_v51  ;;  %v3935_v12 = vpop.f32.mrf.mxu2  ;;  %v1173_v51 = vrot.slane %v3606_v33, 2 }
  0xe6   : > { %v3937_v15 = vpop.f32.mrf.mxu1  ;;  %2923 = vmatmul.msk.f32.gmra.mxu3 %vm523_vm2, %v3604_v31 }
  0xe7   : > { %v3963_v29 = vsel %vm1136_vm5, %v1172_v56, %v1173_v51 }
  0xe8   : > { %4850 = vst [vmem:[#allocation47_spill] sm:$0xff] %v3963_v29 }
  0xe9   : > { %2857 = vmatmul.msk.f32.gmra.mxu1 %vm523_vm2, %v3604_v31  ;;  %v3948_v23 = vpop.f32.mrf.mxu3 }
  0xea   : > { %v3944_v24 = vpop.f32.mrf.mxu0  ;;  %4848 = vst [vmem:[#allocation45_spill] sm:$0xff] %v3948_v23  ;;  %2890 = vmatmul.msk.f32.gmra.mxu2 %vm523_vm2, %v3942_v53 }
  0xed   : > { %2958 = vmatmul.msk.f32.gmra.mxu0 %vm523_vm2, %v3688_v36  ;;  %v3956_v43 = vpop.f32.mrf.mxu2  ;;  %v1175_v36 = vrot.slane %v3644_v9, 2  ;;  %v1177_v9 = vrot.slane %v3401_v25, 2 }
  0xee   : > { %4849 = vst [vmem:[#allocation46_spill] sm:$0xff] %v3956_v43  ;;  %v3958_v54 = vpop.f32.mrf.mxu1  ;;  %2924 = vmatmul.msk.f32.gmra.mxu3 %vm523_vm2, %v3606_v33 }
  0xef   : > { %v3981_v56 = vsel %vm1136_vm5, %v1173_v51, %v1175_v36 }
  0xf0   : > { %4853 = vst [vmem:[#allocation50_spill] sm:$0xff] %v3981_v56 }
  0xf1   : > { %2858 = vmatmul.msk.f32.gmra.mxu1 %vm523_vm2, %v3606_v33  ;;  %v3969_v31 = vpop.f32.mrf.mxu3 }
  0xf2   : > { %v3965_v23 = vpop.f32.mrf.mxu0  ;;  %4851 = vst [vmem:[#allocation48_spill] sm:$0xff] %v3969_v31  ;;  %2891 = vmatmul.msk.f32.gmra.mxu2 %vm523_vm2, %v3963_v29 }
  0xf5   : > { %2959 = vmatmul.msk.f32.gmra.mxu0 %vm523_vm2, %v3420_v35  ;;  %v3976_v53 = vpop.f32.mrf.mxu2  ;;  %v1178_v35 = vrot.slane %v3404_v26, 2 }
  0xf6   : > { %4852 = vst [vmem:[#allocation49_spill] sm:$0xff] %v3976_v53  ;;  %v1040_v43 = vpop.f32.mrf.mxu1  ;;  %2925 = vmatmul.msk.f32.gmra.mxu3 %vm523_vm2, %v3401_v25 }
  0xf7   : > { %v4000_v51 = vsel %vm1136_vm5, %v1177_v9, %v1178_v35 }
  0xf8   : > { %4856 = vst [vmem:[#allocation53_spill] sm:$0xff] %v4000_v51 }
  0xf9   : > { %2859 = vmatmul.msk.f32.gmra.mxu1 %vm523_vm2, %v3401_v25  ;;  %v3987_v31 = vpop.f32.mrf.mxu3  ;;  %v1180_v25 = vrot.slane %v3414_v32, 2 }
  0xfa   : > { %v3983_v33 = vpop.f32.mrf.mxu0  ;;  %4854 = vst [vmem:[#allocation51_spill] sm:$0xff] %v3987_v31  ;;  %2892 = vmatmul.msk.f32.gmra.mxu2 %vm523_vm2, %v3981_v56 }
  0xfd   : > { %2960 = vmatmul.msk.f32.gmra.mxu0 %vm523_vm2, %v3461_v55  ;;  %v3995_v29 = vpop.f32.mrf.mxu2  ;;  %v1041_v55 = vadd.f32 %v1040_v43, %v3844_v37  ;;  %v1182_v37 = vrot.slane %v3473_v60, 2  ;;  %v1183_v43 = vrot.slane %v3475_v61, 2 }
  0xfe   : > { %4855 = vst [vmem:[#allocation52_spill] sm:$0xff] %v3995_v29  ;;  %v1043_v36 = vpop.f32.mrf.mxu1  ;;  %2926 = vmatmul.msk.f32.gmra.mxu3 %vm523_vm2, %v3404_v26 }
 0x101   : > { %2860 = vmatmul.msk.f32.gmra.mxu1 %vm523_vm2, %v3404_v26  ;;  %v4004_v56 = vpop.f32.mrf.mxu3  ;;  %v4015_v26 = vsel %vm1136_vm5, %v1178_v35, %v1180_v25 }
 0x102   : > { %v1619_v31 = vpop.f32.mrf.mxu0  ;;  %4857 = vst [vmem:[#allocation54_spill] sm:$0xff] %v4004_v56  ;;  %2893 = vmatmul.msk.f32.gmra.mxu2 %vm523_vm2, %v4000_v51 }
 0x103   : > { %4858 = vst [vmem:[#allocation55_spill] sm:$0xff] %v4015_v26 }
 0x105   : > { %2961 = vmatmul.msk.f32.gmra.mxu0 %vm523_vm2, %v3522_v28  ;;  %v1303_v29 = vpop.f32.mrf.mxu2 }
 0x106   : > { %v1046_v53 = vpop.f32.mrf.mxu1  ;;  %2927 = vmatmul.msk.f32.gmra.mxu3 %vm523_vm2, %v3473_v60  ;;  %v1399_v9 = vadd.f32 %v1303_v29, %v1041_v55  ;;  %v1044_v55 = vadd.f32 %v1043_v36, %v3862_v27  ;;  %v1185_v27 = vrot.slane %v3530_v34, 2 }
 0x109   : > { %2861 = vmatmul.msk.f32.gmra.mxu1 %vm523_vm2, %v3473_v60  ;;  %v1459_v51 = vpop.f32.mrf.mxu3 }
 0x10a   : > { %v1622_v56 = vpop.f32.mrf.mxu0  ;;  %v1555_v32 = vadd.f32 %v1459_v51, %v1399_v9  ;;  %2894 = vmatmul.msk.f32.gmra.mxu2 %vm523_vm2, %v4015_v26  ;;  %v4031_v9 = vsel %vm1136_vm5, %v1182_v37, %v1183_v43 }
 0x10c   : > { %v4026_v35 = vadd.f32 %v1619_v31, %v1555_v32  ;;  %v1047_v31 = vadd.f32 %v1046_v53, %v3883_v4  ;;  %v1187_v4 = vrot.slane %v3572_v63, 2  ;;  %v1188_v53 = vrot.slane %v3574_v0, 2 }
 0x10d   : > { %2962 = vmatmul.msk.f32.gmra.mxu0 %vm523_vm2, %v3567_v59  ;;  %v1306_v29 = vpop.f32.mrf.mxu2 }
 0x10e   : > { %v1049_v25 = vpop.f32.mrf.mxu1  ;;  %2928 = vmatmul.msk.f32.gmra.mxu3 %vm523_vm2, %v3475_v61  ;;  %v1400_v51 = vadd.f32 %v1306_v29, %v1044_v55  ;;  %v4046_v55 = vsel %vm1136_vm5, %v1183_v43, %v1185_v27 }
 0x111   : > { %2862 = vmatmul.msk.f32.gmra.mxu1 %vm523_vm2, %v3475_v61  ;;  %v1462_v60 = vpop.f32.mrf.mxu3 }
 0x112   : > { %v1625_v28 = vpop.f32.mrf.mxu0  ;;  %v1556_v26 = vadd.f32 %v1462_v60, %v1400_v51  ;;  %2895 = vmatmul.msk.f32.gmra.mxu2 %vm523_vm2, %v4031_v9 }
 0x114   : > { %v4041_v36 = vadd.f32 %v1622_v56, %v1556_v26  ;;  %v1050_v56 = vadd.f32 %v1049_v25, %v3903_v47  ;;  %v4859_v47 = vld [vmem:[#allocation32_spill] sm:$0xff] }
 0x115   : > { %2963 = vmatmul.msk.f32.gmra.mxu0 %vm523_vm2, %v3609_v39  ;;  %v1309_v32 = vpop.f32.mrf.mxu2 }
 0x116   : > { %v1052_v37 = vpop.f32.mrf.mxu1  ;;  %2929 = vmatmul.msk.f32.gmra.mxu3 %vm523_vm2, %v3572_v63  ;;  %v1401_v61 = vadd.f32 %v1309_v32, %v1047_v31  ;;  %v4062_v31 = vsel %vm1136_vm5, %v1187_v4, %v1188_v53 }
 0x117   : > { %v1053_v25 = vadd.f32 %v1052_v37, %v3924_v44  ;;  %v4862_v37 = vld [vmem:[#allocation27_spill] sm:$0xff] }
 0x119   : > { %2863 = vmatmul.msk.f32.gmra.mxu1 %vm523_vm2, %v3572_v63  ;;  %v1465_v34 = vpop.f32.mrf.mxu3 }
 0x11a   : > { %v1628_v29 = vpop.f32.mrf.mxu0  ;;  %v1557_v51 = vadd.f32 %v1465_v34, %v1401_v61  ;;  %2896 = vmatmul.msk.f32.gmra.mxu2 %vm523_vm2, %v4046_v55 }
 0x11c   : > { %v4057_v26 = vadd.f32 %v1625_v28, %v1557_v51  ;;  %v1190_v28 = vrot.slane %v3615_v48, 2 }
 0x11d   : > { %2964 = vmatmul.msk.f32.gmra.mxu0 %vm523_vm2, %v3653_v16  ;;  %v1312_v43 = vpop.f32.mrf.mxu2 }
 0x11e   : > { %v1055_v60 = vpop.f32.mrf.mxu1  ;;  %2930 = vmatmul.msk.f32.gmra.mxu3 %vm523_vm2, %v3574_v0  ;;  %v1402_v27 = vadd.f32 %v1312_v43, %v1050_v56  ;;  %v4861_v56 = vld [vmem:[#allocation26_spill] sm:$0xff]  ;;  %v4077_v43 = vsel %vm1136_vm5, %v1188_v53, %v1190_v28 }
 0x11f   : > { %v1192_v44 = vrot.slane %v4861_v56, 2 }
 0x121   : > { %2864 = vmatmul.msk.f32.gmra.mxu1 %vm523_vm2, %v3574_v0  ;;  %v1468_v63 = vpop.f32.mrf.mxu3 }
 0x122   : > { %v1631_v32 = vpop.f32.mrf.mxu0  ;;  %v1558_v61 = vadd.f32 %v1468_v63, %v1402_v27  ;;  %2897 = vmatmul.msk.f32.gmra.mxu2 %vm523_vm2, %v4062_v31 }
 0x124   : > { %v4072_v34 = vadd.f32 %v1628_v29, %v1558_v61  ;;  %v1193_v29 = vrot.slane %v4862_v37, 2  ;;  %v1056_v61 = vadd.f32 %v1055_v60, %v3944_v24  ;;  %v4864_v24 = vld [vmem:[#allocation33_spill] sm:$0xff] }
 0x125   : > { %2965 = vmatmul.msk.f32.gmra.mxu0 %vm523_vm2, %v4859_v47  ;;  %v1315_v51 = vpop.f32.mrf.mxu2  ;;  %v1195_v60 = vrot.slane %v4864_v24, 2 }
 0x126   : > { %4860 = vst [vmem:[#allocation32_spill] sm:$0xff] %v4072_v34  ;;  %v1058_v4 = vpop.f32.mrf.mxu1  ;;  %2931 = vmatmul.msk.f32.gmra.mxu3 %vm523_vm2, %v4861_v56  ;;  %v1403_v0 = vadd.f32 %v1315_v51, %v1053_v25 }
 0x129   : > { %2865 = vmatmul.msk.f32.gmra.mxu1 %vm523_vm2, %v4861_v56  ;;  %v1471_v48 = vpop.f32.mrf.mxu3 }
 0x12a   : > { %v1634_v27 = vpop.f32.mrf.mxu0  ;;  %v1559_v63 = vadd.f32 %v1471_v48, %v1403_v0  ;;  %2898 = vmatmul.msk.f32.gmra.mxu2 %vm523_vm2, %v4077_v43  ;;  %v4093_v0 = vsel %vm1136_vm5, %v1192_v44, %v1193_v29 }
 0x12c   : > { %v4088_v53 = vadd.f32 %v1631_v32, %v1559_v63  ;;  %v4865_v32 = vld [vmem:[#allocation8_spill] sm:$0xff]  ;;  %v1059_v63 = vadd.f32 %v1058_v4, %v3965_v23 }
 0x12d   : > { %2966 = vmatmul.msk.f32.gmra.mxu0 %vm523_vm2, %v3724_v6  ;;  %v1318_v28 = vpop.f32.mrf.mxu2 }
 0x12e   : > { %4863 = vst [vmem:[#allocation26_spill] sm:$0xff] %v4088_v53  ;;  %v1061_v25 = vpop.f32.mrf.mxu1  ;;  %2932 = vmatmul.msk.f32.gmra.mxu3 %vm523_vm2, %v4862_v37  ;;  %v1404_v51 = vadd.f32 %v1318_v28, %v1056_v61  ;;  %v4867_v53 = vld [vmem:[#allocation5_spill] sm:$0xff] }
 0x12f   : > { %v1197_v23 = vrot.slane %v4867_v53, 2 }
 0x131   : > { %2866 = vmatmul.msk.f32.gmra.mxu1 %vm523_vm2, %v4862_v37  ;;  %v1474_v56 = vpop.f32.mrf.mxu3 }
 0x132   : > { %v1637_v48 = vpop.f32.mrf.mxu0  ;;  %v1560_v34 = vadd.f32 %v1474_v56, %v1404_v51  ;;  %2899 = vmatmul.msk.f32.gmra.mxu2 %vm523_vm2, %v4093_v0  ;;  %v4108_v51 = vsel %vm1136_vm5, %v1193_v29, %v1195_v60 }
 0x134   : > { %v4103_v61 = vadd.f32 %v1634_v27, %v1560_v34  ;;  %v4868_v34 = vld [vmem:[#allocation6_spill] sm:$0xff]  ;;  %v4869_v27 = vld [vmem:[#allocation11_spill] sm:$0xff] }
 0x135   : > { %2967 = vmatmul.msk.f32.gmra.mxu0 %vm523_vm2, %v4865_v32  ;;  %v1321_v44 = vpop.f32.mrf.mxu2  ;;  %v1198_v4 = vrot.slane %v4868_v34, 2 }
 0x136   : > { %4866 = vst [vmem:[#allocation27_spill] sm:$0xff] %v4103_v61  ;;  %v1064_v28 = vpop.f32.mrf.mxu1  ;;  %2933 = vmatmul.msk.f32.gmra.mxu3 %vm523_vm2, %v4867_v53  ;;  %v1405_v37 = vadd.f32 %v1321_v44, %v1059_v63  ;;  %v1062_v63 = vadd.f32 %v1061_v25, %v3983_v33  ;;  %v4872_v25 = vld [vmem:[#allocation16_spill] sm:$0xff] }
 0x139   : > { %2867 = vmatmul.msk.f32.gmra.mxu1 %vm523_vm2, %v4867_v53  ;;  %v1477_v24 = vpop.f32.mrf.mxu3 }
 0x13a   : > { %v1640_v56 = vpop.f32.mrf.mxu0  ;;  %v1561_v6 = vadd.f32 %v1477_v24, %v1405_v37  ;;  %2900 = vmatmul.msk.f32.gmra.mxu2 %vm523_vm2, %v4108_v51  ;;  %v4124_v24 = vsel %vm1136_vm5, %v1197_v23, %v1198_v4 }
 0x13c   : > { %v4119_v29 = vadd.f32 %v1637_v48, %v1561_v6  ;;  %v4871_v6 = vld [vmem:[#allocation7_spill] sm:$0xff]  ;;  %v1065_v48 = vadd.f32 %v1064_v28, %v3817_v2 }
 0x13d   : > { %2968 = vmatmul.msk.f32.gmra.mxu0 %vm523_vm2, %v4869_v27  ;;  %v1324_v60 = vpop.f32.mrf.mxu2  ;;  %v1200_v33 = vrot.slane %v4871_v6, 2 }
 0x13e   : > { %4870 = vst [vmem:[#allocation33_spill] sm:$0xff] %v4119_v29  ;;  %v1067_v44 = vpop.f32.mrf.mxu1  ;;  %2934 = vmatmul.msk.f32.gmra.mxu3 %vm523_vm2, %v4868_v34  ;;  %v1406_v37 = vadd.f32 %v1324_v60, %v1062_v63  ;;  %v4874_v29 = vld [vmem:[#allocation12_spill] sm:$0xff] }
 0x13f   : > { %v1202_v2 = vrot.slane %v4874_v29, 2 }
 0x141   : > { %2868 = vmatmul.msk.f32.gmra.mxu1 %vm523_vm2, %v4868_v34  ;;  %v1480_v53 = vpop.f32.mrf.mxu3 }
 0x142   : > { %v1643_v61 = vpop.f32.mrf.mxu0  ;;  %v1562_v32 = vadd.f32 %v1480_v53, %v1406_v37  ;;  %2901 = vmatmul.msk.f32.gmra.mxu2 %vm523_vm2, %v4124_v24  ;;  %v4139_v37 = vsel %vm1136_vm5, %v1198_v4, %v1200_v33  ;;  %v1068_v4 = vadd.f32 %v1067_v44, %v3837_v40  ;;  %v4879_v44 = vld [vmem:[#allocation17_spill] sm:$0xff] }
 0x144   : > { %v4134_v63 = vadd.f32 %v1640_v56, %v1562_v32  ;;  %v4875_v32 = vld [vmem:[#allocation13_spill] sm:$0xff]  ;;  %v4876_v56 = vld [vmem:[#allocation19_spill] sm:$0xff] }
 0x145   : > { %2969 = vmatmul.msk.f32.gmra.mxu0 %vm523_vm2, %v4872_v25  ;;  %v1327_v23 = vpop.f32.mrf.mxu2  ;;  %v1203_v28 = vrot.slane %v4875_v32, 2 }
 0x146   : > { %4873 = vst [vmem:[#allocation5_spill] sm:$0xff] %v4134_v63  ;;  %v1070_v60 = vpop.f32.mrf.mxu1  ;;  %2935 = vmatmul.msk.f32.gmra.mxu3 %vm523_vm2, %v4874_v29  ;;  %v1407_v34 = vadd.f32 %v1327_v23, %v1065_v48  ;;  %v520_v63 = vld [vmem:[%s3273_s28 + $0xf0] sm:$0xff] }
 0x147   : > { %554 = vst.msk [vmem:[#allocation2 + $0x181] sm:$0xff] %vm523_vm2, %v520_v63  ;;  %v1071_v63 = vadd.f32 %v1070_v60, %v3855_v1  ;;  %v4883_v60 = vld [vmem:[#allocation21_spill] sm:$0xff] }
 0x149   : > { %2869 = vmatmul.msk.f32.gmra.mxu1 %vm523_vm2, %v4874_v29  ;;  %v1483_v6 = vpop.f32.mrf.mxu3  ;;  %v4157_v29 = vsel %vm1136_vm5, %v1202_v2, %v1203_v28 }
 0x14a   : > { %v1646_v53 = vpop.f32.mrf.mxu0  ;;  %v1563_v25 = vadd.f32 %v1483_v6, %v1407_v34  ;;  %2902 = vmatmul.msk.f32.gmra.mxu2 %vm523_vm2, %v4139_v37  ;;  %4878 = vst [vmem:[#allocation11_spill] sm:$0xff] %v4157_v29 }
 0x14c   : > { %v4150_v33 = vadd.f32 %v1643_v61, %v1563_v25  ;;  %v521_v61 = vld [vmem:[%s3273_s28 + $0xf8] sm:$0xff]  ;;  %v1205_v25 = vrot.slane %v4879_v44, 2  ;;  %s446_s28 = scalar_lea.vmem %s4732_s5, %s4947_s21 }
 0x14d   : > { %2970 = vmatmul.msk.f32.gmra.mxu0 %vm523_vm2, %v4876_v56  ;;  %v1330_v48 = vpop.f32.mrf.mxu2  ;;  %555 = vst.msk [vmem:[#allocation2 + $0x189] sm:$0xff] %vm523_vm2, %v521_v61 }
 0x14e   : > { %4877 = vst [vmem:[#allocation6_spill] sm:$0xff] %v4150_v33  ;;  %v1073_v23 = vpop.f32.mrf.mxu1  ;;  %2936 = vmatmul.msk.f32.gmra.mxu3 %vm523_vm2, %v4875_v32  ;;  %v1408_v34 = vadd.f32 %v1330_v48, %v1068_v4  ;;  %v4880_v33 = vld [vmem:[#allocation23_spill] sm:$0xff] }
 0x14f   : > { %v1074_v61 = vadd.f32 %v1073_v23, %v3876_v30  ;;  %v4886_v30 = vld [vmem:[#allocation24_spill] sm:$0xff]  ;;  %v4887_v23 = vld [vmem:[#allocation34_spill] sm:$0xff] }
 0x151   : > { %2870 = vmatmul.msk.f32.gmra.mxu1 %vm523_vm2, %v4875_v32  ;;  %v1486_v56 = vpop.f32.mrf.mxu3  ;;  %v4882_v32 = vld [vmem:[#allocation20_spill] sm:$0xff] }
 0x152   : > { %v1649_v6 = vpop.f32.mrf.mxu0  ;;  %v1564_v40 = vadd.f32 %v1486_v56, %v1408_v34  ;;  %2903 = vmatmul.msk.f32.gmra.mxu2 %vm523_vm2, %v4157_v29  ;;  %v4174_v34 = vsel %vm1136_vm5, %v1203_v28, %v1205_v25  ;;  %v1207_v1 = vrot.slane %v4882_v32, 2 }
 0x154   : > { %v4169_v2 = vadd.f32 %v1646_v53, %v1564_v40  ;;  %v1208_v53 = vrot.slane %v4883_v60, 2  ;;  %v4884_v40 = vld [vmem:[#allocation28_spill] sm:$0xff] }
 0x155   : > { %2971 = vmatmul.msk.f32.gmra.mxu0 %vm523_vm2, %v4880_v33  ;;  %v1333_v4 = vpop.f32.mrf.mxu2 }
 0x156   : > { %4881 = vst [vmem:[#allocation7_spill] sm:$0xff] %v4169_v2  ;;  %v1076_v48 = vpop.f32.mrf.mxu1  ;;  %2937 = vmatmul.msk.f32.gmra.mxu3 %vm523_vm2, %v4882_v32  ;;  %v1409_v56 = vadd.f32 %v1333_v4, %v1071_v63 }
 0x159   : > { %2871 = vmatmul.msk.f32.gmra.mxu1 %vm523_vm2, %v4882_v32  ;;  %v1489_v44 = vpop.f32.mrf.mxu3 }
 0x15a   : > { %v1652_v29 = vpop.f32.mrf.mxu0  ;;  %v1565_v33 = vadd.f32 %v1489_v44, %v1409_v56  ;;  %2904 = vmatmul.msk.f32.gmra.mxu2 %vm523_vm2, %v4174_v34  ;;  %v4190_v56 = vsel %vm1136_vm5, %v1207_v1, %v1208_v53 }
 0x15c   : > { %v4185_v28 = vadd.f32 %v1649_v6, %v1565_v33  ;;  %v1210_v33 = vrot.slane %v4886_v30, 2  ;;  %v1077_v6 = vadd.f32 %v1076_v48, %v3896_v57  ;;  %v4215_v48 = vld [vmem:[#allocation2 + $0x180] sm:$0xff] }
 0x15d   : > { %2972 = vmatmul.msk.f32.gmra.mxu0 %vm523_vm2, %v4884_v40  ;;  %v1336_v25 = vpop.f32.mrf.mxu2  ;;  %v4209_v40 = vld [vmem:[#allocation2 + $0x188] sm:$0xff] }
 0x15e   : > { %4885 = vst [vmem:[#allocation12_spill] sm:$0xff] %v4185_v28  ;;  %v1079_v63 = vpop.f32.mrf.mxu1  ;;  %2938 = vmatmul.msk.f32.gmra.mxu3 %vm523_vm2, %v4883_v60  ;;  %v1410_v4 = vadd.f32 %v1336_v25, %v1074_v61  ;;  %v4889_v28 = vld [vmem:[#allocation29_spill] sm:$0xff] }
 0x15f   : > { %v1212_v57 = vrot.slane %v4889_v28, 2 }
 0x161   : > { %2872 = vmatmul.msk.f32.gmra.mxu1 %vm523_vm2, %v4883_v60  ;;  %v1492_v32 = vpop.f32.mrf.mxu3 }
 0x162   : > { %v1655_v44 = vpop.f32.mrf.mxu0  ;;  %v1566_v2 = vadd.f32 %v1492_v32, %v1410_v4  ;;  %2905 = vmatmul.msk.f32.gmra.mxu2 %vm523_vm2, %v4190_v56  ;;  %v4205_v4 = vsel %vm1136_vm5, %v1208_v53, %v1210_v33  ;;  %v1080_v53 = vadd.f32 %v1079_v63, %v3917_v5 }
 0x163   : > { %4890 = vst [vmem:[#allocation17_spill] sm:$0xff] %v4205_v4 }
 0x164   : > { %v4200_v61 = vadd.f32 %v1652_v29, %v1566_v2  ;;  %v4891_v29 = vld [vmem:[#allocation30_spill] sm:$0xff] }
 0x165   : > { %2973 = vmatmul.msk.f32.gmra.mxu0 %vm523_vm2, %v4887_v23  ;;  %v1339_v1 = vpop.f32.mrf.mxu2  ;;  %v1213_v2 = vrot.slane %v4891_v29, 2 }
 0x166   : > { %4888 = vst [vmem:[#allocation13_spill] sm:$0xff] %v4200_v61  ;;  %v1082_v25 = vpop.f32.mrf.mxu1  ;;  %2939 = vmatmul.msk.f32.gmra.mxu3 %vm523_vm2, %v4889_v28  ;;  %v1411_v60 = vadd.f32 %v1339_v1, %v1077_v6  ;;  %v1588_v6 = vrot.slane %v4215_v48, 1  ;;  %v1589_v1 = vrot.slane %v4209_v40, 1 }
 0x167   : > { %v4227_v61 = vsel %vm1136_vm5, %v1212_v57, %v1213_v2  ;;  %v1083_v57 = vadd.f32 %v1082_v25, %v3937_v15 }
 0x168   : > { %v4232_v5 = vsel %vm692_vm3, %v1588_v6, %v1589_v1 }
 0x169   : > { %2873 = vmatmul.msk.f32.gmra.mxu1 %vm523_vm2, %v4889_v28  ;;  %v1495_v30 = vpop.f32.mrf.mxu3 }
 0x16a   : > { %v1658_v32 = vpop.f32.mrf.mxu0  ;;  %v1567_v23 = vadd.f32 %v1495_v30, %v1411_v60  ;;  %2906 = vmatmul.msk.f32.gmra.mxu2 %vm523_vm2, %v4205_v4 }
 0x16c   : > { %v4220_v33 = vadd.f32 %v1655_v44, %v1567_v23  ;;  %v4234_v44 = vld [vmem:[#allocation2 + $0x190] sm:$0x3] }
 0x16d   : > { %2974 = vmatmul.msk.f32.gmra.mxu0 %vm523_vm2, %v3735_v46  ;;  %v1342_v60 = vpop.f32.mrf.mxu2 }
 0x16e   : > { %4892 = vst [vmem:[#allocation20_spill] sm:$0xff] %v4220_v33  ;;  %v1085_v30 = vpop.f32.mrf.mxu1  ;;  %2940 = vmatmul.msk.f32.gmra.mxu3 %vm523_vm2, %v4891_v29  ;;  %v1412_v28 = vadd.f32 %v1342_v60, %v1080_v53  ;;  %v1215_v33 = vrot.slane %v3718_v14, 2 }
 0x171   : > { %2874 = vmatmul.msk.f32.gmra.mxu1 %vm523_vm2, %v4891_v29  ;;  %v1498_v63 = vpop.f32.mrf.mxu3  ;;  %v1591_v29 = vrot.slane %v4234_v44, 1 }
 0x172   : > { %v1661_v4 = vpop.f32.mrf.mxu0  ;;  %v1568_v23 = vadd.f32 %v1498_v63, %v1412_v28  ;;  %2907 = vmatmul.msk.f32.gmra.mxu2 %vm523_vm2, %v4227_v61  ;;  %v4248_v63 = vsel %vm1136_vm5, %v1213_v2, %v1215_v33 }
 0x173   : > { %v4253_v14 = vsel %vm692_vm3, %v1589_v1, %v1591_v29 }
 0x174   : > { %v4242_v53 = vadd.f32 %v1658_v32, %v1568_v23  ;;  %v1086_v32 = vadd.f32 %v1085_v30, %v3958_v54 }
 0x175   : > { %2975 = vmatmul.msk.f32.gmra.mxu0 %vm523_vm2, %v4232_v5  ;;  %v1345_v6 = vpop.f32.mrf.mxu2 }
 0x176   : > { %v1088_v60 = vpop.f32.mrf.mxu1  ;;  %2941 = vmatmul.msk.f32.gmra.mxu3 %vm523_vm2, %v4215_v48  ;;  %v1413_v28 = vadd.f32 %v1345_v6, %v1083_v57 }
 0x177   : > { %v1089_v54 = vadd.f32 %v1088_v60, %v3853_v17 }
 0x179   : > { %2979 = vmatmul.msk.f32.vlgmr.msra.gmra.mxu1 %vm523_vm2, %v3763_v58  ;;  %v1501_v15 = vpop.f32.mrf.mxu3 }
 0x17a   : > { %v1664_v46 = vpop.f32.mrf.mxu0  ;;  %v1569_v25 = vadd.f32 %v1501_v15, %v1413_v28  ;;  %2908 = vmatmul.msk.f32.gmra.mxu2 %vm523_vm2, %v4248_v63 }
 0x17c   : > { %v4260_v23 = vadd.f32 %v1661_v4, %v1569_v25 }
 0x17d   : > { %2976 = vmatmul.msk.f32.gmra.mxu0 %vm523_vm2, %v4253_v14  ;;  %v1348_v2 = vpop.f32.mrf.mxu2 }
 0x17e   : > { %v1091_v33 = vpop.f32.mrf.mxu1  ;;  %2942 = vmatmul.msk.f32.gmra.mxu3 %vm523_vm2, %v4209_v40  ;;  %v1414_v58 = vadd.f32 %v1348_v2, %v1086_v32 }
 0x181   : > { %2980 = vmatmul.msk.f32.gmra.mxu1 %vm523_vm2, %v3775_v10  ;;  %v1504_v57 = vpop.f32.mrf.mxu3 }
 0x182   : > { %v1667_v1 = vpop.f32.mrf.mxu0  ;;  %v1570_v29 = vadd.f32 %v1504_v57, %v1414_v58  ;;  %3013 = vmatmul.msk.f32.vlgmr.msra.gmra.mxu2 %vm523_vm2, %v3580_v3  ;;  %v1092_v3 = vadd.f32 %v1091_v33, %v3874_v38 }
 0x184   : > { %v4271_v4 = vadd.f32 %v1664_v46, %v1570_v29 }
 0x185   : > { %3081 = vmatmul.msk.f32.vlgmr.msra.gmra.mxu0 %vm523_vm2, %v3788_v42  ;;  %v1351_v30 = vpop.f32.mrf.mxu2 }
 0x186   : > { %v1094_v6 = vpop.f32.mrf.mxu1  ;;  %3047 = vmatmul.msk.f32.vlgmr.msra.gmra.mxu3 %vm523_vm2, %v3618_v41  ;;  %v1415_v28 = vadd.f32 %v1351_v30, %v1089_v54 }
 0x189   : > { %2981 = vmatmul.msk.f32.gmra.mxu1 %vm523_vm2, %v3788_v42  ;;  %v1507_v10 = vpop.f32.mrf.mxu3 }
 0x18a   : > { %v1670_v15 = vpop.f32.mrf.mxu0  ;;  %v1571_v25 = vadd.f32 %v1507_v10, %v1415_v28  ;;  %3014 = vmatmul.msk.f32.gmra.mxu2 %vm523_vm2, %v3582_v7  ;;  %v1095_v7 = vadd.f32 %v1094_v6, %v3894_v19 }
 0x18c   : > { %v4282_v46 = vadd.f32 %v1667_v1, %v1571_v25 }
 0x18d   : > { %3082 = vmatmul.msk.f32.gmra.mxu0 %vm523_vm2, %v3800_v18  ;;  %v1354_v17 = vpop.f32.mrf.mxu2 }
 0x18e   : > { %v1097_v60 = vpop.f32.mrf.mxu1  ;;  %3048 = vmatmul.msk.f32.gmra.mxu3 %vm523_vm2, %v3665_v45  ;;  %v1416_v41 = vadd.f32 %v1354_v17, %v1092_v3  ;;  %v3149_v17 = vld [vmem:[#allocation2 + $0x68] sm:$0xff] }
 0x18f   : > { %v1098_v19 = vadd.f32 %v1097_v60, %v3915_v21 }
 0x191   : > { %2982 = vmatmul.msk.f32.gmra.mxu1 %vm523_vm2, %v3800_v18  ;;  %v1510_v42 = vpop.f32.mrf.mxu3 }
 0x192   : > { %v1673_v32 = vpop.f32.mrf.mxu0  ;;  %v1572_v2 = vadd.f32 %v1510_v42, %v1416_v41  ;;  %3015 = vmatmul.msk.f32.gmra.mxu2 %vm523_vm2, %v3668_v13 }
 0x194   : > { %v4293_v38 = vadd.f32 %v1670_v15, %v1572_v2 }
 0x195   : > { %3083 = vmatmul.msk.f32.gmra.mxu0 %vm523_vm2, %v3813_v62  ;;  %v1357_v33 = vpop.f32.mrf.mxu2 }
 0x196   : > { %v1100_v58 = vpop.f32.mrf.mxu1  ;;  %3049 = vmatmul.msk.f32.gmra.mxu3 %vm523_vm2, %v3706_v52  ;;  %v1417_v45 = vadd.f32 %v1357_v33, %v1095_v7 }
 0x197   : > { %v1101_v21 = vadd.f32 %v1100_v58, %v3935_v12  ;;  %v4893_v12 = vld [vmem:[#allocation46_spill] sm:$0xff]  ;;  %v3150_v58 = vld [vmem:[#allocation2 + $0x78] sm:$0xff] }
 0x199   : > { %2983 = vmatmul.msk.f32.gmra.mxu1 %vm523_vm2, %v3813_v62  ;;  %v1513_v18 = vpop.f32.mrf.mxu3 }
 0x19a   : > { %v1676_v1 = vpop.f32.mrf.mxu0  ;;  %v1573_v57 = vadd.f32 %v1513_v18, %v1417_v45  ;;  %3016 = vmatmul.msk.f32.gmra.mxu2 %vm523_vm2, %v3670_v20  ;;  %v3148_v20 = vld [vmem:[#allocation2 + $0x60] sm:$0xff]  ;;  %v4895_v45 = vld [vmem:[#allocation38_spill] sm:$0xff] }
 0x19c   : > { %v4304_v13 = vadd.f32 %v1673_v32, %v1573_v57 }
 0x19d   : > { %3084 = vmatmul.msk.f32.gmra.mxu0 %vm523_vm2, %v3827_v11  ;;  %v1360_v29 = vpop.f32.mrf.mxu2 }
 0x19e   : > { %v1103_v54 = vpop.f32.mrf.mxu1  ;;  %3050 = vmatmul.msk.f32.gmra.mxu3 %vm523_vm2, %v3730_v50  ;;  %v1418_v52 = vadd.f32 %v1360_v29, %v1098_v19 }
 0x19f   : > { %v1104_v60 = vadd.f32 %v1103_v54, %v4893_v12  ;;  %v4897_v54 = vld [vmem:[#allocation10_spill] sm:$0xff] }
 0x1a1   : > { %2984 = vmatmul.msk.f32.gmra.mxu1 %vm523_vm2, %v3827_v11  ;;  %v1516_v62 = vpop.f32.mrf.mxu3 }
 0x1a2   : > { %v1679_v30 = vpop.f32.mrf.mxu0  ;;  %v1574_v6 = vadd.f32 %v1516_v62, %v1418_v52  ;;  %3017 = vmatmul.msk.f32.gmra.mxu2 %vm523_vm2, %v3148_v20  ;;  %v4898_v20 = vld [vmem:[#allocation40_spill] sm:$0xff] }
 0x1a4   : > { %v4314_v28 = vadd.f32 %v1676_v1, %v1574_v6  ;;  %v4896_v1 = vld [vmem:[#allocation49_spill] sm:$0xff] }
 0x1a5   : > { %3085 = vmatmul.msk.f32.gmra.mxu0 %vm523_vm2, %v3842_v22  ;;  %v1363_v15 = vpop.f32.mrf.mxu2  ;;  %v3151_v6 = vld [vmem:[#allocation2 + $0x80] sm:$0xff] }
 0x1a6   : > { %v1106_v10 = vpop.f32.mrf.mxu1  ;;  %3051 = vmatmul.msk.f32.gmra.mxu3 %vm523_vm2, %v3308_v8  ;;  %v1419_v50 = vadd.f32 %v1363_v15, %v1101_v21  ;;  %v4894_v8 = vld [vmem:[#allocation3_spill] sm:$0xff]  ;;  %v4899_v21 = vld [vmem:[#allocation52_spill] sm:$0xff] }
 0x1a7   : > { %v1107_v18 = vadd.f32 %v1106_v10, %v4896_v1 }
 0x1a9   : > { %2985 = vmatmul.msk.f32.gmra.mxu1 %vm523_vm2, %v3842_v22  ;;  %v1519_v11 = vpop.f32.mrf.mxu3 }
 0x1aa   : > { %v1682_v25 = vpop.f32.mrf.mxu0  ;;  %v1575_v3 = vadd.f32 %v1519_v11, %v1419_v50  ;;  %3018 = vmatmul.msk.f32.gmra.mxu2 %vm523_vm2, %v3149_v17  ;;  %v4900_v11 = vld [vmem:[#allocation14_spill] sm:$0xff] }
 0x1ac   : > { %v4324_v41 = vadd.f32 %v1679_v30, %v1575_v3 }
 0x1ad   : > { %3086 = vmatmul.msk.f32.gmra.mxu0 %vm523_vm2, %v3860_v49  ;;  %v1366_v32 = vpop.f32.mrf.mxu2 }
 0x1ae   : > { %v1109_v42 = vpop.f32.mrf.mxu1  ;;  %3052 = vmatmul.msk.f32.gmra.mxu3 %vm523_vm2, %v4894_v8  ;;  %v1420_v2 = vadd.f32 %v1366_v32, %v1104_v60  ;;  %v3152_v32 = vld [vmem:[#allocation2 + $0x90] sm:$0xff]  ;;  %v4901_v8 = vld [vmem:[#allocation42_spill] sm:$0xff] }
 0x1af   : > { %v1110_v15 = vadd.f32 %v1109_v42, %v4899_v21  ;;  %v4902_v42 = vld [vmem:[#allocation37_spill] sm:$0xff] }
 0x1b1   : > { %2986 = vmatmul.msk.f32.gmra.mxu1 %vm523_vm2, %v3860_v49  ;;  %v1522_v22 = vpop.f32.mrf.mxu3 }
 0x1b2   : > { %v1685_v7 = vpop.f32.mrf.mxu0  ;;  %v1576_v33 = vadd.f32 %v1522_v22, %v1420_v2  ;;  %3019 = vmatmul.msk.f32.gmra.mxu2 %vm523_vm2, %v3150_v58  ;;  %v4903_v58 = vld [vmem:[#allocation18_spill] sm:$0xff] }
 0x1b4   : > { %v4334_v57 = vadd.f32 %v1682_v25, %v1576_v33 }
 0x1b5   : > { %3087 = vmatmul.msk.f32.gmra.mxu0 %vm523_vm2, %v4895_v45  ;;  %v1369_v19 = vpop.f32.mrf.mxu2 }
 0x1b6   : > { %v1112_v29 = vpop.f32.mrf.mxu1  ;;  %3053 = vmatmul.msk.f32.gmra.mxu3 %vm523_vm2, %v4897_v54  ;;  %v1421_v52 = vadd.f32 %v1369_v19, %v1107_v18  ;;  %v3153_v54 = vld [vmem:[#allocation2 + $0x98] sm:$0xff] }
 0x1b7   : > { %v1113_v2 = vadd.f32 %v1112_v29, %v4902_v42  ;;  %v4905_v29 = vld [vmem:[#allocation39_spill] sm:$0xff]  ;;  %v4909_v42 = vld [vmem:[#allocation25_spill] sm:$0xff] }
 0x1b9   : > { %2987 = vmatmul.msk.f32.gmra.mxu1 %vm523_vm2, %v4895_v45  ;;  %v1525_v49 = vpop.f32.mrf.mxu3 }
 0x1ba   : > { %v1688_v30 = vpop.f32.mrf.mxu0  ;;  %v1577_v62 = vadd.f32 %v1525_v49, %v1421_v52  ;;  %3020 = vmatmul.msk.f32.gmra.mxu2 %vm523_vm2, %v3151_v6  ;;  %v4904_v52 = vld [vmem:[#allocation44_spill] sm:$0xff] }
 0x1bc   : > { %v4344_v10 = vadd.f32 %v1685_v7, %v1577_v62 }
 0x1bd   : > { %3088 = vmatmul.msk.f32.gmra.mxu0 %vm523_vm2, %v4898_v20  ;;  %v1372_v50 = vpop.f32.mrf.mxu2 }
 0x1be   : > { %v1115_v25 = vpop.f32.mrf.mxu1  ;;  %3054 = vmatmul.msk.f32.gmra.mxu3 %vm523_vm2, %v4900_v11  ;;  %v1422_v3 = vadd.f32 %v1372_v50, %v1110_v15 }
 0x1c1   : > { %2988 = vmatmul.msk.f32.gmra.mxu1 %vm523_vm2, %v4898_v20  ;;  %v1528_v12 = vpop.f32.mrf.mxu3  ;;  %v4906_v20 = vld [vmem:[#allocation22_spill] sm:$0xff] }
 0x1c2   : > { %v1691_v17 = vpop.f32.mrf.mxu0  ;;  %v1578_v60 = vadd.f32 %v1528_v12, %v1422_v3  ;;  %3021 = vmatmul.msk.f32.gmra.mxu2 %vm523_vm2, %v3152_v32  ;;  %v3154_v3 = vld [vmem:[#allocation2 + $0xa8] sm:$0xff]  ;;  %v4907_v12 = vld [vmem:[#allocation47_spill] sm:$0xff] }
 0x1c4   : > { %v4354_v7 = vadd.f32 %v1688_v30, %v1578_v60  ;;  %v1116_v30 = vadd.f32 %v1115_v25, %v4905_v29  ;;  %v4908_v25 = vld [vmem:[#allocation41_spill] sm:$0xff] }
 0x1c5   : > { %3089 = vmatmul.msk.f32.gmra.mxu0 %vm523_vm2, %v4901_v8  ;;  %v1375_v22 = vpop.f32.mrf.mxu2 }
 0x1c6   : > { %v1118_v33 = vpop.f32.mrf.mxu1  ;;  %3055 = vmatmul.msk.f32.gmra.mxu3 %vm523_vm2, %v4903_v58  ;;  %v1423_v45 = vadd.f32 %v1375_v22, %v1113_v2 }
 0x1c9   : > { %2989 = vmatmul.msk.f32.gmra.mxu1 %vm523_vm2, %v4901_v8  ;;  %v1531_v18 = vpop.f32.mrf.mxu3 }
 0x1ca   : > { %v1694_v1 = vpop.f32.mrf.mxu0  ;;  %v1579_v19 = vadd.f32 %v1531_v18, %v1423_v45  ;;  %3022 = vmatmul.msk.f32.gmra.mxu2 %vm523_vm2, %v3153_v54  ;;  %v3155_v18 = vld [vmem:[#allocation2 + $0xb0] sm:$0xff] }
 0x1cc   : > { %v4364_v49 = vadd.f32 %v1691_v17, %v1579_v19  ;;  %v1119_v17 = vadd.f32 %v1118_v33, %v4908_v25  ;;  %v4910_v19 = vld [vmem:[#allocation50_spill] sm:$0xff]  ;;  %v4911_v33 = vld [vmem:[#allocation43_spill] sm:$0xff] }
 0x1cd   : > { %3090 = vmatmul.msk.f32.gmra.mxu0 %vm523_vm2, %v4904_v52  ;;  %v1378_v62 = vpop.f32.mrf.mxu2 }
 0x1ce   : > { %v1121_v6 = vpop.f32.mrf.mxu1  ;;  %3056 = vmatmul.msk.f32.gmra.mxu3 %vm523_vm2, %v4906_v20  ;;  %v1424_v21 = vadd.f32 %v1378_v62, %v1116_v30  ;;  %v4912_v30 = vld [vmem:[#allocation31_spill] sm:$0xff] }
 0x1d1   : > { %2990 = vmatmul.msk.f32.gmra.mxu1 %vm523_vm2, %v4904_v52  ;;  %v1534_v50 = vpop.f32.mrf.mxu3 }
 0x1d2   : > { %v1697_v15 = vpop.f32.mrf.mxu0  ;;  %v1580_v11 = vadd.f32 %v1534_v50, %v1424_v21  ;;  %3023 = vmatmul.msk.f32.gmra.mxu2 %vm523_vm2, %v3154_v3  ;;  %v4913_v3 = vld [vmem:[#allocation53_spill] sm:$0xff] }
 0x1d4   : > { %v4374_v60 = vadd.f32 %v1694_v1, %v1580_v11  ;;  %v1122_v1 = vadd.f32 %v1121_v6, %v4911_v33  ;;  %v3156_v11 = vld [vmem:[#allocation2 + $0xc0] sm:$0xff] }
 0x1d5   : > { %3091 = vmatmul.msk.f32.gmra.mxu0 %vm523_vm2, %v4907_v12  ;;  %v1381_v32 = vpop.f32.mrf.mxu2  ;;  %v4914_v6 = vld [vmem:[#allocation45_spill] sm:$0xff] }
 0x1d6   : > { %v1124_v8 = vpop.f32.mrf.mxu1  ;;  %3057 = vmatmul.msk.f32.gmra.mxu3 %vm523_vm2, %v4909_v42  ;;  %v1425_v2 = vadd.f32 %v1381_v32, %v1119_v17  ;;  %v4915_v32 = vld [vmem:[#allocation4_spill] sm:$0xff] }
 0x1d9   : > { %2991 = vmatmul.msk.f32.gmra.mxu1 %vm523_vm2, %v4907_v12  ;;  %v1537_v58 = vpop.f32.mrf.mxu3 }
 0x1da   : > { %v1700_v22 = vpop.f32.mrf.mxu0  ;;  %v1581_v45 = vadd.f32 %v1537_v58, %v1425_v2  ;;  %3024 = vmatmul.msk.f32.gmra.mxu2 %vm523_vm2, %v3155_v18  ;;  %v3157_v18 = vld [vmem:[#allocation2 + $0xc8] sm:$0xff] }
 0x1dc   : > { %v4384_v54 = vadd.f32 %v1697_v15, %v1581_v45  ;;  %v1125_v15 = vadd.f32 %v1124_v8, %v4914_v6  ;;  %v4917_v8 = vld [vmem:[#allocation48_spill] sm:$0xff] }
 0x1dd   : > { %3092 = vmatmul.msk.f32.gmra.mxu0 %vm523_vm2, %v4910_v19  ;;  %v1384_v52 = vpop.f32.mrf.mxu2 }
 0x1de   : > { %v1127_v29 = vpop.f32.mrf.mxu1  ;;  %3058 = vmatmul.msk.f32.gmra.mxu3 %vm523_vm2, %v4912_v30  ;;  %v1426_v62 = vadd.f32 %v1384_v52, %v1122_v1  ;;  %v4918_v30 = vld [vmem:[#allocation9_spill] sm:$0xff] }
 0x1e1   : > { %2992 = vmatmul.msk.f32.gmra.mxu1 %vm523_vm2, %v4910_v19  ;;  %v1540_v21 = vpop.f32.mrf.mxu3  ;;  %v4916_v19 = vld [vmem:[#allocation55_spill] sm:$0xff] }
 0x1e2   : > { %v1703_v20 = vpop.f32.mrf.mxu0  ;;  %v1582_v50 = vadd.f32 %v1540_v21, %v1426_v62  ;;  %3025 = vmatmul.msk.f32.gmra.mxu2 %vm523_vm2, %v3156_v11 }
 0x1e4   : > { %v4394_v12 = vadd.f32 %v1700_v22, %v1582_v50  ;;  %v1128_v22 = vadd.f32 %v1127_v29, %v4917_v8  ;;  %v4919_v29 = vld [vmem:[#allocation51_spill] sm:$0xff] }
 0x1e5   : > { %3093 = vmatmul.msk.f32.gmra.mxu0 %vm523_vm2, %v4913_v3  ;;  %v1387_v25 = vpop.f32.mrf.mxu2 }
 0x1e6   : > { %v1130_v17 = vpop.f32.mrf.mxu1  ;;  %3059 = vmatmul.msk.f32.gmra.mxu3 %vm523_vm2, %v4915_v32  ;;  %v1427_v42 = vadd.f32 %v1387_v25, %v1125_v15  ;;  %v4920_v32 = vld [vmem:[#allocation15_spill] sm:$0xff] }
 0x1e9   : > { %2993 = vmatmul.msk.f32.gmra.mxu1 %vm523_vm2, %v4913_v3  ;;  %v1543_v58 = vpop.f32.mrf.mxu3  ;;  %v3158_v3 = vld [vmem:[#allocation2 + $0xd8] sm:$0xff] }
 0x1ea   : > { %v1706_v2 = vpop.f32.mrf.mxu0  ;;  %v1583_v45 = vadd.f32 %v1543_v58, %v1427_v42  ;;  %3026 = vmatmul.msk.f32.gmra.mxu2 %vm523_vm2, %v3157_v18 }
 0x1ec   : > { %v4404_v33 = vadd.f32 %v1703_v20, %v1583_v45  ;;  %v1131_v20 = vadd.f32 %v1130_v17, %v4919_v29  ;;  %v4921_v17 = vld [vmem:[#allocation54_spill] sm:$0xff] }
 0x1ed   : > { %3094 = vmatmul.msk.f32.gmra.mxu0 %vm523_vm2, %v4916_v19  ;;  %v1390_v1 = vpop.f32.mrf.mxu2 }
 0x1ee   : > { %v1133_v52 = vpop.f32.mrf.mxu1  ;;  %3060 = vmatmul.msk.f32.gmra.mxu3 %vm523_vm2, %v4918_v30  ;;  %v1428_v62 = vadd.f32 %v1390_v1, %v1128_v22 }
 0x1f1   : > { %2994 = vmatmul.msk.f32.gmra.mxu1 %vm523_vm2, %v4916_v19  ;;  %v1546_v50 = vpop.f32.mrf.mxu3  ;;  %v3159_v19 = vld [vmem:[#allocation2 + $0xe0] sm:$0xff] }
 0x1f2   : > { %v1709_v21 = vpop.f32.mrf.mxu0  ;;  %v1584_v11 = vadd.f32 %v1546_v50, %v1428_v62  ;;  %3027 = vmatmul.msk.f32.gmra.mxu2 %vm523_vm2, %v3158_v3 }
 0x1f4   : > { %v4414_v6 = vadd.f32 %v1706_v2, %v1584_v11  ;;  %v1134_v2 = vadd.f32 %v1133_v52, %v4921_v17  ;;  %v3160_v11 = vld [vmem:[#allocation2 + $0xf0] sm:$0xff] }
 0x1f5   : > { %3095 = vmatmul.msk.f32.gmra.mxu0 %vm523_vm2, %v4031_v9  ;;  %v1393_v15 = vpop.f32.mrf.mxu2 }
 0x1f6   : > { %v1778_v25 = vpop.f32.mrf.mxu1  ;;  %3061 = vmatmul.msk.f32.gmra.mxu3 %vm523_vm2, %v4920_v32  ;;  %v1429_v42 = vadd.f32 %v1393_v15, %v1131_v20  ;;  %v3161_v32 = vld [vmem:[#allocation2 + $0xf8] sm:$0xff] }
 0x1f7   : > { %v1874_v52 = vadd.f32 %v1778_v25, %v4026_v35 }
 0x1f9   : > { %2995 = vmatmul.msk.f32.gmra.mxu1 %vm523_vm2, %v4031_v9  ;;  %v1549_v45 = vpop.f32.mrf.mxu3 }
 0x1fa   : > { %v1712_v58 = vpop.f32.mrf.mxu0  ;;  %v1585_v18 = vadd.f32 %v1549_v45, %v1429_v42  ;;  %3028 = vmatmul.msk.f32.gmra.mxu2 %vm523_vm2, %v3159_v19  ;;  %v3162_v19 = vld [vmem:[#allocation2 + $0x108] sm:$0xff] }
 0x1fc   : > { %v4424_v8 = vadd.f32 %v1709_v21, %v1585_v18 }
 0x1fd   : > { %3096 = vmatmul.msk.f32.gmra.mxu0 %vm523_vm2, %v4046_v55  ;;  %v1396_v22 = vpop.f32.mrf.mxu2 }
 0x1fe   : > { %v1781_v1 = vpop.f32.mrf.mxu1  ;;  %3062 = vmatmul.msk.f32.gmra.mxu3 %vm523_vm2, %v3567_v59  ;;  %v1430_v30 = vadd.f32 %v1396_v22, %v1134_v2 }
 0x201   : > { %2996 = vmatmul.msk.f32.gmra.mxu1 %vm523_vm2, %v4046_v55  ;;  %v1552_v9 = vpop.f32.mrf.mxu3 }
 0x202   : > { %v2253_v62 = vpop.f32.mrf.mxu0  ;;  %v1586_v50 = vadd.f32 %v1552_v9, %v1430_v30  ;;  %3029 = vmatmul.msk.f32.gmra.mxu2 %vm523_vm2, %v3160_v11 }
 0x204   : > { %v4434_v21 = vadd.f32 %v1712_v58, %v1586_v50 }
 0x205   : > { %3097 = vmatmul.msk.f32.gmra.mxu0 %vm523_vm2, %v4062_v31  ;;  %v1934_v3 = vpop.f32.mrf.mxu2 }
 0x206   : > { %v1784_v59 = vpop.f32.mrf.mxu1  ;;  %3063 = vmatmul.msk.f32.gmra.mxu3 %vm523_vm2, %v3609_v39  ;;  %v2030_v29 = vadd.f32 %v1934_v3, %v1874_v52  ;;  %v1875_v39 = vadd.f32 %v1781_v1, %v4041_v36 }
 0x207   : > { %v1876_v17 = vadd.f32 %v1784_v59, %v4057_v26 }
 0x209   : > { %2997 = vmatmul.msk.f32.gmra.mxu1 %vm523_vm2, %v4062_v31  ;;  %v2094_v20 = vpop.f32.mrf.mxu3 }
 0x20a   : > { %v2256_v55 = vpop.f32.mrf.mxu0  ;;  %v2190_v15 = vadd.f32 %v2094_v20, %v2030_v29  ;;  %3030 = vmatmul.msk.f32.gmra.mxu2 %vm523_vm2, %v3161_v32  ;;  %v3163_v29 = vld [vmem:[#allocation2 + $0x110] sm:$0xff] }
 0x20c   : > { %v2349_v35 = vadd.f32 %v2253_v62, %v2190_v15 }
 0x20d   : > { %3098 = vmatmul.msk.f32.gmra.mxu0 %vm523_vm2, %v4077_v43  ;;  %v1937_v31 = vpop.f32.mrf.mxu2 }
 0x20e   : > { %v1787_v25 = vpop.f32.mrf.mxu1  ;;  %2382 = vst.msk [vmem:[%s4446_s26] sm:$0xff] %vm2381_vm6, %v2349_v35  ;;  %3064 = vmatmul.msk.f32.gmra.mxu3 %vm523_vm2, %v3653_v16  ;;  %v2031_v42 = vadd.f32 %v1937_v31, %v1875_v39  ;;  %v2485_v36 = vmul.f32 %v2349_v35, %v2349_v35  ;;  %v2414_v16 = vsel %vm2381_vm6, %v2349_v35, 0.0 }
 0x210   : > { %v2517_v50 = vsel %vm2381_vm6, %v2485_v36, 0.0  ;;  %v3164_v36 = vld [vmem:[#allocation2 + $0x120] sm:$0xff] }
 0x211   : > { %2998 = vmatmul.msk.f32.gmra.mxu1 %vm523_vm2, %v4077_v43  ;;  %v2097_v45 = vpop.f32.mrf.mxu3 }
 0x212   : > { %v2259_v58 = vpop.f32.mrf.mxu0  ;;  %v2191_v18 = vadd.f32 %v2097_v45, %v2031_v42  ;;  %3031 = vmatmul.msk.f32.gmra.mxu2 %vm523_vm2, %v3162_v19 }
 0x214   : > { %v2350_v2 = vadd.f32 %v2256_v55, %v2191_v18 }
 0x215   : > { %3099 = vmatmul.msk.f32.gmra.mxu0 %vm523_vm2, %v4093_v0  ;;  %v1940_v22 = vpop.f32.mrf.mxu2 }
 0x216   : > { %v1790_v1 = vpop.f32.mrf.mxu1  ;;  %2383 = vst.msk [vmem:[%s4446_s26 + $0x8] sm:$0xff] %vm2381_vm6, %v2350_v2  ;;  %v2415_v43 = vsel %vm2381_vm6, %v2350_v2, 0.0  ;;  %v2486_v30 = vmul.f32 %v2350_v2, %v2350_v2  ;;  %3065 = vmatmul.msk.f32.gmra.mxu3 %vm523_vm2, %v4859_v47  ;;  %v2032_v62 = vadd.f32 %v1940_v22, %v1876_v17  ;;  %v4922_v47 = vld [vmem:[#allocation32_spill] sm:$0xff]  ;;  %v4924_v17 = vld [vmem:[#allocation26_spill] sm:$0xff] }
 0x217   : > { %v2416_v9 = vadd.f32 %v2415_v43, %v2414_v16  ;;  %v1877_v55 = vadd.f32 %v1787_v25, %v4922_v47  ;;  %v1878_v2 = vadd.f32 %v1790_v1, %v4924_v17 }
 0x218   : > { %v2518_v26 = vsel %vm2381_vm6, %v2486_v30, 0.0 }
 0x219   : > { %2999 = vmatmul.msk.f32.gmra.mxu1 %vm523_vm2, %v4093_v0  ;;  %v2519_v52 = vadd.f32 %v2518_v26, %v2517_v50  ;;  %v2100_v3 = vpop.f32.mrf.mxu3  ;;  %v4923_v0 = vld [vmem:[#allocation35_spill] sm:$0xff] }
 0x21a   : > { %v2262_v11 = vpop.f32.mrf.mxu0  ;;  %v2192_v59 = vadd.f32 %v2100_v3, %v2032_v62  ;;  %3032 = vmatmul.msk.f32.gmra.mxu2 %vm523_vm2, %v3163_v29  ;;  %v4926_v29 = vld [vmem:[#allocation27_spill] sm:$0xff] }
 0x21c   : > { %v2351_v20 = vadd.f32 %v2259_v58, %v2192_v59  ;;  %v3165_v59 = vld [vmem:[#allocation2 + $0x128] sm:$0xff] }
 0x21d   : > { %3100 = vmatmul.msk.f32.gmra.mxu0 %vm523_vm2, %v4108_v51  ;;  %v1943_v15 = vpop.f32.mrf.mxu2 }
 0x21e   : > { %v1793_v32 = vpop.f32.mrf.mxu1  ;;  %2384 = vst.msk [vmem:[%s4446_s26 + $0x10] sm:$0xff] %vm2381_vm6, %v2351_v20  ;;  %v2417_v39 = vsel %vm2381_vm6, %v2351_v20, 0.0  ;;  %v2487_v35 = vmul.f32 %v2351_v20, %v2351_v20  ;;  %3066 = vmatmul.msk.f32.gmra.mxu3 %vm523_vm2, %v4923_v0  ;;  %v2033_v31 = vadd.f32 %v1943_v15, %v1877_v55 }
 0x21f   : > { %v2418_v42 = vadd.f32 %v2417_v39, %v2416_v9  ;;  %v1879_v47 = vadd.f32 %v1793_v32, %v4926_v29 }
 0x220   : > { %v2520_v45 = vsel %vm2381_vm6, %v2487_v35, 0.0 }
 0x221   : > { %3000 = vmatmul.msk.f32.gmra.mxu1 %vm523_vm2, %v4108_v51  ;;  %v2521_v25 = vadd.f32 %v2520_v45, %v2519_v52  ;;  %v2103_v58 = vpop.f32.mrf.mxu3  ;;  %v4925_v51 = vld [vmem:[#allocation8_spill] sm:$0xff] }
 0x222   : > { %v2265_v18 = vpop.f32.mrf.mxu0  ;;  %v2193_v19 = vadd.f32 %v2103_v58, %v2033_v31  ;;  %3033 = vmatmul.msk.f32.gmra.mxu2 %vm523_vm2, %v3164_v36  ;;  %v4927_v58 = vld [vmem:[#allocation11_spill] sm:$0xff] }
 0x224   : > { %v2352_v22 = vadd.f32 %v2262_v11, %v2193_v19  ;;  %v4928_v19 = vld [vmem:[#allocation33_spill] sm:$0xff] }
 0x225   : > { %3101 = vmatmul.msk.f32.gmra.mxu0 %vm523_vm2, %v4124_v24  ;;  %v1946_v16 = vpop.f32.mrf.mxu2 }
 0x226   : > { %v1796_v43 = vpop.f32.mrf.mxu1  ;;  %2385 = vst.msk [vmem:[%s4446_s26 + $0x18] sm:$0xff] %vm2381_vm6, %v2352_v22  ;;  %v2419_v30 = vsel %vm2381_vm6, %v2352_v22, 0.0  ;;  %v2488_v62 = vmul.f32 %v2352_v22, %v2352_v22  ;;  %3067 = vmatmul.msk.f32.gmra.mxu3 %vm523_vm2, %v4925_v51  ;;  %v2034_v9 = vadd.f32 %v1946_v16, %v1878_v2 }
 0x227   : > { %v2420_v50 = vadd.f32 %v2419_v30, %v2418_v42 }
 0x228   : > { %v2522_v26 = vsel %vm2381_vm6, %v2488_v62, 0.0 }
 0x229   : > { %3001 = vmatmul.msk.f32.gmra.mxu1 %vm523_vm2, %v4124_v24  ;;  %v2523_v1 = vadd.f32 %v2522_v26, %v2521_v25  ;;  %v2106_v11 = vpop.f32.mrf.mxu3  ;;  %v3166_v25 = vld [vmem:[#allocation2 + $0x138] sm:$0xff] }
 0x22a   : > { %v2268_v52 = vpop.f32.mrf.mxu0  ;;  %v2194_v3 = vadd.f32 %v2106_v11, %v2034_v9  ;;  %3034 = vmatmul.msk.f32.gmra.mxu2 %vm523_vm2, %v3165_v59 }
 0x22c   : > { %v2353_v55 = vadd.f32 %v2265_v18, %v2194_v3 }
 0x22d   : > { %3102 = vmatmul.msk.f32.gmra.mxu0 %vm523_vm2, %v4139_v37  ;;  %v1949_v20 = vpop.f32.mrf.mxu2 }
 0x22e   : > { %v1799_v15 = vpop.f32.mrf.mxu1  ;;  %2386 = vst.msk [vmem:[%s4446_s26 + $0x20] sm:$0xff] %vm2381_vm6, %v2353_v55  ;;  %v2421_v39 = vsel %vm2381_vm6, %v2353_v55, 0.0  ;;  %v2489_v35 = vmul.f32 %v2353_v55, %v2353_v55  ;;  %3068 = vmatmul.msk.f32.gmra.mxu3 %vm523_vm2, %v4869_v27  ;;  %v2035_v24 = vadd.f32 %v1949_v20, %v1879_v47  ;;  %v1880_v27 = vadd.f32 %v1796_v43, %v4928_v19  ;;  %v4931_v20 = vld [vmem:[#allocation19_spill] sm:$0xff] }
 0x22f   : > { %v2422_v0 = vadd.f32 %v2421_v39, %v2420_v50 }
 0x230   : > { %v2524_v31 = vsel %vm2381_vm6, %v2489_v35, 0.0 }
 0x231   : > { %3002 = vmatmul.msk.f32.gmra.mxu1 %vm523_vm2, %v4139_v37  ;;  %v2525_v32 = vadd.f32 %v2524_v31, %v2523_v1  ;;  %v2109_v45 = vpop.f32.mrf.mxu3  ;;  %v4929_v37 = vld [vmem:[#allocation16_spill] sm:$0xff]  ;;  %v4930_v1 = vld [vmem:[#allocation5_spill] sm:$0xff] }
 0x232   : > { %v2271_v42 = vpop.f32.mrf.mxu0  ;;  %v2195_v18 = vadd.f32 %v2109_v45, %v2035_v24  ;;  %3035 = vmatmul.msk.f32.gmra.mxu2 %vm523_vm2, %v3166_v25  ;;  %v1881_v11 = vadd.f32 %v1799_v15, %v4930_v1  ;;  %v4932_v45 = vld [vmem:[#allocation6_spill] sm:$0xff] }
 0x234   : > { %v2354_v36 = vadd.f32 %v2268_v52, %v2195_v18  ;;  %v3167_v52 = vld [vmem:[#allocation2 + $0x140] sm:$0xff] }
 0x235   : > { %3103 = vmatmul.msk.f32.gmra.mxu0 %vm523_vm2, %v4927_v58  ;;  %v1952_v17 = vpop.f32.mrf.mxu2 }
 0x236   : > { %v1802_v2 = vpop.f32.mrf.mxu1  ;;  %2387 = vst.msk [vmem:[%s4446_s26 + $0x28] sm:$0xff] %vm2381_vm6, %v2354_v36  ;;  %v2423_v22 = vsel %vm2381_vm6, %v2354_v36, 0.0  ;;  %v2490_v16 = vmul.f32 %v2354_v36, %v2354_v36  ;;  %3069 = vmatmul.msk.f32.gmra.mxu3 %vm523_vm2, %v4929_v37  ;;  %v2036_v30 = vadd.f32 %v1952_v17, %v1880_v27 }
 0x237   : > { %v2424_v62 = vadd.f32 %v2423_v22, %v2422_v0  ;;  %v1882_v18 = vadd.f32 %v1802_v2, %v4932_v45 }
 0x238   : > { %v2526_v51 = vsel %vm2381_vm6, %v2490_v16, 0.0 }
 0x239   : > { %3003 = vmatmul.msk.f32.gmra.mxu1 %vm523_vm2, %v4927_v58  ;;  %v2527_v43 = vadd.f32 %v2526_v51, %v2525_v32  ;;  %v2112_v50 = vpop.f32.mrf.mxu3  ;;  %v3168_v32 = vld [vmem:[#allocation2 + $0x150] sm:$0xff]  ;;  %v3169_v51 = vld [vmem:[#allocation2 + $0x158] sm:$0xff] }
 0x23a   : > { %v2274_v9 = vpop.f32.mrf.mxu0  ;;  %v2196_v26 = vadd.f32 %v2112_v50, %v2036_v30  ;;  %3036 = vmatmul.msk.f32.gmra.mxu2 %vm523_vm2, %v3167_v52 }
 0x23c   : > { %v2355_v3 = vadd.f32 %v2271_v42, %v2196_v26 }
 0x23d   : > { %3104 = vmatmul.msk.f32.gmra.mxu0 %vm523_vm2, %v4174_v34  ;;  %v1955_v59 = vpop.f32.mrf.mxu2 }
 0x23e   : > { %v1805_v29 = vpop.f32.mrf.mxu1  ;;  %2388 = vst.msk [vmem:[%s4446_s26 + $0x30] sm:$0xff] %vm2381_vm6, %v2355_v3  ;;  %v2425_v47 = vsel %vm2381_vm6, %v2355_v3, 0.0  ;;  %v2491_v55 = vmul.f32 %v2355_v3, %v2355_v3  ;;  %3070 = vmatmul.msk.f32.gmra.mxu3 %vm523_vm2, %v4931_v20  ;;  %v2037_v39 = vadd.f32 %v1955_v59, %v1881_v11 }
 0x23f   : > { %v2426_v35 = vadd.f32 %v2425_v47, %v2424_v62 }
 0x240   : > { %v2528_v24 = vsel %vm2381_vm6, %v2491_v55, 0.0 }
 0x241   : > { %3004 = vmatmul.msk.f32.gmra.mxu1 %vm523_vm2, %v4174_v34  ;;  %v2529_v15 = vadd.f32 %v2528_v24, %v2527_v43  ;;  %v2115_v31 = vpop.f32.mrf.mxu3  ;;  %v4933_v34 = vld [vmem:[#allocation23_spill] sm:$0xff]  ;;  %v3170_v24 = vld [vmem:[#allocation2 + $0x168] sm:$0xff] }
 0x242   : > { %v2277_v0 = vpop.f32.mrf.mxu0  ;;  %v2197_v42 = vadd.f32 %v2115_v31, %v2037_v39  ;;  %3037 = vmatmul.msk.f32.gmra.mxu2 %vm523_vm2, %v3168_v32  ;;  %v4935_v43 = vld [vmem:[#allocation7_spill] sm:$0xff] }
 0x243   : > { %v1883_v50 = vadd.f32 %v1805_v29, %v4935_v43 }
 0x244   : > { %v2356_v25 = vadd.f32 %v2274_v9, %v2197_v42  ;;  %v4934_v9 = vld [vmem:[#allocation17_spill] sm:$0xff] }
 0x245   : > { %3105 = vmatmul.msk.f32.gmra.mxu0 %vm523_vm2, %v4190_v56  ;;  %v1958_v58 = vpop.f32.mrf.mxu2 }
 0x246   : > { %v1808_v19 = vpop.f32.mrf.mxu1  ;;  %2389 = vst.msk [vmem:[%s4446_s26 + $0x38] sm:$0xff] %vm2381_vm6, %v2356_v25  ;;  %v2427_v27 = vsel %vm2381_vm6, %v2356_v25, 0.0  ;;  %v2492_v36 = vmul.f32 %v2356_v25, %v2356_v25  ;;  %3071 = vmatmul.msk.f32.gmra.mxu3 %vm523_vm2, %v4933_v34  ;;  %v2038_v17 = vadd.f32 %v1958_v58, %v1882_v18  ;;  %v4938_v25 = vld [vmem:[#allocation34_spill] sm:$0xff] }
 0x247   : > { %v2428_v22 = vadd.f32 %v2427_v27, %v2426_v35 }
 0x248   : > { %v2530_v16 = vsel %vm2381_vm6, %v2492_v36, 0.0 }
 0x249   : > { %3005 = vmatmul.msk.f32.gmra.mxu1 %vm523_vm2, %v4190_v56  ;;  %v2531_v2 = vadd.f32 %v2530_v16, %v2529_v15  ;;  %v2118_v30 = vpop.f32.mrf.mxu3  ;;  %v4936_v56 = vld [vmem:[#allocation28_spill] sm:$0xff]  ;;  %v3171_v16 = vld [vmem:[#allocation2 + $0x170] sm:$0xff] }
 0x24a   : > { %v2280_v37 = vpop.f32.mrf.mxu0  ;;  %v2198_v62 = vadd.f32 %v2118_v30, %v2038_v17  ;;  %3038 = vmatmul.msk.f32.gmra.mxu2 %vm523_vm2, %v3169_v51  ;;  %v4939_v30 = vld [vmem:[#allocation13_spill] sm:$0xff] }
 0x24c   : > { %v2357_v26 = vadd.f32 %v2277_v0, %v2198_v62  ;;  %v4937_v0 = vld [vmem:[#allocation12_spill] sm:$0xff] }
 0x24d   : > { %3106 = vmatmul.msk.f32.gmra.mxu0 %vm523_vm2, %v4934_v9  ;;  %v1961_v52 = vpop.f32.mrf.mxu2  ;;  %v1884_v15 = vadd.f32 %v1808_v19, %v4937_v0 }
 0x24e   : > { %v1811_v1 = vpop.f32.mrf.mxu1  ;;  %2390 = vst.msk [vmem:[%s4446_s26 + $0x40] sm:$0xff] %vm2381_vm6, %v2357_v26  ;;  %v2429_v11 = vsel %vm2381_vm6, %v2357_v26, 0.0  ;;  %v2493_v3 = vmul.f32 %v2357_v26, %v2357_v26  ;;  %3072 = vmatmul.msk.f32.gmra.mxu3 %vm523_vm2, %v4936_v56  ;;  %v2039_v59 = vadd.f32 %v1961_v52, %v1883_v50  ;;  %v4940_v26 = vld [vmem:[#allocation36_spill] sm:$0xff] }
 0x24f   : > { %v2430_v47 = vadd.f32 %v2429_v11, %v2428_v22  ;;  %v1885_v62 = vadd.f32 %v1811_v1, %v4939_v30 }
 0x250   : > { %v2532_v55 = vsel %vm2381_vm6, %v2493_v3, 0.0 }
 0x251   : > { %3006 = vmatmul.msk.f32.gmra.mxu1 %vm523_vm2, %v4934_v9  ;;  %v2533_v29 = vadd.f32 %v2532_v55, %v2531_v2  ;;  %v2121_v39 = vpop.f32.mrf.mxu3  ;;  %v1748_v2 = vrot.slane %v4209_v40, 2 }
 0x252   : > { %v2283_v20 = vpop.f32.mrf.mxu0  ;;  %v2199_v35 = vadd.f32 %v2121_v39, %v2039_v59  ;;  %3039 = vmatmul.msk.f32.gmra.mxu2 %vm523_vm2, %v3170_v24 }
 0x254   : > { %v2358_v31 = vadd.f32 %v2280_v37, %v2199_v35  ;;  %v1747_v37 = vrot.slane %v4215_v48, 2  ;;  %v1750_v35 = vrot.slane %v4234_v44, 2 }
 0x255   : > { %3107 = vmatmul.msk.f32.gmra.mxu0 %vm523_vm2, %v4227_v61  ;;  %v1964_v42 = vpop.f32.mrf.mxu2 }
 0x256   : > { %v1814_v32 = vpop.f32.mrf.mxu1  ;;  %2391 = vst.msk [vmem:[%s4446_s26 + $0x48] sm:$0xff] %vm2381_vm6, %v2358_v31  ;;  %v2431_v45 = vsel %vm2381_vm6, %v2358_v31, 0.0  ;;  %v2494_v18 = vmul.f32 %v2358_v31, %v2358_v31  ;;  %3073 = vmatmul.msk.f32.gmra.mxu3 %vm523_vm2, %v4938_v25  ;;  %v2040_v58 = vadd.f32 %v1964_v42, %v1884_v15  ;;  %v1749_v1 = vsel %vm1136_vm5, %v1747_v37, %v1748_v2 }
 0x257   : > { %v2432_v27 = vadd.f32 %v2431_v45, %v2430_v47  ;;  %v1751_v44 = vsel %vm1136_vm5, %v1748_v2, %v1750_v35 }
 0x258   : > { %v2534_v36 = vsel %vm2381_vm6, %v2494_v18, 0.0 }
 0x259   : > { %3007 = vmatmul.msk.f32.gmra.mxu1 %vm523_vm2, %v4227_v61  ;;  %v2535_v19 = vadd.f32 %v2534_v36, %v2533_v29  ;;  %v2124_v17 = vpop.f32.mrf.mxu3 }
 0x25a   : > { %v2286_v34 = vpop.f32.mrf.mxu0  ;;  %v2200_v22 = vadd.f32 %v2124_v17, %v2040_v58  ;;  %3040 = vmatmul.msk.f32.gmra.mxu2 %vm523_vm2, %v3171_v16  ;;  %v640_v58 = vld [vmem:[#allocation2 + $0x198] sm:$0xff] }
 0x25b   : > { %v2063_v30 = vrot.slane %v640_v58, 1 }
 0x25c   : > { %v2359_v51 = vadd.f32 %v2283_v20, %v2200_v22  ;;  %v4941_v20 = vld [vmem:[#allocation20_spill] sm:$0xff] }
 0x25d   : > { %3108 = vmatmul.msk.f32.gmra.mxu0 %vm523_vm2, %v4248_v63  ;;  %v1967_v9 = vpop.f32.mrf.mxu2  ;;  %v1886_v29 = vadd.f32 %v1814_v32, %v4941_v20 }
 0x25e   : > { %v1817_v43 = vpop.f32.mrf.mxu1  ;;  %2392 = vst.msk [vmem:[%s4446_s26 + $0x50] sm:$0xff] %vm2381_vm6, %v2359_v51  ;;  %v2433_v61 = vsel %vm2381_vm6, %v2359_v51, 0.0  ;;  %v2495_v50 = vmul.f32 %v2359_v51, %v2359_v51  ;;  %3074 = vmatmul.msk.f32.gmra.mxu3 %vm523_vm2, %v4940_v26  ;;  %v2041_v52 = vadd.f32 %v1967_v9, %v1885_v62 }
 0x25f   : > { %v2434_v11 = vadd.f32 %v2433_v61, %v2432_v27  ;;  %v641_v27 = vld [vmem:[#allocation2 + $0x1a0] sm:$0xff] }
 0x260   : > { %v2536_v3 = vsel %vm2381_vm6, %v2495_v50, 0.0  ;;  %v2064_v62 = vrot.slane %v641_v27, 1 }
 0x261   : > { %3008 = vmatmul.msk.f32.gmra.mxu1 %vm523_vm2, %v4248_v63  ;;  %v2537_v59 = vadd.f32 %v2536_v3, %v2535_v19  ;;  %v2127_v47 = vpop.f32.mrf.mxu3  ;;  %v2223_v19 = vrot.slane %v641_v27, 2 }
 0x262   : > { %v2289_v56 = vpop.f32.mrf.mxu0  ;;  %v2201_v55 = vadd.f32 %v2127_v47, %v2041_v52  ;;  %3041 = vmatmul.msk.f32.gmra.mxu2 %vm523_vm2, %v4215_v48  ;;  %v2065_v26 = vsel %vm692_vm3, %v2063_v30, %v2064_v62 }
 0x264   : > { %v2360_v39 = vadd.f32 %v2286_v34, %v2201_v55  ;;  %v2222_v34 = vrot.slane %v640_v58, 2 }
 0x265   : > { %3109 = vmatmul.msk.f32.gmra.mxu0 %vm523_vm2, %v1749_v1  ;;  %v1970_v24 = vpop.f32.mrf.mxu2 }
 0x266   : > { %v1820_v0 = vpop.f32.mrf.mxu1  ;;  %2393 = vst.msk [vmem:[%s4446_s26 + $0x58] sm:$0xff] %vm2381_vm6, %v2360_v39  ;;  %v2435_v63 = vsel %vm2381_vm6, %v2360_v39, 0.0  ;;  %v2496_v15 = vmul.f32 %v2360_v39, %v2360_v39  ;;  %3075 = vmatmul.msk.f32.gmra.mxu3 %vm523_vm2, %v4232_v5  ;;  %v2042_v31 = vadd.f32 %v1970_v24, %v1886_v29  ;;  %v1887_v5 = vadd.f32 %v1817_v43, %v4242_v53 }
 0x267   : > { %v2436_v42 = vadd.f32 %v2435_v63, %v2434_v11  ;;  %v2224_v9 = vsel %vm1136_vm5, %v2222_v34, %v2223_v19  ;;  %v1888_v52 = vadd.f32 %v1820_v0, %v4260_v23 }
 0x268   : > { %v2538_v48 = vsel %vm2381_vm6, %v2496_v15, 0.0 }
 0x269   : > { %3009 = vmatmul.msk.f32.gmra.mxu1 %vm523_vm2, %v1749_v1  ;;  %v2539_v32 = vadd.f32 %v2538_v48, %v2537_v59  ;;  %v2130_v18 = vpop.f32.mrf.mxu3 }
 0x26a   : > { %v2292_v45 = vpop.f32.mrf.mxu0  ;;  %v2202_v25 = vadd.f32 %v2130_v18, %v2042_v31  ;;  %3042 = vmatmul.msk.f32.gmra.mxu2 %vm523_vm2, %v4209_v40 }
 0x26c   : > { %v2361_v36 = vadd.f32 %v2289_v56, %v2202_v25 }
 0x26d   : > { %3110 = vmatmul.msk.f32.gmra.mxu0 %vm523_vm2, %v1751_v44  ;;  %v1973_v17 = vpop.f32.mrf.mxu2 }
 0x26e   : > { %v1823_v22 = vpop.f32.mrf.mxu1  ;;  %2394 = vst.msk [vmem:[%s4446_s26 + $0x60] sm:$0xff] %vm2381_vm6, %v2361_v36  ;;  %v2437_v16 = vsel %vm2381_vm6, %v2361_v36, 0.0  ;;  %v2497_v37 = vmul.f32 %v2361_v36, %v2361_v36  ;;  %3076 = vmatmul.msk.f32.gmra.mxu3 %vm523_vm2, %v4253_v14  ;;  %v2043_v40 = vadd.f32 %v1973_v17, %v1887_v5  ;;  %v642_v14 = vld [vmem:[#allocation2 + $0x1a8] sm:$0x3] }
 0x26f   : > { %v2438_v2 = vadd.f32 %v2437_v16, %v2436_v42  ;;  %v2225_v3 = vrot.slane %v642_v14, 2  ;;  %v2066_v29 = vrot.slane %v642_v14, 1  ;;  %v1889_v31 = vadd.f32 %v1823_v22, %v4271_v4 }
 0x270   : > { %v2540_v51 = vsel %vm2381_vm6, %v2497_v37, 0.0 }
 0x271   : > { %3010 = vmatmul.msk.f32.gmra.mxu1 %vm523_vm2, %v1751_v44  ;;  %v2541_v43 = vadd.f32 %v2540_v51, %v2539_v32  ;;  %v2133_v61 = vpop.f32.mrf.mxu3  ;;  %v2226_v23 = vsel %vm1136_vm5, %v2223_v19, %v2225_v3  ;;  %v2067_v15 = vsel %vm692_vm3, %v2064_v62, %v2066_v29 }
 0x272   : > { %v2295_v53 = vpop.f32.mrf.mxu0  ;;  %v2203_v50 = vadd.f32 %v2133_v61, %v2043_v40  ;;  %3043 = vmatmul.msk.f32.gmra.mxu2 %vm523_vm2, %v640_v58 }
 0x274   : > { %v2362_v11 = vadd.f32 %v2292_v45, %v2203_v50 }
 0x275   : > { %3111 = vmatmul.msk.f32.gmra.mxu0 %vm523_vm2, %v2224_v9  ;;  %v1976_v56 = vpop.f32.mrf.mxu2 }
 0x276   : > { %v1826_v1 = vpop.f32.mrf.mxu1  ;;  %2395 = vst.msk [vmem:[%s4446_s26 + $0x68] sm:$0xff] %vm2381_vm6, %v2362_v11  ;;  %v2439_v59 = vsel %vm2381_vm6, %v2362_v11, 0.0  ;;  %v2498_v47 = vmul.f32 %v2362_v11, %v2362_v11  ;;  %3077 = vmatmul.msk.f32.gmra.mxu3 %vm523_vm2, %v2065_v26  ;;  %v2044_v55 = vadd.f32 %v1976_v56, %v1888_v52 }
 0x277   : > { %v2440_v20 = vadd.f32 %v2439_v59, %v2438_v2  ;;  %v1890_v4 = vadd.f32 %v1826_v1, %v4282_v46 }
 0x278   : > { %v2542_v39 = vsel %vm2381_vm6, %v2498_v47, 0.0 }
 0x279   : > { %v2543_v24 = vadd.f32 %v2542_v39, %v2541_v43  ;;  %v2136_v0 = vpop.f32.mrf.mxu3 }
 0x27a   : > { %v2298_v35 = vpop.f32.mrf.mxu0  ;;  %v2204_v63 = vadd.f32 %v2136_v0, %v2044_v55  ;;  %3044 = vmatmul.msk.f32.gmra.mxu2 %vm523_vm2, %v641_v27 }
 0x27c   : > { %v2363_v42 = vadd.f32 %v2295_v53, %v2204_v63 }
 0x27d   : > { %3112 = vmatmul.msk.f32.gmra.mxu0 %vm523_vm2, %v2226_v23  ;;  %v1979_v48 = vpop.f32.mrf.mxu2 }
 0x27e   : > { %v1829_v45 = vpop.f32.mrf.mxu1  ;;  %2396 = vst.msk [vmem:[%s4446_s26 + $0x70] sm:$0xff] %vm2381_vm6, %v2363_v42  ;;  %v2441_v44 = vsel %vm2381_vm6, %v2363_v42, 0.0  ;;  %v2499_v32 = vmul.f32 %v2363_v42, %v2363_v42  ;;  %3078 = vmatmul.msk.f32.gmra.mxu3 %vm523_vm2, %v2067_v15  ;;  %v2045_v18 = vadd.f32 %v1979_v48, %v1889_v31 }
 0x27f   : > { %v2442_v25 = vadd.f32 %v2441_v44, %v2440_v20  ;;  %v1891_v43 = vadd.f32 %v1829_v45, %v4293_v38 }
 0x280   : > { %v2544_v58 = vsel %vm2381_vm6, %v2499_v32, 0.0 }
 0x281   : > { %v2545_v5 = vadd.f32 %v2544_v58, %v2543_v24  ;;  %v2139_v36 = vpop.f32.mrf.mxu3 }
 0x282   : > { %v2301_v27 = vpop.f32.mrf.mxu0  ;;  %v2205_v34 = vadd.f32 %v2139_v36, %v2045_v18 }
 0x284   : > { %v2364_v19 = vadd.f32 %v2298_v35, %v2205_v34 }
 0x285   : > { %v1982_v17 = vpop.f32.mrf.mxu2 }
 0x286   : > { %v1832_v22 = vpop.f32.mrf.mxu1  ;;  %2397 = vst.msk [vmem:[%s4446_s26 + $0x78] sm:$0xff] %vm2381_vm6, %v2364_v19  ;;  %v2443_v16 = vsel %vm2381_vm6, %v2364_v19, 0.0  ;;  %v2500_v37 = vmul.f32 %v2364_v19, %v2364_v19  ;;  %v2046_v40 = vadd.f32 %v1982_v17, %v1890_v4 }
 0x287   : > { %v2444_v2 = vadd.f32 %v2443_v16, %v2442_v25  ;;  %v1892_v55 = vadd.f32 %v1832_v22, %v4304_v13 }
 0x288   : > { %v2546_v30 = vsel %vm2381_vm6, %v2500_v37, 0.0 }
 0x289   : > { %v2547_v51 = vadd.f32 %v2546_v30, %v2545_v5  ;;  %v2142_v53 = vpop.f32.mrf.mxu3 }
 0x28a   : > { %v2304_v62 = vpop.f32.mrf.mxu0  ;;  %v2206_v9 = vadd.f32 %v2142_v53, %v2046_v40 }
 0x28c   : > { %v2365_v46 = vadd.f32 %v2301_v27, %v2206_v9 }
 0x28d   : > { %v1985_v61 = vpop.f32.mrf.mxu2 }
 0x28e   : > { %v1835_v50 = vpop.f32.mrf.mxu1  ;;  %2398 = vst.msk [vmem:[%s4446_s26 + $0x80] sm:$0xff] %vm2381_vm6, %v2365_v46  ;;  %v2445_v26 = vsel %vm2381_vm6, %v2365_v46, 0.0  ;;  %v2501_v14 = vmul.f32 %v2365_v46, %v2365_v46  ;;  %v2047_v52 = vadd.f32 %v1985_v61, %v1891_v43 }
 0x28f   : > { %v2446_v11 = vadd.f32 %v2445_v26, %v2444_v2  ;;  %v1893_v48 = vadd.f32 %v1835_v50, %v4314_v28 }
 0x290   : > { %v2548_v3 = vsel %vm2381_vm6, %v2501_v14, 0.0 }
 0x291   : > { %v2549_v1 = vadd.f32 %v2548_v3, %v2547_v51  ;;  %v2145_v59 = vpop.f32.mrf.mxu3 }
 0x292   : > { %v2307_v56 = vpop.f32.mrf.mxu0  ;;  %v2207_v47 = vadd.f32 %v2145_v59, %v2047_v52 }
 0x294   : > { %v2366_v38 = vadd.f32 %v2304_v62, %v2207_v47 }
 0x295   : > { %v1988_v20 = vpop.f32.mrf.mxu2 }
 0x296   : > { %v1838_v29 = vpop.f32.mrf.mxu1  ;;  %2399 = vst.msk [vmem:[%s4446_s26 + $0x88] sm:$0xff] %vm2381_vm6, %v2366_v38  ;;  %v2447_v39 = vsel %vm2381_vm6, %v2366_v38, 0.0  ;;  %v2502_v35 = vmul.f32 %v2366_v38, %v2366_v38  ;;  %v2048_v23 = vadd.f32 %v1988_v20, %v1892_v55 }
 0x297   : > { %v2448_v24 = vadd.f32 %v2447_v39, %v2446_v11  ;;  %v1894_v19 = vadd.f32 %v1838_v29, %v4324_v41 }
 0x298   : > { %v2550_v0 = vsel %vm2381_vm6, %v2502_v35, 0.0 }
 0x299   : > { %v2551_v15 = vadd.f32 %v2550_v0, %v2549_v1  ;;  %v2148_v31 = vpop.f32.mrf.mxu3 }
 0x29a   : > { %v2310_v63 = vpop.f32.mrf.mxu0  ;;  %v2208_v42 = vadd.f32 %v2148_v31, %v2048_v23 }
 0x29c   : > { %v2367_v13 = vadd.f32 %v2307_v56, %v2208_v42 }
 0x29d   : > { %v1991_v45 = vpop.f32.mrf.mxu2 }
 0x29e   : > { %v1841_v44 = vpop.f32.mrf.mxu1  ;;  %2400 = vst.msk [vmem:[%s4446_s26 + $0x90] sm:$0xff] %vm2381_vm6, %v2367_v13  ;;  %v2449_v32 = vsel %vm2381_vm6, %v2367_v13, 0.0  ;;  %v2503_v18 = vmul.f32 %v2367_v13, %v2367_v13  ;;  %v2049_v25 = vadd.f32 %v1991_v45, %v1893_v48 }
 0x29f   : > { %v2450_v58 = vadd.f32 %v2449_v32, %v2448_v24  ;;  %v1895_v43 = vadd.f32 %v1841_v44, %v4334_v57 }
 0x2a0   : > { %v2552_v27 = vsel %vm2381_vm6, %v2503_v18, 0.0 }
 0x2a1   : > { %v2553_v36 = vadd.f32 %v2552_v27, %v2551_v15  ;;  %v2151_v34 = vpop.f32.mrf.mxu3 }
 0x2a2   : > { %v2313_v5 = vpop.f32.mrf.mxu0  ;;  %v2209_v4 = vadd.f32 %v2151_v34, %v2049_v25 }
 0x2a4   : > { %v2368_v28 = vadd.f32 %v2310_v63, %v2209_v4 }
 0x2a5   : > { %v1994_v17 = vpop.f32.mrf.mxu2 }
 0x2a6   : > { %v1844_v22 = vpop.f32.mrf.mxu1  ;;  %2401 = vst.msk [vmem:[%s4446_s26 + $0x98] sm:$0xff] %vm2381_vm6, %v2368_v28  ;;  %v2451_v16 = vsel %vm2381_vm6, %v2368_v28, 0.0  ;;  %v2504_v37 = vmul.f32 %v2368_v28, %v2368_v28  ;;  %v2050_v40 = vadd.f32 %v1994_v17, %v1894_v19 }
 0x2a7   : > { %v2452_v2 = vadd.f32 %v2451_v16, %v2450_v58  ;;  %v1896_v47 = vadd.f32 %v1844_v22, %v4344_v10 }
 0x2a8   : > { %v2554_v30 = vsel %vm2381_vm6, %v2504_v37, 0.0 }
 0x2a9   : > { %v2555_v51 = vadd.f32 %v2554_v30, %v2553_v36  ;;  %v2154_v53 = vpop.f32.mrf.mxu3 }
 0x2aa   : > { %v2316_v62 = vpop.f32.mrf.mxu0  ;;  %v2210_v9 = vadd.f32 %v2154_v53, %v2050_v40 }
 0x2ac   : > { %v2369_v41 = vadd.f32 %v2313_v5, %v2210_v9 }
 0x2ad   : > { %v1997_v46 = vpop.f32.mrf.mxu2 }
 0x2ae   : > { %v1847_v61 = vpop.f32.mrf.mxu1  ;;  %2402 = vst.msk [vmem:[%s4446_s26 + $0xa0] sm:$0xff] %vm2381_vm6, %v2369_v41  ;;  %v2453_v50 = vsel %vm2381_vm6, %v2369_v41, 0.0  ;;  %v2505_v26 = vmul.f32 %v2369_v41, %v2369_v41  ;;  %v2051_v14 = vadd.f32 %v1997_v46, %v1895_v43 }
 0x2af   : > { %v2454_v52 = vadd.f32 %v2453_v50, %v2452_v2  ;;  %v1897_v31 = vadd.f32 %v1847_v61, %v4354_v7 }
 0x2b0   : > { %v2556_v11 = vsel %vm2381_vm6, %v2505_v26, 0.0 }
 0x2b1   : > { %v2557_v56 = vadd.f32 %v2556_v11, %v2555_v51  ;;  %v2157_v1 = vpop.f32.mrf.mxu3 }
 0x2b2   : > { %v2319_v3 = vpop.f32.mrf.mxu0  ;;  %v2211_v59 = vadd.f32 %v2157_v1, %v2051_v14 }
 0x2b4   : > { %v2370_v57 = vadd.f32 %v2316_v62, %v2211_v59 }
 0x2b5   : > { %v2000_v55 = vpop.f32.mrf.mxu2 }
 0x2b6   : > { %v1850_v38 = vpop.f32.mrf.mxu1  ;;  %2403 = vst.msk [vmem:[%s4446_s26 + $0xa8] sm:$0xff] %vm2381_vm6, %v2370_v57  ;;  %v2455_v20 = vsel %vm2381_vm6, %v2370_v57, 0.0  ;;  %v2506_v29 = vmul.f32 %v2370_v57, %v2370_v57  ;;  %v2052_v39 = vadd.f32 %v2000_v55, %v1896_v47 }
 0x2b7   : > { %v2456_v35 = vadd.f32 %v2455_v20, %v2454_v52  ;;  %v1898_v36 = vadd.f32 %v1850_v38, %v4364_v49 }
 0x2b8   : > { %v2558_v23 = vsel %vm2381_vm6, %v2506_v29, 0.0 }
 0x2b9   : > { %v2559_v0 = vadd.f32 %v2558_v23, %v2557_v56  ;;  %v2160_v63 = vpop.f32.mrf.mxu3 }
 0x2ba   : > { %v2322_v24 = vpop.f32.mrf.mxu0  ;;  %v2212_v15 = vadd.f32 %v2160_v63, %v2052_v39 }
 0x2bc   : > { %v2371_v10 = vadd.f32 %v2319_v3, %v2212_v15 }
 0x2bd   : > { %v2003_v42 = vpop.f32.mrf.mxu2 }
 0x2be   : > { %v1853_v48 = vpop.f32.mrf.mxu1  ;;  %2404 = vst.msk [vmem:[%s4446_s26 + $0xb0] sm:$0xff] %vm2381_vm6, %v2371_v10  ;;  %v2457_v13 = vsel %vm2381_vm6, %v2371_v10, 0.0  ;;  %v2507_v45 = vmul.f32 %v2371_v10, %v2371_v10  ;;  %v2053_v44 = vadd.f32 %v2003_v42, %v1897_v31 }
 0x2bf   : > { %v2458_v32 = vadd.f32 %v2457_v13, %v2456_v35  ;;  %v1899_v62 = vadd.f32 %v1853_v48, %v4374_v60 }
 0x2c0   : > { %v2560_v18 = vsel %vm2381_vm6, %v2507_v45, 0.0 }
 0x2c1   : > { %v2561_v58 = vadd.f32 %v2560_v18, %v2559_v0  ;;  %v2163_v27 = vpop.f32.mrf.mxu3 }
 0x2c2   : > { %v2325_v25 = vpop.f32.mrf.mxu0  ;;  %v2213_v5 = vadd.f32 %v2163_v27, %v2053_v44 }
 0x2c4   : > { %v2372_v7 = vadd.f32 %v2322_v24, %v2213_v5 }
 0x2c5   : > { %v2006_v34 = vpop.f32.mrf.mxu2 }
 0x2c6   : > { %2405 = vst.msk [vmem:[%s4446_s26 + $0xb8] sm:$0xff] %vm2381_vm6, %v2372_v7  ;;  %v2459_v4 = vsel %vm2381_vm6, %v2372_v7, 0.0  ;;  %v2508_v19 = vmul.f32 %v2372_v7, %v2372_v7  ;;  %v2054_v28 = vadd.f32 %v2006_v34, %v1898_v36  ;;  %v1856_v22 = vpop.f32.mrf.mxu1 }
 0x2c7   : > { %v2460_v17 = vadd.f32 %v2459_v4, %v2458_v32  ;;  %v1900_v11 = vadd.f32 %v1856_v22, %v4384_v54 }
 0x2c8   : > { %v2562_v16 = vsel %vm2381_vm6, %v2508_v19, 0.0 }
 0x2c9   : > { %v2563_v40 = vadd.f32 %v2562_v16, %v2561_v58  ;;  %v2166_v2 = vpop.f32.mrf.mxu3 }
 0x2ca   : > { %v2328_v37 = vpop.f32.mrf.mxu0  ;;  %v2214_v30 = vadd.f32 %v2166_v2, %v2054_v28 }
 0x2cc   : > { %v2373_v49 = vadd.f32 %v2325_v25, %v2214_v30 }
 0x2cd   : > { %v2009_v51 = vpop.f32.mrf.mxu2 }
 0x2ce   : > { %2406 = vst.msk [vmem:[%s4446_s26 + $0xc0] sm:$0xff] %vm2381_vm6, %v2373_v49  ;;  %v2461_v53 = vsel %vm2381_vm6, %v2373_v49, 0.0  ;;  %v2509_v9 = vmul.f32 %v2373_v49, %v2373_v49  ;;  %v2055_v43 = vadd.f32 %v2009_v51, %v1899_v62  ;;  %v1859_v14 = vpop.f32.mrf.mxu1 }
 0x2cf   : > { %v2462_v41 = vadd.f32 %v2461_v53, %v2460_v17  ;;  %v1901_v35 = vadd.f32 %v1859_v14, %v4394_v12 }
 0x2d0   : > { %v2564_v46 = vsel %vm2381_vm6, %v2509_v9, 0.0 }
 0x2d1   : > { %v2565_v50 = vadd.f32 %v2564_v46, %v2563_v40  ;;  %v2169_v26 = vpop.f32.mrf.mxu3 }
 0x2d2   : > { %v2331_v61 = vpop.f32.mrf.mxu0  ;;  %v2215_v52 = vadd.f32 %v2169_v26, %v2055_v43 }
 0x2d4   : > { %v2374_v60 = vadd.f32 %v2328_v37, %v2215_v52 }
 0x2d5   : > { %v2012_v3 = vpop.f32.mrf.mxu2 }
 0x2d6   : > { %2407 = vst.msk [vmem:[%s4446_s26 + $0xc8] sm:$0xff] %vm2381_vm6, %v2374_v60  ;;  %v2463_v56 = vsel %vm2381_vm6, %v2374_v60, 0.0  ;;  %v2510_v1 = vmul.f32 %v2374_v60, %v2374_v60  ;;  %v2056_v59 = vadd.f32 %v2012_v3, %v1900_v11  ;;  %v1862_v39 = vpop.f32.mrf.mxu1 }
 0x2d7   : > { %v2464_v47 = vadd.f32 %v2463_v56, %v2462_v41  ;;  %v1902_v45 = vadd.f32 %v1862_v39, %v4404_v33 }
 0x2d8   : > { %v2566_v57 = vsel %vm2381_vm6, %v2510_v1, 0.0 }
 0x2d9   : > { %v2567_v55 = vadd.f32 %v2566_v57, %v2565_v50  ;;  %v2172_v38 = vpop.f32.mrf.mxu3 }
 0x2da   : > { %v2334_v20 = vpop.f32.mrf.mxu0  ;;  %v2216_v29 = vadd.f32 %v2172_v38, %v2056_v59 }
 0x2dc   : > { %v2375_v54 = vadd.f32 %v2331_v61, %v2216_v29 }
 0x2dd   : > { %v2015_v23 = vpop.f32.mrf.mxu2 }
 0x2de   : > { %2408 = vst.msk [vmem:[%s4446_s26 + $0xd0] sm:$0xff] %vm2381_vm6, %v2375_v54  ;;  %v2465_v24 = vsel %vm2381_vm6, %v2375_v54, 0.0  ;;  %v2511_v0 = vmul.f32 %v2375_v54, %v2375_v54  ;;  %v2057_v63 = vadd.f32 %v2015_v23, %v1901_v35  ;;  %v1865_v32 = vpop.f32.mrf.mxu1 }
 0x2df   : > { %v2466_v15 = vadd.f32 %v2465_v24, %v2464_v47  ;;  %v1903_v4 = vadd.f32 %v1865_v32, %v4414_v6 }
 0x2e0   : > { %v2568_v31 = vsel %vm2381_vm6, %v2511_v0, 0.0 }
 0x2e1   : > { %v2569_v10 = vadd.f32 %v2568_v31, %v2567_v55  ;;  %v2175_v42 = vpop.f32.mrf.mxu3 }
 0x2e2   : > { %v2217_v48 = vadd.f32 %v2175_v42, %v2057_v63  ;;  %v2337_v13 = vpop.f32.mrf.mxu0 }
 0x2e4   : > { %v2376_v44 = vadd.f32 %v2334_v20, %v2217_v48 }
 0x2e5   : > { %v2018_v12 = vpop.f32.mrf.mxu2 }
 0x2e6   : > { %2409 = vst.msk [vmem:[%s4446_s26 + $0xd8] sm:$0xff] %vm2381_vm6, %v2376_v44  ;;  %v2467_v18 = vsel %vm2381_vm6, %v2376_v44, 0.0  ;;  %v2512_v25 = vmul.f32 %v2376_v44, %v2376_v44  ;;  %v2058_v58 = vadd.f32 %v2018_v12, %v1902_v45  ;;  %v1868_v40 = vpop.f32.mrf.mxu1 }
 0x2e7   : > { %v2468_v27 = vadd.f32 %v2467_v18, %v2466_v15  ;;  %v1904_v51 = vadd.f32 %v1868_v40, %v4424_v8 }
 0x2e8   : > { %v2570_v5 = vsel %vm2381_vm6, %v2512_v25, 0.0 }
 0x2e9   : > { %v2571_v36 = vadd.f32 %v2570_v5, %v2569_v10  ;;  %v2178_v7 = vpop.f32.mrf.mxu3 }
 0x2ea   : > { %v2218_v34 = vadd.f32 %v2178_v7, %v2058_v58  ;;  %v2340_v28 = vpop.f32.mrf.mxu0 }
 0x2ec   : > { %v2377_v19 = vadd.f32 %v2337_v13, %v2218_v34 }
 0x2ed   : > { %v2021_v33 = vpop.f32.mrf.mxu2 }
 0x2ee   : > { %2410 = vst.msk [vmem:[%s4446_s26 + $0xe0] sm:$0xff] %vm2381_vm6, %v2377_v19  ;;  %v2469_v17 = vsel %vm2381_vm6, %v2377_v19, 0.0  ;;  %v2513_v22 = vmul.f32 %v2377_v19, %v2377_v19  ;;  %v2059_v16 = vadd.f32 %v2021_v33, %v1903_v4  ;;  %v1871_v14 = vpop.f32.mrf.mxu1 }
 0x2ef   : > { %v2470_v37 = vadd.f32 %v2469_v17, %v2468_v27  ;;  %v1905_v8 = vadd.f32 %v1871_v14, %v4434_v21 }
 0x2f0   : > { %v2572_v2 = vsel %vm2381_vm6, %v2513_v22, 0.0 }
 0x2f1   : > { %v2573_v30 = vadd.f32 %v2572_v2, %v2571_v36  ;;  %v2181_v62 = vpop.f32.mrf.mxu3 }
 0x2f2   : > { %v2219_v49 = vadd.f32 %v2181_v62, %v2059_v16  ;;  %v2343_v61 = vpop.f32.mrf.mxu0 }
 0x2f4   : > { %v2378_v6 = vadd.f32 %v2340_v28, %v2219_v49 }
 0x2f5   : > { %v2024_v53 = vpop.f32.mrf.mxu2 }
 0x2f6   : > { %2411 = vst.msk [vmem:[%s4446_s26 + $0xe8] sm:$0xff] %vm2381_vm6, %v2378_v6  ;;  %v2471_v9 = vsel %vm2381_vm6, %v2378_v6, 0.0  ;;  %v2514_v43 = vmul.f32 %v2378_v6, %v2378_v6  ;;  %v2060_v41 = vadd.f32 %v2024_v53, %v1904_v51 }
 0x2f7   : > { %v2472_v46 = vadd.f32 %v2471_v9, %v2470_v37 }
 0x2f8   : > { %v2574_v50 = vsel %vm2381_vm6, %v2514_v43, 0.0 }
 0x2f9   : > { %v2575_v26 = vadd.f32 %v2574_v50, %v2573_v30  ;;  %v2184_v52 = vpop.f32.mrf.mxu3 }
 0x2fa   : > { %v2220_v11 = vadd.f32 %v2184_v52, %v2060_v41  ;;  %v2346_v20 = vpop.f32.mrf.mxu0 }
 0x2fc   : > { %v2379_v60 = vadd.f32 %v2343_v61, %v2220_v11 }
 0x2fd   : > { %v2027_v3 = vpop.f32.mrf.mxu2 }
 0x2fe   : > { %2412 = vst.msk [vmem:[%s4446_s26 + $0xf0] sm:$0xff] %vm2381_vm6, %v2379_v60  ;;  %v2473_v56 = vsel %vm2381_vm6, %v2379_v60, 0.0  ;;  %v2515_v1 = vmul.f32 %v2379_v60, %v2379_v60  ;;  %v2061_v59 = vadd.f32 %v2027_v3, %v1905_v8 }
 0x2ff   : > { %v2474_v47 = vadd.f32 %v2473_v56, %v2472_v46 }
 0x300   : > { %v2576_v57 = vsel %vm2381_vm6, %v2515_v1, 0.0 }
 0x301   : > { %v2577_v55 = vadd.f32 %v2576_v57, %v2575_v26  ;;  %v2187_v38 = vpop.f32.mrf.mxu3 }
 0x302   : > { %v2221_v29 = vadd.f32 %v2187_v38, %v2061_v59 }
 0x304   : > { %v2380_v39 = vadd.f32 %v2346_v20, %v2221_v29 }
 0x306   : > { %2413 = vst.msk [vmem:[%s4446_s26 + $0xf8] sm:$0xff] %vm2381_vm6, %v2380_v39  ;;  %v2475_v21 = vsel %vm2381_vm6, %v2380_v39, 0.0  ;;  %v2516_v35 = vmul.f32 %v2380_v39, %v2380_v39 }
 0x307   : > { %v2476_v54 = vadd.f32 %v2475_v21, %v2474_v47 }
 0x308   : > { %v2578_v23 = vsel %vm2381_vm6, %v2516_v35, 0.0 }
 0x309   : > { %v2477_v24 = vrot.slane %v2476_v54, 4  ;;  %v2579_v0 = vadd.f32 %v2578_v23, %v2577_v55 }
 0x30b   : > { %v2478_v63 = vadd.f32 %v2477_v24, %v2476_v54  ;;  %v2580_v15 = vrot.slane %v2579_v0, 4 }
 0x30d   : > { %v2479_v31 = vrot.slane %v2478_v63, 2  ;;  %v2581_v10 = vadd.f32 %v2580_v15, %v2579_v0 }
 0x30f   : > { %v2480_v42 = vadd.f32 %v2479_v31, %v2478_v63  ;;  %v2582_v48 = vrot.slane %v2581_v10, 2 }
 0x311   : > { %v2481_v13 = vrot.slane %v2480_v42, 1  ;;  %v2583_v45 = vadd.f32 %v2582_v48, %v2581_v10 }
 0x313   : > { %v2482_v44 = vadd.f32 %v2481_v13, %v2480_v42  ;;  %v2584_v12 = vrot.slane %v2583_v45, 1 }
 0x315   : > { %2484 = vst.msk [vmem:[%s446_s28] sm:$0x1] %vm2483_vm7, %v2482_v44  ;;  %v2585_v32 = vadd.f32 %v2584_v12, %v2583_v45 }
 0x317   : > { %2586 = vst.msk [vmem:[%s452_s7] sm:$0x1] %vm2483_vm7, %v2585_v32 }
 0x318 PF: > { %s17_s1 = sadd.s32 1, %s3194_s1   ;;  %s4942_s21 = smov %s3190_s22 }
 0x319   : > { %p14_p5 = scmp.ge.s32.totalorder %s17_s1, 4   ;;  %s4943_s22 = smov %s4945_s2 }
 0x31b   :  { %16 = sbr.rel (!%p14_p5) target bundleno = 2 (0x2), region = 123 }

// kernel: unet_conv2_forward.4
= control target key start
LH: loop header
LB: loop body
LE: loop exit
PB: predicated region body
PF: predicated region fallthrough
CT: control target
= control target key end

     0   :  { %s3393_s26 = smov 0   ;;  %s3395_s2 = smov 0   ;;  %s4972_s0 = inlined_call_operand.vmem [shape: f32[2,16,16,8], index: 0, kind: input, shape index: {}, may-alias: {0,1,2}]   ;;  %s4973_s1 = inlined_call_operand.vmem [shape: f32[2,16,16,8], index: 1, kind: input, shape index: {}, may-alias: {0,1,2}]   ;;  %s4974_s2 = inlined_call_operand.vmem [shape: f32[2,16,16,8], index: 2, kind: input, shape index: {}, may-alias: {0,1,2}]   ;;  %s4975_s3 = inlined_call_operand.vmem [shape: f32[9,8,8], index: 3, kind: input, shape index: {}]   ;;  %s4976_s4 = inlined_call_operand.vmem [shape: f32[1,8], index: 4, kind: input, shape index: {}]   ;;  %s4977_s5 = inlined_call_operand.vmem [shape: f32[1,8], index: 5, kind: input, shape index: {}]   ;;  %s4978_s6 = inlined_call_operand.vmem [shape: f32[2,16,16,8], index: 6, kind: output, shape index: {0}]   ;;  %s4979_s7 = inlined_call_operand.vmem [shape: f32[2,1,1,8], index: 7, kind: output, shape index: {1}]   ;;  %s4980_s8 = inlined_call_operand.vmem [shape: f32[2,1,1,8], index: 8, kind: output, shape index: {2}]  }
   0x1   :  { %s3397_s27 = smov 0  }
   0x2 LB: > { %s31_s28 = sadd.s32 1, %s3341_s2  ;;  %p2955_p0 = scmp.ge.s32.totalorder %s3345_s27, 1  ;;  %s3345_s27 = sphi %s3397_s27, %s19_s27   ;;  %s3341_s2 = sphi %s3395_s2, %s5191_s2   ;;  %s3337_s26 = sphi %s3393_s26, %s5190_s26  }
   0x3   : > { %p33_p1 = scmp.ge.s32.totalorder %s31_s28, 2  ;;  %p357_p2 = scmp.lt.s32.totalorder %s3345_s27, 3 }
   0x5   : > { %s5193_s28 = smov (%p33_p1, %s31_s28), 0  ;;  %p358_p3 = pnand %p2955_p0, %p357_p2 }
   0x7   : > { %361 = sbr.rel (%p358_p3) target bundleno = 795 (0x31b), region = 44 }
   0xc   : > { %v2964_v0 = vld [vmem:[%s4975_s3 + $0x8] sm:$0xff]  ;;  %p440_p4 = scmp.lt.s32.totalorder %s3337_s26, 1  ;;  %vm507_vm0 = vcmask 57344   ;;  %v3347_v1 = vmov 0.0   ;;  %v3421_v2 = vld [vmem:[%s4976_s4] ss:$0 sm:$0xff] }
   0xd   : > { %3267 = vmatpush.msra.mxu1 %v2964_v0  ;;  %3268 = vmatpush.msra.mxu2 %v2964_v0  ;;  %512 = vst.msk [vmem:[#allocation2 + $0x60] sm:$0x1] %vm507_vm0, %v3347_v1  ;;  %v3438_v3 = vld [vmem:[%s4977_s5] ss:$0 sm:$0xff]  ;;  %vm681_vm1 = vcmask 64512   ;;  %vm878_vm2 = vcmask 1046528  }
   0xe   : > { %s5195_s26 = smov (!%p440_p4, %s3337_s26), 1  ;;  %3269 = vmatpush.msra.mxu3 %v2964_v0  ;;  %1040 = vmatpush.msra.mxu0 %v2964_v0  ;;  %508 = vst.msk [vmem:[#allocation2] sm:$0x1] %vm507_vm0, %v3347_v1  ;;  %v3029_v16 = vld [vmem:[%s4975_s3 + $0x10] sm:$0xff]  ;;  %v3062_v18 = vld [vmem:[%s4975_s3 + $0x18] sm:$0xff]  ;;  %v829_v19 = vld [vmem:[%s4975_s3] sm:$0xff] }
   0xf   : > { %s3262_s11 = sshll.u32 %s5195_s26, 8  ;;  %509 = vst.msk [vmem:[#allocation2 + $0x18] sm:$0x1] %vm507_vm0, %v3347_v1  ;;  %1477 = vmatpush.msrb.mxu2 %v3029_v16  ;;  %1217 = vmatpush.msrb.mxu1 %v829_v19  ;;  %v3095_v31 = vld [vmem:[%s4975_s3 + $0x20] sm:$0xff]  ;;  %vm742_vm3 = vcmask 58368   ;;  %vm1315_vm4 = vcmask 1045504   ;;  %s500_s22 = scalar_lea.vmem %s4979_s7, %s5195_s26 }
  0x10   : > { %s3433_s14 = scalar_lea.vmem %s4972_s0, %s3262_s11  ;;  %510 = vst.msk [vmem:[#allocation2 + $0x30] sm:$0x1] %vm507_vm0, %v3347_v1  ;;  %1630 = vmatpush.msrb.mxu3 %v3062_v18  ;;  %1787 = vmatpush.msrb.mxu0 %v3095_v31  ;;  %s4689_s20 = scalar_lea.vmem %s4978_s6, %s3262_s11 }
  0x11   : > { %v550_v4 = vld [vmem:[%s3433_s14 + $0x30] sm:$0xff]  ;;  %v551_v5 = vld [vmem:[%s3433_s14 + $0x38] sm:$0xff]  ;;  %511 = vst.msk [vmem:[#allocation2 + $0x48] sm:$0x1] %vm507_vm0, %v3347_v1  ;;  %v552_v27 = vld [vmem:[%s3433_s14 + $0x40] sm:$0xff]  ;;  %s506_s25 = scalar_lea.vmem %s4980_s8, %s5195_s26 }
  0x12   : > { %v586_v6 = vmul.f32 %v3421_v2, %v550_v4  ;;  %v587_v7 = vmul.f32 %v3421_v2, %v551_v5  ;;  %513 = vst.msk [vmem:[#allocation2 + $0x78] sm:$0x1] %vm507_vm0, %v3347_v1  ;;  %v558_v20 = vld [vmem:[%s3433_s14 + $0x70] sm:$0xff]  ;;  %v559_v21 = vld [vmem:[%s3433_s14 + $0x78] sm:$0xff]  ;;  %v553_v32 = vld [vmem:[%s3433_s14 + $0x48] sm:$0xff]  ;;  %v588_v37 = vmul.f32 %v3421_v2, %v552_v27 }
  0x13   : > { %514 = vst.msk [vmem:[#allocation2 + $0x90] sm:$0x1] %vm507_vm0, %v3347_v1  ;;  %v594_v22 = vmul.f32 %v3421_v2, %v558_v20  ;;  %v595_v23 = vmul.f32 %v3421_v2, %v559_v21  ;;  %v566_v24 = vld [vmem:[%s3433_s14 + $0xb0] sm:$0xff]  ;;  %v567_v25 = vld [vmem:[%s3433_s14 + $0xb8] sm:$0xff]  ;;  %v560_v35 = vld [vmem:[%s3433_s14 + $0x80] sm:$0xff]  ;;  %v589_v39 = vmul.f32 %v3421_v2, %v553_v32 }
  0x14   : > { %v622_v8 = vadd.f32 %v3438_v3, %v586_v6  ;;  %v623_v9 = vadd.f32 %v3438_v3, %v587_v7  ;;  %515 = vst.msk [vmem:[#allocation2 + $0xa8] sm:$0x1] %vm507_vm0, %v3347_v1  ;;  %v602_v29 = vmul.f32 %v3421_v2, %v566_v24  ;;  %v603_v34 = vmul.f32 %v3421_v2, %v567_v25  ;;  %v561_v38 = vld [vmem:[%s3433_s14 + $0x88] sm:$0xff]  ;;  %v568_v43 = vld [vmem:[%s3433_s14 + $0xc0] sm:$0xff]  ;;  %v554_v53 = vld [vmem:[%s3433_s14 + $0x50] sm:$0xff] }
  0x15   : > { %516 = vst.msk [vmem:[#allocation2 + $0xc0] sm:$0x1] %vm507_vm0, %v3347_v1  ;;  %v630_v28 = vadd.f32 %v3438_v3, %v594_v22  ;;  %v631_v33 = vadd.f32 %v3438_v3, %v595_v23  ;;  %v596_v42 = vmul.f32 %v3421_v2, %v560_v35  ;;  %v597_v46 = vmul.f32 %v3421_v2, %v561_v38  ;;  %v569_v47 = vld [vmem:[%s3433_s14 + $0xc8] sm:$0xff]  ;;  %v544_v49 = vld [vmem:[%s3433_s14] sm:$0xff]  ;;  %v555_v57 = vld [vmem:[%s3433_s14 + $0x58] sm:$0xff] }
  0x16   : > { %v654_v10 = vmax.f32 %v622_v8, 0.0  ;;  %v655_v11 = vmax.f32 %v623_v9, 0.0  ;;  %517 = vst.msk [vmem:[#allocation2 + $0xd8] sm:$0x1] %vm507_vm0, %v3347_v1  ;;  %v638_v41 = vadd.f32 %v3438_v3, %v602_v29  ;;  %v639_v45 = vadd.f32 %v3438_v3, %v603_v34  ;;  %v545_v50 = vld [vmem:[%s3433_s14 + $0x8] sm:$0xff]  ;;  %v562_v58 = vld [vmem:[%s3433_s14 + $0x90] sm:$0xff] }
  0x17   : > { %518 = vst.msk [vmem:[#allocation2 + $0xf0] sm:$0x1] %vm507_vm0, %v3347_v1  ;;  %v662_v40 = vmax.f32 %v630_v28, 0.0  ;;  %v663_v44 = vmax.f32 %v631_v33, 0.0  ;;  %v624_v48 = vadd.f32 %v3438_v3, %v588_v37  ;;  %v625_v51 = vadd.f32 %v3438_v3, %v589_v39  ;;  %v563_v7 = vld [vmem:[%s3433_s14 + $0x98] sm:$0xff]  ;;  %v570_v18 = vld [vmem:[%s3433_s14 + $0xd0] sm:$0xff] }
  0x18   : > { %688 = vst.msk [vmem:[#allocation2 + $0x61] sm:$0xff] %vm681_vm1, %v654_v10  ;;  %v604_v52 = vmul.f32 %v3421_v2, %v568_v43  ;;  %v670_v54 = vmax.f32 %v638_v41, 0.0  ;;  %v632_v55 = vadd.f32 %v3438_v3, %v596_v42  ;;  %v605_v56 = vmul.f32 %v3421_v2, %v569_v47  ;;  %v571_v21 = vld [vmem:[%s3433_s14 + $0xd8] sm:$0xff]  ;;  %v546_v27 = vld [vmem:[%s3433_s14 + $0x10] sm:$0xff] }
  0x19   : > { %689 = vst.msk [vmem:[#allocation2 + $0x69] sm:$0xff] %vm681_vm1, %v655_v11  ;;  %v671_v59 = vmax.f32 %v639_v45, 0.0  ;;  %v633_v60 = vadd.f32 %v3438_v3, %v597_v46  ;;  %v580_v61 = vmul.f32 %v3421_v2, %v544_v49  ;;  %v581_v62 = vmul.f32 %v3421_v2, %v545_v50  ;;  %v547_v33 = vld [vmem:[%s3433_s14 + $0x18] sm:$0xff] }
  0x1a   : > { %519 = vst.msk [vmem:[#allocation2 + $0x108] sm:$0x1] %vm507_vm0, %v3347_v1  ;;  %v656_v63 = vmax.f32 %v624_v48, 0.0  ;;  %v590_v0 = vmul.f32 %v3421_v2, %v554_v53  ;;  %v657_v4 = vmax.f32 %v625_v51, 0.0  ;;  %v640_v5 = vadd.f32 %v3438_v3, %v604_v52 }
  0x1b   : > { %520 = vst.msk [vmem:[#allocation2 + $0x120] sm:$0x1] %vm507_vm0, %v3347_v1  ;;  %v591_v6 = vmul.f32 %v3421_v2, %v555_v57  ;;  %v598_v8 = vmul.f32 %v3421_v2, %v562_v58  ;;  %v664_v9 = vmax.f32 %v632_v55, 0.0  ;;  %v641_v10 = vadd.f32 %v3438_v3, %v605_v56 }
  0x1c   : > { %521 = vst.msk [vmem:[#allocation2 + $0x138] sm:$0x1] %vm507_vm0, %v3347_v1  ;;  %v3602_v16 = vadd.f32 %v3438_v3, %v581_v62  ;;  %v3607_v19 = vadd.f32 %v3438_v3, %v590_v0  ;;  %v599_v20 = vmul.f32 %v3421_v2, %v563_v7  ;;  %v672_v23 = vmax.f32 %v640_v5, 0.0  ;;  %v565_v5 = vld [vmem:[%s3433_s14 + $0xa8] sm:$0xff] }
  0x1d   : > { %522 = vst.msk [vmem:[#allocation2 + $0x150] sm:$0x1] %vm507_vm0, %v3347_v1  ;;  %v3615_v24 = vadd.f32 %v3438_v3, %v591_v6  ;;  %v3618_v25 = vadd.f32 %v3438_v3, %v598_v8  ;;  %v673_v31 = vmax.f32 %v641_v10, 0.0  ;;  %v606_v32 = vmul.f32 %v3421_v2, %v570_v18 }
  0x1e   : > { %523 = vst.msk [vmem:[#allocation2 + $0x168] sm:$0x1] %vm507_vm0, %v3347_v1  ;;  %v649_v38 = vmax.f32 %v3602_v16, 0.0  ;;  %v607_v39 = vmul.f32 %v3421_v2, %v571_v21  ;;  %v658_v42 = vmax.f32 %v3607_v19, 0.0  ;;  %v635_v43 = vadd.f32 %v3438_v3, %v599_v20  ;;  %v572_v20 = vld [vmem:[%s3433_s14 + $0xe0] sm:$0xff] }
  0x1f   : > { %v3474_v12 = vld [vmem:[#allocation2 + $0x60] sm:$0xff]  ;;  %524 = vst.msk [vmem:[#allocation2 + $0x180] sm:$0x1] %vm507_vm0, %v3347_v1  ;;  %v659_v47 = vmax.f32 %v3615_v24, 0.0  ;;  %v666_v48 = vmax.f32 %v3618_v25, 0.0  ;;  %v583_v49 = vmul.f32 %v3421_v2, %v547_v33  ;;  %v642_v53 = vadd.f32 %v3438_v3, %v606_v32 }
  0x20   : > { %v3478_v13 = vld [vmem:[#allocation2 + $0x68] sm:$0xff]  ;;  %v899_v14 = vrot.slane %v3474_v12, 1  ;;  %525 = vst.msk [vmem:[#allocation2 + $0x198] sm:$0x1] %vm507_vm0, %v3347_v1  ;;  %v643_v58 = vadd.f32 %v3438_v3, %v607_v39  ;;  %v601_v19 = vmul.f32 %v3421_v2, %v565_v5 }
  0x21   : > { %v900_v15 = vrot.slane %v3478_v13, 1  ;;  %526 = vst.msk [vmem:[#allocation2 + $0x11] sm:$0x1] %vm507_vm0, %v3347_v1  ;;  %v619_v10 = vadd.f32 %v3438_v3, %v583_v49  ;;  %v674_v16 = vmax.f32 %v642_v53, 0.0  ;;  %v549_v5 = vld [vmem:[%s3433_s14 + $0x28] sm:$0xff] }
  0x22   : > { %527 = vst.msk [vmem:[#allocation2 + $0x29] sm:$0x1] %vm507_vm0, %v3347_v1  ;;  %v675_v25 = vmax.f32 %v643_v58, 0.0 }
  0x23   : > { %v3492_v17 = vsel %vm878_vm2, %v899_v14, %v900_v15  ;;  %528 = vst.msk [vmem:[#allocation2 + $0x41] sm:$0x1] %vm507_vm0, %v3347_v1  ;;  %v665_v14 = vmax.f32 %v633_v60, 0.0  ;;  %v651_v39 = vmax.f32 %v619_v10, 0.0 }
  0x24   : > { %2973 = vmatmul.msk.f32.vlgmr.msra.gmra.mxu1 %vm681_vm1, %v3492_v17  ;;  %529 = vst.msk [vmem:[#allocation2 + $0x59] sm:$0x1] %vm507_vm0, %v3347_v1 }
  0x25   : > { %530 = vst.msk [vmem:[#allocation2 + $0x71] sm:$0x1] %vm507_vm0, %v3347_v1 }
  0x26   : > { %531 = vst.msk [vmem:[#allocation2 + $0x89] sm:$0x1] %vm507_vm0, %v3347_v1 }
  0x27   : > { %532 = vst.msk [vmem:[#allocation2 + $0xa1] sm:$0x1] %vm507_vm0, %v3347_v1 }
  0x28   : > { %533 = vst.msk [vmem:[#allocation2 + $0xb9] sm:$0x1] %vm507_vm0, %v3347_v1 }
  0x29   : > { %534 = vst.msk [vmem:[#allocation2 + $0xd1] sm:$0x1] %vm507_vm0, %v3347_v1 }
  0x2a   : > { %535 = vst.msk [vmem:[#allocation2 + $0xe9] sm:$0x1] %vm507_vm0, %v3347_v1 }
  0x2b   : > { %536 = vst.msk [vmem:[#allocation2 + $0x101] sm:$0x1] %vm507_vm0, %v3347_v1 }
  0x2c   : > { %537 = vst.msk [vmem:[#allocation2 + $0x119] sm:$0x1] %vm507_vm0, %v3347_v1  ;;  %v3528_v26 = vld [vmem:[#allocation2 + $0x70] sm:$0x3] }
  0x2d   : > { %538 = vst.msk [vmem:[#allocation2 + $0x131] sm:$0x1] %vm507_vm0, %v3347_v1  ;;  %v902_v30 = vrot.slane %v3528_v26, 1 }
  0x2e   : > { %539 = vst.msk [vmem:[#allocation2 + $0x149] sm:$0x1] %vm507_vm0, %v3347_v1 }
  0x2f   : > { %540 = vst.msk [vmem:[#allocation2 + $0x161] sm:$0x1] %vm507_vm0, %v3347_v1  ;;  %v3548_v36 = vsel %vm878_vm2, %v900_v15, %v902_v30  ;;  %v616_v15 = vadd.f32 %v3438_v3, %v580_v61  ;;  %v564_v61 = vld [vmem:[%s3433_s14 + $0xa0] sm:$0xff] }
  0x30   : > { %5055 = vst [vmem:[#allocation3_spill] sm:$0xff] %v3548_v36  ;;  %2974 = vmatmul.msk.f32.gmra.mxu1 %vm681_vm1, %v3548_v36  ;;  %v600_v6 = vmul.f32 %v3421_v2, %v564_v61  ;;  %v548_v61 = vld [vmem:[%s3433_s14 + $0x20] sm:$0xff] }
  0x31   : > { %541 = vst.msk [vmem:[#allocation2 + $0x179] sm:$0x1] %vm507_vm0, %v3347_v1  ;;  %v648_v37 = vmax.f32 %v616_v15, 0.0 }
  0x32   : > { %542 = vst.msk [vmem:[#allocation2 + $0x191] sm:$0x1] %vm507_vm0, %v3347_v1 }
  0x33   : > { %543 = vst.msk [vmem:[#allocation2 + $0x1a9] sm:$0x1] %vm507_vm0, %v3347_v1 }
  0x34   : > { %741 = vst.msk [vmem:[#allocation2 + $0x8] sm:$0xff] %vm681_vm1, %v3347_v1 }
  0x35   : > { %772 = vst.msk [vmem:[#allocation2 + $0x1a0] sm:$0xff] %vm681_vm1, %v3347_v1 }
  0x36   : > { %696 = vst.msk [vmem:[#allocation2 + $0xc1] sm:$0xff] %vm681_vm1, %v662_v40 }
  0x37   : > { %697 = vst.msk [vmem:[#allocation2 + $0xc9] sm:$0xff] %vm681_vm1, %v663_v44  ;;  %v582_v44 = vmul.f32 %v3421_v2, %v546_v27 }
  0x38   : > { %740 = vst.msk [vmem:[#allocation2] sm:$0xff] %vm681_vm1, %v3347_v1 }
  0x39   : > { %771 = vst.msk [vmem:[#allocation2 + $0x198] sm:$0xff] %vm681_vm1, %v3347_v1  ;;  %v618_v0 = vadd.f32 %v3438_v3, %v582_v44 }
  0x3a   : > { %704 = vst.msk [vmem:[#allocation2 + $0x121] sm:$0xff] %vm681_vm1, %v670_v54  ;;  %v556_v54 = vld [vmem:[%s3433_s14 + $0x60] sm:$0xff] }
  0x3b   : > { %705 = vst.msk [vmem:[#allocation2 + $0x129] sm:$0xff] %vm681_vm1, %v671_v59  ;;  %v3598_v11 = vld [vmem:[#allocation2 + $0x8] sm:$0xff]  ;;  %v592_v60 = vmul.f32 %v3421_v2, %v556_v54 }
  0x3c   : > { %690 = vst.msk [vmem:[#allocation2 + $0x79] sm:$0xff] %vm681_vm1, %v656_v63  ;;  %v880_v30 = vrot.slane %v3598_v11, 1  ;;  %v557_v59 = vld [vmem:[%s3433_s14 + $0x68] sm:$0xff] }
  0x3d   : > { %v3611_v22 = vld [vmem:[#allocation2 + $0xc0] sm:$0xff]  ;;  %691 = vst.msk [vmem:[#allocation2 + $0x81] sm:$0xff] %vm681_vm1, %v657_v4  ;;  %v593_v4 = vmul.f32 %v3421_v2, %v557_v59  ;;  %v628_v18 = vadd.f32 %v3438_v3, %v592_v60 }
  0x3e   : > { %v3621_v28 = vld [vmem:[#allocation2 + $0xc8] sm:$0xff]  ;;  %v919_v29 = vrot.slane %v3611_v22, 1  ;;  %698 = vst.msk [vmem:[#allocation2 + $0xd9] sm:$0xff] %vm681_vm1, %v664_v9  ;;  %v3634_v40 = vld [vmem:[#allocation2 + $0xd0] sm:$0x3]  ;;  %v667_v9 = vmax.f32 %v635_v43, 0.0 }
  0x3f   : > { %v920_v34 = vrot.slane %v3621_v28, 1  ;;  %v3629_v35 = vld [vmem:[#allocation2] sm:$0xff]  ;;  %699 = vst.msk [vmem:[#allocation2 + $0xe1] sm:$0xff] %vm681_vm1, %v665_v14  ;;  %v922_v56 = vrot.slane %v3634_v40, 1  ;;  %v629_v27 = vadd.f32 %v3438_v3, %v593_v4 }
  0x40   : > { %v879_v41 = vrot.slane %v3629_v35, 1  ;;  %743 = vst.msk [vmem:[#allocation2 + $0x10] sm:$0x3] %vm742_vm3, %v3347_v1 }
  0x41   : > { %v3643_v45 = vsel %vm878_vm2, %v919_v29, %v920_v34  ;;  %v3645_v46 = vld [vmem:[#allocation2 + $0x120] sm:$0xff]  ;;  %774 = vst.msk [vmem:[#allocation2 + $0x1a8] sm:$0x3] %vm742_vm3, %v3347_v1  ;;  %v3699_v21 = vsel %vm878_vm2, %v920_v34, %v922_v56  ;;  %v573_v29 = vld [vmem:[%s3433_s14 + $0xe8] sm:$0xff]  ;;  %v650_v34 = vmax.f32 %v618_v0, 0.0 }
  0x42   : > { %5056 = vst [vmem:[#allocation4_spill] sm:$0xff] %v3643_v45  ;;  %2981 = vmatmul.msk.f32.vlgmr.msra.gmra.mxu2 %vm681_vm1, %v3643_v45  ;;  %v3654_v50 = vld [vmem:[#allocation2 + $0x128] sm:$0xff]  ;;  %v939_v51 = vrot.slane %v3645_v46, 1  ;;  %v881_v52 = vsel %vm878_vm2, %v879_v41, %v880_v30  ;;  %v3660_v1 = vld [vmem:[#allocation2 + $0x130] sm:$0x3]  ;;  %v637_v41 = vadd.f32 %v3438_v3, %v601_v19 }
  0x43   : > { %5057 = vst [vmem:[#allocation5_spill] sm:$0xff] %v3645_v46  ;;  %v940_v55 = vrot.slane %v3654_v50, 1  ;;  %2965 = vmatmul.msk.f32.vlgmr.msra.gmra.mxu0 %vm681_vm1, %v881_v52  ;;  %v3668_v57 = vld [vmem:[#allocation2 + $0x78] sm:$0xff]  ;;  %v942_v14 = vrot.slane %v3660_v1, 1 }
  0x44   : > { %5058 = vst [vmem:[#allocation6_spill] sm:$0xff] %v3654_v50  ;;  %v3675_v62 = vld [vmem:[#allocation2 + $0x80] sm:$0xff]  ;;  %v904_v63 = vrot.slane %v3668_v57, 1  ;;  %v3692_v15 = vld [vmem:[#allocation2 + $0x88] sm:$0x3]  ;;  %v669_v4 = vmax.f32 %v637_v41, 0.0 }
  0x45   : > { %5059 = vst [vmem:[#allocation7_spill] sm:$0xff] %v3660_v1  ;;  %v3684_v7 = vsel %vm878_vm2, %v939_v51, %v940_v55  ;;  %v905_v8 = vrot.slane %v3675_v62, 1  ;;  %v3725_v43 = vsel %vm878_vm2, %v940_v55, %v942_v14  ;;  %v584_v14 = vmul.f32 %v3421_v2, %v548_v61 }
  0x46   : > { %706 = vst.msk [vmem:[#allocation2 + $0x139] sm:$0xff] %vm681_vm1, %v672_v23  ;;  %2989 = vmatmul.msk.f32.vlgmr.msra.gmra.mxu3 %vm681_vm1, %v3684_v7  ;;  %v3713_v32 = vld [vmem:[#allocation2 + $0xe0] sm:$0xff] }
  0x47   : > { %707 = vst.msk [vmem:[#allocation2 + $0x141] sm:$0xff] %vm681_vm1, %v673_v31  ;;  %v3702_v23 = vsel %vm878_vm2, %v904_v63, %v905_v8  ;;  %v3704_v24 = vld [vmem:[#allocation2 + $0x10] sm:$0x3]  ;;  %v3711_v31 = vld [vmem:[#allocation2 + $0xd8] sm:$0xff]  ;;  %v925_v51 = vrot.slane %v3713_v32, 1 }
  0x48   : > { %682 = vst.msk [vmem:[#allocation2 + $0x19] sm:$0xff] %vm681_vm1, %v648_v37  ;;  %2975 = vmatmul.msk.f32.gmra.mxu1 %vm681_vm1, %v3702_v23  ;;  %v882_v33 = vrot.slane %v3704_v24, 1  ;;  %v636_v37 = vadd.f32 %v3438_v3, %v600_v6  ;;  %v924_v49 = vrot.slane %v3711_v31, 1 }
  0x49   : > { %5060 = vst [vmem:[#allocation8_spill] sm:$0xff] %v3684_v7 }
  0x4a   : > { %683 = vst.msk [vmem:[#allocation2 + $0x21] sm:$0xff] %vm681_vm1, %v649_v38  ;;  %v907_v38 = vrot.slane %v3692_v15, 1  ;;  %2982 = vmatmul.msk.f32.gmra.mxu2 %vm681_vm1, %v3699_v21  ;;  %v883_v44 = vsel %vm878_vm2, %v880_v30, %v882_v33  ;;  %v661_v30 = vmax.f32 %v629_v27, 0.0  ;;  %v668_v59 = vmax.f32 %v636_v37, 0.0 }
  0x4b   : > { %692 = vst.msk [vmem:[#allocation2 + $0x91] sm:$0xff] %vm681_vm1, %v658_v42  ;;  %v608_v42 = vmul.f32 %v3421_v2, %v572_v20  ;;  %2966 = vmatmul.msk.f32.gmra.mxu0 %vm681_vm1, %v883_v44  ;;  %v3772_v20 = vld [vmem:[#allocation2 + $0xe8] sm:$0x3]  ;;  %v620_v27 = vadd.f32 %v3438_v3, %v584_v14 }
  0x4c   : > { %5061 = vst [vmem:[#allocation9_spill] sm:$0xff] %v3699_v21  ;;  %v3750_v63 = vsel %vm878_vm2, %v905_v8, %v907_v38  ;;  %v585_v8 = vmul.f32 %v3421_v2, %v549_v5  ;;  %v927_v41 = vrot.slane %v3772_v20, 1 }
  0x4d   : > { %5062 = vst [vmem:[#allocation10_spill] sm:$0xff] %v3702_v23  ;;  %v3735_v52 = vld [vmem:[#allocation2 + $0x138] sm:$0xff]  ;;  %v644_v54 = vadd.f32 %v3438_v3, %v608_v42  ;;  %v652_v38 = vmax.f32 %v620_v27, 0.0 }
  0x4e   : > { %693 = vst.msk [vmem:[#allocation2 + $0x99] sm:$0xff] %vm681_vm1, %v659_v47  ;;  %v660_v47 = vmax.f32 %v628_v18, 0.0  ;;  %v3741_v55 = vld [vmem:[#allocation2 + $0x140] sm:$0xff]  ;;  %2990 = vmatmul.msk.f32.gmra.mxu3 %vm681_vm1, %v3725_v43  ;;  %v944_v18 = vrot.slane %v3735_v52, 1 }
  0x4f   : > { %700 = vst.msk [vmem:[#allocation2 + $0xf1] sm:$0xff] %vm681_vm1, %v666_v48  ;;  %v609_v48 = vmul.f32 %v3421_v2, %v573_v29  ;;  %v3737_v53 = vld [vmem:[#allocation2 + $0x18] sm:$0xff]  ;;  %v676_v10 = vmax.f32 %v644_v54, 0.0  ;;  %v945_v19 = vrot.slane %v3741_v55, 1  ;;  %v621_v29 = vadd.f32 %v3438_v3, %v585_v8 }
  0x50   : > { %701 = vst.msk [vmem:[#allocation2 + $0xf9] sm:$0xff] %vm681_vm1, %v667_v9  ;;  %v884_v58 = vrot.slane %v3737_v53, 1  ;;  %2976 = vmatmul.msk.f32.gmra.mxu1 %vm681_vm1, %v3750_v63 }
  0x51   : > { %5063 = vst [vmem:[#allocation11_spill] sm:$0xff] %v3725_v43  ;;  %v3743_v56 = vld [vmem:[#allocation2 + $0x20] sm:$0xff]  ;;  %v645_v60 = vadd.f32 %v3438_v3, %v609_v48  ;;  %v3782_v37 = vld [vmem:[#allocation2 + $0x28] sm:$0x3]  ;;  %v653_v44 = vmax.f32 %v621_v29, 0.0 }
  0x52   : > { %708 = vst.msk [vmem:[#allocation2 + $0x151] sm:$0xff] %vm681_vm1, %v674_v16  ;;  %v885_v0 = vrot.slane %v3743_v56, 1  ;;  %v3757_v6 = vld [vmem:[#allocation2 + $0x90] sm:$0xff]  ;;  %v3765_v16 = vsel %vm878_vm2, %v924_v49, %v925_v51  ;;  %v3795_v3 = vld [vmem:[#allocation2 + $0x148] sm:$0x3]  ;;  %v887_v42 = vrot.slane %v3782_v37, 1  ;;  %v3808_v49 = vsel %vm878_vm2, %v925_v51, %v927_v41 }
  0x53   : > { %5064 = vst [vmem:[#allocation12_spill] sm:$0xff] %v3735_v52  ;;  %v677_v2 = vmax.f32 %v645_v60, 0.0  ;;  %v909_v33 = vrot.slane %v3757_v6, 1  ;;  %2983 = vmatmul.msk.f32.gmra.mxu2 %vm681_vm1, %v3765_v16 }
  0x54   : > { %709 = vst.msk [vmem:[#allocation2 + $0x159] sm:$0xff] %vm681_vm1, %v675_v25  ;;  %v3775_v25 = vsel %vm878_vm2, %v884_v58, %v885_v0 }
  0x55   : > { %5065 = vst [vmem:[#allocation13_spill] sm:$0xff] %v3741_v55  ;;  %v3759_v9 = vld [vmem:[#allocation2 + $0x98] sm:$0xff]  ;;  %2967 = vmatmul.msk.f32.gmra.mxu0 %vm681_vm1, %v3775_v25  ;;  %v3804_v48 = vld [vmem:[#allocation2 + $0xa0] sm:$0x3] }
  0x56   : > { %684 = vst.msk [vmem:[#allocation2 + $0x31] sm:$0xff] %vm681_vm1, %v650_v34  ;;  %v910_v34 = vrot.slane %v3759_v9, 1  ;;  %v3813_v54 = vld [vmem:[#allocation2 + $0xf0] sm:$0xff]  ;;  %v912_v60 = vrot.slane %v3804_v48, 1 }
  0x57   : > { %5066 = vst [vmem:[#allocation14_spill] sm:$0xff] %v3750_v63  ;;  %v3815_v58 = vld [vmem:[#allocation2 + $0xf8] sm:$0xff]  ;;  %v929_v5 = vrot.slane %v3813_v54, 1  ;;  %v3856_v41 = vld [vmem:[#allocation2 + $0x100] sm:$0x3] }
  0x58   : > { %685 = vst.msk [vmem:[#allocation2 + $0x39] sm:$0xff] %vm681_vm1, %v651_v39  ;;  %v3789_v39 = vsel %vm878_vm2, %v944_v18, %v945_v19 }
  0x59   : > { %694 = vst.msk [vmem:[#allocation2 + $0xa9] sm:$0xff] %vm681_vm1, %v660_v47  ;;  %v3800_v47 = vsel %vm878_vm2, %v909_v33, %v910_v34  ;;  %2991 = vmatmul.msk.f32.gmra.mxu3 %vm681_vm1, %v3789_v39 }
  0x5a   : > { %5067 = vst [vmem:[#allocation15_spill] sm:$0xff] %v3765_v16  ;;  %2977 = vmatmul.msk.f32.gmra.mxu1 %vm681_vm1, %v3800_v47 }
  0x5b   : > { %695 = vst.msk [vmem:[#allocation2 + $0xb1] sm:$0xff] %vm681_vm1, %v661_v30  ;;  %v947_v30 = vrot.slane %v3795_v3, 1  ;;  %2984 = vmatmul.msk.f32.gmra.mxu2 %vm681_vm1, %v3808_v49  ;;  %v3836_v14 = vld [vmem:[#allocation2 + $0x158] sm:$0xff] }
  0x5c   : > { %702 = vst.msk [vmem:[#allocation2 + $0x109] sm:$0xff] %vm681_vm1, %v668_v59  ;;  %v3818_v59 = vsel %vm878_vm2, %v885_v0, %v887_v42  ;;  %v3834_v0 = vld [vmem:[#allocation2 + $0x150] sm:$0xff] }
  0x5d   : > { %703 = vst.msk [vmem:[#allocation2 + $0x111] sm:$0xff] %vm681_vm1, %v669_v4  ;;  %v3821_v61 = vld [vmem:[#allocation2 + $0x30] sm:$0xff]  ;;  %v3828_v51 = vsel %vm878_vm2, %v945_v19, %v947_v30  ;;  %2968 = vmatmul.msk.f32.gmra.mxu0 %vm681_vm1, %v3818_v59  ;;  %v949_v33 = vrot.slane %v3834_v0, 1 }
  0x5e   : > { %710 = vst.msk [vmem:[#allocation2 + $0x169] sm:$0xff] %vm681_vm1, %v676_v10  ;;  %v930_v10 = vrot.slane %v3815_v58, 1  ;;  %v889_v8 = vrot.slane %v3821_v61, 1 }
  0x5f   : > { %5068 = vst [vmem:[#allocation16_spill] sm:$0xff] %v3789_v39  ;;  %v3823_v4 = vld [vmem:[#allocation2 + $0x38] sm:$0xff]  ;;  %v3863_v30 = vld [vmem:[#allocation2 + $0x40] sm:$0x3] }
  0x60   : > { %711 = vst.msk [vmem:[#allocation2 + $0x171] sm:$0xff] %vm681_vm1, %v677_v2  ;;  %v890_v18 = vrot.slane %v3823_v4, 1  ;;  %v3841_v2 = vsel %vm878_vm2, %v910_v34, %v912_v60  ;;  %v3845_v19 = vld [vmem:[#allocation2 + $0xa8] sm:$0xff]  ;;  %v3850_v29 = vsel %vm878_vm2, %v929_v5, %v930_v10  ;;  %v3161_v60 = vld [vmem:[%s4975_s3 + $0x30] sm:$0xff] }
  0x61   : > { %5069 = vst [vmem:[#allocation17_spill] sm:$0xff] %v3795_v3  ;;  %2992 = vmatmul.msk.f32.gmra.mxu3 %vm681_vm1, %v3828_v51  ;;  %v914_v42 = vrot.slane %v3845_v19, 1  ;;  %2096 = vmatpush.msra.mxu2 %v3161_v60  ;;  %v3128_v60 = vld [vmem:[%s4975_s3 + $0x28] sm:$0xff] }
  0x62   : > { %686 = vst.msk [vmem:[#allocation2 + $0x49] sm:$0xff] %vm681_vm1, %v652_v38  ;;  %v3847_v27 = vld [vmem:[#allocation2 + $0xb0] sm:$0xff]  ;;  %v950_v38 = vrot.slane %v3836_v14, 1  ;;  %2978 = vmatmul.msk.f32.gmra.mxu1 %vm681_vm1, %v3841_v2  ;;  %v3859_v34 = vsel %vm878_vm2, %v889_v8, %v890_v18  ;;  %v3876_v8 = vld [vmem:[#allocation2 + $0x160] sm:$0x3] }
  0x63   : > { %5070 = vst [vmem:[#allocation18_spill] sm:$0xff] %v3800_v47  ;;  %2985 = vmatmul.msk.f32.gmra.mxu2 %vm681_vm1, %v3850_v29  ;;  %v952_v52 = vrot.slane %v3876_v8, 1  ;;  %1943 = vmatpush.msra.mxu1 %v3128_v60 }
  0x64   : > { %687 = vst.msk [vmem:[#allocation2 + $0x51] sm:$0xff] %vm681_vm1, %v653_v44  ;;  %v915_v44 = vrot.slane %v3847_v27, 1  ;;  %v3871_v5 = vsel %vm878_vm2, %v949_v33, %v950_v38  ;;  %v3194_v33 = vld [vmem:[%s4975_s3 + $0x38] sm:$0xff] }
  0x65   : > { %5071 = vst [vmem:[#allocation19_spill] sm:$0xff] %v3828_v51  ;;  %2969 = vmatmul.msk.f32.gmra.mxu0 %vm681_vm1, %v3859_v34  ;;  %v3884_v51 = vld [vmem:[#allocation2 + $0xb8] sm:$0x3]  ;;  %2253 = vmatpush.msra.mxu3 %v3194_v33 }
  0x66   : > { %5072 = vst [vmem:[#allocation20_spill] sm:$0xff] %v3834_v0  ;;  %v892_v0 = vrot.slane %v3863_v30, 1  ;;  %v3880_v3 = vsel %vm878_vm2, %v914_v42, %v915_v44  ;;  %v3898_v42 = vld [vmem:[#allocation2 + $0x108] sm:$0xff]  ;;  %v917_v1 = vrot.slane %v3884_v51, 1 }
  0x67   : > { %5073 = vst [vmem:[#allocation21_spill] sm:$0xff] %v3836_v14  ;;  %v932_v14 = vrot.slane %v3856_v41, 1  ;;  %v934_v33 = vrot.slane %v3898_v42, 1 }
  0x68   : > { %5074 = vst [vmem:[#allocation22_spill] sm:$0xff] %v3841_v2  ;;  %v3903_v39 = vsel %vm878_vm2, %v890_v18, %v892_v0  ;;  %v3919_v0 = vld [vmem:[#allocation2 + $0x168] sm:$0xff]  ;;  %v3921_v18 = vld [vmem:[#allocation2 + $0x170] sm:$0xff]  ;;  %v3926_v46 = vsel %vm878_vm2, %v915_v44, %v917_v1  ;;  %v3940_v1 = vld [vmem:[#allocation2 + $0x118] sm:$0x3] }
  0x69   : > { %5075 = vst [vmem:[#allocation23_spill] sm:$0xff] %v3871_v5  ;;  %2993 = vmatmul.msk.f32.gmra.mxu3 %vm681_vm1, %v3871_v5  ;;  %v3893_v55 = vsel %vm878_vm2, %v930_v10, %v932_v14  ;;  %v3900_v5 = vld [vmem:[#allocation2 + $0x110] sm:$0xff]  ;;  %v3906_v43 = vld [vmem:[#allocation2 + $0x48] sm:$0xff]  ;;  %v3913_v14 = vsel %vm878_vm2, %v950_v38, %v952_v52  ;;  %v3227_v52 = vld [vmem:[%s4975_s3 + $0x40] sm:$0xff]  ;;  %v954_v7 = vrot.slane %v3919_v0, 1 }
  0x6a   : > { %5076 = vst [vmem:[#allocation24_spill] sm:$0xff] %v3876_v8  ;;  %2979 = vmatmul.msk.f32.gmra.mxu1 %vm681_vm1, %v3880_v3  ;;  %v935_v60 = vrot.slane %v3900_v5, 1  ;;  %v894_v8 = vrot.slane %v3906_v43, 1  ;;  %2409 = vmatpush.msra.mxu0 %v3227_v52  ;;  %v3955_v52 = vld [vmem:[#allocation2 + $0x178] sm:$0x3] }
  0x6b   : > { %5077 = vst [vmem:[#allocation25_spill] sm:$0xff] %v3880_v3  ;;  %v3908_v10 = vld [vmem:[#allocation2 + $0x50] sm:$0xff]  ;;  %2986 = vmatmul.msk.f32.gmra.mxu2 %vm681_vm1, %v3893_v55 }
  0x6c   : > { %5078 = vst [vmem:[#allocation26_spill] sm:$0xff] %v3898_v42  ;;  %v895_v50 = vrot.slane %v3908_v10, 1  ;;  %v3934_v38 = vsel %vm878_vm2, %v934_v33, %v935_v60  ;;  %v957_v42 = vrot.slane %v3955_v52, 1 }
  0x6d   : > { %5079 = vst [vmem:[#allocation27_spill] sm:$0xff] %v3900_v5  ;;  %2970 = vmatmul.msk.f32.gmra.mxu0 %vm681_vm1, %v3903_v39  ;;  %v955_v5 = vrot.slane %v3921_v18, 1 }
  0x6e   : > { %5080 = vst [vmem:[#allocation28_spill] sm:$0xff] %v3913_v14  ;;  %v3943_v44 = vsel %vm878_vm2, %v894_v8, %v895_v50 }
  0x6f   : > { %5081 = vst [vmem:[#allocation29_spill] sm:$0xff] %v3919_v0  ;;  %v3950_v33 = vsel %vm878_vm2, %v954_v7, %v955_v5  ;;  %v937_v0 = vrot.slane %v3940_v1, 1 }
  0x70   : > { %5082 = vst [vmem:[#allocation30_spill] sm:$0xff] %v3921_v18 }
  0x71   : > { %5083 = vst [vmem:[#allocation31_spill] sm:$0xff] %v3926_v46  ;;  %2994 = vmatmul.msk.f32.gmra.mxu3 %vm681_vm1, %v3913_v14  ;;  %v3945_v14 = vld [vmem:[#allocation2 + $0x58] sm:$0x3]  ;;  %v3961_v8 = vsel %vm878_vm2, %v935_v60, %v937_v0  ;;  %v1329_v60 = vrot.slane %v3863_v30, 2 }
  0x72   : > { %5084 = vst [vmem:[#allocation32_spill] sm:$0xff] %v3934_v38  ;;  %2980 = vmatmul.msk.f32.gmra.mxu1 %vm681_vm1, %v3926_v46  ;;  %v897_v18 = vrot.slane %v3945_v14, 1 }
  0x73   : > { %5085 = vst [vmem:[#allocation33_spill] sm:$0xff] %v3940_v1  ;;  %2987 = vmatmul.msk.f32.gmra.mxu2 %vm681_vm1, %v3934_v38  ;;  %v3972_v1 = vsel %vm878_vm2, %v955_v5, %v957_v42  ;;  %v1316_v38 = vrot.slane %v3629_v35, 2  ;;  %v1319_v5 = vrot.slane %v3704_v24, 2  ;;  %v1321_v42 = vrot.slane %v3737_v53, 2 }
  0x74   : > { %5086 = vst [vmem:[#allocation34_spill] sm:$0xff] %v3950_v33  ;;  %v3967_v7 = vsel %vm878_vm2, %v895_v50, %v897_v18  ;;  %v1331_v18 = vrot.slane %v3906_v43, 2 }
  0x75   : > { %2971 = vmatmul.msk.f32.gmra.mxu0 %vm681_vm1, %v3943_v44  ;;  %5087 = vst [vmem:[#allocation35_spill] sm:$0xff] %v3961_v8 }
  0x76   : > { %5088 = vst [vmem:[#allocation36_spill] sm:$0xff] %v3972_v1 }
  0x79   : > { %2995 = vmatmul.msk.f32.gmra.mxu3 %vm681_vm1, %v3950_v33  ;;  %v1317_v33 = vrot.slane %v3598_v11, 2 }
  0x7a   : > { %2997 = vmatmul.msk.f32.vlgmr.msrb.gmra.mxu1 %vm681_vm1, %v3629_v35 }
  0x7b   : > { %2988 = vmatmul.msk.f32.gmra.mxu2 %vm681_vm1, %v3961_v8  ;;  %v1318_v50 = vsel %vm1315_vm4, %v1316_v38, %v1317_v33  ;;  %v1320_v35 = vsel %vm1315_vm4, %v1317_v33, %v1319_v5  ;;  %v1332_v38 = vrot.slane %v3908_v10, 2 }
  0x7d   : > { %2972 = vmatmul.msk.f32.gmra.mxu0 %vm681_vm1, %v3967_v7  ;;  %v4050_v30 = vsel %vm1315_vm4, %v1331_v18, %v1332_v38 }
  0x81   : > { %2996 = vmatmul.msk.f32.gmra.mxu3 %vm681_vm1, %v3972_v1 }
  0x82   : > { %2998 = vmatmul.msk.f32.gmra.mxu1 %vm681_vm1, %v3598_v11  ;;  %v1322_v11 = vrot.slane %v3743_v56, 2 }
  0x83   : > { %3030 = vmatmul.msk.f32.vlgmr.msrb.gmra.mxu2 %vm681_vm1, %v1318_v50  ;;  %v1334_v50 = vrot.slane %v3945_v14, 2 }
  0x84   : > { %v4000_v24 = vsel %vm1315_vm4, %v1321_v42, %v1322_v11  ;;  %v1337_v42 = vrot.slane %v3478_v13, 2 }
  0x85   : > { %3096 = vmatmul.msk.f32.vlgmr.msrb.gmra.mxu0 %vm681_vm1, %v3775_v25  ;;  %v1324_v25 = vrot.slane %v3782_v37, 2  ;;  %v4064_v5 = vsel %vm1315_vm4, %v1332_v38, %v1334_v50  ;;  %v1342_v38 = vrot.slane %v3675_v62, 2 }
  0x89   : > { %3063 = vmatmul.msk.f32.vlgmr.msrb.gmra.mxu3 %vm681_vm1, %v3737_v53 }
  0x8a   : > { %2999 = vmatmul.msk.f32.gmra.mxu1 %vm681_vm1, %v3737_v53  ;;  %v4012_v53 = vsel %vm1315_vm4, %v1322_v11, %v1324_v25 }
  0x8b   : > { %3031 = vmatmul.msk.f32.gmra.mxu2 %vm681_vm1, %v1320_v35  ;;  %v1336_v35 = vrot.slane %v3474_v12, 2 }
  0x8d   : > { %3097 = vmatmul.msk.f32.gmra.mxu0 %vm681_vm1, %v3818_v59  ;;  %v1327_v59 = vrot.slane %v3823_v4, 2  ;;  %v4079_v11 = vsel %vm1315_vm4, %v1336_v35, %v1337_v42 }
  0x8f   : > { %v4037_v0 = vsel %vm1315_vm4, %v1327_v59, %v1329_v60 }
  0x91   : > { %3064 = vmatmul.msk.f32.gmra.mxu3 %vm681_vm1, %v3743_v56 }
  0x92   : > { %3000 = vmatmul.msk.f32.gmra.mxu1 %vm681_vm1, %v3743_v56  ;;  %v1326_v56 = vrot.slane %v3821_v61, 2 }
  0x93   : > { %3032 = vmatmul.msk.f32.gmra.mxu2 %vm681_vm1, %v4000_v24 }
  0x94   : > { %v4025_v37 = vsel %vm1315_vm4, %v1326_v56, %v1327_v59 }
  0x95   : > { %3098 = vmatmul.msk.f32.gmra.mxu0 %vm681_vm1, %v3859_v34 }
  0x99   : > { %3065 = vmatmul.msk.f32.gmra.mxu3 %vm681_vm1, %v3821_v61 }
  0x9a   : > { %3001 = vmatmul.msk.f32.gmra.mxu1 %vm681_vm1, %v3821_v61 }
  0x9b   : > { %3033 = vmatmul.msk.f32.gmra.mxu2 %vm681_vm1, %v4012_v53 }
  0x9d   : > { %3099 = vmatmul.msk.f32.gmra.mxu0 %vm681_vm1, %v3903_v39 }
  0xa1   : > { %3066 = vmatmul.msk.f32.gmra.mxu3 %vm681_vm1, %v3823_v4  ;;  %v4054_v33 = vpop.f32.mrf.mxu1 }
  0xa2   : > { %3002 = vmatmul.msk.f32.gmra.mxu1 %vm681_vm1, %v3823_v4 }
  0xa3   : > { %3034 = vmatmul.msk.f32.gmra.mxu2 %vm681_vm1, %v4025_v37 }
  0xa5   : > { %3100 = vmatmul.msk.f32.gmra.mxu0 %vm681_vm1, %v3943_v44 }
  0xa9   : > { %3067 = vmatmul.msk.f32.gmra.mxu3 %vm681_vm1, %v3906_v43 }
  0xaa   : > { %3003 = vmatmul.msk.f32.gmra.mxu1 %vm681_vm1, %v3906_v43 }
  0xab   : > { %3035 = vmatmul.msk.f32.gmra.mxu2 %vm681_vm1, %v4037_v0 }
  0xad   : > { %3101 = vmatmul.msk.f32.gmra.mxu0 %vm681_vm1, %v3967_v7  ;;  %v4074_v14 = vpop.f32.mrf.mxu1 }
  0xb1   : > { %3068 = vmatmul.msk.f32.gmra.mxu3 %vm681_vm1, %v3908_v10 }
  0xb2   : > { %3004 = vmatmul.msk.f32.gmra.mxu1 %vm681_vm1, %v3908_v10 }
  0xb3   : > { %3036 = vmatmul.msk.f32.gmra.mxu2 %vm681_vm1, %v4050_v30 }
  0xb5   : > { %3102 = vmatmul.msk.f32.gmra.mxu0 %vm681_vm1, %v3492_v17 }
  0xb9   : > { %3069 = vmatmul.msk.f32.gmra.mxu3 %vm681_vm1, %v3474_v12 }
  0xba   : > { %3005 = vmatmul.msk.f32.gmra.mxu1 %vm681_vm1, %v3474_v12  ;;  %v1339_v12 = vrot.slane %v3528_v26, 2  ;;  %v1341_v26 = vrot.slane %v3668_v57, 2 }
  0xbb   : > { %3037 = vmatmul.msk.f32.gmra.mxu2 %vm681_vm1, %v4064_v5 }
  0xbc   : > { %v4097_v60 = vsel %vm1315_vm4, %v1337_v42, %v1339_v12  ;;  %v4118_v42 = vsel %vm1315_vm4, %v1341_v26, %v1342_v38 }
  0xbd   : > { %3103 = vmatmul.msk.f32.gmra.mxu0 %vm681_vm1, %v3548_v36  ;;  %5090 = vst [vmem:[#allocation38_spill] sm:$0xff] %v4118_v42 }
  0xc0   : > { %v4081_v25 = vpop.f32.mrf.mxu0 }
  0xc1   : > { %3070 = vmatmul.msk.f32.gmra.mxu3 %vm681_vm1, %v3478_v13 }
  0xc2   : > { %3006 = vmatmul.msk.f32.gmra.mxu1 %vm681_vm1, %v3478_v13 }
  0xc3   : > { %3038 = vmatmul.msk.f32.gmra.mxu2 %vm681_vm1, %v4079_v11 }
  0xc5   : > { %3104 = vmatmul.msk.f32.gmra.mxu0 %vm681_vm1, %v3702_v23  ;;  %v4090_v56 = vpop.f32.mrf.mxu2  ;;  %v4092_v59 = vpop.f32.mrf.mxu1 }
  0xc8   : > { %v4099_v18 = vpop.f32.mrf.mxu0 }
  0xc9   : > { %3071 = vmatmul.msk.f32.gmra.mxu3 %vm681_vm1, %v3668_v57  ;;  %v4103_v13 = vpop.f32.mrf.mxu3 }
  0xca   : > { %3007 = vmatmul.msk.f32.gmra.mxu1 %vm681_vm1, %v3668_v57  ;;  %5089 = vst [vmem:[#allocation37_spill] sm:$0xff] %v4103_v13  ;;  %v1344_v13 = vrot.slane %v3692_v15, 2  ;;  %v1346_v15 = vrot.slane %v3757_v6, 2 }
  0xcb   : > { %3039 = vmatmul.msk.f32.gmra.mxu2 %vm681_vm1, %v4097_v60 }
  0xcc   : > { %v4138_v26 = vsel %vm1315_vm4, %v1342_v38, %v1344_v13 }
  0xcd   : > { %3105 = vmatmul.msk.f32.gmra.mxu0 %vm681_vm1, %v3750_v63  ;;  %v4111_v50 = vpop.f32.mrf.mxu2  ;;  %v4113_v35 = vpop.f32.mrf.mxu1  ;;  %5092 = vst [vmem:[#allocation40_spill] sm:$0xff] %v4138_v26 }
  0xd1   : > { %3072 = vmatmul.msk.f32.gmra.mxu3 %vm681_vm1, %v3675_v62  ;;  %v4124_v57 = vpop.f32.mrf.mxu3 }
  0xd2   : > { %v4120_v12 = vpop.f32.mrf.mxu0  ;;  %3008 = vmatmul.msk.f32.gmra.mxu1 %vm681_vm1, %v3675_v62  ;;  %5091 = vst [vmem:[#allocation39_spill] sm:$0xff] %v4124_v57 }
  0xd3   : > { %3040 = vmatmul.msk.f32.gmra.mxu2 %vm681_vm1, %v4118_v42 }
  0xd5   : > { %3106 = vmatmul.msk.f32.gmra.mxu0 %vm681_vm1, %v3800_v47  ;;  %v1347_v47 = vrot.slane %v3759_v9, 2 }
  0xd6   : > { %v4131_v63 = vpop.f32.mrf.mxu2 }
  0xd7   : > { %v4133_v23 = vpop.f32.mrf.mxu1  ;;  %v4159_v38 = vsel %vm1315_vm4, %v1346_v15, %v1347_v47 }
  0xd8   : > { %5094 = vst [vmem:[#allocation42_spill] sm:$0xff] %v4159_v38 }
  0xd9   : > { %3073 = vmatmul.msk.f32.gmra.mxu3 %vm681_vm1, %v3757_v6 }
  0xda   : > { %v4140_v62 = vpop.f32.mrf.mxu0  ;;  %3009 = vmatmul.msk.f32.gmra.mxu1 %vm681_vm1, %v3757_v6 }
  0xdb   : > { %3041 = vmatmul.msk.f32.gmra.mxu2 %vm681_vm1, %v4138_v26 }
  0xdc   : > { %v4144_v57 = vpop.f32.mrf.mxu3 }
  0xdd   : > { %5093 = vst [vmem:[#allocation41_spill] sm:$0xff] %v4144_v57  ;;  %3107 = vmatmul.msk.f32.gmra.mxu0 %vm681_vm1, %v3841_v2  ;;  %v1349_v2 = vrot.slane %v3804_v48, 2  ;;  %v1351_v48 = vrot.slane %v3845_v19, 2 }
  0xde   : > { %v4152_v42 = vpop.f32.mrf.mxu2 }
  0xdf   : > { %v4154_v13 = vpop.f32.mrf.mxu1  ;;  %v4179_v15 = vsel %vm1315_vm4, %v1347_v47, %v1349_v2 }
  0xe0   : > { %5096 = vst [vmem:[#allocation44_spill] sm:$0xff] %v4179_v15 }
  0xe1   : > { %3074 = vmatmul.msk.f32.gmra.mxu3 %vm681_vm1, %v3759_v9 }
  0xe2   : > { %v4161_v57 = vpop.f32.mrf.mxu0  ;;  %3010 = vmatmul.msk.f32.gmra.mxu1 %vm681_vm1, %v3759_v9 }
  0xe3   : > { %3042 = vmatmul.msk.f32.gmra.mxu2 %vm681_vm1, %v4159_v38 }
  0xe4   : > { %v4165_v6 = vpop.f32.mrf.mxu3 }
  0xe5   : > { %5095 = vst [vmem:[#allocation43_spill] sm:$0xff] %v4165_v6  ;;  %3108 = vmatmul.msk.f32.gmra.mxu0 %vm681_vm1, %v3880_v3  ;;  %v1352_v3 = vrot.slane %v3847_v27, 2 }
  0xe6   : > { %v4172_v26 = vpop.f32.mrf.mxu2 }
  0xe7   : > { %v4174_v36 = vpop.f32.mrf.mxu1  ;;  %v4200_v2 = vsel %vm1315_vm4, %v1351_v48, %v1352_v3 }
  0xe8   : > { %5099 = vst [vmem:[#allocation47_spill] sm:$0xff] %v4200_v2 }
  0xe9   : > { %3075 = vmatmul.msk.f32.gmra.mxu3 %vm681_vm1, %v3845_v19 }
  0xea   : > { %v4181_v9 = vpop.f32.mrf.mxu0  ;;  %3011 = vmatmul.msk.f32.gmra.mxu1 %vm681_vm1, %v3845_v19 }
  0xeb   : > { %3043 = vmatmul.msk.f32.gmra.mxu2 %vm681_vm1, %v4179_v15 }
  0xec   : > { %v4185_v6 = vpop.f32.mrf.mxu3 }
  0xed   : > { %5097 = vst [vmem:[#allocation45_spill] sm:$0xff] %v4185_v6  ;;  %3109 = vmatmul.msk.f32.gmra.mxu0 %vm681_vm1, %v3926_v46  ;;  %v1354_v46 = vrot.slane %v3884_v51, 2  ;;  %v1356_v51 = vrot.slane %v3611_v22, 2 }
  0xee   : > { %v4193_v38 = vpop.f32.mrf.mxu2 }
  0xef   : > { %5098 = vst [vmem:[#allocation46_spill] sm:$0xff] %v4193_v38  ;;  %v4195_v47 = vpop.f32.mrf.mxu1  ;;  %v4218_v48 = vsel %vm1315_vm4, %v1352_v3, %v1354_v46 }
  0xf0   : > { %5102 = vst [vmem:[#allocation50_spill] sm:$0xff] %v4218_v48 }
  0xf1   : > { %3076 = vmatmul.msk.f32.gmra.mxu3 %vm681_vm1, %v3847_v27 }
  0xf2   : > { %v4202_v6 = vpop.f32.mrf.mxu0  ;;  %3012 = vmatmul.msk.f32.gmra.mxu1 %vm681_vm1, %v3847_v27 }
  0xf3   : > { %3044 = vmatmul.msk.f32.gmra.mxu2 %vm681_vm1, %v4200_v2 }
  0xf4   : > { %v4206_v19 = vpop.f32.mrf.mxu3 }
  0xf5   : > { %5100 = vst [vmem:[#allocation48_spill] sm:$0xff] %v4206_v19  ;;  %3110 = vmatmul.msk.f32.gmra.mxu0 %vm681_vm1, %v3643_v45  ;;  %v1357_v45 = vrot.slane %v3621_v28, 2 }
  0xf6   : > { %v4213_v15 = vpop.f32.mrf.mxu2 }
  0xf7   : > { %5101 = vst [vmem:[#allocation49_spill] sm:$0xff] %v4213_v15  ;;  %v1219_v38 = vpop.f32.mrf.mxu1  ;;  %v4237_v3 = vsel %vm1315_vm4, %v1356_v51, %v1357_v45 }
  0xf8   : > { %5105 = vst [vmem:[#allocation53_spill] sm:$0xff] %v4237_v3 }
  0xf9   : > { %3077 = vmatmul.msk.f32.gmra.mxu3 %vm681_vm1, %v3611_v22 }
  0xfa   : > { %v4220_v27 = vpop.f32.mrf.mxu0  ;;  %3013 = vmatmul.msk.f32.gmra.mxu1 %vm681_vm1, %v3611_v22  ;;  %v1359_v22 = vrot.slane %v3634_v40, 2 }
  0xfb   : > { %3045 = vmatmul.msk.f32.gmra.mxu2 %vm681_vm1, %v4218_v48 }
  0xfc   : > { %v4224_v19 = vpop.f32.mrf.mxu3 }
  0xfd   : > { %5103 = vst [vmem:[#allocation51_spill] sm:$0xff] %v4224_v19  ;;  %3111 = vmatmul.msk.f32.gmra.mxu0 %vm681_vm1, %v3699_v21  ;;  %v1220_v21 = vadd.f32 %v1219_v38, %v4081_v25  ;;  %v1361_v25 = vrot.slane %v3711_v31, 2  ;;  %v1362_v38 = vrot.slane %v3713_v32, 2 }
  0xfe   : > { %v4232_v2 = vpop.f32.mrf.mxu2 }
  0xff   : > { %5104 = vst [vmem:[#allocation52_spill] sm:$0xff] %v4232_v2  ;;  %v1222_v46 = vpop.f32.mrf.mxu1 }
 0x101   : > { %3078 = vmatmul.msk.f32.gmra.mxu3 %vm681_vm1, %v3621_v28 }
 0x102   : > { %v1789_v19 = vpop.f32.mrf.mxu0  ;;  %3014 = vmatmul.msk.f32.gmra.mxu1 %vm681_vm1, %v3621_v28  ;;  %v4252_v28 = vsel %vm1315_vm4, %v1357_v45, %v1359_v22 }
 0x103   : > { %3046 = vmatmul.msk.f32.gmra.mxu2 %vm681_vm1, %v4237_v3  ;;  %5107 = vst [vmem:[#allocation55_spill] sm:$0xff] %v4252_v28 }
 0x104   : > { %v4241_v48 = vpop.f32.mrf.mxu3 }
 0x105   : > { %5106 = vst [vmem:[#allocation54_spill] sm:$0xff] %v4241_v48  ;;  %3112 = vmatmul.msk.f32.gmra.mxu0 %vm681_vm1, %v3765_v16 }
 0x106   : > { %v1479_v2 = vpop.f32.mrf.mxu2 }
 0x107   : > { %v1225_v15 = vpop.f32.mrf.mxu1  ;;  %v1575_v51 = vadd.f32 %v1479_v2, %v1220_v21  ;;  %v1223_v21 = vadd.f32 %v1222_v46, %v4099_v18  ;;  %v1364_v18 = vrot.slane %v3772_v20, 2 }
 0x109   : > { %3079 = vmatmul.msk.f32.gmra.mxu3 %vm681_vm1, %v3711_v31 }
 0x10a   : > { %v1792_v48 = vpop.f32.mrf.mxu0  ;;  %3015 = vmatmul.msk.f32.gmra.mxu1 %vm681_vm1, %v3711_v31 }
 0x10b   : > { %3047 = vmatmul.msk.f32.gmra.mxu2 %vm681_vm1, %v4252_v28 }
 0x10c   : > { %v1632_v3 = vpop.f32.mrf.mxu3 }
 0x10d   : > { %v1728_v40 = vadd.f32 %v1632_v3, %v1575_v51  ;;  %3113 = vmatmul.msk.f32.gmra.mxu0 %vm681_vm1, %v3808_v49  ;;  %v4268_v51 = vsel %vm1315_vm4, %v1361_v25, %v1362_v38 }
 0x10e   : > { %v1482_v2 = vpop.f32.mrf.mxu2 }
 0x10f   : > { %v4263_v45 = vadd.f32 %v1789_v19, %v1728_v40  ;;  %v1228_v22 = vpop.f32.mrf.mxu1  ;;  %v1576_v3 = vadd.f32 %v1482_v2, %v1223_v21  ;;  %v1226_v19 = vadd.f32 %v1225_v15, %v4120_v12  ;;  %v4283_v21 = vsel %vm1315_vm4, %v1362_v38, %v1364_v18 }
 0x110   : > { %v1366_v12 = vrot.slane %v3813_v54, 2  ;;  %v1367_v15 = vrot.slane %v3815_v58, 2 }
 0x111   : > { %3080 = vmatmul.msk.f32.gmra.mxu3 %vm681_vm1, %v3713_v32 }
 0x112   : > { %v1795_v16 = vpop.f32.mrf.mxu0  ;;  %3016 = vmatmul.msk.f32.gmra.mxu1 %vm681_vm1, %v3713_v32 }
 0x113   : > { %3048 = vmatmul.msk.f32.gmra.mxu2 %vm681_vm1, %v4268_v51 }
 0x114   : > { %v1635_v31 = vpop.f32.mrf.mxu3 }
 0x115   : > { %v1729_v28 = vadd.f32 %v1635_v31, %v1576_v3  ;;  %3114 = vmatmul.msk.f32.gmra.mxu0 %vm681_vm1, %v3850_v29 }
 0x116   : > { %v1485_v40 = vpop.f32.mrf.mxu2 }
 0x117   : > { %v4278_v46 = vadd.f32 %v1792_v48, %v1729_v28  ;;  %v1231_v25 = vpop.f32.mrf.mxu1  ;;  %v1577_v32 = vadd.f32 %v1485_v40, %v1226_v19  ;;  %v1229_v48 = vadd.f32 %v1228_v22, %v4140_v62  ;;  %v4299_v19 = vsel %vm1315_vm4, %v1366_v12, %v1367_v15  ;;  %v5108_v62 = vld [vmem:[#allocation32_spill] sm:$0xff] }
 0x118   : > { %v1232_v22 = vadd.f32 %v1231_v25, %v4161_v57  ;;  %v5111_v25 = vld [vmem:[#allocation27_spill] sm:$0xff] }
 0x119   : > { %3081 = vmatmul.msk.f32.gmra.mxu3 %vm681_vm1, %v3813_v54 }
 0x11a   : > { %v1798_v2 = vpop.f32.mrf.mxu0  ;;  %3017 = vmatmul.msk.f32.gmra.mxu1 %vm681_vm1, %v3813_v54 }
 0x11b   : > { %3049 = vmatmul.msk.f32.gmra.mxu2 %vm681_vm1, %v4283_v21 }
 0x11c   : > { %v1638_v20 = vpop.f32.mrf.mxu3 }
 0x11d   : > { %v1730_v3 = vadd.f32 %v1638_v20, %v1577_v32  ;;  %3115 = vmatmul.msk.f32.gmra.mxu0 %vm681_vm1, %v3893_v55 }
 0x11e   : > { %v1488_v38 = vpop.f32.mrf.mxu2 }
 0x11f   : > { %v4294_v28 = vadd.f32 %v1795_v16, %v1730_v3  ;;  %v1234_v31 = vpop.f32.mrf.mxu1  ;;  %v1578_v18 = vadd.f32 %v1488_v38, %v1229_v48  ;;  %v1369_v16 = vrot.slane %v3856_v41, 2  ;;  %v5110_v48 = vld [vmem:[#allocation26_spill] sm:$0xff] }
 0x120   : > { %v1371_v57 = vrot.slane %v5110_v48, 2 }
 0x121   : > { %3082 = vmatmul.msk.f32.gmra.mxu3 %vm681_vm1, %v3815_v58  ;;  %v4314_v38 = vsel %vm1315_vm4, %v1367_v15, %v1369_v16 }
 0x122   : > { %v1801_v40 = vpop.f32.mrf.mxu0  ;;  %3018 = vmatmul.msk.f32.gmra.mxu1 %vm681_vm1, %v3815_v58 }
 0x123   : > { %3050 = vmatmul.msk.f32.gmra.mxu2 %vm681_vm1, %v4299_v19 }
 0x124   : > { %v1641_v54 = vpop.f32.mrf.mxu3 }
 0x125   : > { %v1731_v32 = vadd.f32 %v1641_v54, %v1578_v18  ;;  %3116 = vmatmul.msk.f32.gmra.mxu0 %vm681_vm1, %v5108_v62 }
 0x126   : > { %v1491_v3 = vpop.f32.mrf.mxu2 }
 0x127   : > { %v4309_v20 = vadd.f32 %v1798_v2, %v1731_v32  ;;  %v1237_v12 = vpop.f32.mrf.mxu1  ;;  %v1579_v58 = vadd.f32 %v1491_v3, %v1232_v22  ;;  %v1372_v2 = vrot.slane %v5111_v25, 2  ;;  %v1235_v32 = vadd.f32 %v1234_v31, %v4181_v9  ;;  %v5113_v9 = vld [vmem:[#allocation33_spill] sm:$0xff] }
 0x128   : > { %v1374_v31 = vrot.slane %v5113_v9, 2 }
 0x129   : > { %5109 = vst [vmem:[#allocation56_spill] sm:$0xff] %v4309_v20  ;;  %3083 = vmatmul.msk.f32.gmra.mxu3 %vm681_vm1, %v5110_v48 }
 0x12a   : > { %v1804_v18 = vpop.f32.mrf.mxu0  ;;  %3019 = vmatmul.msk.f32.gmra.mxu1 %vm681_vm1, %v5110_v48 }
 0x12b   : > { %3051 = vmatmul.msk.f32.gmra.mxu2 %vm681_vm1, %v4314_v38 }
 0x12c   : > { %v1644_v41 = vpop.f32.mrf.mxu3 }
 0x12d   : > { %v1732_v54 = vadd.f32 %v1644_v41, %v1579_v58  ;;  %3117 = vmatmul.msk.f32.gmra.mxu0 %vm681_vm1, %v3961_v8  ;;  %v4330_v58 = vsel %vm1315_vm4, %v1371_v57, %v1372_v2 }
 0x12e   : > { %v1494_v16 = vpop.f32.mrf.mxu2 }
 0x12f   : > { %v4325_v15 = vadd.f32 %v1801_v40, %v1732_v54  ;;  %v1240_v22 = vpop.f32.mrf.mxu1  ;;  %v1580_v3 = vadd.f32 %v1494_v16, %v1235_v32  ;;  %v5114_v40 = vld [vmem:[#allocation8_spill] sm:$0xff]  ;;  %v1238_v54 = vadd.f32 %v1237_v12, %v4202_v6 }
 0x131   : > { %5112 = vst [vmem:[#allocation26_spill] sm:$0xff] %v4325_v15  ;;  %3084 = vmatmul.msk.f32.gmra.mxu3 %vm681_vm1, %v5111_v25  ;;  %v5116_v15 = vld [vmem:[#allocation5_spill] sm:$0xff] }
 0x132   : > { %v1807_v41 = vpop.f32.mrf.mxu0  ;;  %3020 = vmatmul.msk.f32.gmra.mxu1 %vm681_vm1, %v5111_v25  ;;  %v1376_v6 = vrot.slane %v5116_v15, 2 }
 0x133   : > { %3052 = vmatmul.msk.f32.gmra.mxu2 %vm681_vm1, %v4330_v58 }
 0x134   : > { %v1647_v48 = vpop.f32.mrf.mxu3 }
 0x135   : > { %v1733_v20 = vadd.f32 %v1647_v48, %v1580_v3  ;;  %3118 = vmatmul.msk.f32.gmra.mxu0 %vm681_vm1, %v5114_v40  ;;  %v4345_v3 = vsel %vm1315_vm4, %v1372_v2, %v1374_v31 }
 0x136   : > { %v1497_v57 = vpop.f32.mrf.mxu2  ;;  %5117 = vst [vmem:[#allocation33_spill] sm:$0xff] %v4345_v3 }
 0x137   : > { %v4340_v32 = vadd.f32 %v1804_v18, %v1733_v20  ;;  %v1243_v16 = vpop.f32.mrf.mxu1  ;;  %v1581_v25 = vadd.f32 %v1497_v57, %v1238_v54  ;;  %v5118_v20 = vld [vmem:[#allocation6_spill] sm:$0xff]  ;;  %v5119_v18 = vld [vmem:[#allocation11_spill] sm:$0xff]  ;;  %v1241_v54 = vadd.f32 %v1240_v22, %v4220_v27  ;;  %v5123_v22 = vld [vmem:[#allocation16_spill] sm:$0xff] }
 0x138   : > { %v1377_v12 = vrot.slane %v5118_v20, 2 }
 0x139   : > { %5115 = vst [vmem:[#allocation27_spill] sm:$0xff] %v4340_v32  ;;  %3085 = vmatmul.msk.f32.gmra.mxu3 %vm681_vm1, %v5116_v15 }
 0x13a   : > { %v1810_v48 = vpop.f32.mrf.mxu0  ;;  %3021 = vmatmul.msk.f32.gmra.mxu1 %vm681_vm1, %v5116_v15 }
 0x13b   : > { %3053 = vmatmul.msk.f32.gmra.mxu2 %vm681_vm1, %v4345_v3 }
 0x13c   : > { %v1650_v9 = vpop.f32.mrf.mxu3 }
 0x13d   : > { %v1734_v8 = vadd.f32 %v1650_v9, %v1581_v25  ;;  %3119 = vmatmul.msk.f32.gmra.mxu0 %vm681_vm1, %v5119_v18  ;;  %v4361_v9 = vsel %vm1315_vm4, %v1376_v6, %v1377_v12 }
 0x13e   : > { %v1500_v31 = vpop.f32.mrf.mxu2  ;;  %5121 = vst [vmem:[#allocation6_spill] sm:$0xff] %v4361_v9 }
 0x13f   : > { %v4356_v2 = vadd.f32 %v1807_v41, %v1734_v8  ;;  %v1246_v57 = vpop.f32.mrf.mxu1  ;;  %v1582_v25 = vadd.f32 %v1500_v31, %v1241_v54  ;;  %v5122_v8 = vld [vmem:[#allocation7_spill] sm:$0xff]  ;;  %v1244_v41 = vadd.f32 %v1243_v16, %v4054_v33  ;;  %v3297_v33 = vld [vmem:[%s4976_s4] ss:$0 sm:$0xff] }
 0x140   : > { %v1379_v27 = vrot.slane %v5122_v8, 2 }
 0x141   : > { %5120 = vst [vmem:[#allocation5_spill] sm:$0xff] %v4356_v2  ;;  %3086 = vmatmul.msk.f32.gmra.mxu3 %vm681_vm1, %v5118_v20  ;;  %v5125_v2 = vld [vmem:[#allocation12_spill] sm:$0xff] }
 0x142   : > { %v1813_v15 = vpop.f32.mrf.mxu0  ;;  %3022 = vmatmul.msk.f32.gmra.mxu1 %vm681_vm1, %v5118_v20 }
 0x143   : > { %3054 = vmatmul.msk.f32.gmra.mxu2 %vm681_vm1, %v4361_v9 }
 0x144   : > { %v1653_v32 = vpop.f32.mrf.mxu3 }
 0x145   : > { %v1735_v18 = vadd.f32 %v1653_v32, %v1582_v25  ;;  %3120 = vmatmul.msk.f32.gmra.mxu0 %vm681_vm1, %v5123_v22  ;;  %v4376_v32 = vsel %vm1315_vm4, %v1377_v12, %v1379_v27  ;;  %v574_v25 = vld [vmem:[%s3433_s14 + $0xf0] sm:$0xff]  ;;  %v3298_v12 = vld [vmem:[%s4977_s5] ss:$0 sm:$0xff]  ;;  %v1381_v27 = vrot.slane %v5125_v2, 2  ;;  %v1247_v22 = vadd.f32 %v1246_v57, %v4074_v14 }
 0x146   : > { %v1503_v6 = vpop.f32.mrf.mxu2  ;;  %5126 = vst [vmem:[#allocation12_spill] sm:$0xff] %v4376_v32  ;;  %v610_v16 = vmul.f32 %v3297_v33, %v574_v25 }
 0x147   : > { %v4371_v54 = vadd.f32 %v1810_v48, %v1735_v18  ;;  %v1249_v31 = vpop.f32.mrf.mxu1  ;;  %v1583_v20 = vadd.f32 %v1503_v6, %v1244_v41  ;;  %v5127_v41 = vld [vmem:[#allocation13_spill] sm:$0xff] }
 0x148   : > { %v646_v8 = vadd.f32 %v3298_v12, %v610_v16  ;;  %v1382_v6 = vrot.slane %v5127_v41, 2 }
 0x149   : > { %5124 = vst [vmem:[#allocation7_spill] sm:$0xff] %v4371_v54  ;;  %3087 = vmatmul.msk.f32.gmra.mxu3 %vm681_vm1, %v5125_v2  ;;  %v5128_v54 = vld [vmem:[#allocation19_spill] sm:$0xff] }
 0x14a   : > { %v1816_v40 = vpop.f32.mrf.mxu0  ;;  %3023 = vmatmul.msk.f32.gmra.mxu1 %vm681_vm1, %v5125_v2  ;;  %v4401_v2 = vsel %vm1315_vm4, %v1381_v27, %v1382_v6  ;;  %v5131_v27 = vld [vmem:[#allocation20_spill] sm:$0xff] }
 0x14b   : > { %3055 = vmatmul.msk.f32.gmra.mxu2 %vm681_vm1, %v4376_v32 }
 0x14c   : > { %v1656_v48 = vpop.f32.mrf.mxu3 }
 0x14d   : > { %v1736_v18 = vadd.f32 %v1656_v48, %v1583_v20  ;;  %3121 = vmatmul.msk.f32.gmra.mxu0 %vm681_vm1, %v5128_v54  ;;  %v678_v20 = vmax.f32 %v646_v8, 0.0  ;;  %v575_v48 = vld [vmem:[%s3433_s14 + $0xf8] sm:$0xff]  ;;  %v5130_v8 = vld [vmem:[#allocation23_spill] sm:$0xff] }
 0x14e   : > { %v1506_v9 = vpop.f32.mrf.mxu2  ;;  %v611_v3 = vmul.f32 %v3297_v33, %v575_v48  ;;  %v5129_v33 = vld [vmem:[#allocation17_spill] sm:$0xff] }
 0x14f   : > { %v4394_v25 = vadd.f32 %v1813_v15, %v1736_v18  ;;  %v1252_v32 = vpop.f32.mrf.mxu1  ;;  %v1584_v16 = vadd.f32 %v1506_v9, %v1247_v22  ;;  %712 = vst.msk [vmem:[#allocation2 + $0x181] sm:$0xff] %vm681_vm1, %v678_v20  ;;  %v1384_v18 = vrot.slane %v5129_v33, 2  ;;  %v1250_v9 = vadd.f32 %v1249_v31, %v4092_v59 }
 0x150   : > { %v647_v62 = vadd.f32 %v3298_v12, %v611_v3  ;;  %v1386_v59 = vrot.slane %v5131_v27, 2 }
 0x151   : > { %3088 = vmatmul.msk.f32.gmra.mxu3 %vm681_vm1, %v5127_v41 }
 0x152   : > { %v1819_v54 = vpop.f32.mrf.mxu0  ;;  %3024 = vmatmul.msk.f32.gmra.mxu1 %vm681_vm1, %v5127_v41  ;;  %v679_v57 = vmax.f32 %v647_v62, 0.0  ;;  %v4417_v41 = vsel %vm1315_vm4, %v1382_v6, %v1384_v18 }
 0x153   : > { %3056 = vmatmul.msk.f32.gmra.mxu2 %vm681_vm1, %v4401_v2 }
 0x154   : > { %v1659_v14 = vpop.f32.mrf.mxu3  ;;  %713 = vst.msk [vmem:[#allocation2 + $0x189] sm:$0xff] %vm681_vm1, %v679_v57  ;;  %v1253_v57 = vadd.f32 %v1252_v32, %v4113_v35  ;;  %v5135_v35 = vld [vmem:[#allocation24_spill] sm:$0xff]  ;;  %v5136_v32 = vld [vmem:[#allocation34_spill] sm:$0xff] }
 0x155   : > { %v1737_v15 = vadd.f32 %v1659_v14, %v1584_v16  ;;  %3122 = vmatmul.msk.f32.gmra.mxu0 %vm681_vm1, %v5130_v8  ;;  %v5133_v14 = vld [vmem:[#allocation28_spill] sm:$0xff] }
 0x156   : > { %v1509_v22 = vpop.f32.mrf.mxu2 }
 0x157   : > { %v4412_v3 = vadd.f32 %v1816_v40, %v1737_v15  ;;  %v1255_v12 = vpop.f32.mrf.mxu1  ;;  %v1585_v62 = vadd.f32 %v1509_v22, %v1250_v9  ;;  %v5132_v40 = vld [vmem:[#allocation21_spill] sm:$0xff] }
 0x158   : > { %v1387_v31 = vrot.slane %v5132_v40, 2 }
 0x159   : > { %3089 = vmatmul.msk.f32.gmra.mxu3 %vm681_vm1, %v5131_v27 }
 0x15a   : > { %v1822_v20 = vpop.f32.mrf.mxu0  ;;  %3025 = vmatmul.msk.f32.gmra.mxu1 %vm681_vm1, %v5131_v27  ;;  %v4433_v9 = vsel %vm1315_vm4, %v1386_v59, %v1387_v31 }
 0x15b   : > { %3057 = vmatmul.msk.f32.gmra.mxu2 %vm681_vm1, %v4417_v41 }
 0x15c   : > { %v1662_v48 = vpop.f32.mrf.mxu3 }
 0x15d   : > { %v1738_v16 = vadd.f32 %v1662_v48, %v1585_v62  ;;  %3123 = vmatmul.msk.f32.gmra.mxu0 %vm681_vm1, %v5133_v14  ;;  %v1256_v48 = vadd.f32 %v1255_v12, %v4133_v23  ;;  %v5139_v12 = vld [vmem:[#allocation30_spill] sm:$0xff] }
 0x15e   : > { %v1512_v15 = vpop.f32.mrf.mxu2 }
 0x15f   : > { %v4428_v6 = vadd.f32 %v1819_v54, %v1738_v16  ;;  %v1258_v33 = vpop.f32.mrf.mxu1  ;;  %v1586_v18 = vadd.f32 %v1512_v15, %v1253_v57  ;;  %v1389_v54 = vrot.slane %v5135_v35, 2  ;;  %v5138_v15 = vld [vmem:[#allocation29_spill] sm:$0xff] }
 0x160   : > { %v1391_v23 = vrot.slane %v5138_v15, 2 }
 0x161   : > { %5134 = vst [vmem:[#allocation13_spill] sm:$0xff] %v4428_v6  ;;  %3090 = vmatmul.msk.f32.gmra.mxu3 %vm681_vm1, %v5132_v40  ;;  %v4452_v6 = vld [vmem:[#allocation2 + $0x188] sm:$0xff] }
 0x162   : > { %v1825_v22 = vpop.f32.mrf.mxu0  ;;  %3026 = vmatmul.msk.f32.gmra.mxu1 %vm681_vm1, %v5132_v40 }
 0x163   : > { %3058 = vmatmul.msk.f32.gmra.mxu2 %vm681_vm1, %v4433_v9 }
 0x164   : > { %v1665_v27 = vpop.f32.mrf.mxu3 }
 0x165   : > { %v1739_v62 = vadd.f32 %v1665_v27, %v1586_v18  ;;  %3124 = vmatmul.msk.f32.gmra.mxu0 %vm681_vm1, %v5136_v32  ;;  %v4448_v18 = vsel %vm1315_vm4, %v1387_v31, %v1389_v54  ;;  %v1259_v31 = vadd.f32 %v1258_v33, %v4154_v13 }
 0x166   : > { %v1515_v59 = vpop.f32.mrf.mxu2 }
 0x167   : > { %v4443_v16 = vadd.f32 %v1822_v20, %v1739_v62  ;;  %v1261_v57 = vpop.f32.mrf.mxu1  ;;  %v1587_v40 = vadd.f32 %v1515_v59, %v1256_v48  ;;  %v1392_v20 = vrot.slane %v5139_v12, 2  ;;  %v4458_v62 = vld [vmem:[#allocation2 + $0x180] sm:$0xff]  ;;  %v1762_v59 = vrot.slane %v4452_v6, 1 }
 0x168   : > { %v1761_v48 = vrot.slane %v4458_v62, 1 }
 0x169   : > { %5137 = vst [vmem:[#allocation17_spill] sm:$0xff] %v4443_v16  ;;  %3091 = vmatmul.msk.f32.gmra.mxu3 %vm681_vm1, %v5138_v15  ;;  %v4470_v16 = vsel %vm1315_vm4, %v1391_v23, %v1392_v20  ;;  %v1262_v23 = vadd.f32 %v1261_v57, %v4174_v36 }
 0x16a   : > { %v1828_v27 = vpop.f32.mrf.mxu0  ;;  %3027 = vmatmul.msk.f32.gmra.mxu1 %vm681_vm1, %v5138_v15  ;;  %v4475_v13 = vsel %vm878_vm2, %v1761_v48, %v1762_v59 }
 0x16b   : > { %3059 = vmatmul.msk.f32.gmra.mxu2 %vm681_vm1, %v4448_v18 }
 0x16c   : > { %v1668_v35 = vpop.f32.mrf.mxu3 }
 0x16d   : > { %v1740_v32 = vadd.f32 %v1668_v35, %v1587_v40  ;;  %3125 = vmatmul.msk.f32.gmra.mxu0 %vm681_vm1, %v3972_v1 }
 0x16e   : > { %v1518_v40 = vpop.f32.mrf.mxu2 }
 0x16f   : > { %v4463_v54 = vadd.f32 %v1825_v22, %v1740_v32  ;;  %v1264_v35 = vpop.f32.mrf.mxu1  ;;  %v1588_v15 = vadd.f32 %v1518_v40, %v1259_v31  ;;  %v4477_v22 = vld [vmem:[#allocation2 + $0x190] sm:$0x3] }
 0x171   : > { %5140 = vst [vmem:[#allocation23_spill] sm:$0xff] %v4463_v54  ;;  %3092 = vmatmul.msk.f32.gmra.mxu3 %vm681_vm1, %v5139_v12  ;;  %v1394_v54 = vrot.slane %v3955_v52, 2 }
 0x172   : > { %v1831_v14 = vpop.f32.mrf.mxu0  ;;  %3028 = vmatmul.msk.f32.gmra.mxu1 %vm681_vm1, %v5139_v12  ;;  %v1764_v12 = vrot.slane %v4477_v22, 1 }
 0x173   : > { %3060 = vmatmul.msk.f32.gmra.mxu2 %vm681_vm1, %v4470_v16 }
 0x174   : > { %v1671_v33 = vpop.f32.mrf.mxu3  ;;  %v4496_v52 = vsel %vm878_vm2, %v1762_v59, %v1764_v12 }
 0x175   : > { %v1741_v32 = vadd.f32 %v1671_v33, %v1588_v15  ;;  %3126 = vmatmul.msk.f32.gmra.mxu0 %vm681_vm1, %v4475_v13  ;;  %v4491_v33 = vsel %vm1315_vm4, %v1392_v20, %v1394_v54 }
 0x176   : > { %v1521_v48 = vpop.f32.mrf.mxu2 }
 0x177   : > { %v4485_v31 = vadd.f32 %v1828_v27, %v1741_v32  ;;  %v1267_v40 = vpop.f32.mrf.mxu1  ;;  %v1589_v15 = vadd.f32 %v1521_v48, %v1262_v23  ;;  %v1265_v27 = vadd.f32 %v1264_v35, %v4195_v47 }
 0x178   : > { %v1268_v47 = vadd.f32 %v1267_v40, %v4090_v56 }
 0x179   : > { %3093 = vmatmul.msk.f32.gmra.mxu3 %vm681_vm1, %v4458_v62 }
 0x17a   : > { %v1834_v1 = vpop.f32.mrf.mxu0  ;;  %3129 = vmatmul.msk.f32.vlgmr.msra.gmra.mxu1 %vm681_vm1, %v4000_v24 }
 0x17b   : > { %3061 = vmatmul.msk.f32.gmra.mxu2 %vm681_vm1, %v4491_v33 }
 0x17c   : > { %v1674_v36 = vpop.f32.mrf.mxu3 }
 0x17d   : > { %v1742_v57 = vadd.f32 %v1674_v36, %v1589_v15  ;;  %3127 = vmatmul.msk.f32.gmra.mxu0 %vm681_vm1, %v4496_v52 }
 0x17e   : > { %v1524_v20 = vpop.f32.mrf.mxu2 }
 0x17f   : > { %v4503_v32 = vadd.f32 %v1831_v14, %v1742_v57  ;;  %v1270_v54 = vpop.f32.mrf.mxu1  ;;  %v1590_v24 = vadd.f32 %v1524_v20, %v1265_v27 }
 0x181   : > { %3094 = vmatmul.msk.f32.gmra.mxu3 %vm681_vm1, %v4452_v6 }
 0x182   : > { %v1837_v59 = vpop.f32.mrf.mxu0  ;;  %3130 = vmatmul.msk.f32.gmra.mxu1 %vm681_vm1, %v4012_v53 }
 0x183   : > { %3162 = vmatmul.msk.f32.vlgmr.msra.gmra.mxu2 %vm681_vm1, %v3821_v61  ;;  %v1271_v61 = vadd.f32 %v1270_v54, %v4111_v50 }
 0x184   : > { %v1677_v23 = vpop.f32.mrf.mxu3 }
 0x185   : > { %v1743_v12 = vadd.f32 %v1677_v23, %v1590_v24  ;;  %3228 = vmatmul.msk.f32.vlgmr.msra.gmra.mxu0 %vm681_vm1, %v4025_v37 }
 0x186   : > { %v1527_v35 = vpop.f32.mrf.mxu2 }
 0x187   : > { %v4514_v14 = vadd.f32 %v1834_v1, %v1743_v12  ;;  %v1273_v48 = vpop.f32.mrf.mxu1  ;;  %v1591_v15 = vadd.f32 %v1527_v35, %v1268_v47 }
 0x189   : > { %3195 = vmatmul.msk.f32.vlgmr.msra.gmra.mxu3 %vm681_vm1, %v3859_v34 }
 0x18a   : > { %v1840_v36 = vpop.f32.mrf.mxu0  ;;  %3131 = vmatmul.msk.f32.gmra.mxu1 %vm681_vm1, %v4025_v37 }
 0x18b   : > { %3163 = vmatmul.msk.f32.gmra.mxu2 %vm681_vm1, %v3823_v4  ;;  %v1274_v4 = vadd.f32 %v1273_v48, %v4131_v63 }
 0x18c   : > { %v1680_v53 = vpop.f32.mrf.mxu3 }
 0x18d   : > { %v1744_v57 = vadd.f32 %v1680_v53, %v1591_v15  ;;  %3229 = vmatmul.msk.f32.gmra.mxu0 %vm681_vm1, %v4037_v0 }
 0x18e   : > { %v1530_v56 = vpop.f32.mrf.mxu2 }
 0x18f   : > { %v4525_v1 = vadd.f32 %v1837_v59, %v1744_v57  ;;  %v1276_v40 = vpop.f32.mrf.mxu1  ;;  %v1592_v34 = vadd.f32 %v1530_v56, %v1271_v61  ;;  %v3300_v56 = vld [vmem:[#allocation2 + $0x68] sm:$0xff] }
 0x191   : > { %3196 = vmatmul.msk.f32.gmra.mxu3 %vm681_vm1, %v3903_v39 }
 0x192   : > { %v1843_v27 = vpop.f32.mrf.mxu0  ;;  %3132 = vmatmul.msk.f32.gmra.mxu1 %vm681_vm1, %v4037_v0 }
 0x193   : > { %3164 = vmatmul.msk.f32.gmra.mxu2 %vm681_vm1, %v3906_v43  ;;  %v1277_v43 = vadd.f32 %v1276_v40, %v4152_v42 }
 0x194   : > { %v1683_v37 = vpop.f32.mrf.mxu3 }
 0x195   : > { %v1745_v20 = vadd.f32 %v1683_v37, %v1592_v34  ;;  %3230 = vmatmul.msk.f32.gmra.mxu0 %vm681_vm1, %v4050_v30 }
 0x196   : > { %v1533_v54 = vpop.f32.mrf.mxu2 }
 0x197   : > { %v4536_v50 = vadd.f32 %v1840_v36, %v1745_v20  ;;  %v1279_v24 = vpop.f32.mrf.mxu1  ;;  %v1593_v39 = vadd.f32 %v1533_v54, %v1274_v4 }
 0x198   : > { %v1280_v42 = vadd.f32 %v1279_v24, %v4172_v26  ;;  %v5141_v26 = vld [vmem:[#allocation46_spill] sm:$0xff]  ;;  %v3301_v24 = vld [vmem:[#allocation2 + $0x78] sm:$0xff] }
 0x199   : > { %3197 = vmatmul.msk.f32.gmra.mxu3 %vm681_vm1, %v3943_v44 }
 0x19a   : > { %v1846_v59 = vpop.f32.mrf.mxu0  ;;  %3133 = vmatmul.msk.f32.gmra.mxu1 %vm681_vm1, %v4050_v30 }
 0x19b   : > { %3165 = vmatmul.msk.f32.gmra.mxu2 %vm681_vm1, %v3908_v10  ;;  %v3299_v10 = vld [vmem:[#allocation2 + $0x60] sm:$0xff] }
 0x19c   : > { %v1686_v0 = vpop.f32.mrf.mxu3 }
 0x19d   : > { %v1746_v23 = vadd.f32 %v1686_v0, %v1593_v39  ;;  %3231 = vmatmul.msk.f32.gmra.mxu0 %vm681_vm1, %v4064_v5  ;;  %v5143_v39 = vld [vmem:[#allocation38_spill] sm:$0xff] }
 0x19e   : > { %v1536_v12 = vpop.f32.mrf.mxu2 }
 0x19f   : > { %v4547_v63 = vadd.f32 %v1843_v27, %v1746_v23  ;;  %v1282_v47 = vpop.f32.mrf.mxu1  ;;  %v1594_v44 = vadd.f32 %v1536_v12, %v1277_v43 }
 0x1a0   : > { %v1283_v40 = vadd.f32 %v1282_v47, %v5141_v26  ;;  %v5145_v47 = vld [vmem:[#allocation10_spill] sm:$0xff] }
 0x1a1   : > { %3198 = vmatmul.msk.f32.gmra.mxu3 %vm681_vm1, %v3967_v7 }
 0x1a2   : > { %v1849_v35 = vpop.f32.mrf.mxu0  ;;  %3134 = vmatmul.msk.f32.gmra.mxu1 %vm681_vm1, %v4064_v5 }
 0x1a3   : > { %3166 = vmatmul.msk.f32.gmra.mxu2 %vm681_vm1, %v3299_v10  ;;  %v5146_v10 = vld [vmem:[#allocation40_spill] sm:$0xff] }
 0x1a4   : > { %v1689_v30 = vpop.f32.mrf.mxu3 }
 0x1a5   : > { %v1747_v48 = vadd.f32 %v1689_v30, %v1594_v44  ;;  %3232 = vmatmul.msk.f32.gmra.mxu0 %vm681_vm1, %v4079_v11 }
 0x1a6   : > { %v1539_v36 = vpop.f32.mrf.mxu2 }
 0x1a7   : > { %v4557_v15 = vadd.f32 %v1846_v59, %v1747_v48  ;;  %v1285_v53 = vpop.f32.mrf.mxu1  ;;  %v1595_v7 = vadd.f32 %v1539_v36, %v1280_v42  ;;  %v5144_v59 = vld [vmem:[#allocation49_spill] sm:$0xff]  ;;  %v5147_v42 = vld [vmem:[#allocation52_spill] sm:$0xff] }
 0x1a8   : > { %v1286_v0 = vadd.f32 %v1285_v53, %v5144_v59  ;;  %v3302_v48 = vld [vmem:[#allocation2 + $0x80] sm:$0xff] }
 0x1a9   : > { %3199 = vmatmul.msk.f32.gmra.mxu3 %vm681_vm1, %v3492_v17  ;;  %v5142_v17 = vld [vmem:[#allocation3_spill] sm:$0xff] }
 0x1aa   : > { %v1852_v57 = vpop.f32.mrf.mxu0  ;;  %3135 = vmatmul.msk.f32.gmra.mxu1 %vm681_vm1, %v4079_v11 }
 0x1ab   : > { %3167 = vmatmul.msk.f32.gmra.mxu2 %vm681_vm1, %v3300_v56 }
 0x1ac   : > { %v1692_v5 = vpop.f32.mrf.mxu3 }
 0x1ad   : > { %v1748_v61 = vadd.f32 %v1692_v5, %v1595_v7  ;;  %3233 = vmatmul.msk.f32.gmra.mxu0 %vm681_vm1, %v4097_v60  ;;  %v5148_v5 = vld [vmem:[#allocation14_spill] sm:$0xff] }
 0x1ae   : > { %v1542_v27 = vpop.f32.mrf.mxu2 }
 0x1af   : > { %v4567_v34 = vadd.f32 %v1849_v35, %v1748_v61  ;;  %v1288_v37 = vpop.f32.mrf.mxu1  ;;  %v1596_v20 = vadd.f32 %v1542_v27, %v1283_v40  ;;  %v3303_v27 = vld [vmem:[#allocation2 + $0x90] sm:$0xff] }
 0x1b0   : > { %v1289_v36 = vadd.f32 %v1288_v37, %v5147_v42  ;;  %v5150_v37 = vld [vmem:[#allocation37_spill] sm:$0xff] }
 0x1b1   : > { %3200 = vmatmul.msk.f32.gmra.mxu3 %vm681_vm1, %v5142_v17  ;;  %v5149_v17 = vld [vmem:[#allocation42_spill] sm:$0xff] }
 0x1b2   : > { %v1855_v4 = vpop.f32.mrf.mxu0  ;;  %3136 = vmatmul.msk.f32.gmra.mxu1 %vm681_vm1, %v4097_v60 }
 0x1b3   : > { %3168 = vmatmul.msk.f32.gmra.mxu2 %vm681_vm1, %v3301_v24  ;;  %v5151_v24 = vld [vmem:[#allocation18_spill] sm:$0xff] }
 0x1b4   : > { %v1695_v11 = vpop.f32.mrf.mxu3 }
 0x1b5   : > { %v1749_v54 = vadd.f32 %v1695_v11, %v1596_v20  ;;  %3234 = vmatmul.msk.f32.gmra.mxu0 %vm681_vm1, %v5143_v39 }
 0x1b6   : > { %v1545_v43 = vpop.f32.mrf.mxu2 }
 0x1b7   : > { %v4577_v23 = vadd.f32 %v1852_v57, %v1749_v54  ;;  %v1291_v12 = vpop.f32.mrf.mxu1  ;;  %v1597_v44 = vadd.f32 %v1545_v43, %v1286_v0 }
 0x1b8   : > { %v1292_v20 = vadd.f32 %v1291_v12, %v5150_v37  ;;  %v5153_v12 = vld [vmem:[#allocation39_spill] sm:$0xff]  ;;  %v5157_v37 = vld [vmem:[#allocation25_spill] sm:$0xff] }
 0x1b9   : > { %3201 = vmatmul.msk.f32.gmra.mxu3 %vm681_vm1, %v5145_v47  ;;  %v3304_v47 = vld [vmem:[#allocation2 + $0x98] sm:$0xff] }
 0x1ba   : > { %v1858_v35 = vpop.f32.mrf.mxu0  ;;  %3137 = vmatmul.msk.f32.gmra.mxu1 %vm681_vm1, %v5143_v39 }
 0x1bb   : > { %3169 = vmatmul.msk.f32.gmra.mxu2 %vm681_vm1, %v3302_v48 }
 0x1bc   : > { %v1698_v60 = vpop.f32.mrf.mxu3 }
 0x1bd   : > { %v1750_v30 = vadd.f32 %v1698_v60, %v1597_v44  ;;  %3235 = vmatmul.msk.f32.gmra.mxu0 %vm681_vm1, %v5146_v10  ;;  %v5152_v44 = vld [vmem:[#allocation44_spill] sm:$0xff] }
 0x1be   : > { %v1548_v7 = vpop.f32.mrf.mxu2 }
 0x1bf   : > { %v4587_v53 = vadd.f32 %v1855_v4, %v1750_v30  ;;  %v1294_v57 = vpop.f32.mrf.mxu1  ;;  %v1598_v61 = vadd.f32 %v1548_v7, %v1289_v36 }
 0x1c1   : > { %3202 = vmatmul.msk.f32.gmra.mxu3 %vm681_vm1, %v5148_v5 }
 0x1c2   : > { %v1861_v56 = vpop.f32.mrf.mxu0  ;;  %3138 = vmatmul.msk.f32.gmra.mxu1 %vm681_vm1, %v5146_v10  ;;  %v5154_v10 = vld [vmem:[#allocation22_spill] sm:$0xff] }
 0x1c3   : > { %3170 = vmatmul.msk.f32.gmra.mxu2 %vm681_vm1, %v3303_v27 }
 0x1c4   : > { %v1701_v26 = vpop.f32.mrf.mxu3 }
 0x1c5   : > { %v1751_v40 = vadd.f32 %v1701_v26, %v1598_v61  ;;  %3236 = vmatmul.msk.f32.gmra.mxu0 %vm681_vm1, %v5149_v17  ;;  %v3305_v61 = vld [vmem:[#allocation2 + $0xa8] sm:$0xff]  ;;  %v5155_v26 = vld [vmem:[#allocation47_spill] sm:$0xff] }
 0x1c6   : > { %v1551_v11 = vpop.f32.mrf.mxu2 }
 0x1c7   : > { %v4597_v4 = vadd.f32 %v1858_v35, %v1751_v40  ;;  %v1297_v54 = vpop.f32.mrf.mxu1  ;;  %v1599_v39 = vadd.f32 %v1551_v11, %v1292_v20  ;;  %v1295_v35 = vadd.f32 %v1294_v57, %v5153_v12  ;;  %v5156_v57 = vld [vmem:[#allocation41_spill] sm:$0xff] }
 0x1c9   : > { %3203 = vmatmul.msk.f32.gmra.mxu3 %vm681_vm1, %v5151_v24 }
 0x1ca   : > { %v1864_v59 = vpop.f32.mrf.mxu0  ;;  %3139 = vmatmul.msk.f32.gmra.mxu1 %vm681_vm1, %v5149_v17 }
 0x1cb   : > { %3171 = vmatmul.msk.f32.gmra.mxu2 %vm681_vm1, %v3304_v47 }
 0x1cc   : > { %v1704_v0 = vpop.f32.mrf.mxu3 }
 0x1cd   : > { %v1752_v43 = vadd.f32 %v1704_v0, %v1599_v39  ;;  %3237 = vmatmul.msk.f32.gmra.mxu0 %vm681_vm1, %v5152_v44  ;;  %v3306_v0 = vld [vmem:[#allocation2 + $0xb0] sm:$0xff] }
 0x1ce   : > { %v1554_v30 = vpop.f32.mrf.mxu2 }
 0x1cf   : > { %v4607_v60 = vadd.f32 %v1861_v56, %v1752_v43  ;;  %v1300_v48 = vpop.f32.mrf.mxu1  ;;  %v1600_v42 = vadd.f32 %v1554_v30, %v1295_v35  ;;  %v1298_v56 = vadd.f32 %v1297_v54, %v5156_v57  ;;  %v5158_v43 = vld [vmem:[#allocation50_spill] sm:$0xff]  ;;  %v5159_v54 = vld [vmem:[#allocation43_spill] sm:$0xff] }
 0x1d0   : > { %v5160_v35 = vld [vmem:[#allocation31_spill] sm:$0xff] }
 0x1d1   : > { %3204 = vmatmul.msk.f32.gmra.mxu3 %vm681_vm1, %v5154_v10 }
 0x1d2   : > { %v1867_v36 = vpop.f32.mrf.mxu0  ;;  %3140 = vmatmul.msk.f32.gmra.mxu1 %vm681_vm1, %v5152_v44 }
 0x1d3   : > { %3172 = vmatmul.msk.f32.gmra.mxu2 %vm681_vm1, %v3305_v61  ;;  %v5161_v61 = vld [vmem:[#allocation53_spill] sm:$0xff] }
 0x1d4   : > { %v1707_v7 = vpop.f32.mrf.mxu3 }
 0x1d5   : > { %v1753_v5 = vadd.f32 %v1707_v7, %v1600_v42  ;;  %3238 = vmatmul.msk.f32.gmra.mxu0 %vm681_vm1, %v5155_v26 }
 0x1d6   : > { %v1557_v27 = vpop.f32.mrf.mxu2 }
 0x1d7   : > { %v4617_v40 = vadd.f32 %v1864_v59, %v1753_v5  ;;  %v1303_v17 = vpop.f32.mrf.mxu1  ;;  %v1601_v20 = vadd.f32 %v1557_v27, %v1298_v56  ;;  %v1301_v59 = vadd.f32 %v1300_v48, %v5159_v54  ;;  %v3307_v5 = vld [vmem:[#allocation2 + $0xc0] sm:$0xff]  ;;  %v5163_v27 = vld [vmem:[#allocation4_spill] sm:$0xff] }
 0x1d8   : > { %v5162_v48 = vld [vmem:[#allocation45_spill] sm:$0xff] }
 0x1d9   : > { %3205 = vmatmul.msk.f32.gmra.mxu3 %vm681_vm1, %v5157_v37 }
 0x1da   : > { %v1870_v11 = vpop.f32.mrf.mxu0  ;;  %3141 = vmatmul.msk.f32.gmra.mxu1 %vm681_vm1, %v5155_v26 }
 0x1db   : > { %3173 = vmatmul.msk.f32.gmra.mxu2 %vm681_vm1, %v3306_v0  ;;  %v3308_v0 = vld [vmem:[#allocation2 + $0xc8] sm:$0xff] }
 0x1dc   : > { %v1710_v24 = vpop.f32.mrf.mxu3 }
 0x1dd   : > { %v1754_v39 = vadd.f32 %v1710_v24, %v1601_v20  ;;  %3239 = vmatmul.msk.f32.gmra.mxu0 %vm681_vm1, %v5158_v43 }
 0x1de   : > { %v1560_v44 = vpop.f32.mrf.mxu2 }
 0x1df   : > { %v4627_v47 = vadd.f32 %v1867_v36, %v1754_v39  ;;  %v1306_v12 = vpop.f32.mrf.mxu1  ;;  %v1602_v30 = vadd.f32 %v1560_v44, %v1301_v59  ;;  %v1304_v36 = vadd.f32 %v1303_v17, %v5162_v48  ;;  %v5165_v17 = vld [vmem:[#allocation48_spill] sm:$0xff] }
 0x1e1   : > { %3206 = vmatmul.msk.f32.gmra.mxu3 %vm681_vm1, %v5160_v35  ;;  %v5166_v35 = vld [vmem:[#allocation9_spill] sm:$0xff] }
 0x1e2   : > { %v1873_v10 = vpop.f32.mrf.mxu0  ;;  %3142 = vmatmul.msk.f32.gmra.mxu1 %vm681_vm1, %v5158_v43  ;;  %v5164_v43 = vld [vmem:[#allocation55_spill] sm:$0xff] }
 0x1e3   : > { %3174 = vmatmul.msk.f32.gmra.mxu2 %vm681_vm1, %v3307_v5 }
 0x1e4   : > { %v1713_v42 = vpop.f32.mrf.mxu3 }
 0x1e5   : > { %v1755_v7 = vadd.f32 %v1713_v42, %v1602_v30  ;;  %3240 = vmatmul.msk.f32.gmra.mxu0 %vm681_vm1, %v5161_v61 }
 0x1e6   : > { %v1563_v57 = vpop.f32.mrf.mxu2 }
 0x1e7   : > { %v4637_v26 = vadd.f32 %v1870_v11, %v1755_v7  ;;  %v1309_v56 = vpop.f32.mrf.mxu1  ;;  %v1603_v37 = vadd.f32 %v1563_v57, %v1304_v36  ;;  %v1307_v11 = vadd.f32 %v1306_v12, %v5165_v17  ;;  %v5167_v12 = vld [vmem:[#allocation51_spill] sm:$0xff] }
 0x1e9   : > { %3207 = vmatmul.msk.f32.gmra.mxu3 %vm681_vm1, %v5163_v27  ;;  %v5168_v27 = vld [vmem:[#allocation15_spill] sm:$0xff] }
 0x1ea   : > { %v1876_v20 = vpop.f32.mrf.mxu0  ;;  %3143 = vmatmul.msk.f32.gmra.mxu1 %vm681_vm1, %v5161_v61  ;;  %v3309_v61 = vld [vmem:[#allocation2 + $0xd8] sm:$0xff] }
 0x1eb   : > { %3175 = vmatmul.msk.f32.gmra.mxu2 %vm681_vm1, %v3308_v0 }
 0x1ec   : > { %v1716_v24 = vpop.f32.mrf.mxu3 }
 0x1ed   : > { %v1756_v39 = vadd.f32 %v1716_v24, %v1603_v37  ;;  %3241 = vmatmul.msk.f32.gmra.mxu0 %vm681_vm1, %v5164_v43 }
 0x1ee   : > { %v1566_v59 = vpop.f32.mrf.mxu2 }
 0x1ef   : > { %v4647_v54 = vadd.f32 %v1873_v10, %v1756_v39  ;;  %v1312_v44 = vpop.f32.mrf.mxu1  ;;  %v1604_v30 = vadd.f32 %v1566_v59, %v1307_v11  ;;  %v1310_v10 = vadd.f32 %v1309_v56, %v5167_v12  ;;  %v5169_v56 = vld [vmem:[#allocation54_spill] sm:$0xff] }
 0x1f1   : > { %3208 = vmatmul.msk.f32.gmra.mxu3 %vm681_vm1, %v5166_v35 }
 0x1f2   : > { %v1879_v42 = vpop.f32.mrf.mxu0  ;;  %3144 = vmatmul.msk.f32.gmra.mxu1 %vm681_vm1, %v5164_v43  ;;  %v3310_v43 = vld [vmem:[#allocation2 + $0xe0] sm:$0xff] }
 0x1f3   : > { %3176 = vmatmul.msk.f32.gmra.mxu2 %vm681_vm1, %v3309_v61 }
 0x1f4   : > { %v1719_v7 = vpop.f32.mrf.mxu3 }
 0x1f5   : > { %v1757_v5 = vadd.f32 %v1719_v7, %v1604_v30  ;;  %3242 = vmatmul.msk.f32.gmra.mxu0 %vm681_vm1, %v4268_v51 }
 0x1f6   : > { %v1569_v36 = vpop.f32.mrf.mxu2 }
 0x1f7   : > { %v4657_v48 = vadd.f32 %v1876_v20, %v1757_v5  ;;  %v1945_v57 = vpop.f32.mrf.mxu1  ;;  %v1605_v37 = vadd.f32 %v1569_v36, %v1310_v10  ;;  %v1313_v20 = vadd.f32 %v1312_v44, %v5169_v56  ;;  %v3311_v5 = vld [vmem:[#allocation2 + $0xf0] sm:$0xff] }
 0x1f8   : > { %v2041_v44 = vadd.f32 %v1945_v57, %v4263_v45 }
 0x1f9   : > { %3209 = vmatmul.msk.f32.gmra.mxu3 %vm681_vm1, %v5168_v27  ;;  %v3312_v27 = vld [vmem:[#allocation2 + $0xf8] sm:$0xff] }
 0x1fa   : > { %v1882_v24 = vpop.f32.mrf.mxu0  ;;  %3145 = vmatmul.msk.f32.gmra.mxu1 %vm681_vm1, %v4268_v51 }
 0x1fb   : > { %3177 = vmatmul.msk.f32.gmra.mxu2 %vm681_vm1, %v3310_v43  ;;  %v3313_v43 = vld [vmem:[#allocation2 + $0x108] sm:$0xff] }
 0x1fc   : > { %v1722_v39 = vpop.f32.mrf.mxu3 }
 0x1fd   : > { %v1758_v0 = vadd.f32 %v1722_v39, %v1605_v37  ;;  %3243 = vmatmul.msk.f32.gmra.mxu0 %vm681_vm1, %v4283_v21 }
 0x1fe   : > { %v1572_v11 = vpop.f32.mrf.mxu2 }
 0x1ff   : > { %v4667_v17 = vadd.f32 %v1879_v42, %v1758_v0  ;;  %v1948_v59 = vpop.f32.mrf.mxu1  ;;  %v1606_v35 = vadd.f32 %v1572_v11, %v1313_v20 }
 0x201   : > { %3210 = vmatmul.msk.f32.gmra.mxu3 %vm681_vm1, %v3808_v49 }
 0x202   : > { %v2411_v30 = vpop.f32.mrf.mxu0  ;;  %3146 = vmatmul.msk.f32.gmra.mxu1 %vm681_vm1, %v4283_v21 }
 0x203   : > { %3178 = vmatmul.msk.f32.gmra.mxu2 %vm681_vm1, %v3311_v5 }
 0x204   : > { %v1725_v51 = vpop.f32.mrf.mxu3 }
 0x205   : > { %v1759_v7 = vadd.f32 %v1725_v51, %v1606_v35  ;;  %3244 = vmatmul.msk.f32.gmra.mxu0 %vm681_vm1, %v4299_v19 }
 0x206   : > { %v2098_v61 = vpop.f32.mrf.mxu2 }
 0x207   : > { %v4677_v42 = vadd.f32 %v1882_v24, %v1759_v7  ;;  %v1951_v49 = vpop.f32.mrf.mxu1  ;;  %v2194_v12 = vadd.f32 %v2098_v61, %v2041_v44 }
 0x208   : > { %v2043_v56 = vadd.f32 %v1951_v49, %v4294_v28 }
 0x209   : > { %3211 = vmatmul.msk.f32.gmra.mxu3 %vm681_vm1, %v3850_v29  ;;  %v2042_v29 = vadd.f32 %v1948_v59, %v4278_v46 }
 0x20a   : > { %v2414_v21 = vpop.f32.mrf.mxu0  ;;  %3147 = vmatmul.msk.f32.gmra.mxu1 %vm681_vm1, %v4299_v19 }
 0x20b   : > { %3179 = vmatmul.msk.f32.gmra.mxu2 %vm681_vm1, %v3312_v27 }
 0x20c   : > { %v2255_v10 = vpop.f32.mrf.mxu3 }
 0x20d   : > { %v2351_v36 = vadd.f32 %v2255_v10, %v2194_v12  ;;  %3245 = vmatmul.msk.f32.gmra.mxu0 %vm681_vm1, %v4314_v38  ;;  %v5171_v10 = vld [vmem:[#allocation33_spill] sm:$0xff] }
 0x20e   : > { %v2101_v57 = vpop.f32.mrf.mxu2 }
 0x20f   : > { %v2507_v45 = vadd.f32 %v2411_v30, %v2351_v36  ;;  %v1954_v19 = vpop.f32.mrf.mxu1  ;;  %v2195_v37 = vadd.f32 %v2101_v57, %v2042_v29  ;;  %v5170_v30 = vld [vmem:[#allocation32_spill] sm:$0xff] }
 0x210   : > { %v5172_v36 = vld [vmem:[#allocation56_spill] sm:$0xff] }
 0x211   : > { %2539 = vst.msk [vmem:[%s4689_s20] sm:$0xff] %vm681_vm1, %v2507_v45  ;;  %3212 = vmatmul.msk.f32.gmra.mxu3 %vm681_vm1, %v3893_v55  ;;  %v2641_v46 = vmul.f32 %v2507_v45, %v2507_v45  ;;  %v2571_v55 = vsel %vm681_vm1, %v2507_v45, 0.0  ;;  %v2044_v27 = vadd.f32 %v1954_v19, %v5172_v36 }
 0x212   : > { %v2417_v24 = vpop.f32.mrf.mxu0  ;;  %3148 = vmatmul.msk.f32.gmra.mxu1 %vm681_vm1, %v4314_v38 }
 0x213   : > { %3180 = vmatmul.msk.f32.gmra.mxu2 %vm681_vm1, %v3313_v43  ;;  %v2673_v5 = vsel %vm681_vm1, %v2641_v46, 0.0 }
 0x214   : > { %v2258_v39 = vpop.f32.mrf.mxu3 }
 0x215   : > { %v2352_v0 = vadd.f32 %v2258_v39, %v2195_v37  ;;  %3246 = vmatmul.msk.f32.gmra.mxu0 %vm681_vm1, %v4330_v58 }
 0x216   : > { %v2104_v11 = vpop.f32.mrf.mxu2 }
 0x217   : > { %v2508_v20 = vadd.f32 %v2414_v21, %v2352_v0  ;;  %v1957_v59 = vpop.f32.mrf.mxu1  ;;  %v2196_v51 = vadd.f32 %v2104_v11, %v2043_v56  ;;  %v3314_v21 = vld [vmem:[#allocation2 + $0x110] sm:$0xff]  ;;  %v3315_v11 = vld [vmem:[#allocation2 + $0x120] sm:$0xff] }
 0x219   : > { %2540 = vst.msk [vmem:[%s4689_s20 + $0x8] sm:$0xff] %vm681_vm1, %v2508_v20  ;;  %v2572_v38 = vsel %vm681_vm1, %v2508_v20, 0.0  ;;  %v2642_v35 = vmul.f32 %v2508_v20, %v2508_v20  ;;  %3213 = vmatmul.msk.f32.gmra.mxu3 %vm681_vm1, %v5170_v30 }
 0x21a   : > { %v2573_v7 = vadd.f32 %v2572_v38, %v2571_v55  ;;  %v2420_v44 = vpop.f32.mrf.mxu0  ;;  %3149 = vmatmul.msk.f32.gmra.mxu1 %vm681_vm1, %v4330_v58  ;;  %v5173_v58 = vld [vmem:[#allocation35_spill] sm:$0xff]  ;;  %v5174_v55 = vld [vmem:[#allocation6_spill] sm:$0xff] }
 0x21b   : > { %v2674_v28 = vsel %vm681_vm1, %v2642_v35, 0.0  ;;  %3181 = vmatmul.msk.f32.gmra.mxu2 %vm681_vm1, %v3314_v21  ;;  %v5175_v38 = vld [vmem:[#allocation26_spill] sm:$0xff] }
 0x21c   : > { %v2675_v61 = vadd.f32 %v2674_v28, %v2673_v5  ;;  %v2261_v49 = vpop.f32.mrf.mxu3  ;;  %v2045_v35 = vadd.f32 %v1957_v59, %v5175_v38 }
 0x21d   : > { %v2353_v12 = vadd.f32 %v2261_v49, %v2196_v51  ;;  %3247 = vmatmul.msk.f32.gmra.mxu0 %vm681_vm1, %v5171_v10  ;;  %v5176_v49 = vld [vmem:[#allocation8_spill] sm:$0xff] }
 0x21e   : > { %v2107_v45 = vpop.f32.mrf.mxu2 }
 0x21f   : > { %v2509_v29 = vadd.f32 %v2417_v24, %v2353_v12  ;;  %v1960_v57 = vpop.f32.mrf.mxu1  ;;  %v2197_v0 = vadd.f32 %v2107_v45, %v2044_v27  ;;  %v3316_v27 = vld [vmem:[#allocation2 + $0x128] sm:$0xff]  ;;  %v5178_v45 = vld [vmem:[#allocation27_spill] sm:$0xff] }
 0x221   : > { %2541 = vst.msk [vmem:[%s4689_s20 + $0x10] sm:$0xff] %vm681_vm1, %v2509_v29  ;;  %v2574_v37 = vsel %vm681_vm1, %v2509_v29, 0.0  ;;  %v2643_v39 = vmul.f32 %v2509_v29, %v2509_v29  ;;  %3214 = vmatmul.msk.f32.gmra.mxu3 %vm681_vm1, %v5173_v58  ;;  %v5177_v29 = vld [vmem:[#allocation12_spill] sm:$0xff] }
 0x222   : > { %v2575_v43 = vadd.f32 %v2574_v37, %v2573_v7  ;;  %v2423_v56 = vpop.f32.mrf.mxu0  ;;  %3150 = vmatmul.msk.f32.gmra.mxu1 %vm681_vm1, %v5171_v10  ;;  %v2046_v37 = vadd.f32 %v1960_v57, %v5178_v45  ;;  %v3318_v45 = vld [vmem:[#allocation2 + $0x140] sm:$0xff] }
 0x223   : > { %v2676_v46 = vsel %vm681_vm1, %v2643_v39, 0.0  ;;  %3182 = vmatmul.msk.f32.gmra.mxu2 %vm681_vm1, %v3315_v11 }
 0x224   : > { %v2677_v19 = vadd.f32 %v2676_v46, %v2675_v61  ;;  %v2264_v24 = vpop.f32.mrf.mxu3 }
 0x225   : > { %v2354_v20 = vadd.f32 %v2264_v24, %v2197_v0  ;;  %3248 = vmatmul.msk.f32.gmra.mxu0 %vm681_vm1, %v5174_v55  ;;  %v5179_v24 = vld [vmem:[#allocation11_spill] sm:$0xff] }
 0x226   : > { %v2110_v51 = vpop.f32.mrf.mxu2 }
 0x227   : > { %v2510_v30 = vadd.f32 %v2420_v44, %v2354_v20  ;;  %v1963_v7 = vpop.f32.mrf.mxu1  ;;  %v2198_v61 = vadd.f32 %v2110_v51, %v2045_v35  ;;  %v3317_v35 = vld [vmem:[#allocation2 + $0x138] sm:$0xff] }
 0x229   : > { %2542 = vst.msk [vmem:[%s4689_s20 + $0x18] sm:$0xff] %vm681_vm1, %v2510_v30  ;;  %v2576_v5 = vsel %vm681_vm1, %v2510_v30, 0.0  ;;  %v2644_v28 = vmul.f32 %v2510_v30, %v2510_v30  ;;  %3215 = vmatmul.msk.f32.gmra.mxu3 %vm681_vm1, %v5176_v49  ;;  %v5180_v30 = vld [vmem:[#allocation5_spill] sm:$0xff] }
 0x22a   : > { %v2577_v12 = vadd.f32 %v2576_v5, %v2575_v43  ;;  %v2426_v10 = vpop.f32.mrf.mxu0  ;;  %3151 = vmatmul.msk.f32.gmra.mxu1 %vm681_vm1, %v5174_v55  ;;  %v2047_v51 = vadd.f32 %v1963_v7, %v5180_v30 }
 0x22b   : > { %v2678_v21 = vsel %vm681_vm1, %v2644_v28, 0.0  ;;  %3183 = vmatmul.msk.f32.gmra.mxu2 %vm681_vm1, %v3316_v27 }
 0x22c   : > { %v2679_v59 = vadd.f32 %v2678_v21, %v2677_v19  ;;  %v2267_v44 = vpop.f32.mrf.mxu3  ;;  %v5181_v21 = vld [vmem:[#allocation16_spill] sm:$0xff] }
 0x22d   : > { %v2355_v36 = vadd.f32 %v2267_v44, %v2198_v61  ;;  %3249 = vmatmul.msk.f32.gmra.mxu0 %vm681_vm1, %v5177_v29 }
 0x22e   : > { %v2113_v58 = vpop.f32.mrf.mxu2 }
 0x22f   : > { %v2511_v39 = vadd.f32 %v2423_v56, %v2355_v36  ;;  %v1966_v0 = vpop.f32.mrf.mxu1  ;;  %v2199_v19 = vadd.f32 %v2113_v58, %v2046_v37  ;;  %v5182_v37 = vld [vmem:[#allocation7_spill] sm:$0xff] }
 0x231   : > { %2543 = vst.msk [vmem:[%s4689_s20 + $0x20] sm:$0xff] %vm681_vm1, %v2511_v39  ;;  %v2578_v43 = vsel %vm681_vm1, %v2511_v39, 0.0  ;;  %v2645_v46 = vmul.f32 %v2511_v39, %v2511_v39  ;;  %3216 = vmatmul.msk.f32.gmra.mxu3 %vm681_vm1, %v5179_v24  ;;  %v2048_v39 = vadd.f32 %v1966_v0, %v5182_v37 }
 0x232   : > { %v2579_v20 = vadd.f32 %v2578_v43, %v2577_v12  ;;  %v2429_v55 = vpop.f32.mrf.mxu0  ;;  %3152 = vmatmul.msk.f32.gmra.mxu1 %vm681_vm1, %v5177_v29 }
 0x233   : > { %v2680_v11 = vsel %vm681_vm1, %v2645_v46, 0.0  ;;  %3184 = vmatmul.msk.f32.gmra.mxu2 %vm681_vm1, %v3317_v35  ;;  %v3319_v35 = vld [vmem:[#allocation2 + $0x150] sm:$0xff] }
 0x234   : > { %v2681_v57 = vadd.f32 %v2680_v11, %v2679_v59  ;;  %v2270_v56 = vpop.f32.mrf.mxu3 }
 0x235   : > { %v2356_v38 = vadd.f32 %v2270_v56, %v2199_v19  ;;  %3250 = vmatmul.msk.f32.gmra.mxu0 %vm681_vm1, %v4401_v2 }
 0x236   : > { %v2116_v28 = vpop.f32.mrf.mxu2 }
 0x237   : > { %v2512_v5 = vadd.f32 %v2426_v10, %v2356_v38  ;;  %v1969_v49 = vpop.f32.mrf.mxu1  ;;  %v2200_v59 = vadd.f32 %v2116_v28, %v2047_v51 }
 0x238   : > { %v2049_v30 = vadd.f32 %v1969_v49, %v4394_v25 }
 0x239   : > { %2544 = vst.msk [vmem:[%s4689_s20 + $0x28] sm:$0xff] %vm681_vm1, %v2512_v5  ;;  %v2580_v61 = vsel %vm681_vm1, %v2512_v5, 0.0  ;;  %v2646_v12 = vmul.f32 %v2512_v5, %v2512_v5  ;;  %3217 = vmatmul.msk.f32.gmra.mxu3 %vm681_vm1, %v5181_v21 }
 0x23a   : > { %v2581_v44 = vadd.f32 %v2580_v61, %v2579_v20  ;;  %v2432_v27 = vpop.f32.mrf.mxu0  ;;  %3153 = vmatmul.msk.f32.gmra.mxu1 %vm681_vm1, %v4401_v2  ;;  %v5183_v2 = vld [vmem:[#allocation19_spill] sm:$0xff] }
 0x23b   : > { %v2682_v36 = vsel %vm681_vm1, %v2646_v12, 0.0  ;;  %3185 = vmatmul.msk.f32.gmra.mxu2 %vm681_vm1, %v3318_v45 }
 0x23c   : > { %v2683_v7 = vadd.f32 %v2682_v36, %v2681_v57  ;;  %v2273_v10 = vpop.f32.mrf.mxu3 }
 0x23d   : > { %v2357_v29 = vadd.f32 %v2273_v10, %v2200_v59  ;;  %3251 = vmatmul.msk.f32.gmra.mxu0 %vm681_vm1, %v4417_v41 }
 0x23e   : > { %v2119_v43 = vpop.f32.mrf.mxu2 }
 0x23f   : > { %v2513_v58 = vadd.f32 %v2429_v55, %v2357_v29  ;;  %v1972_v46 = vpop.f32.mrf.mxu1  ;;  %v2201_v20 = vadd.f32 %v2119_v43, %v2048_v39 }
 0x241   : > { %2545 = vst.msk [vmem:[%s4689_s20 + $0x30] sm:$0xff] %vm681_vm1, %v2513_v58  ;;  %v2582_v24 = vsel %vm681_vm1, %v2513_v58, 0.0  ;;  %v2647_v19 = vmul.f32 %v2513_v58, %v2513_v58  ;;  %3218 = vmatmul.msk.f32.gmra.mxu3 %vm681_vm1, %v5183_v2  ;;  %v3321_v2 = vld [vmem:[#allocation2 + $0x168] sm:$0xff] }
 0x242   : > { %v2583_v11 = vadd.f32 %v2582_v24, %v2581_v44  ;;  %v2435_v56 = vpop.f32.mrf.mxu0  ;;  %3154 = vmatmul.msk.f32.gmra.mxu1 %vm681_vm1, %v4417_v41 }
 0x243   : > { %v2684_v57 = vsel %vm681_vm1, %v2647_v19, 0.0  ;;  %3186 = vmatmul.msk.f32.gmra.mxu2 %vm681_vm1, %v3319_v35 }
 0x244   : > { %v2685_v0 = vadd.f32 %v2684_v57, %v2683_v7  ;;  %v2276_v55 = vpop.f32.mrf.mxu3 }
 0x245   : > { %v2358_v38 = vadd.f32 %v2276_v55, %v2201_v20  ;;  %3252 = vmatmul.msk.f32.gmra.mxu0 %vm681_vm1, %v4433_v9  ;;  %v5185_v20 = vld [vmem:[#allocation13_spill] sm:$0xff] }
 0x246   : > { %v2122_v5 = vpop.f32.mrf.mxu2 }
 0x247   : > { %v2514_v51 = vadd.f32 %v2432_v27, %v2358_v38  ;;  %v1975_v28 = vpop.f32.mrf.mxu1  ;;  %v2202_v41 = vadd.f32 %v2122_v5, %v2049_v30  ;;  %v3320_v27 = vld [vmem:[#allocation2 + $0x158] sm:$0xff] }
 0x249   : > { %2546 = vst.msk [vmem:[%s4689_s20 + $0x38] sm:$0xff] %vm681_vm1, %v2514_v51  ;;  %v2584_v61 = vsel %vm681_vm1, %v2514_v51, 0.0  ;;  %v2648_v12 = vmul.f32 %v2514_v51, %v2514_v51  ;;  %3219 = vmatmul.msk.f32.gmra.mxu3 %vm681_vm1, %v5130_v8  ;;  %v2050_v8 = vadd.f32 %v1972_v46, %v4412_v3 }
 0x24a   : > { %v2585_v21 = vadd.f32 %v2584_v61, %v2583_v11  ;;  %v2438_v44 = vpop.f32.mrf.mxu0  ;;  %3155 = vmatmul.msk.f32.gmra.mxu1 %vm681_vm1, %v4433_v9  ;;  %v5184_v9 = vld [vmem:[#allocation28_spill] sm:$0xff]  ;;  %v2051_v11 = vadd.f32 %v1975_v28, %v5185_v20 }
 0x24b   : > { %v2686_v59 = vsel %vm681_vm1, %v2648_v12, 0.0  ;;  %3187 = vmatmul.msk.f32.gmra.mxu2 %vm681_vm1, %v3320_v27 }
 0x24c   : > { %v2687_v25 = vadd.f32 %v2686_v59, %v2685_v0  ;;  %v2279_v49 = vpop.f32.mrf.mxu3  ;;  %v1918_v59 = vrot.slane %v4452_v6, 2 }
 0x24d   : > { %v2359_v36 = vadd.f32 %v2279_v49, %v2202_v41  ;;  %3253 = vmatmul.msk.f32.gmra.mxu0 %vm681_vm1, %v4448_v18  ;;  %v3322_v41 = vld [vmem:[#allocation2 + $0x170] sm:$0xff] }
 0x24e   : > { %v2125_v10 = vpop.f32.mrf.mxu2 }
 0x24f   : > { %v2515_v7 = vadd.f32 %v2435_v56, %v2359_v36  ;;  %v1978_v29 = vpop.f32.mrf.mxu1  ;;  %v2203_v39 = vadd.f32 %v2125_v10, %v2050_v8 }
 0x251   : > { %2547 = vst.msk [vmem:[%s4689_s20 + $0x40] sm:$0xff] %vm681_vm1, %v2515_v7  ;;  %v2586_v45 = vsel %vm681_vm1, %v2515_v7, 0.0  ;;  %v2649_v37 = vmul.f32 %v2515_v7, %v2515_v7  ;;  %3220 = vmatmul.msk.f32.gmra.mxu3 %vm681_vm1, %v5184_v9  ;;  %v5188_v7 = vld [vmem:[#allocation36_spill] sm:$0xff] }
 0x252   : > { %v2587_v58 = vadd.f32 %v2586_v45, %v2585_v21  ;;  %v2441_v24 = vpop.f32.mrf.mxu0  ;;  %3156 = vmatmul.msk.f32.gmra.mxu1 %vm681_vm1, %v4448_v18  ;;  %v5186_v18 = vld [vmem:[#allocation34_spill] sm:$0xff]  ;;  %v1917_v21 = vrot.slane %v4458_v62, 2 }
 0x253   : > { %v2688_v43 = vsel %vm681_vm1, %v2649_v37, 0.0  ;;  %3188 = vmatmul.msk.f32.gmra.mxu2 %vm681_vm1, %v3321_v2 }
 0x254   : > { %v2689_v3 = vadd.f32 %v2688_v43, %v2687_v25  ;;  %v2282_v46 = vpop.f32.mrf.mxu3 }
 0x255   : > { %v2360_v19 = vadd.f32 %v2282_v46, %v2203_v39  ;;  %3254 = vmatmul.msk.f32.gmra.mxu0 %vm681_vm1, %v4470_v16 }
 0x256   : > { %v2128_v56 = vpop.f32.mrf.mxu2 }
 0x257   : > { %v2516_v57 = vadd.f32 %v2438_v44, %v2360_v19  ;;  %v1981_v0 = vpop.f32.mrf.mxu1  ;;  %v2204_v35 = vadd.f32 %v2128_v56, %v2051_v11  ;;  %v5187_v44 = vld [vmem:[#allocation17_spill] sm:$0xff]  ;;  %v1920_v19 = vrot.slane %v4477_v22, 2 }
 0x258   : > { %v2052_v25 = vadd.f32 %v1978_v29, %v5187_v44  ;;  %v1919_v29 = vsel %vm1315_vm4, %v1917_v21, %v1918_v59 }
 0x259   : > { %2548 = vst.msk [vmem:[%s4689_s20 + $0x48] sm:$0xff] %vm681_vm1, %v2516_v57  ;;  %v2588_v55 = vsel %vm681_vm1, %v2516_v57, 0.0  ;;  %v2650_v38 = vmul.f32 %v2516_v57, %v2516_v57  ;;  %3221 = vmatmul.msk.f32.gmra.mxu3 %vm681_vm1, %v5186_v18  ;;  %v1921_v22 = vsel %vm1315_vm4, %v1918_v59, %v1920_v19 }
 0x25a   : > { %v2589_v30 = vadd.f32 %v2588_v55, %v2587_v58  ;;  %v2444_v5 = vpop.f32.mrf.mxu0  ;;  %3157 = vmatmul.msk.f32.gmra.mxu1 %vm681_vm1, %v4470_v16 }
 0x25b   : > { %v2690_v51 = vsel %vm681_vm1, %v2650_v38, 0.0  ;;  %3189 = vmatmul.msk.f32.gmra.mxu2 %vm681_vm1, %v3322_v41 }
 0x25c   : > { %v2691_v28 = vadd.f32 %v2690_v51, %v2689_v3  ;;  %v2285_v61 = vpop.f32.mrf.mxu3 }
 0x25d   : > { %v2361_v12 = vadd.f32 %v2285_v61, %v2204_v35  ;;  %3255 = vmatmul.msk.f32.gmra.mxu0 %vm681_vm1, %v4491_v33  ;;  %v826_v35 = vld [vmem:[#allocation2 + $0x198] sm:$0xff] }
 0x25e   : > { %v2131_v36 = vpop.f32.mrf.mxu2  ;;  %v2227_v44 = vrot.slane %v826_v35, 1 }
 0x25f   : > { %v2517_v49 = vadd.f32 %v2441_v24, %v2361_v12  ;;  %v1984_v27 = vpop.f32.mrf.mxu1  ;;  %v2205_v10 = vadd.f32 %v2131_v36, %v2052_v25  ;;  %v5189_v24 = vld [vmem:[#allocation23_spill] sm:$0xff] }
 0x260   : > { %v2053_v3 = vadd.f32 %v1981_v0, %v5189_v24 }
 0x261   : > { %2549 = vst.msk [vmem:[%s4689_s20 + $0x50] sm:$0xff] %vm681_vm1, %v2517_v49  ;;  %v2590_v16 = vsel %vm681_vm1, %v2517_v49, 0.0  ;;  %v2651_v8 = vmul.f32 %v2517_v49, %v2517_v49  ;;  %3222 = vmatmul.msk.f32.gmra.mxu3 %vm681_vm1, %v5188_v7 }
 0x262   : > { %v2591_v45 = vadd.f32 %v2590_v16, %v2589_v30  ;;  %v2447_v9 = vpop.f32.mrf.mxu0  ;;  %3158 = vmatmul.msk.f32.gmra.mxu1 %vm681_vm1, %v4491_v33  ;;  %v827_v30 = vld [vmem:[#allocation2 + $0x1a0] sm:$0xff] }
 0x263   : > { %v2692_v37 = vsel %vm681_vm1, %v2651_v8, 0.0  ;;  %3190 = vmatmul.msk.f32.gmra.mxu2 %vm681_vm1, %v4458_v62  ;;  %v2228_v25 = vrot.slane %v827_v30, 1 }
 0x264   : > { %v2693_v39 = vadd.f32 %v2692_v37, %v2691_v28  ;;  %v2288_v58 = vpop.f32.mrf.mxu3  ;;  %v2384_v28 = vrot.slane %v827_v30, 2 }
 0x265   : > { %v2362_v43 = vadd.f32 %v2288_v58, %v2205_v10  ;;  %3256 = vmatmul.msk.f32.gmra.mxu0 %vm681_vm1, %v1919_v29  ;;  %v2229_v7 = vsel %vm878_vm2, %v2227_v44, %v2228_v25 }
 0x266   : > { %v2134_v2 = vpop.f32.mrf.mxu2 }
 0x267   : > { %v2518_v46 = vadd.f32 %v2444_v5, %v2362_v43  ;;  %v1987_v20 = vpop.f32.mrf.mxu1  ;;  %v2206_v57 = vadd.f32 %v2134_v2, %v2053_v3  ;;  %v2383_v5 = vrot.slane %v826_v35, 2 }
 0x268   : > { %v2055_v10 = vadd.f32 %v1987_v20, %v4503_v32 }
 0x269   : > { %2550 = vst.msk [vmem:[%s4689_s20 + $0x58] sm:$0xff] %vm681_vm1, %v2518_v46  ;;  %v2592_v33 = vsel %vm681_vm1, %v2518_v46, 0.0  ;;  %v2652_v11 = vmul.f32 %v2518_v46, %v2518_v46  ;;  %3223 = vmatmul.msk.f32.gmra.mxu3 %vm681_vm1, %v4475_v13  ;;  %v2054_v13 = vadd.f32 %v1984_v27, %v4485_v31  ;;  %v2385_v36 = vsel %vm1315_vm4, %v2383_v5, %v2384_v28 }
 0x26a   : > { %v2593_v56 = vadd.f32 %v2592_v33, %v2591_v45  ;;  %v2450_v55 = vpop.f32.mrf.mxu0  ;;  %3159 = vmatmul.msk.f32.gmra.mxu1 %vm681_vm1, %v1919_v29 }
 0x26b   : > { %v2694_v62 = vsel %vm681_vm1, %v2652_v11, 0.0  ;;  %3191 = vmatmul.msk.f32.gmra.mxu2 %vm681_vm1, %v4452_v6 }
 0x26c   : > { %v2695_v0 = vadd.f32 %v2694_v62, %v2693_v39  ;;  %v2291_v38 = vpop.f32.mrf.mxu3 }
 0x26d   : > { %v2363_v18 = vadd.f32 %v2291_v38, %v2206_v57  ;;  %3257 = vmatmul.msk.f32.gmra.mxu0 %vm681_vm1, %v1921_v22 }
 0x26e   : > { %v2137_v61 = vpop.f32.mrf.mxu2 }
 0x26f   : > { %v2519_v51 = vadd.f32 %v2447_v9, %v2363_v18  ;;  %v1990_v12 = vpop.f32.mrf.mxu1  ;;  %v2207_v6 = vadd.f32 %v2137_v61, %v2054_v13 }
 0x270   : > { %v2056_v57 = vadd.f32 %v1990_v12, %v4514_v14 }
 0x271   : > { %2551 = vst.msk [vmem:[%s4689_s20 + $0x60] sm:$0xff] %vm681_vm1, %v2519_v51  ;;  %v2594_v41 = vsel %vm681_vm1, %v2519_v51, 0.0  ;;  %v2653_v21 = vmul.f32 %v2519_v51, %v2519_v51  ;;  %3224 = vmatmul.msk.f32.gmra.mxu3 %vm681_vm1, %v4496_v52  ;;  %v828_v52 = vld [vmem:[#allocation2 + $0x1a8] sm:$0x3] }
 0x272   : > { %v2595_v59 = vadd.f32 %v2594_v41, %v2593_v56  ;;  %v2453_v31 = vpop.f32.mrf.mxu0  ;;  %3160 = vmatmul.msk.f32.gmra.mxu1 %vm681_vm1, %v1921_v22  ;;  %v2386_v37 = vrot.slane %v828_v52, 2  ;;  %v2230_v3 = vrot.slane %v828_v52, 1 }
 0x273   : > { %v2696_v49 = vsel %vm681_vm1, %v2653_v21, 0.0  ;;  %3192 = vmatmul.msk.f32.gmra.mxu2 %vm681_vm1, %v826_v35 }
 0x274   : > { %v2697_v27 = vadd.f32 %v2696_v49, %v2695_v0  ;;  %v2294_v16 = vpop.f32.mrf.mxu3  ;;  %v2387_v32 = vsel %vm1315_vm4, %v2384_v28, %v2386_v37  ;;  %v2231_v11 = vsel %vm878_vm2, %v2228_v25, %v2230_v3 }
 0x275   : > { %v2364_v8 = vadd.f32 %v2294_v16, %v2207_v6  ;;  %3258 = vmatmul.msk.f32.gmra.mxu0 %vm681_vm1, %v2385_v36 }
 0x276   : > { %v2140_v9 = vpop.f32.mrf.mxu2 }
 0x277   : > { %v2520_v45 = vadd.f32 %v2450_v55, %v2364_v8  ;;  %v1993_v29 = vpop.f32.mrf.mxu1  ;;  %v2208_v43 = vadd.f32 %v2140_v9, %v2055_v10 }
 0x278   : > { %v2057_v14 = vadd.f32 %v1993_v29, %v4525_v1 }
 0x279   : > { %2552 = vst.msk [vmem:[%s4689_s20 + $0x68] sm:$0xff] %vm681_vm1, %v2520_v45  ;;  %v2596_v39 = vsel %vm681_vm1, %v2520_v45, 0.0  ;;  %v2654_v58 = vmul.f32 %v2520_v45, %v2520_v45  ;;  %3225 = vmatmul.msk.f32.gmra.mxu3 %vm681_vm1, %v2229_v7 }
 0x27a   : > { %v2597_v24 = vadd.f32 %v2596_v39, %v2595_v59  ;;  %v2456_v19 = vpop.f32.mrf.mxu0 }
 0x27b   : > { %v2698_v46 = vsel %vm681_vm1, %v2654_v58, 0.0  ;;  %3193 = vmatmul.msk.f32.gmra.mxu2 %vm681_vm1, %v827_v30 }
 0x27c   : > { %v2699_v2 = vadd.f32 %v2698_v46, %v2697_v27  ;;  %v2297_v20 = vpop.f32.mrf.mxu3 }
 0x27d   : > { %v2365_v33 = vadd.f32 %v2297_v20, %v2208_v43  ;;  %3259 = vmatmul.msk.f32.gmra.mxu0 %vm681_vm1, %v2387_v32 }
 0x27e   : > { %v2143_v62 = vpop.f32.mrf.mxu2 }
 0x27f   : > { %v2521_v56 = vadd.f32 %v2453_v31, %v2365_v33  ;;  %v1996_v55 = vpop.f32.mrf.mxu1  ;;  %v2209_v38 = vadd.f32 %v2143_v62, %v2056_v57 }
 0x280   : > { %v2058_v27 = vadd.f32 %v1996_v55, %v4536_v50 }
 0x281   : > { %2553 = vst.msk [vmem:[%s4689_s20 + $0x70] sm:$0xff] %vm681_vm1, %v2521_v56  ;;  %v2598_v22 = vsel %vm681_vm1, %v2521_v56, 0.0  ;;  %v2655_v0 = vmul.f32 %v2521_v56, %v2521_v56  ;;  %3226 = vmatmul.msk.f32.gmra.mxu3 %vm681_vm1, %v2231_v11 }
 0x282   : > { %v2599_v18 = vadd.f32 %v2598_v22, %v2597_v24  ;;  %v2459_v30 = vpop.f32.mrf.mxu0 }
 0x283   : > { %v2700_v35 = vsel %vm681_vm1, %v2655_v0, 0.0 }
 0x284   : > { %v2701_v13 = vadd.f32 %v2700_v35, %v2699_v2  ;;  %v2300_v51 = vpop.f32.mrf.mxu3 }
 0x285   : > { %v2366_v5 = vadd.f32 %v2300_v51, %v2209_v38 }
 0x286   : > { %v2146_v61 = vpop.f32.mrf.mxu2 }
 0x287   : > { %v2522_v28 = vadd.f32 %v2456_v19, %v2366_v5  ;;  %v1999_v12 = vpop.f32.mrf.mxu1  ;;  %v2210_v6 = vadd.f32 %v2146_v61, %v2057_v14 }
 0x288   : > { %v2059_v43 = vadd.f32 %v1999_v12, %v4547_v63 }
 0x289   : > { %2554 = vst.msk [vmem:[%s4689_s20 + $0x78] sm:$0xff] %vm681_vm1, %v2522_v28  ;;  %v2600_v41 = vsel %vm681_vm1, %v2522_v28, 0.0  ;;  %v2656_v21 = vmul.f32 %v2522_v28, %v2522_v28 }
 0x28a   : > { %v2601_v59 = vadd.f32 %v2600_v41, %v2599_v18  ;;  %v2462_v25 = vpop.f32.mrf.mxu0 }
 0x28b   : > { %v2702_v44 = vsel %vm681_vm1, %v2656_v21, 0.0 }
 0x28c   : > { %v2703_v49 = vadd.f32 %v2702_v44, %v2701_v13  ;;  %v2303_v31 = vpop.f32.mrf.mxu3 }
 0x28d   : > { %v2367_v36 = vadd.f32 %v2303_v31, %v2210_v6 }
 0x28e   : > { %v2149_v16 = vpop.f32.mrf.mxu2 }
 0x28f   : > { %v2523_v1 = vadd.f32 %v2459_v30, %v2367_v36  ;;  %v2002_v8 = vpop.f32.mrf.mxu1  ;;  %v2211_v10 = vadd.f32 %v2149_v16, %v2058_v27 }
 0x290   : > { %v2060_v62 = vadd.f32 %v2002_v8, %v4557_v15 }
 0x291   : > { %2555 = vst.msk [vmem:[%s4689_s20 + $0x80] sm:$0xff] %vm681_vm1, %v2523_v1  ;;  %v2602_v7 = vsel %vm681_vm1, %v2523_v1, 0.0  ;;  %v2657_v52 = vmul.f32 %v2523_v1, %v2523_v1 }
 0x292   : > { %v2603_v45 = vadd.f32 %v2602_v7, %v2601_v59  ;;  %v2465_v9 = vpop.f32.mrf.mxu0 }
 0x293   : > { %v2704_v37 = vsel %vm681_vm1, %v2657_v52, 0.0 }
 0x294   : > { %v2705_v29 = vadd.f32 %v2704_v37, %v2703_v49  ;;  %v2306_v39 = vpop.f32.mrf.mxu3 }
 0x295   : > { %v2368_v58 = vadd.f32 %v2306_v39, %v2211_v10 }
 0x296   : > { %v2152_v24 = vpop.f32.mrf.mxu2 }
 0x297   : > { %v2524_v50 = vadd.f32 %v2462_v25, %v2368_v58  ;;  %v2005_v3 = vpop.f32.mrf.mxu1  ;;  %v2212_v32 = vadd.f32 %v2152_v24, %v2059_v43 }
 0x298   : > { %v2061_v28 = vadd.f32 %v2005_v3, %v4567_v34 }
 0x299   : > { %2556 = vst.msk [vmem:[%s4689_s20 + $0x88] sm:$0xff] %vm681_vm1, %v2524_v50  ;;  %v2604_v46 = vsel %vm681_vm1, %v2524_v50, 0.0  ;;  %v2658_v19 = vmul.f32 %v2524_v50, %v2524_v50 }
 0x29a   : > { %v2605_v2 = vadd.f32 %v2604_v46, %v2603_v45  ;;  %v2468_v33 = vpop.f32.mrf.mxu0 }
 0x29b   : > { %v2706_v20 = vsel %vm681_vm1, %v2658_v19, 0.0 }
 0x29c   : > { %v2707_v11 = vadd.f32 %v2706_v20, %v2705_v29  ;;  %v2309_v57 = vpop.f32.mrf.mxu3 }
 0x29d   : > { %v2369_v56 = vadd.f32 %v2309_v57, %v2212_v32 }
 0x29e   : > { %v2155_v55 = vpop.f32.mrf.mxu2 }
 0x29f   : > { %v2525_v63 = vadd.f32 %v2465_v9, %v2369_v56  ;;  %v2008_v22 = vpop.f32.mrf.mxu1  ;;  %v2213_v18 = vadd.f32 %v2155_v55, %v2060_v62 }
 0x2a0   : > { %v2062_v27 = vadd.f32 %v2008_v22, %v4577_v23 }
 0x2a1   : > { %2557 = vst.msk [vmem:[%s4689_s20 + $0x90] sm:$0xff] %vm681_vm1, %v2525_v63  ;;  %v2606_v0 = vsel %vm681_vm1, %v2525_v63, 0.0  ;;  %v2659_v38 = vmul.f32 %v2525_v63, %v2525_v63 }
 0x2a2   : > { %v2607_v35 = vadd.f32 %v2606_v0, %v2605_v2  ;;  %v2471_v13 = vpop.f32.mrf.mxu0 }
 0x2a3   : > { %v2708_v30 = vsel %vm681_vm1, %v2659_v38, 0.0 }
 0x2a4   : > { %v2709_v51 = vadd.f32 %v2708_v30, %v2707_v11  ;;  %v2312_v5 = vpop.f32.mrf.mxu3 }
 0x2a5   : > { %v2370_v14 = vadd.f32 %v2312_v5, %v2213_v18 }
 0x2a6   : > { %v2158_v61 = vpop.f32.mrf.mxu2 }
 0x2a7   : > { %v2526_v15 = vadd.f32 %v2468_v33, %v2370_v14  ;;  %v2011_v12 = vpop.f32.mrf.mxu1  ;;  %v2214_v6 = vadd.f32 %v2158_v61, %v2061_v28 }
 0x2a8   : > { %v2063_v58 = vadd.f32 %v2011_v12, %v4587_v53 }
 0x2a9   : > { %2558 = vst.msk [vmem:[%s4689_s20 + $0x98] sm:$0xff] %vm681_vm1, %v2526_v15  ;;  %v2608_v41 = vsel %vm681_vm1, %v2526_v15, 0.0  ;;  %v2660_v21 = vmul.f32 %v2526_v15, %v2526_v15 }
 0x2aa   : > { %v2609_v59 = vadd.f32 %v2608_v41, %v2607_v35  ;;  %v2474_v25 = vpop.f32.mrf.mxu0 }
 0x2ab   : > { %v2710_v44 = vsel %vm681_vm1, %v2660_v21, 0.0 }
 0x2ac   : > { %v2711_v49 = vadd.f32 %v2710_v44, %v2709_v51  ;;  %v2315_v31 = vpop.f32.mrf.mxu3 }
 0x2ad   : > { %v2371_v36 = vadd.f32 %v2315_v31, %v2214_v6 }
 0x2ae   : > { %v2161_v1 = vpop.f32.mrf.mxu2 }
 0x2af   : > { %v2527_v34 = vadd.f32 %v2471_v13, %v2371_v36  ;;  %v2014_v16 = vpop.f32.mrf.mxu1  ;;  %v2215_v52 = vadd.f32 %v2161_v1, %v2062_v27 }
 0x2b0   : > { %v2064_v57 = vadd.f32 %v2014_v16, %v4597_v4 }
 0x2b1   : > { %2559 = vst.msk [vmem:[%s4689_s20 + $0xa0] sm:$0xff] %vm681_vm1, %v2527_v34  ;;  %v2610_v8 = vsel %vm681_vm1, %v2527_v34, 0.0  ;;  %v2661_v7 = vmul.f32 %v2527_v34, %v2527_v34 }
 0x2b2   : > { %v2611_v10 = vadd.f32 %v2610_v8, %v2609_v59  ;;  %v2477_v37 = vpop.f32.mrf.mxu0 }
 0x2b3   : > { %v2712_v45 = vsel %vm681_vm1, %v2661_v7, 0.0 }
 0x2b4   : > { %v2713_v9 = vadd.f32 %v2712_v45, %v2711_v49  ;;  %v2318_v29 = vpop.f32.mrf.mxu3 }
 0x2b5   : > { %v2372_v39 = vadd.f32 %v2318_v29, %v2215_v52 }
 0x2b6   : > { %v2164_v43 = vpop.f32.mrf.mxu2 }
 0x2b7   : > { %v2528_v23 = vadd.f32 %v2474_v25, %v2372_v39  ;;  %v2017_v50 = vpop.f32.mrf.mxu1  ;;  %v2216_v46 = vadd.f32 %v2164_v43, %v2063_v58 }
 0x2b8   : > { %v2065_v51 = vadd.f32 %v2017_v50, %v4607_v60 }
 0x2b9   : > { %2560 = vst.msk [vmem:[%s4689_s20 + $0xa8] sm:$0xff] %vm681_vm1, %v2528_v23  ;;  %v2612_v24 = vsel %vm681_vm1, %v2528_v23, 0.0  ;;  %v2662_v3 = vmul.f32 %v2528_v23, %v2528_v23 }
 0x2ba   : > { %v2613_v19 = vadd.f32 %v2612_v24, %v2611_v10  ;;  %v2480_v2 = vpop.f32.mrf.mxu0 }
 0x2bb   : > { %v2714_v32 = vsel %vm681_vm1, %v2662_v3, 0.0 }
 0x2bc   : > { %v2715_v20 = vadd.f32 %v2714_v32, %v2713_v9  ;;  %v2321_v33 = vpop.f32.mrf.mxu3 }
 0x2bd   : > { %v2373_v11 = vadd.f32 %v2321_v33, %v2216_v46 }
 0x2be   : > { %v2167_v56 = vpop.f32.mrf.mxu2 }
 0x2bf   : > { %v2529_v53 = vadd.f32 %v2477_v37, %v2373_v11  ;;  %v2020_v62 = vpop.f32.mrf.mxu1  ;;  %v2217_v22 = vadd.f32 %v2167_v56, %v2064_v57 }
 0x2c0   : > { %v2066_v25 = vadd.f32 %v2020_v62, %v4617_v40 }
 0x2c1   : > { %2561 = vst.msk [vmem:[%s4689_s20 + $0xb0] sm:$0xff] %vm681_vm1, %v2529_v53  ;;  %v2614_v63 = vsel %vm681_vm1, %v2529_v53, 0.0  ;;  %v2663_v55 = vmul.f32 %v2529_v53, %v2529_v53 }
 0x2c2   : > { %v2615_v0 = vadd.f32 %v2614_v63, %v2613_v19  ;;  %v2483_v18 = vpop.f32.mrf.mxu0 }
 0x2c3   : > { %v2716_v38 = vsel %vm681_vm1, %v2663_v55, 0.0 }
 0x2c4   : > { %v2717_v35 = vadd.f32 %v2716_v38, %v2715_v20  ;;  %v2324_v30 = vpop.f32.mrf.mxu3 }
 0x2c5   : > { %v2374_v13 = vadd.f32 %v2324_v30, %v2217_v22 }
 0x2c6   : > { %v2170_v5 = vpop.f32.mrf.mxu2 }
 0x2c7   : > { %v2530_v4 = vadd.f32 %v2480_v2, %v2374_v13  ;;  %v2218_v15 = vadd.f32 %v2170_v5, %v2065_v51  ;;  %v2023_v12 = vpop.f32.mrf.mxu1 }
 0x2c8   : > { %v2067_v45 = vadd.f32 %v2023_v12, %v4627_v47 }
 0x2c9   : > { %2562 = vst.msk [vmem:[%s4689_s20 + $0xb8] sm:$0xff] %vm681_vm1, %v2530_v4  ;;  %v2616_v14 = vsel %vm681_vm1, %v2530_v4, 0.0  ;;  %v2664_v28 = vmul.f32 %v2530_v4, %v2530_v4 }
 0x2ca   : > { %v2617_v61 = vadd.f32 %v2616_v14, %v2615_v0  ;;  %v2486_v21 = vpop.f32.mrf.mxu0 }
 0x2cb   : > { %v2718_v41 = vsel %vm681_vm1, %v2664_v28, 0.0 }
 0x2cc   : > { %v2719_v6 = vadd.f32 %v2718_v41, %v2717_v35  ;;  %v2327_v59 = vpop.f32.mrf.mxu3 }
 0x2cd   : > { %v2375_v44 = vadd.f32 %v2327_v59, %v2218_v15 }
 0x2ce   : > { %v2173_v49 = vpop.f32.mrf.mxu2 }
 0x2cf   : > { %v2531_v60 = vadd.f32 %v2483_v18, %v2375_v44  ;;  %v2219_v27 = vadd.f32 %v2173_v49, %v2066_v25  ;;  %v2026_v52 = vpop.f32.mrf.mxu1 }
 0x2d0   : > { %v2068_v19 = vadd.f32 %v2026_v52, %v4637_v26 }
 0x2d1   : > { %2563 = vst.msk [vmem:[%s4689_s20 + $0xc0] sm:$0xff] %vm681_vm1, %v2531_v60  ;;  %v2618_v31 = vsel %vm681_vm1, %v2531_v60, 0.0  ;;  %v2665_v36 = vmul.f32 %v2531_v60, %v2531_v60 }
 0x2d2   : > { %v2619_v34 = vadd.f32 %v2618_v31, %v2617_v61  ;;  %v2489_v16 = vpop.f32.mrf.mxu0 }
 0x2d3   : > { %v2720_v1 = vsel %vm681_vm1, %v2665_v36, 0.0 }
 0x2d4   : > { %v2721_v8 = vadd.f32 %v2720_v1, %v2719_v6  ;;  %v2330_v7 = vpop.f32.mrf.mxu3 }
 0x2d5   : > { %v2376_v10 = vadd.f32 %v2330_v7, %v2219_v27 }
 0x2d6   : > { %v2176_v37 = vpop.f32.mrf.mxu2 }
 0x2d7   : > { %v2532_v40 = vadd.f32 %v2486_v21, %v2376_v10  ;;  %v2220_v39 = vadd.f32 %v2176_v37, %v2067_v45  ;;  %v2029_v46 = vpop.f32.mrf.mxu1 }
 0x2d8   : > { %v2069_v55 = vadd.f32 %v2029_v46, %v4647_v54 }
 0x2d9   : > { %2564 = vst.msk [vmem:[%s4689_s20 + $0xc8] sm:$0xff] %vm681_vm1, %v2532_v40  ;;  %v2620_v9 = vsel %vm681_vm1, %v2532_v40, 0.0  ;;  %v2666_v29 = vmul.f32 %v2532_v40, %v2532_v40 }
 0x2da   : > { %v2621_v58 = vadd.f32 %v2620_v9, %v2619_v34  ;;  %v2492_v24 = vpop.f32.mrf.mxu0 }
 0x2db   : > { %v2722_v23 = vsel %vm681_vm1, %v2666_v29, 0.0 }
 0x2dc   : > { %v2723_v43 = vadd.f32 %v2722_v23, %v2721_v8  ;;  %v2333_v50 = vpop.f32.mrf.mxu3 }
 0x2dd   : > { %v2377_v3 = vadd.f32 %v2333_v50, %v2220_v39 }
 0x2de   : > { %v2179_v32 = vpop.f32.mrf.mxu2 }
 0x2df   : > { %v2533_v47 = vadd.f32 %v2489_v16, %v2377_v3  ;;  %v2221_v33 = vadd.f32 %v2179_v32, %v2068_v19  ;;  %v2032_v0 = vpop.f32.mrf.mxu1 }
 0x2e0   : > { %v2070_v14 = vadd.f32 %v2032_v0, %v4657_v48 }
 0x2e1   : > { %2565 = vst.msk [vmem:[%s4689_s20 + $0xd0] sm:$0xff] %vm681_vm1, %v2533_v47  ;;  %v2622_v2 = vsel %vm681_vm1, %v2533_v47, 0.0  ;;  %v2667_v20 = vmul.f32 %v2533_v47, %v2533_v47 }
 0x2e2   : > { %v2623_v11 = vadd.f32 %v2622_v2, %v2621_v58  ;;  %v2495_v63 = vpop.f32.mrf.mxu0 }
 0x2e3   : > { %v2724_v57 = vsel %vm681_vm1, %v2667_v20, 0.0 }
 0x2e4   : > { %v2725_v53 = vadd.f32 %v2724_v57, %v2723_v43  ;;  %v2336_v56 = vpop.f32.mrf.mxu3 }
 0x2e5   : > { %v2378_v62 = vadd.f32 %v2336_v56, %v2221_v33 }
 0x2e6   : > { %v2182_v26 = vpop.f32.mrf.mxu2 }
 0x2e7   : > { %v2534_v22 = vadd.f32 %v2492_v24, %v2378_v62  ;;  %v2222_v35 = vadd.f32 %v2182_v26, %v2069_v55  ;;  %v2035_v6 = vpop.f32.mrf.mxu1 }
 0x2e8   : > { %v2071_v49 = vadd.f32 %v2035_v6, %v4667_v17 }
 0x2e9   : > { %2566 = vst.msk [vmem:[%s4689_s20 + $0xd8] sm:$0xff] %vm681_vm1, %v2534_v22  ;;  %v2624_v38 = vsel %vm681_vm1, %v2534_v22, 0.0  ;;  %v2668_v18 = vmul.f32 %v2534_v22, %v2534_v22 }
 0x2ea   : > { %v2625_v30 = vadd.f32 %v2624_v38, %v2623_v11  ;;  %v2498_v15 = vpop.f32.mrf.mxu0 }
 0x2eb   : > { %v2726_v13 = vsel %vm681_vm1, %v2668_v18, 0.0 }
 0x2ec   : > { %v2727_v51 = vadd.f32 %v2726_v13, %v2725_v53  ;;  %v2339_v4 = vpop.f32.mrf.mxu3 }
 0x2ed   : > { %v2379_v5 = vadd.f32 %v2339_v4, %v2222_v35 }
 0x2ee   : > { %v2185_v54 = vpop.f32.mrf.mxu2 }
 0x2ef   : > { %v2535_v28 = vadd.f32 %v2495_v63, %v2379_v5  ;;  %v2223_v41 = vadd.f32 %v2185_v54, %v2070_v14  ;;  %v2038_v52 = vpop.f32.mrf.mxu1 }
 0x2f0   : > { %v2072_v17 = vadd.f32 %v2038_v52, %v4677_v42 }
 0x2f1   : > { %2567 = vst.msk [vmem:[%s4689_s20 + $0xe0] sm:$0xff] %vm681_vm1, %v2535_v28  ;;  %v2626_v61 = vsel %vm681_vm1, %v2535_v28, 0.0  ;;  %v2669_v12 = vmul.f32 %v2535_v28, %v2535_v28 }
 0x2f2   : > { %v2627_v21 = vadd.f32 %v2626_v61, %v2625_v30  ;;  %v2501_v16 = vpop.f32.mrf.mxu0 }
 0x2f3   : > { %v2728_v59 = vsel %vm681_vm1, %v2669_v12, 0.0 }
 0x2f4   : > { %v2729_v44 = vadd.f32 %v2728_v59, %v2727_v51  ;;  %v2342_v25 = vpop.f32.mrf.mxu3 }
 0x2f5   : > { %v2380_v60 = vadd.f32 %v2342_v25, %v2223_v41 }
 0x2f6   : > { %v2188_v31 = vpop.f32.mrf.mxu2 }
 0x2f7   : > { %v2536_v48 = vadd.f32 %v2498_v15, %v2380_v60  ;;  %v2224_v34 = vadd.f32 %v2188_v31, %v2071_v49 }
 0x2f9   : > { %2568 = vst.msk [vmem:[%s4689_s20 + $0xe8] sm:$0xff] %vm681_vm1, %v2536_v48  ;;  %v2628_v36 = vsel %vm681_vm1, %v2536_v48, 0.0  ;;  %v2670_v27 = vmul.f32 %v2536_v48, %v2536_v48 }
 0x2fa   : > { %v2629_v1 = vadd.f32 %v2628_v36, %v2627_v21  ;;  %v2504_v24 = vpop.f32.mrf.mxu0 }
 0x2fb   : > { %v2730_v8 = vsel %vm681_vm1, %v2670_v27, 0.0 }
 0x2fc   : > { %v2731_v7 = vadd.f32 %v2730_v8, %v2729_v44  ;;  %v2345_v10 = vpop.f32.mrf.mxu3 }
 0x2fd   : > { %v2381_v45 = vadd.f32 %v2345_v10, %v2224_v34 }
 0x2fe   : > { %v2191_v37 = vpop.f32.mrf.mxu2 }
 0x2ff   : > { %v2537_v40 = vadd.f32 %v2501_v16, %v2381_v45  ;;  %v2225_v39 = vadd.f32 %v2191_v37, %v2072_v17 }
 0x301   : > { %2569 = vst.msk [vmem:[%s4689_s20 + $0xf0] sm:$0xff] %vm681_vm1, %v2537_v40  ;;  %v2630_v9 = vsel %vm681_vm1, %v2537_v40, 0.0  ;;  %v2671_v29 = vmul.f32 %v2537_v40, %v2537_v40 }
 0x302   : > { %v2631_v58 = vadd.f32 %v2630_v9, %v2629_v1 }
 0x303   : > { %v2732_v23 = vsel %vm681_vm1, %v2671_v29, 0.0 }
 0x304   : > { %v2733_v43 = vadd.f32 %v2732_v23, %v2731_v7  ;;  %v2348_v50 = vpop.f32.mrf.mxu3 }
 0x305   : > { %v2382_v3 = vadd.f32 %v2348_v50, %v2225_v39 }
 0x307   : > { %v2538_v46 = vadd.f32 %v2504_v24, %v2382_v3 }
 0x309   : > { %2570 = vst.msk [vmem:[%s4689_s20 + $0xf8] sm:$0xff] %vm681_vm1, %v2538_v46  ;;  %v2632_v42 = vsel %vm681_vm1, %v2538_v46, 0.0  ;;  %v2672_v19 = vmul.f32 %v2538_v46, %v2538_v46 }
 0x30a   : > { %v2633_v47 = vadd.f32 %v2632_v42, %v2631_v58 }
 0x30b   : > { %v2734_v32 = vsel %vm681_vm1, %v2672_v19, 0.0 }
 0x30c   : > { %v2634_v2 = vrot.slane %v2633_v47, 4  ;;  %v2735_v20 = vadd.f32 %v2734_v32, %v2733_v43 }
 0x30e   : > { %v2635_v33 = vadd.f32 %v2634_v2, %v2633_v47  ;;  %v2736_v11 = vrot.slane %v2735_v20, 4 }
 0x310   : > { %v2636_v57 = vrot.slane %v2635_v33, 2  ;;  %v2737_v53 = vadd.f32 %v2736_v11, %v2735_v20 }
 0x312   : > { %v2637_v56 = vadd.f32 %v2636_v57, %v2635_v33  ;;  %v2738_v62 = vrot.slane %v2737_v53, 2 }
 0x314   : > { %v2638_v63 = vrot.slane %v2637_v56, 1  ;;  %v2739_v55 = vadd.f32 %v2738_v62, %v2737_v53 }
 0x316   : > { %v2639_v22 = vadd.f32 %v2638_v63, %v2637_v56  ;;  %v2740_v26 = vrot.slane %v2739_v55, 1 }
 0x318   : > { %2640 = vst.msk [vmem:[%s500_s22] sm:$0x1] %vm507_vm0, %v2639_v22  ;;  %v2741_v0 = vadd.f32 %v2740_v26, %v2739_v55 }
 0x31a   : > { %2742 = vst.msk [vmem:[%s506_s25] sm:$0x1] %vm507_vm0, %v2741_v0 }
 0x31b PF: > { %s19_s27 = sadd.s32 1, %s3345_s27   ;;  %s5190_s26 = smov %s3341_s2 }
 0x31c   : > { %p16_p5 = scmp.ge.s32.totalorder %s19_s27, 4   ;;  %s5191_s2 = smov %s5193_s28 }
 0x31e   :  { %18 = sbr.rel (!%p16_p5) target bundleno = 2 (0x2), region = 131 }

</bundles_post_ra>
